<compile_context>
chip_gen: v6e
topology: v6e:2x2x1
jax: 0.10.0
libtpu: 0.0.40
codegen_flags: <defaults>
</compile_context>

<pallas_src>
import functools

import jax
import jax.numpy as jnp
import numpy as np
from jax.experimental import pallas as pl
from jax.experimental.pallas import tpu as pltpu

L = 3            # LSTM layers (layers_num)
NUM_FRAMES = 10  # hard-coded frame loop in FrameByFrame.forward


# ---------------------------------------------------------------------------
# Fused kernel: LSTM recurrence with per-frame Match/Prob MLP fused into the time loop
# ---------------------------------------------------------------------------
def _fused_kernel(x_ref, v_ref, wih0_ref, whh0_ref, w12_ref, b_ref,
                  vw1_ref, w_ref, bb_ref, out_ref, *, T, B, H):
    f32 = jnp.float32
    H3 = 3 * H

    # ---- hoisted weight / bias loads (out of the unrolled recurrence) ----
    aw1, aw2 = w_ref[0], w_ref[1]
    vw2 = w_ref[2]
    pw1a, pw1v = w_ref[3], w_ref[4]
    pw2p = w_ref[5]                                           # (H, H): pw2/T zero-padded
    ab1 = jnp.broadcast_to(bb_ref[0], (B, H))                 # pre-broadcast once
    ab2 = jnp.broadcast_to(bb_ref[1], (B, H))
    vb1, vb2, pb1 = bb_ref[2], bb_ref[3], bb_ref[4]
    pb2p = bb_ref[5]                                          # (1, H): pb2 zero-padded

    whh0 = whh0_ref[...]
    w12 = [w12_ref[0], w12_ref[1]]                            # fused [wihr; whh], (2H, 4H) each
    b12 = [jnp.broadcast_to(b_ref[l], (B, 4 * H)) for l in range(1, L)]

    # ---- visual branch: independent of the LSTM, Prob.fc1 visual half + bias folded in ----
    v1 = jax.nn.relu(jnp.dot(v_ref[...], vw1_ref[...], preferred_element_type=f32) + vb1)
    v2 = jax.nn.relu(jnp.dot(v1, vw2, preferred_element_type=f32) + vb2)
    pv = jnp.dot(v2, pw1v, preferred_element_type=f32) + pb1           # (T*B, H)

    # ---- layer-0 input projection for ALL timesteps (off the serial chain), b[0] folded ----
    gx0_all = jnp.dot(x_ref[...], wih0_ref[...], preferred_element_type=f32) + b_ref[0]  # (T*B,4H)

    # Gate columns are host-permuted to (i, f, o, g): sigmoid on [:3H], tanh on [3H:].
    def activate(gates):
        sig = jax.nn.sigmoid(gates[:, :H3])
        return sig[:, :H], sig[:, H:2 * H], sig[:, 2 * H:H3], jnp.tanh(gates[:, H3:])

    h = [jnp.zeros((B, H), f32) for _ in range(L)]
    c = [jnp.zeros((B, H), f32) for _ in range(L)]
    p_acc = None

    for t in range(T):                            # serial recurrence, fully unrolled (T = 10)
        # layer 0: only the recurrent matmul sits on the chain (input proj + bias hoisted)
        gates = gx0_all[t * B:(t + 1) * B, :] + jnp.dot(h[0], whh0, preferred_element_type=f32)
        i_g, f_g, o_g, g_g = activate(gates)
        c[0] = f_g * c[0] + i_g * g_g
        h[0] = o_g * jnp.tanh(c[0])

        # layers 1..2: fused input+recurrent matmul on concat([h[l-1], h[l]])
        for l in range(1, L):
            hcat = jnp.concatenate([h[l - 1], h[l]], axis=1)           # (B, 2H), XLU lane concat
            gates = jnp.dot(hcat, w12[l - 1], preferred_element_type=f32) + b12[l - 1]
            i_g, f_g, o_g, g_g = activate(gates)
            c[l] = f_g * c[l] + i_g * g_g
            h[l] = o_g * jnp.tanh(c[l])

        # per-frame audio MLP + Prob.fc1 fused here, straight off the live h_t (no scratch).
        a1 = jax.nn.relu(jnp.dot(h[L - 1], aw1, preferred_element_type=f32) + ab1)
        a2 = jax.nn.relu(jnp.dot(a1, aw2, preferred_element_type=f32) + ab2)
        p1 = jax.nn.relu(jnp.dot(a2, pw1a, preferred_element_type=f32)
                         + pv[t * B:(t + 1) * B, :])
        p_acc = p1 if p_acc is None else p_acc + p1

    # ---- tail: Prob.fc2 is linear, so one matmul on the frame-summed p1 (1/T folded in pw2p) ----
    out_full = jnp.dot(p_acc, pw2p, preferred_element_type=f32) + pb2p   # (B, H), cols 2.. are junk
    out_ref[...] = out_full[:, :2].astype(out_ref.dtype)


# ---------------------------------------------------------------------------
# Wrapper: layout plumbing, gate permutation, weight packing + single pallas_call
# ---------------------------------------------------------------------------
def frame_by_frame(Vfeat, Afeat, params):
    B, A, T = Afeat.shape
    Vin = Vfeat.shape[1]
    H = params["whh"].shape[1]
    assert T == NUM_FRAMES, "FrameByFrame hard-codes a 10-frame loop"

    # (B, C, T) -> (T, B, C) -> (T*B, C), lane-dense, time-major.
    x_flat = jnp.transpose(Afeat, (2, 0, 1)).reshape(T * B, A).astype(jnp.float32)
    v_flat = jnp.transpose(Vfeat, (2, 0, 1)).reshape(T * B, Vin).astype(jnp.float32)

    # Permute LSTM gate columns (i, f, g, o) -> (i, f, o, g) so sigmoid covers a contiguous 3H.
    def perm(w):
        return jnp.concatenate([w[..., :2 * H], w[..., 3 * H:4 * H], w[..., 2 * H:3 * H]], axis=-1)

    wih0 = perm(params["wih0"] * (1.0 / 255.0)).astype(jnp.float32)   # /255 folded in
    whh_p = perm(params["whh"]).astype(jnp.float32)
    wihr_p = perm(params["wihr"]).astype(jnp.float32)
    b_p = perm(params["b"]).astype(jnp.float32)

    whh0 = whh_p[0]
    # Fused [wihr[l-1]; whh[l]] weights for layers 1..2: (L-1, 2H, 4H).
    w12 = jnp.stack([jnp.concatenate([wihr_p[k], whh_p[k + 1]], axis=0) for k in range(L - 1)])

    # Prob.fc1 split into audio/visual halves; Prob.fc2 zero-padded to (H, H) with 1/T folded in.
    pw1a = params["pw1"][:H]
    pw1v = params["pw1"][H:]
    pw2_pad = jnp.zeros((H, H), jnp.float32).at[:, :2].set(params["pw2"] * (1.0 / NUM_FRAMES))
    pb2_pad = jnp.zeros((1, H), jnp.float32).at[:, :2].set(params["pb2"])

    # Pack the small MLP params: one (6, H, H) weight stack and one (6, 1, H) bias stack.
    w_stack = jnp.stack([params["aw1"], params["aw2"], params["vw2"], pw1a, pw1v, pw2_pad])
    b_stack = jnp.stack([params["ab1"], params["ab2"], params["vb1"], params["vb2"],
                         params["pb1"], pb2_pad])

    kernel = functools.partial(_fused_kernel, T=T, B=B, H=H)

    def full(shape):
        return pl.BlockSpec(shape, lambda i, _n=len(shape): (0,) * _n)

    in_specs = [
        full((T * B, A)),                 # x (audio, flattened time-major)
        full((T * B, Vin)),               # v (visual, flattened time-major)
        full((A, 4 * H)),                 # wih0 (pre-scaled, gate-permuted)
        full((H, 4 * H)),                 # whh[0]
        full((L - 1, 2 * H, 4 * H)),      # fused [wihr; whh] for layers 1..2
        full((L, 1, 4 * H)),              # b (= b_ih + b_hh, gate-permuted)
        full((Vin, H)),                   # vw1
        full((6, H, H)),                  # w_stack: aw1, aw2, vw2, pw1a, pw1v, pw2_pad
        full((6, 1, H)),                  # b_stack: ab1, ab2, vb1, vb2, pb1, pb2_pad
    ]

    return pl.pallas_call(
        kernel,
        out_shape=jax.ShapeDtypeStruct((B, 2), jnp.float32),
        grid_spec=pltpu.PrefetchScalarGridSpec(
            num_scalar_prefetch=0,
            grid=(1,),
            in_specs=in_specs,
            out_specs=pl.BlockSpec((B, 2), lambda i: (0, 0)),
            scratch_shapes=[],
        ),
        compiler_params=pltpu.CompilerParams(dimension_semantics=("arbitrary",)),
    )(x_flat, v_flat, wih0, whh0, w12, b_p, params["vw1"], w_stack, b_stack)


# ---------------------------------------------------------------------------
# Deterministic parameter init (PyTorch-style LSTM uniform + xavier-normal linears)
# ---------------------------------------------------------------------------
def init_params(key, Vin=512, A=128, H=64):
    ks = iter(jax.random.split(key, 32))
    lim = 1.0 / np.sqrt(H)

    def uni(shape):
        return jax.random.uniform(next(ks), shape, jnp.float32, -lim, lim)

    def xavier(fan_in, fan_out):
        std = float(np.sqrt(2.0 / (fan_in + fan_out)))
        return std * jax.random.normal(next(ks), (fan_in, fan_out), jnp.float32)

    p = {}
    # LSTM weights stored transposed (in, 4H); gate order i, f, g, o (PyTorch order).
    p["wih0"] = uni((A, 4 * H))
    p["wihr"] = uni((L - 1, H, 4 * H))
    p["whh"] = uni((L, H, 4 * H))
    p["b"] = uni((L, 1, 4 * H)) + uni((L, 1, 4 * H))  # b_ih + b_hh combined
    p["aw1"] = xavier(H, H);      p["ab1"] = jnp.zeros((1, H), jnp.float32)
    p["aw2"] = xavier(H, H);      p["ab2"] = jnp.zeros((1, H), jnp.float32)
    p["vw1"] = xavier(Vin, H);    p["vb1"] = jnp.zeros((1, H), jnp.float32)
    p["vw2"] = xavier(H, H);      p["vb2"] = jnp.zeros((1, H), jnp.float32)
    p["pw1"] = xavier(2 * H, H);  p["pb1"] = jnp.zeros((1, H), jnp.float32)
    p["pw2"] = xavier(H, 2);      p["pb2"] = jnp.zeros((1, 2), jnp.float32)
    return p


# Pure-JAX reference (mirrors the PyTorch forward) for correctness checking.
def reference(Vfeat, Afeat, p):
    x = jnp.transpose(Afeat / 255.0, (2, 0, 1))
    T, B, A = x.shape
    H = p["whh"].shape[1]
    h = jnp.zeros((L, B, H), jnp.float32)
    c = jnp.zeros((L, B, H), jnp.float32)
    outs = []
    for t in range(T):
        inp = x[t]
        nh, nc = [], []
        for l in range(L):
            w_ih = p["wih0"] if l == 0 else p["wihr"][l - 1]
            gates = inp @ w_ih + h[l] @ p["whh"][l] + p["b"][l]
            i_g = jax.nn.sigmoid(gates[:, :H])
            f_g = jax.nn.sigmoid(gates[:, H:2 * H])
            g_g = jnp.tanh(gates[:, 2 * H:3 * H])
            o_g = jax.nn.sigmoid(gates[:, 3 * H:])
            cl = f_g * c[l] + i_g * g_g
            hl = o_g * jnp.tanh(cl)
            nh.append(hl); nc.append(cl)
            inp = hl
        h, c = jnp.stack(nh), jnp.stack(nc)
        outs.append(inp)
    outA = jnp.stack(outs)
    v = jnp.transpose(Vfeat, (2, 0, 1))
    prob = jnp.zeros((B, 2), jnp.float32)
    for i in range(NUM_FRAMES):
        a2 = jax.nn.relu(jax.nn.relu(outA[i] @ p["aw1"] + p["ab1"]) @ p["aw2"] + p["ab2"])
        v2 = jax.nn.relu(jax.nn.relu(v[i] @ p["vw1"] + p["vb1"]) @ p["vw2"] + p["vb2"])
        feat = jnp.concatenate([a2, v2], axis=1)
        prob = prob + (jax.nn.relu(feat @ p["pw1"] + p["pb1"]) @ p["pw2"] + p["pb2"])
    return prob / NUM_FRAMES


if __name__ == "__main__":
    B, T = 2, 10
    Vin, A, H = 512, 128, 64   # module defaults: Vinput_size, Ainput_size, output_size

    key = jax.random.PRNGKey(0)
    k_params, k_v, k_a = jax.random.split(key, 3)
    params = init_params(k_params, Vin=Vin, A=A, H=H)

    Vfeat = jax.random.normal(k_v, (B, Vin, T), jnp.float32)
    Afeat = 255.0 * jax.random.uniform(k_a, (B, A, T), jnp.float32)

    prob = frame_by_frame(Vfeat, Afeat, params)
    prob = jax.block_until_ready(prob)
    assert prob.shape == (B, 2) and prob.dtype == jnp.float32

    ref = jax.block_until_ready(reference(Vfeat, Afeat, params))
    np.testing.assert_allclose(np.asarray(prob), np.asarray(ref), rtol=2e-2, atol=2e-2)

    print("KERNEL_OK")
</pallas_src>

<mosaic_0001>
module attributes {stable_mosaic.version = 11 : i64} {
  func.func @_fused_kernel(%arg0: i32, %arg1: memref<20x128xf32, #tpu.memory_space<vmem>>, %arg2: memref<20x512xf32, #tpu.memory_space<vmem>>, %arg3: memref<128x256xf32, #tpu.memory_space<vmem>>, %arg4: memref<64x256xf32, #tpu.memory_space<vmem>>, %arg5: memref<2x128x256xf32, #tpu.memory_space<vmem>>, %arg6: memref<3x1x256xf32, #tpu.memory_space<vmem>>, %arg7: memref<512x64xf32, #tpu.memory_space<vmem>>, %arg8: memref<6x64x64xf32, #tpu.memory_space<vmem>>, %arg9: memref<6x1x64xf32, #tpu.memory_space<vmem>>, %arg10: memref<2x2xf32, #tpu.memory_space<vmem>>) attributes {dimension_semantics = [#tpu.dimension_semantics<arbitrary>], iteration_bounds = array<i64: 1>, scalar_prefetch = 0 : i64, scratch_operands = 0 : i64, tpu.core_type = #tpu.core_type<tc>, window_params = [{pipeline_mode = #tpu.pipeline_mode<synchronous>, transform_indices = @transform_0, window_bounds = array<i64: 20, 128>}, {pipeline_mode = #tpu.pipeline_mode<synchronous>, transform_indices = @transform_1, window_bounds = array<i64: 20, 512>}, {pipeline_mode = #tpu.pipeline_mode<synchronous>, transform_indices = @transform_2, window_bounds = array<i64: 128, 256>}, {pipeline_mode = #tpu.pipeline_mode<synchronous>, transform_indices = @transform_3, window_bounds = array<i64: 64, 256>}, {pipeline_mode = #tpu.pipeline_mode<synchronous>, transform_indices = @transform_4, window_bounds = array<i64: 2, 128, 256>}, {pipeline_mode = #tpu.pipeline_mode<synchronous>, transform_indices = @transform_5, window_bounds = array<i64: 3, 1, 256>}, {pipeline_mode = #tpu.pipeline_mode<synchronous>, transform_indices = @transform_6, window_bounds = array<i64: 512, 64>}, {pipeline_mode = #tpu.pipeline_mode<synchronous>, transform_indices = @transform_7, window_bounds = array<i64: 6, 64, 64>}, {pipeline_mode = #tpu.pipeline_mode<synchronous>, transform_indices = @transform_8, window_bounds = array<i64: 6, 1, 64>}, {pipeline_mode = #tpu.pipeline_mode<synchronous>, transform_indices = @transform_9, window_bounds = array<i64: 2, 2>}]} {
    %c0 = arith.constant 0 : index
    %c0_0 = arith.constant 0 : index
    %c0_1 = arith.constant 0 : index
    %0 = vector.load %arg8[%c0, %c0_0, %c0_1] : memref<6x64x64xf32, #tpu.memory_space<vmem>>, vector<1x64x64xf32>
    %1 = vector.shape_cast %0 : vector<1x64x64xf32> to vector<64x64xf32>
    %c1 = arith.constant 1 : index
    %c0_2 = arith.constant 0 : index
    %c0_3 = arith.constant 0 : index
    %2 = vector.load %arg8[%c1, %c0_2, %c0_3] : memref<6x64x64xf32, #tpu.memory_space<vmem>>, vector<1x64x64xf32>
    %3 = vector.shape_cast %2 : vector<1x64x64xf32> to vector<64x64xf32>
    %c2 = arith.constant 2 : index
    %c0_4 = arith.constant 0 : index
    %c0_5 = arith.constant 0 : index
    %4 = vector.load %arg8[%c2, %c0_4, %c0_5] : memref<6x64x64xf32, #tpu.memory_space<vmem>>, vector<1x64x64xf32>
    %5 = vector.shape_cast %4 : vector<1x64x64xf32> to vector<64x64xf32>
    %c3 = arith.constant 3 : index
    %c0_6 = arith.constant 0 : index
    %c0_7 = arith.constant 0 : index
    %6 = vector.load %arg8[%c3, %c0_6, %c0_7] : memref<6x64x64xf32, #tpu.memory_space<vmem>>, vector<1x64x64xf32>
    %7 = vector.shape_cast %6 : vector<1x64x64xf32> to vector<64x64xf32>
    %c4 = arith.constant 4 : index
    %c0_8 = arith.constant 0 : index
    %c0_9 = arith.constant 0 : index
    %8 = vector.load %arg8[%c4, %c0_8, %c0_9] : memref<6x64x64xf32, #tpu.memory_space<vmem>>, vector<1x64x64xf32>
    %9 = vector.shape_cast %8 : vector<1x64x64xf32> to vector<64x64xf32>
    %c5 = arith.constant 5 : index
    %c0_10 = arith.constant 0 : index
    %c0_11 = arith.constant 0 : index
    %10 = vector.load %arg8[%c5, %c0_10, %c0_11] : memref<6x64x64xf32, #tpu.memory_space<vmem>>, vector<1x64x64xf32>
    %11 = vector.shape_cast %10 : vector<1x64x64xf32> to vector<64x64xf32>
    %c0_12 = arith.constant 0 : index
    %c0_13 = arith.constant 0 : index
    %c0_14 = arith.constant 0 : index
    %12 = vector.load %arg9[%c0_12, %c0_13, %c0_14] : memref<6x1x64xf32, #tpu.memory_space<vmem>>, vector<1x1x64xf32>
    %13 = vector.shape_cast %12 : vector<1x1x64xf32> to vector<1x64xf32>
    %14 = vector.shape_cast %13 : vector<1x64xf32> to vector<1x64xf32>
    %15 = vector.broadcast %14 : vector<1x64xf32> to vector<2x64xf32>
    %c1_15 = arith.constant 1 : index
    %c0_16 = arith.constant 0 : index
    %c0_17 = arith.constant 0 : index
    %16 = vector.load %arg9[%c1_15, %c0_16, %c0_17] : memref<6x1x64xf32, #tpu.memory_space<vmem>>, vector<1x1x64xf32>
    %17 = vector.shape_cast %16 : vector<1x1x64xf32> to vector<1x64xf32>
    %18 = vector.shape_cast %17 : vector<1x64xf32> to vector<1x64xf32>
    %19 = vector.broadcast %18 : vector<1x64xf32> to vector<2x64xf32>
    %c2_18 = arith.constant 2 : index
    %c0_19 = arith.constant 0 : index
    %c0_20 = arith.constant 0 : index
    %20 = vector.load %arg9[%c2_18, %c0_19, %c0_20] : memref<6x1x64xf32, #tpu.memory_space<vmem>>, vector<1x1x64xf32>
    %21 = vector.shape_cast %20 : vector<1x1x64xf32> to vector<1x64xf32>
    %c3_21 = arith.constant 3 : index
    %c0_22 = arith.constant 0 : index
    %c0_23 = arith.constant 0 : index
    %22 = vector.load %arg9[%c3_21, %c0_22, %c0_23] : memref<6x1x64xf32, #tpu.memory_space<vmem>>, vector<1x1x64xf32>
    %23 = vector.shape_cast %22 : vector<1x1x64xf32> to vector<1x64xf32>
    %c4_24 = arith.constant 4 : index
    %c0_25 = arith.constant 0 : index
    %c0_26 = arith.constant 0 : index
    %24 = vector.load %arg9[%c4_24, %c0_25, %c0_26] : memref<6x1x64xf32, #tpu.memory_space<vmem>>, vector<1x1x64xf32>
    %25 = vector.shape_cast %24 : vector<1x1x64xf32> to vector<1x64xf32>
    %c5_27 = arith.constant 5 : index
    %c0_28 = arith.constant 0 : index
    %c0_29 = arith.constant 0 : index
    %26 = vector.load %arg9[%c5_27, %c0_28, %c0_29] : memref<6x1x64xf32, #tpu.memory_space<vmem>>, vector<1x1x64xf32>
    %27 = vector.shape_cast %26 : vector<1x1x64xf32> to vector<1x64xf32>
    %c0_30 = arith.constant 0 : index
    %c0_31 = arith.constant 0 : index
    %28 = vector.load %arg4[%c0_30, %c0_31] : memref<64x256xf32, #tpu.memory_space<vmem>>, vector<64x256xf32>
    %c0_32 = arith.constant 0 : index
    %c0_33 = arith.constant 0 : index
    %c0_34 = arith.constant 0 : index
    %29 = vector.load %arg5[%c0_32, %c0_33, %c0_34] : memref<2x128x256xf32, #tpu.memory_space<vmem>>, vector<1x128x256xf32>
    %30 = vector.shape_cast %29 : vector<1x128x256xf32> to vector<128x256xf32>
    %c1_35 = arith.constant 1 : index
    %c0_36 = arith.constant 0 : index
    %c0_37 = arith.constant 0 : index
    %31 = vector.load %arg5[%c1_35, %c0_36, %c0_37] : memref<2x128x256xf32, #tpu.memory_space<vmem>>, vector<1x128x256xf32>
    %32 = vector.shape_cast %31 : vector<1x128x256xf32> to vector<128x256xf32>
    %c1_38 = arith.constant 1 : index
    %c0_39 = arith.constant 0 : index
    %c0_40 = arith.constant 0 : index
    %33 = vector.load %arg6[%c1_38, %c0_39, %c0_40] : memref<3x1x256xf32, #tpu.memory_space<vmem>>, vector<1x1x256xf32>
    %34 = vector.shape_cast %33 : vector<1x1x256xf32> to vector<1x256xf32>
    %35 = vector.shape_cast %34 : vector<1x256xf32> to vector<1x256xf32>
    %36 = vector.broadcast %35 : vector<1x256xf32> to vector<2x256xf32>
    %c2_41 = arith.constant 2 : index
    %c0_42 = arith.constant 0 : index
    %c0_43 = arith.constant 0 : index
    %37 = vector.load %arg6[%c2_41, %c0_42, %c0_43] : memref<3x1x256xf32, #tpu.memory_space<vmem>>, vector<1x1x256xf32>
    %38 = vector.shape_cast %37 : vector<1x1x256xf32> to vector<1x256xf32>
    %39 = vector.shape_cast %38 : vector<1x256xf32> to vector<1x256xf32>
    %40 = vector.broadcast %39 : vector<1x256xf32> to vector<2x256xf32>
    %c0_44 = arith.constant 0 : index
    %c0_45 = arith.constant 0 : index
    %41 = vector.load %arg2[%c0_44, %c0_45] : memref<20x512xf32, #tpu.memory_space<vmem>>, vector<20x512xf32>
    %c0_46 = arith.constant 0 : index
    %c0_47 = arith.constant 0 : index
    %42 = vector.load %arg7[%c0_46, %c0_47] : memref<512x64xf32, #tpu.memory_space<vmem>>, vector<512x64xf32>
    %cst = arith.constant dense<0.000000e+00> : vector<20x64xf32>
    %43 = tpu.matmul %41, %42, %cst {dimension_numbers = #tpu.dot_dimension_numbers<[1], [0], [0], [1], [0, 0, 1, 1], [], []>} : vector<20x512xf32>, vector<512x64xf32>, vector<20x64xf32> -> vector<20x64xf32>
    %44 = vector.broadcast %21 : vector<1x64xf32> to vector<20x64xf32>
    %45 = arith.addf %43, %44 : vector<20x64xf32>
    %cst_48 = arith.constant 0.000000e+00 : f32
    %46 = vector.broadcast %cst_48 : f32 to vector<20x64xf32>
    %47 = arith.maximumf %45, %46 : vector<20x64xf32>
    %cst_49 = arith.constant dense<0.000000e+00> : vector<20x64xf32>
    %48 = tpu.matmul %47, %5, %cst_49 {dimension_numbers = #tpu.dot_dimension_numbers<[1], [0], [0], [1], [0, 0, 1, 1], [], []>} : vector<20x64xf32>, vector<64x64xf32>, vector<20x64xf32> -> vector<20x64xf32>
    %49 = vector.broadcast %23 : vector<1x64xf32> to vector<20x64xf32>
    %50 = arith.addf %48, %49 : vector<20x64xf32>
    %cst_50 = arith.constant 0.000000e+00 : f32
    %51 = vector.broadcast %cst_50 : f32 to vector<20x64xf32>
    %52 = arith.maximumf %50, %51 : vector<20x64xf32>
    %cst_51 = arith.constant dense<0.000000e+00> : vector<20x64xf32>
    %53 = tpu.matmul %52, %9, %cst_51 {dimension_numbers = #tpu.dot_dimension_numbers<[1], [0], [0], [1], [0, 0, 1, 1], [], []>} : vector<20x64xf32>, vector<64x64xf32>, vector<20x64xf32> -> vector<20x64xf32>
    %54 = vector.broadcast %25 : vector<1x64xf32> to vector<20x64xf32>
    %55 = arith.addf %53, %54 : vector<20x64xf32>
    %c0_52 = arith.constant 0 : index
    %c0_53 = arith.constant 0 : index
    %56 = vector.load %arg1[%c0_52, %c0_53] : memref<20x128xf32, #tpu.memory_space<vmem>>, vector<20x128xf32>
    %c0_54 = arith.constant 0 : index
    %c0_55 = arith.constant 0 : index
    %57 = vector.load %arg3[%c0_54, %c0_55] : memref<128x256xf32, #tpu.memory_space<vmem>>, vector<128x256xf32>
    %cst_56 = arith.constant dense<0.000000e+00> : vector<20x256xf32>
    %58 = tpu.matmul %56, %57, %cst_56 {dimension_numbers = #tpu.dot_dimension_numbers<[1], [0], [0], [1], [0, 0, 1, 1], [], []>} : vector<20x128xf32>, vector<128x256xf32>, vector<20x256xf32> -> vector<20x256xf32>
    %c0_57 = arith.constant 0 : index
    %c0_58 = arith.constant 0 : index
    %c0_59 = arith.constant 0 : index
    %59 = vector.load %arg6[%c0_57, %c0_58, %c0_59] : memref<3x1x256xf32, #tpu.memory_space<vmem>>, vector<1x1x256xf32>
    %60 = vector.shape_cast %59 : vector<1x1x256xf32> to vector<1x256xf32>
    %61 = vector.broadcast %60 : vector<1x256xf32> to vector<20x256xf32>
    %62 = arith.addf %58, %61 : vector<20x256xf32>
    %cst_60 = arith.constant 0.000000e+00 : f32
    %63 = vector.broadcast %cst_60 : f32 to vector<2x64xf32>
    %cst_61 = arith.constant 0.000000e+00 : f32
    %64 = vector.broadcast %cst_61 : f32 to vector<2x64xf32>
    %cst_62 = arith.constant 0.000000e+00 : f32
    %65 = vector.broadcast %cst_62 : f32 to vector<2x64xf32>
    %cst_63 = arith.constant 0.000000e+00 : f32
    %66 = vector.broadcast %cst_63 : f32 to vector<2x64xf32>
    %cst_64 = arith.constant 0.000000e+00 : f32
    %67 = vector.broadcast %cst_64 : f32 to vector<2x64xf32>
    %cst_65 = arith.constant 0.000000e+00 : f32
    %68 = vector.broadcast %cst_65 : f32 to vector<2x64xf32>
    %69 = vector.extract_strided_slice %62 {offsets = [0, 0], sizes = [2, 256], strides = [1, 1]} : vector<20x256xf32> to vector<2x256xf32>
    %cst_66 = arith.constant dense<0.000000e+00> : vector<2x256xf32>
    %70 = tpu.matmul %63, %28, %cst_66 {dimension_numbers = #tpu.dot_dimension_numbers<[1], [0], [0], [1], [0, 0, 1, 1], [], []>} : vector<2x64xf32>, vector<64x256xf32>, vector<2x256xf32> -> vector<2x256xf32>
    %71 = arith.addf %69, %70 : vector<2x256xf32>
    %72 = vector.extract_strided_slice %71 {offsets = [0, 0], sizes = [2, 192], strides = [1, 1]} : vector<2x256xf32> to vector<2x192xf32>
    %73 = arith.negf %72 : vector<2x192xf32>
    %74 = math.exp %73 : vector<2x192xf32>
    %cst_67 = arith.constant 1.000000e+00 : f32
    %75 = vector.broadcast %cst_67 : f32 to vector<2x192xf32>
    %76 = arith.addf %75, %74 : vector<2x192xf32>
    %77 = arith.divf %75, %76 : vector<2x192xf32>
    %78 = vector.extract_strided_slice %77 {offsets = [0, 0], sizes = [2, 64], strides = [1, 1]} : vector<2x192xf32> to vector<2x64xf32>
    %79 = vector.extract_strided_slice %77 {offsets = [0, 64], sizes = [2, 64], strides = [1, 1]} : vector<2x192xf32> to vector<2x64xf32>
    %80 = vector.extract_strided_slice %77 {offsets = [0, 128], sizes = [2, 64], strides = [1, 1]} : vector<2x192xf32> to vector<2x64xf32>
    %81 = vector.extract_strided_slice %71 {offsets = [0, 192], sizes = [2, 64], strides = [1, 1]} : vector<2x256xf32> to vector<2x64xf32>
    %82 = math.tanh %81 : vector<2x64xf32>
    %83 = arith.mulf %79, %66 : vector<2x64xf32>
    %84 = arith.mulf %78, %82 : vector<2x64xf32>
    %85 = arith.addf %83, %84 : vector<2x64xf32>
    %86 = math.tanh %85 : vector<2x64xf32>
    %87 = arith.mulf %80, %86 : vector<2x64xf32>
    %88 = tpu.concatenate %87, %64 in 1 : vector<2x64xf32>, vector<2x64xf32> -> vector<2x128xf32>
    %cst_68 = arith.constant dense<0.000000e+00> : vector<2x256xf32>
    %89 = tpu.matmul %88, %30, %cst_68 {dimension_numbers = #tpu.dot_dimension_numbers<[1], [0], [0], [1], [0, 0, 1, 1], [], []>} : vector<2x128xf32>, vector<128x256xf32>, vector<2x256xf32> -> vector<2x256xf32>
    %90 = arith.addf %89, %36 : vector<2x256xf32>
    %91 = vector.extract_strided_slice %90 {offsets = [0, 0], sizes = [2, 192], strides = [1, 1]} : vector<2x256xf32> to vector<2x192xf32>
    %92 = arith.negf %91 : vector<2x192xf32>
    %93 = math.exp %92 : vector<2x192xf32>
    %cst_69 = arith.constant 1.000000e+00 : f32
    %94 = vector.broadcast %cst_69 : f32 to vector<2x192xf32>
    %95 = arith.addf %94, %93 : vector<2x192xf32>
    %96 = arith.divf %94, %95 : vector<2x192xf32>
    %97 = vector.extract_strided_slice %96 {offsets = [0, 0], sizes = [2, 64], strides = [1, 1]} : vector<2x192xf32> to vector<2x64xf32>
    %98 = vector.extract_strided_slice %96 {offsets = [0, 64], sizes = [2, 64], strides = [1, 1]} : vector<2x192xf32> to vector<2x64xf32>
    %99 = vector.extract_strided_slice %96 {offsets = [0, 128], sizes = [2, 64], strides = [1, 1]} : vector<2x192xf32> to vector<2x64xf32>
    %100 = vector.extract_strided_slice %90 {offsets = [0, 192], sizes = [2, 64], strides = [1, 1]} : vector<2x256xf32> to vector<2x64xf32>
    %101 = math.tanh %100 : vector<2x64xf32>
    %102 = arith.mulf %98, %67 : vector<2x64xf32>
    %103 = arith.mulf %97, %101 : vector<2x64xf32>
    %104 = arith.addf %102, %103 : vector<2x64xf32>
    %105 = math.tanh %104 : vector<2x64xf32>
    %106 = arith.mulf %99, %105 : vector<2x64xf32>
    %107 = tpu.concatenate %106, %65 in 1 : vector<2x64xf32>, vector<2x64xf32> -> vector<2x128xf32>
    %cst_70 = arith.constant dense<0.000000e+00> : vector<2x256xf32>
    %108 = tpu.matmul %107, %32, %cst_70 {dimension_numbers = #tpu.dot_dimension_numbers<[1], [0], [0], [1], [0, 0, 1, 1], [], []>} : vector<2x128xf32>, vector<128x256xf32>, vector<2x256xf32> -> vector<2x256xf32>
    %109 = arith.addf %108, %40 : vector<2x256xf32>
    %110 = vector.extract_strided_slice %109 {offsets = [0, 0], sizes = [2, 192], strides = [1, 1]} : vector<2x256xf32> to vector<2x192xf32>
    %111 = arith.negf %110 : vector<2x192xf32>
    %112 = math.exp %111 : vector<2x192xf32>
    %cst_71 = arith.constant 1.000000e+00 : f32
    %113 = vector.broadcast %cst_71 : f32 to vector<2x192xf32>
    %114 = arith.addf %113, %112 : vector<2x192xf32>
    %115 = arith.divf %113, %114 : vector<2x192xf32>
    %116 = vector.extract_strided_slice %115 {offsets = [0, 0], sizes = [2, 64], strides = [1, 1]} : vector<2x192xf32> to vector<2x64xf32>
    %117 = vector.extract_strided_slice %115 {offsets = [0, 64], sizes = [2, 64], strides = [1, 1]} : vector<2x192xf32> to vector<2x64xf32>
    %118 = vector.extract_strided_slice %115 {offsets = [0, 128], sizes = [2, 64], strides = [1, 1]} : vector<2x192xf32> to vector<2x64xf32>
    %119 = vector.extract_strided_slice %109 {offsets = [0, 192], sizes = [2, 64], strides = [1, 1]} : vector<2x256xf32> to vector<2x64xf32>
    %120 = math.tanh %119 : vector<2x64xf32>
    %121 = arith.mulf %117, %68 : vector<2x64xf32>
    %122 = arith.mulf %116, %120 : vector<2x64xf32>
    %123 = arith.addf %121, %122 : vector<2x64xf32>
    %124 = math.tanh %123 : vector<2x64xf32>
    %125 = arith.mulf %118, %124 : vector<2x64xf32>
    %cst_72 = arith.constant dense<0.000000e+00> : vector<2x64xf32>
    %126 = tpu.matmul %125, %1, %cst_72 {dimension_numbers = #tpu.dot_dimension_numbers<[1], [0], [0], [1], [0, 0, 1, 1], [], []>} : vector<2x64xf32>, vector<64x64xf32>, vector<2x64xf32> -> vector<2x64xf32>
    %127 = arith.addf %126, %15 : vector<2x64xf32>
    %cst_73 = arith.constant 0.000000e+00 : f32
    %128 = vector.broadcast %cst_73 : f32 to vector<2x64xf32>
    %129 = arith.maximumf %127, %128 : vector<2x64xf32>
    %cst_74 = arith.constant dense<0.000000e+00> : vector<2x64xf32>
    %130 = tpu.matmul %129, %3, %cst_74 {dimension_numbers = #tpu.dot_dimension_numbers<[1], [0], [0], [1], [0, 0, 1, 1], [], []>} : vector<2x64xf32>, vector<64x64xf32>, vector<2x64xf32> -> vector<2x64xf32>
    %131 = arith.addf %130, %19 : vector<2x64xf32>
    %cst_75 = arith.constant 0.000000e+00 : f32
    %132 = vector.broadcast %cst_75 : f32 to vector<2x64xf32>
    %133 = arith.maximumf %131, %132 : vector<2x64xf32>
    %cst_76 = arith.constant dense<0.000000e+00> : vector<2x64xf32>
    %134 = tpu.matmul %133, %7, %cst_76 {dimension_numbers = #tpu.dot_dimension_numbers<[1], [0], [0], [1], [0, 0, 1, 1], [], []>} : vector<2x64xf32>, vector<64x64xf32>, vector<2x64xf32> -> vector<2x64xf32>
    %135 = vector.extract_strided_slice %55 {offsets = [0, 0], sizes = [2, 64], strides = [1, 1]} : vector<20x64xf32> to vector<2x64xf32>
    %136 = arith.addf %134, %135 : vector<2x64xf32>
    %cst_77 = arith.constant 0.000000e+00 : f32
    %137 = vector.broadcast %cst_77 : f32 to vector<2x64xf32>
    %138 = arith.maximumf %136, %137 : vector<2x64xf32>
    %139 = vector.extract_strided_slice %62 {offsets = [2, 0], sizes = [2, 256], strides = [1, 1]} : vector<20x256xf32> to vector<2x256xf32>
    %cst_78 = arith.constant dense<0.000000e+00> : vector<2x256xf32>
    %140 = tpu.matmul %87, %28, %cst_78 {dimension_numbers = #tpu.dot_dimension_numbers<[1], [0], [0], [1], [0, 0, 1, 1], [], []>} : vector<2x64xf32>, vector<64x256xf32>, vector<2x256xf32> -> vector<2x256xf32>
    %141 = arith.addf %139, %140 : vector<2x256xf32>
    %142 = vector.extract_strided_slice %141 {offsets = [0, 0], sizes = [2, 192], strides = [1, 1]} : vector<2x256xf32> to vector<2x192xf32>
    %143 = arith.negf %142 : vector<2x192xf32>
    %144 = math.exp %143 : vector<2x192xf32>
    %cst_79 = arith.constant 1.000000e+00 : f32
    %145 = vector.broadcast %cst_79 : f32 to vector<2x192xf32>
    %146 = arith.addf %145, %144 : vector<2x192xf32>
    %147 = arith.divf %145, %146 : vector<2x192xf32>
    %148 = vector.extract_strided_slice %147 {offsets = [0, 0], sizes = [2, 64], strides = [1, 1]} : vector<2x192xf32> to vector<2x64xf32>
    %149 = vector.extract_strided_slice %147 {offsets = [0, 64], sizes = [2, 64], strides = [1, 1]} : vector<2x192xf32> to vector<2x64xf32>
    %150 = vector.extract_strided_slice %147 {offsets = [0, 128], sizes = [2, 64], strides = [1, 1]} : vector<2x192xf32> to vector<2x64xf32>
    %151 = vector.extract_strided_slice %141 {offsets = [0, 192], sizes = [2, 64], strides = [1, 1]} : vector<2x256xf32> to vector<2x64xf32>
    %152 = math.tanh %151 : vector<2x64xf32>
    %153 = arith.mulf %149, %85 : vector<2x64xf32>
    %154 = arith.mulf %148, %152 : vector<2x64xf32>
    %155 = arith.addf %153, %154 : vector<2x64xf32>
    %156 = math.tanh %155 : vector<2x64xf32>
    %157 = arith.mulf %150, %156 : vector<2x64xf32>
    %158 = tpu.concatenate %157, %106 in 1 : vector<2x64xf32>, vector<2x64xf32> -> vector<2x128xf32>
    %cst_80 = arith.constant dense<0.000000e+00> : vector<2x256xf32>
    %159 = tpu.matmul %158, %30, %cst_80 {dimension_numbers = #tpu.dot_dimension_numbers<[1], [0], [0], [1], [0, 0, 1, 1], [], []>} : vector<2x128xf32>, vector<128x256xf32>, vector<2x256xf32> -> vector<2x256xf32>
    %160 = arith.addf %159, %36 : vector<2x256xf32>
    %161 = vector.extract_strided_slice %160 {offsets = [0, 0], sizes = [2, 192], strides = [1, 1]} : vector<2x256xf32> to vector<2x192xf32>
    %162 = arith.negf %161 : vector<2x192xf32>
    %163 = math.exp %162 : vector<2x192xf32>
    %cst_81 = arith.constant 1.000000e+00 : f32
    %164 = vector.broadcast %cst_81 : f32 to vector<2x192xf32>
    %165 = arith.addf %164, %163 : vector<2x192xf32>
    %166 = arith.divf %164, %165 : vector<2x192xf32>
    %167 = vector.extract_strided_slice %166 {offsets = [0, 0], sizes = [2, 64], strides = [1, 1]} : vector<2x192xf32> to vector<2x64xf32>
    %168 = vector.extract_strided_slice %166 {offsets = [0, 64], sizes = [2, 64], strides = [1, 1]} : vector<2x192xf32> to vector<2x64xf32>
    %169 = vector.extract_strided_slice %166 {offsets = [0, 128], sizes = [2, 64], strides = [1, 1]} : vector<2x192xf32> to vector<2x64xf32>
    %170 = vector.extract_strided_slice %160 {offsets = [0, 192], sizes = [2, 64], strides = [1, 1]} : vector<2x256xf32> to vector<2x64xf32>
    %171 = math.tanh %170 : vector<2x64xf32>
    %172 = arith.mulf %168, %104 : vector<2x64xf32>
    %173 = arith.mulf %167, %171 : vector<2x64xf32>
    %174 = arith.addf %172, %173 : vector<2x64xf32>
    %175 = math.tanh %174 : vector<2x64xf32>
    %176 = arith.mulf %169, %175 : vector<2x64xf32>
    %177 = tpu.concatenate %176, %125 in 1 : vector<2x64xf32>, vector<2x64xf32> -> vector<2x128xf32>
    %cst_82 = arith.constant dense<0.000000e+00> : vector<2x256xf32>
    %178 = tpu.matmul %177, %32, %cst_82 {dimension_numbers = #tpu.dot_dimension_numbers<[1], [0], [0], [1], [0, 0, 1, 1], [], []>} : vector<2x128xf32>, vector<128x256xf32>, vector<2x256xf32> -> vector<2x256xf32>
    %179 = arith.addf %178, %40 : vector<2x256xf32>
    %180 = vector.extract_strided_slice %179 {offsets = [0, 0], sizes = [2, 192], strides = [1, 1]} : vector<2x256xf32> to vector<2x192xf32>
    %181 = arith.negf %180 : vector<2x192xf32>
    %182 = math.exp %181 : vector<2x192xf32>
    %cst_83 = arith.constant 1.000000e+00 : f32
    %183 = vector.broadcast %cst_83 : f32 to vector<2x192xf32>
    %184 = arith.addf %183, %182 : vector<2x192xf32>
    %185 = arith.divf %183, %184 : vector<2x192xf32>
    %186 = vector.extract_strided_slice %185 {offsets = [0, 0], sizes = [2, 64], strides = [1, 1]} : vector<2x192xf32> to vector<2x64xf32>
    %187 = vector.extract_strided_slice %185 {offsets = [0, 64], sizes = [2, 64], strides = [1, 1]} : vector<2x192xf32> to vector<2x64xf32>
    %188 = vector.extract_strided_slice %185 {offsets = [0, 128], sizes = [2, 64], strides = [1, 1]} : vector<2x192xf32> to vector<2x64xf32>
    %189 = vector.extract_strided_slice %179 {offsets = [0, 192], sizes = [2, 64], strides = [1, 1]} : vector<2x256xf32> to vector<2x64xf32>
    %190 = math.tanh %189 : vector<2x64xf32>
    %191 = arith.mulf %187, %123 : vector<2x64xf32>
    %192 = arith.mulf %186, %190 : vector<2x64xf32>
    %193 = arith.addf %191, %192 : vector<2x64xf32>
    %194 = math.tanh %193 : vector<2x64xf32>
    %195 = arith.mulf %188, %194 : vector<2x64xf32>
    %cst_84 = arith.constant dense<0.000000e+00> : vector<2x64xf32>
    %196 = tpu.matmul %195, %1, %cst_84 {dimension_numbers = #tpu.dot_dimension_numbers<[1], [0], [0], [1], [0, 0, 1, 1], [], []>} : vector<2x64xf32>, vector<64x64xf32>, vector<2x64xf32> -> vector<2x64xf32>
    %197 = arith.addf %196, %15 : vector<2x64xf32>
    %cst_85 = arith.constant 0.000000e+00 : f32
    %198 = vector.broadcast %cst_85 : f32 to vector<2x64xf32>
    %199 = arith.maximumf %197, %198 : vector<2x64xf32>
    %cst_86 = arith.constant dense<0.000000e+00> : vector<2x64xf32>
    %200 = tpu.matmul %199, %3, %cst_86 {dimension_numbers = #tpu.dot_dimension_numbers<[1], [0], [0], [1], [0, 0, 1, 1], [], []>} : vector<2x64xf32>, vector<64x64xf32>, vector<2x64xf32> -> vector<2x64xf32>
    %201 = arith.addf %200, %19 : vector<2x64xf32>
    %cst_87 = arith.constant 0.000000e+00 : f32
    %202 = vector.broadcast %cst_87 : f32 to vector<2x64xf32>
    %203 = arith.maximumf %201, %202 : vector<2x64xf32>
    %cst_88 = arith.constant dense<0.000000e+00> : vector<2x64xf32>
    %204 = tpu.matmul %203, %7, %cst_88 {dimension_numbers = #tpu.dot_dimension_numbers<[1], [0], [0], [1], [0, 0, 1, 1], [], []>} : vector<2x64xf32>, vector<64x64xf32>, vector<2x64xf32> -> vector<2x64xf32>
    %205 = vector.extract_strided_slice %55 {offsets = [2, 0], sizes = [2, 64], strides = [1, 1]} : vector<20x64xf32> to vector<2x64xf32>
    %206 = arith.addf %204, %205 : vector<2x64xf32>
    %cst_89 = arith.constant 0.000000e+00 : f32
    %207 = vector.broadcast %cst_89 : f32 to vector<2x64xf32>
    %208 = arith.maximumf %206, %207 : vector<2x64xf32>
    %209 = arith.addf %138, %208 : vector<2x64xf32>
    %210 = vector.extract_strided_slice %62 {offsets = [4, 0], sizes = [2, 256], strides = [1, 1]} : vector<20x256xf32> to vector<2x256xf32>
    %cst_90 = arith.constant dense<0.000000e+00> : vector<2x256xf32>
    %211 = tpu.matmul %157, %28, %cst_90 {dimension_numbers = #tpu.dot_dimension_numbers<[1], [0], [0], [1], [0, 0, 1, 1], [], []>} : vector<2x64xf32>, vector<64x256xf32>, vector<2x256xf32> -> vector<2x256xf32>
    %212 = arith.addf %210, %211 : vector<2x256xf32>
    %213 = vector.extract_strided_slice %212 {offsets = [0, 0], sizes = [2, 192], strides = [1, 1]} : vector<2x256xf32> to vector<2x192xf32>
    %214 = arith.negf %213 : vector<2x192xf32>
    %215 = math.exp %214 : vector<2x192xf32>
    %cst_91 = arith.constant 1.000000e+00 : f32
    %216 = vector.broadcast %cst_91 : f32 to vector<2x192xf32>
    %217 = arith.addf %216, %215 : vector<2x192xf32>
    %218 = arith.divf %216, %217 : vector<2x192xf32>
    %219 = vector.extract_strided_slice %218 {offsets = [0, 0], sizes = [2, 64], strides = [1, 1]} : vector<2x192xf32> to vector<2x64xf32>
    %220 = vector.extract_strided_slice %218 {offsets = [0, 64], sizes = [2, 64], strides = [1, 1]} : vector<2x192xf32> to vector<2x64xf32>
    %221 = vector.extract_strided_slice %218 {offsets = [0, 128], sizes = [2, 64], strides = [1, 1]} : vector<2x192xf32> to vector<2x64xf32>
    %222 = vector.extract_strided_slice %212 {offsets = [0, 192], sizes = [2, 64], strides = [1, 1]} : vector<2x256xf32> to vector<2x64xf32>
    %223 = math.tanh %222 : vector<2x64xf32>
    %224 = arith.mulf %220, %155 : vector<2x64xf32>
    %225 = arith.mulf %219, %223 : vector<2x64xf32>
    %226 = arith.addf %224, %225 : vector<2x64xf32>
    %227 = math.tanh %226 : vector<2x64xf32>
    %228 = arith.mulf %221, %227 : vector<2x64xf32>
    %229 = tpu.concatenate %228, %176 in 1 : vector<2x64xf32>, vector<2x64xf32> -> vector<2x128xf32>
    %cst_92 = arith.constant dense<0.000000e+00> : vector<2x256xf32>
    %230 = tpu.matmul %229, %30, %cst_92 {dimension_numbers = #tpu.dot_dimension_numbers<[1], [0], [0], [1], [0, 0, 1, 1], [], []>} : vector<2x128xf32>, vector<128x256xf32>, vector<2x256xf32> -> vector<2x256xf32>
    %231 = arith.addf %230, %36 : vector<2x256xf32>
    %232 = vector.extract_strided_slice %231 {offsets = [0, 0], sizes = [2, 192], strides = [1, 1]} : vector<2x256xf32> to vector<2x192xf32>
    %233 = arith.negf %232 : vector<2x192xf32>
    %234 = math.exp %233 : vector<2x192xf32>
    %cst_93 = arith.constant 1.000000e+00 : f32
    %235 = vector.broadcast %cst_93 : f32 to vector<2x192xf32>
    %236 = arith.addf %235, %234 : vector<2x192xf32>
    %237 = arith.divf %235, %236 : vector<2x192xf32>
    %238 = vector.extract_strided_slice %237 {offsets = [0, 0], sizes = [2, 64], strides = [1, 1]} : vector<2x192xf32> to vector<2x64xf32>
    %239 = vector.extract_strided_slice %237 {offsets = [0, 64], sizes = [2, 64], strides = [1, 1]} : vector<2x192xf32> to vector<2x64xf32>
    %240 = vector.extract_strided_slice %237 {offsets = [0, 128], sizes = [2, 64], strides = [1, 1]} : vector<2x192xf32> to vector<2x64xf32>
    %241 = vector.extract_strided_slice %231 {offsets = [0, 192], sizes = [2, 64], strides = [1, 1]} : vector<2x256xf32> to vector<2x64xf32>
    %242 = math.tanh %241 : vector<2x64xf32>
    %243 = arith.mulf %239, %174 : vector<2x64xf32>
    %244 = arith.mulf %238, %242 : vector<2x64xf32>
    %245 = arith.addf %243, %244 : vector<2x64xf32>
    %246 = math.tanh %245 : vector<2x64xf32>
    %247 = arith.mulf %240, %246 : vector<2x64xf32>
    %248 = tpu.concatenate %247, %195 in 1 : vector<2x64xf32>, vector<2x64xf32> -> vector<2x128xf32>
    %cst_94 = arith.constant dense<0.000000e+00> : vector<2x256xf32>
    %249 = tpu.matmul %248, %32, %cst_94 {dimension_numbers = #tpu.dot_dimension_numbers<[1], [0], [0], [1], [0, 0, 1, 1], [], []>} : vector<2x128xf32>, vector<128x256xf32>, vector<2x256xf32> -> vector<2x256xf32>
    %250 = arith.addf %249, %40 : vector<2x256xf32>
    %251 = vector.extract_strided_slice %250 {offsets = [0, 0], sizes = [2, 192], strides = [1, 1]} : vector<2x256xf32> to vector<2x192xf32>
    %252 = arith.negf %251 : vector<2x192xf32>
    %253 = math.exp %252 : vector<2x192xf32>
    %cst_95 = arith.constant 1.000000e+00 : f32
    %254 = vector.broadcast %cst_95 : f32 to vector<2x192xf32>
    %255 = arith.addf %254, %253 : vector<2x192xf32>
    %256 = arith.divf %254, %255 : vector<2x192xf32>
    %257 = vector.extract_strided_slice %256 {offsets = [0, 0], sizes = [2, 64], strides = [1, 1]} : vector<2x192xf32> to vector<2x64xf32>
    %258 = vector.extract_strided_slice %256 {offsets = [0, 64], sizes = [2, 64], strides = [1, 1]} : vector<2x192xf32> to vector<2x64xf32>
    %259 = vector.extract_strided_slice %256 {offsets = [0, 128], sizes = [2, 64], strides = [1, 1]} : vector<2x192xf32> to vector<2x64xf32>
    %260 = vector.extract_strided_slice %250 {offsets = [0, 192], sizes = [2, 64], strides = [1, 1]} : vector<2x256xf32> to vector<2x64xf32>
    %261 = math.tanh %260 : vector<2x64xf32>
    %262 = arith.mulf %258, %193 : vector<2x64xf32>
    %263 = arith.mulf %257, %261 : vector<2x64xf32>
    %264 = arith.addf %262, %263 : vector<2x64xf32>
    %265 = math.tanh %264 : vector<2x64xf32>
    %266 = arith.mulf %259, %265 : vector<2x64xf32>
    %cst_96 = arith.constant dense<0.000000e+00> : vector<2x64xf32>
    %267 = tpu.matmul %266, %1, %cst_96 {dimension_numbers = #tpu.dot_dimension_numbers<[1], [0], [0], [1], [0, 0, 1, 1], [], []>} : vector<2x64xf32>, vector<64x64xf32>, vector<2x64xf32> -> vector<2x64xf32>
    %268 = arith.addf %267, %15 : vector<2x64xf32>
    %cst_97 = arith.constant 0.000000e+00 : f32
    %269 = vector.broadcast %cst_97 : f32 to vector<2x64xf32>
    %270 = arith.maximumf %268, %269 : vector<2x64xf32>
    %cst_98 = arith.constant dense<0.000000e+00> : vector<2x64xf32>
    %271 = tpu.matmul %270, %3, %cst_98 {dimension_numbers = #tpu.dot_dimension_numbers<[1], [0], [0], [1], [0, 0, 1, 1], [], []>} : vector<2x64xf32>, vector<64x64xf32>, vector<2x64xf32> -> vector<2x64xf32>
    %272 = arith.addf %271, %19 : vector<2x64xf32>
    %cst_99 = arith.constant 0.000000e+00 : f32
    %273 = vector.broadcast %cst_99 : f32 to vector<2x64xf32>
    %274 = arith.maximumf %272, %273 : vector<2x64xf32>
    %cst_100 = arith.constant dense<0.000000e+00> : vector<2x64xf32>
    %275 = tpu.matmul %274, %7, %cst_100 {dimension_numbers = #tpu.dot_dimension_numbers<[1], [0], [0], [1], [0, 0, 1, 1], [], []>} : vector<2x64xf32>, vector<64x64xf32>, vector<2x64xf32> -> vector<2x64xf32>
    %276 = vector.extract_strided_slice %55 {offsets = [4, 0], sizes = [2, 64], strides = [1, 1]} : vector<20x64xf32> to vector<2x64xf32>
    %277 = arith.addf %275, %276 : vector<2x64xf32>
    %cst_101 = arith.constant 0.000000e+00 : f32
    %278 = vector.broadcast %cst_101 : f32 to vector<2x64xf32>
    %279 = arith.maximumf %277, %278 : vector<2x64xf32>
    %280 = arith.addf %209, %279 : vector<2x64xf32>
    %281 = vector.extract_strided_slice %62 {offsets = [6, 0], sizes = [2, 256], strides = [1, 1]} : vector<20x256xf32> to vector<2x256xf32>
    %cst_102 = arith.constant dense<0.000000e+00> : vector<2x256xf32>
    %282 = tpu.matmul %228, %28, %cst_102 {dimension_numbers = #tpu.dot_dimension_numbers<[1], [0], [0], [1], [0, 0, 1, 1], [], []>} : vector<2x64xf32>, vector<64x256xf32>, vector<2x256xf32> -> vector<2x256xf32>
    %283 = arith.addf %281, %282 : vector<2x256xf32>
    %284 = vector.extract_strided_slice %283 {offsets = [0, 0], sizes = [2, 192], strides = [1, 1]} : vector<2x256xf32> to vector<2x192xf32>
    %285 = arith.negf %284 : vector<2x192xf32>
    %286 = math.exp %285 : vector<2x192xf32>
    %cst_103 = arith.constant 1.000000e+00 : f32
    %287 = vector.broadcast %cst_103 : f32 to vector<2x192xf32>
    %288 = arith.addf %287, %286 : vector<2x192xf32>
    %289 = arith.divf %287, %288 : vector<2x192xf32>
    %290 = vector.extract_strided_slice %289 {offsets = [0, 0], sizes = [2, 64], strides = [1, 1]} : vector<2x192xf32> to vector<2x64xf32>
    %291 = vector.extract_strided_slice %289 {offsets = [0, 64], sizes = [2, 64], strides = [1, 1]} : vector<2x192xf32> to vector<2x64xf32>
    %292 = vector.extract_strided_slice %289 {offsets = [0, 128], sizes = [2, 64], strides = [1, 1]} : vector<2x192xf32> to vector<2x64xf32>
    %293 = vector.extract_strided_slice %283 {offsets = [0, 192], sizes = [2, 64], strides = [1, 1]} : vector<2x256xf32> to vector<2x64xf32>
    %294 = math.tanh %293 : vector<2x64xf32>
    %295 = arith.mulf %291, %226 : vector<2x64xf32>
    %296 = arith.mulf %290, %294 : vector<2x64xf32>
    %297 = arith.addf %295, %296 : vector<2x64xf32>
    %298 = math.tanh %297 : vector<2x64xf32>
    %299 = arith.mulf %292, %298 : vector<2x64xf32>
    %300 = tpu.concatenate %299, %247 in 1 : vector<2x64xf32>, vector<2x64xf32> -> vector<2x128xf32>
    %cst_104 = arith.constant dense<0.000000e+00> : vector<2x256xf32>
    %301 = tpu.matmul %300, %30, %cst_104 {dimension_numbers = #tpu.dot_dimension_numbers<[1], [0], [0], [1], [0, 0, 1, 1], [], []>} : vector<2x128xf32>, vector<128x256xf32>, vector<2x256xf32> -> vector<2x256xf32>
    %302 = arith.addf %301, %36 : vector<2x256xf32>
    %303 = vector.extract_strided_slice %302 {offsets = [0, 0], sizes = [2, 192], strides = [1, 1]} : vector<2x256xf32> to vector<2x192xf32>
    %304 = arith.negf %303 : vector<2x192xf32>
    %305 = math.exp %304 : vector<2x192xf32>
    %cst_105 = arith.constant 1.000000e+00 : f32
    %306 = vector.broadcast %cst_105 : f32 to vector<2x192xf32>
    %307 = arith.addf %306, %305 : vector<2x192xf32>
    %308 = arith.divf %306, %307 : vector<2x192xf32>
    %309 = vector.extract_strided_slice %308 {offsets = [0, 0], sizes = [2, 64], strides = [1, 1]} : vector<2x192xf32> to vector<2x64xf32>
    %310 = vector.extract_strided_slice %308 {offsets = [0, 64], sizes = [2, 64], strides = [1, 1]} : vector<2x192xf32> to vector<2x64xf32>
    %311 = vector.extract_strided_slice %308 {offsets = [0, 128], sizes = [2, 64], strides = [1, 1]} : vector<2x192xf32> to vector<2x64xf32>
    %312 = vector.extract_strided_slice %302 {offsets = [0, 192], sizes = [2, 64], strides = [1, 1]} : vector<2x256xf32> to vector<2x64xf32>
    %313 = math.tanh %312 : vector<2x64xf32>
    %314 = arith.mulf %310, %245 : vector<2x64xf32>
    %315 = arith.mulf %309, %313 : vector<2x64xf32>
    %316 = arith.addf %314, %315 : vector<2x64xf32>
    %317 = math.tanh %316 : vector<2x64xf32>
    %318 = arith.mulf %311, %317 : vector<2x64xf32>
    %319 = tpu.concatenate %318, %266 in 1 : vector<2x64xf32>, vector<2x64xf32> -> vector<2x128xf32>
    %cst_106 = arith.constant dense<0.000000e+00> : vector<2x256xf32>
    %320 = tpu.matmul %319, %32, %cst_106 {dimension_numbers = #tpu.dot_dimension_numbers<[1], [0], [0], [1], [0, 0, 1, 1], [], []>} : vector<2x128xf32>, vector<128x256xf32>, vector<2x256xf32> -> vector<2x256xf32>
    %321 = arith.addf %320, %40 : vector<2x256xf32>
    %322 = vector.extract_strided_slice %321 {offsets = [0, 0], sizes = [2, 192], strides = [1, 1]} : vector<2x256xf32> to vector<2x192xf32>
    %323 = arith.negf %322 : vector<2x192xf32>
    %324 = math.exp %323 : vector<2x192xf32>
    %cst_107 = arith.constant 1.000000e+00 : f32
    %325 = vector.broadcast %cst_107 : f32 to vector<2x192xf32>
    %326 = arith.addf %325, %324 : vector<2x192xf32>
    %327 = arith.divf %325, %326 : vector<2x192xf32>
    %328 = vector.extract_strided_slice %327 {offsets = [0, 0], sizes = [2, 64], strides = [1, 1]} : vector<2x192xf32> to vector<2x64xf32>
    %329 = vector.extract_strided_slice %327 {offsets = [0, 64], sizes = [2, 64], strides = [1, 1]} : vector<2x192xf32> to vector<2x64xf32>
    %330 = vector.extract_strided_slice %327 {offsets = [0, 128], sizes = [2, 64], strides = [1, 1]} : vector<2x192xf32> to vector<2x64xf32>
    %331 = vector.extract_strided_slice %321 {offsets = [0, 192], sizes = [2, 64], strides = [1, 1]} : vector<2x256xf32> to vector<2x64xf32>
    %332 = math.tanh %331 : vector<2x64xf32>
    %333 = arith.mulf %329, %264 : vector<2x64xf32>
    %334 = arith.mulf %328, %332 : vector<2x64xf32>
    %335 = arith.addf %333, %334 : vector<2x64xf32>
    %336 = math.tanh %335 : vector<2x64xf32>
    %337 = arith.mulf %330, %336 : vector<2x64xf32>
    %cst_108 = arith.constant dense<0.000000e+00> : vector<2x64xf32>
    %338 = tpu.matmul %337, %1, %cst_108 {dimension_numbers = #tpu.dot_dimension_numbers<[1], [0], [0], [1], [0, 0, 1, 1], [], []>} : vector<2x64xf32>, vector<64x64xf32>, vector<2x64xf32> -> vector<2x64xf32>
    %339 = arith.addf %338, %15 : vector<2x64xf32>
    %cst_109 = arith.constant 0.000000e+00 : f32
    %340 = vector.broadcast %cst_109 : f32 to vector<2x64xf32>
    %341 = arith.maximumf %339, %340 : vector<2x64xf32>
    %cst_110 = arith.constant dense<0.000000e+00> : vector<2x64xf32>
    %342 = tpu.matmul %341, %3, %cst_110 {dimension_numbers = #tpu.dot_dimension_numbers<[1], [0], [0], [1], [0, 0, 1, 1], [], []>} : vector<2x64xf32>, vector<64x64xf32>, vector<2x64xf32> -> vector<2x64xf32>
    %343 = arith.addf %342, %19 : vector<2x64xf32>
    %cst_111 = arith.constant 0.000000e+00 : f32
    %344 = vector.broadcast %cst_111 : f32 to vector<2x64xf32>
    %345 = arith.maximumf %343, %344 : vector<2x64xf32>
    %cst_112 = arith.constant dense<0.000000e+00> : vector<2x64xf32>
    %346 = tpu.matmul %345, %7, %cst_112 {dimension_numbers = #tpu.dot_dimension_numbers<[1], [0], [0], [1], [0, 0, 1, 1], [], []>} : vector<2x64xf32>, vector<64x64xf32>, vector<2x64xf32> -> vector<2x64xf32>
    %347 = vector.extract_strided_slice %55 {offsets = [6, 0], sizes = [2, 64], strides = [1, 1]} : vector<20x64xf32> to vector<2x64xf32>
    %348 = arith.addf %346, %347 : vector<2x64xf32>
    %cst_113 = arith.constant 0.000000e+00 : f32
    %349 = vector.broadcast %cst_113 : f32 to vector<2x64xf32>
    %350 = arith.maximumf %348, %349 : vector<2x64xf32>
    %351 = arith.addf %280, %350 : vector<2x64xf32>
    %352 = vector.extract_strided_slice %62 {offsets = [8, 0], sizes = [2, 256], strides = [1, 1]} : vector<20x256xf32> to vector<2x256xf32>
    %cst_114 = arith.constant dense<0.000000e+00> : vector<2x256xf32>
    %353 = tpu.matmul %299, %28, %cst_114 {dimension_numbers = #tpu.dot_dimension_numbers<[1], [0], [0], [1], [0, 0, 1, 1], [], []>} : vector<2x64xf32>, vector<64x256xf32>, vector<2x256xf32> -> vector<2x256xf32>
    %354 = arith.addf %352, %353 : vector<2x256xf32>
    %355 = vector.extract_strided_slice %354 {offsets = [0, 0], sizes = [2, 192], strides = [1, 1]} : vector<2x256xf32> to vector<2x192xf32>
    %356 = arith.negf %355 : vector<2x192xf32>
    %357 = math.exp %356 : vector<2x192xf32>
    %cst_115 = arith.constant 1.000000e+00 : f32
    %358 = vector.broadcast %cst_115 : f32 to vector<2x192xf32>
    %359 = arith.addf %358, %357 : vector<2x192xf32>
    %360 = arith.divf %358, %359 : vector<2x192xf32>
    %361 = vector.extract_strided_slice %360 {offsets = [0, 0], sizes = [2, 64], strides = [1, 1]} : vector<2x192xf32> to vector<2x64xf32>
    %362 = vector.extract_strided_slice %360 {offsets = [0, 64], sizes = [2, 64], strides = [1, 1]} : vector<2x192xf32> to vector<2x64xf32>
    %363 = vector.extract_strided_slice %360 {offsets = [0, 128], sizes = [2, 64], strides = [1, 1]} : vector<2x192xf32> to vector<2x64xf32>
    %364 = vector.extract_strided_slice %354 {offsets = [0, 192], sizes = [2, 64], strides = [1, 1]} : vector<2x256xf32> to vector<2x64xf32>
    %365 = math.tanh %364 : vector<2x64xf32>
    %366 = arith.mulf %362, %297 : vector<2x64xf32>
    %367 = arith.mulf %361, %365 : vector<2x64xf32>
    %368 = arith.addf %366, %367 : vector<2x64xf32>
    %369 = math.tanh %368 : vector<2x64xf32>
    %370 = arith.mulf %363, %369 : vector<2x64xf32>
    %371 = tpu.concatenate %370, %318 in 1 : vector<2x64xf32>, vector<2x64xf32> -> vector<2x128xf32>
    %cst_116 = arith.constant dense<0.000000e+00> : vector<2x256xf32>
    %372 = tpu.matmul %371, %30, %cst_116 {dimension_numbers = #tpu.dot_dimension_numbers<[1], [0], [0], [1], [0, 0, 1, 1], [], []>} : vector<2x128xf32>, vector<128x256xf32>, vector<2x256xf32> -> vector<2x256xf32>
    %373 = arith.addf %372, %36 : vector<2x256xf32>
    %374 = vector.extract_strided_slice %373 {offsets = [0, 0], sizes = [2, 192], strides = [1, 1]} : vector<2x256xf32> to vector<2x192xf32>
    %375 = arith.negf %374 : vector<2x192xf32>
    %376 = math.exp %375 : vector<2x192xf32>
    %cst_117 = arith.constant 1.000000e+00 : f32
    %377 = vector.broadcast %cst_117 : f32 to vector<2x192xf32>
    %378 = arith.addf %377, %376 : vector<2x192xf32>
    %379 = arith.divf %377, %378 : vector<2x192xf32>
    %380 = vector.extract_strided_slice %379 {offsets = [0, 0], sizes = [2, 64], strides = [1, 1]} : vector<2x192xf32> to vector<2x64xf32>
    %381 = vector.extract_strided_slice %379 {offsets = [0, 64], sizes = [2, 64], strides = [1, 1]} : vector<2x192xf32> to vector<2x64xf32>
    %382 = vector.extract_strided_slice %379 {offsets = [0, 128], sizes = [2, 64], strides = [1, 1]} : vector<2x192xf32> to vector<2x64xf32>
    %383 = vector.extract_strided_slice %373 {offsets = [0, 192], sizes = [2, 64], strides = [1, 1]} : vector<2x256xf32> to vector<2x64xf32>
    %384 = math.tanh %383 : vector<2x64xf32>
    %385 = arith.mulf %381, %316 : vector<2x64xf32>
    %386 = arith.mulf %380, %384 : vector<2x64xf32>
    %387 = arith.addf %385, %386 : vector<2x64xf32>
    %388 = math.tanh %387 : vector<2x64xf32>
    %389 = arith.mulf %382, %388 : vector<2x64xf32>
    %390 = tpu.concatenate %389, %337 in 1 : vector<2x64xf32>, vector<2x64xf32> -> vector<2x128xf32>
    %cst_118 = arith.constant dense<0.000000e+00> : vector<2x256xf32>
    %391 = tpu.matmul %390, %32, %cst_118 {dimension_numbers = #tpu.dot_dimension_numbers<[1], [0], [0], [1], [0, 0, 1, 1], [], []>} : vector<2x128xf32>, vector<128x256xf32>, vector<2x256xf32> -> vector<2x256xf32>
    %392 = arith.addf %391, %40 : vector<2x256xf32>
    %393 = vector.extract_strided_slice %392 {offsets = [0, 0], sizes = [2, 192], strides = [1, 1]} : vector<2x256xf32> to vector<2x192xf32>
    %394 = arith.negf %393 : vector<2x192xf32>
    %395 = math.exp %394 : vector<2x192xf32>
    %cst_119 = arith.constant 1.000000e+00 : f32
    %396 = vector.broadcast %cst_119 : f32 to vector<2x192xf32>
    %397 = arith.addf %396, %395 : vector<2x192xf32>
    %398 = arith.divf %396, %397 : vector<2x192xf32>
    %399 = vector.extract_strided_slice %398 {offsets = [0, 0], sizes = [2, 64], strides = [1, 1]} : vector<2x192xf32> to vector<2x64xf32>
    %400 = vector.extract_strided_slice %398 {offsets = [0, 64], sizes = [2, 64], strides = [1, 1]} : vector<2x192xf32> to vector<2x64xf32>
    %401 = vector.extract_strided_slice %398 {offsets = [0, 128], sizes = [2, 64], strides = [1, 1]} : vector<2x192xf32> to vector<2x64xf32>
    %402 = vector.extract_strided_slice %392 {offsets = [0, 192], sizes = [2, 64], strides = [1, 1]} : vector<2x256xf32> to vector<2x64xf32>
    %403 = math.tanh %402 : vector<2x64xf32>
    %404 = arith.mulf %400, %335 : vector<2x64xf32>
    %405 = arith.mulf %399, %403 : vector<2x64xf32>
    %406 = arith.addf %404, %405 : vector<2x64xf32>
    %407 = math.tanh %406 : vector<2x64xf32>
    %408 = arith.mulf %401, %407 : vector<2x64xf32>
    %cst_120 = arith.constant dense<0.000000e+00> : vector<2x64xf32>
    %409 = tpu.matmul %408, %1, %cst_120 {dimension_numbers = #tpu.dot_dimension_numbers<[1], [0], [0], [1], [0, 0, 1, 1], [], []>} : vector<2x64xf32>, vector<64x64xf32>, vector<2x64xf32> -> vector<2x64xf32>
    %410 = arith.addf %409, %15 : vector<2x64xf32>
    %cst_121 = arith.constant 0.000000e+00 : f32
    %411 = vector.broadcast %cst_121 : f32 to vector<2x64xf32>
    %412 = arith.maximumf %410, %411 : vector<2x64xf32>
    %cst_122 = arith.constant dense<0.000000e+00> : vector<2x64xf32>
    %413 = tpu.matmul %412, %3, %cst_122 {dimension_numbers = #tpu.dot_dimension_numbers<[1], [0], [0], [1], [0, 0, 1, 1], [], []>} : vector<2x64xf32>, vector<64x64xf32>, vector<2x64xf32> -> vector<2x64xf32>
    %414 = arith.addf %413, %19 : vector<2x64xf32>
    %cst_123 = arith.constant 0.000000e+00 : f32
    %415 = vector.broadcast %cst_123 : f32 to vector<2x64xf32>
    %416 = arith.maximumf %414, %415 : vector<2x64xf32>
    %cst_124 = arith.constant dense<0.000000e+00> : vector<2x64xf32>
    %417 = tpu.matmul %416, %7, %cst_124 {dimension_numbers = #tpu.dot_dimension_numbers<[1], [0], [0], [1], [0, 0, 1, 1], [], []>} : vector<2x64xf32>, vector<64x64xf32>, vector<2x64xf32> -> vector<2x64xf32>
    %418 = vector.extract_strided_slice %55 {offsets = [8, 0], sizes = [2, 64], strides = [1, 1]} : vector<20x64xf32> to vector<2x64xf32>
    %419 = arith.addf %417, %418 : vector<2x64xf32>
    %cst_125 = arith.constant 0.000000e+00 : f32
    %420 = vector.broadcast %cst_125 : f32 to vector<2x64xf32>
    %421 = arith.maximumf %419, %420 : vector<2x64xf32>
    %422 = arith.addf %351, %421 : vector<2x64xf32>
    %423 = vector.extract_strided_slice %62 {offsets = [10, 0], sizes = [2, 256], strides = [1, 1]} : vector<20x256xf32> to vector<2x256xf32>
    %cst_126 = arith.constant dense<0.000000e+00> : vector<2x256xf32>
    %424 = tpu.matmul %370, %28, %cst_126 {dimension_numbers = #tpu.dot_dimension_numbers<[1], [0], [0], [1], [0, 0, 1, 1], [], []>} : vector<2x64xf32>, vector<64x256xf32>, vector<2x256xf32> -> vector<2x256xf32>
    %425 = arith.addf %423, %424 : vector<2x256xf32>
    %426 = vector.extract_strided_slice %425 {offsets = [0, 0], sizes = [2, 192], strides = [1, 1]} : vector<2x256xf32> to vector<2x192xf32>
    %427 = arith.negf %426 : vector<2x192xf32>
    %428 = math.exp %427 : vector<2x192xf32>
    %cst_127 = arith.constant 1.000000e+00 : f32
    %429 = vector.broadcast %cst_127 : f32 to vector<2x192xf32>
    %430 = arith.addf %429, %428 : vector<2x192xf32>
    %431 = arith.divf %429, %430 : vector<2x192xf32>
    %432 = vector.extract_strided_slice %431 {offsets = [0, 0], sizes = [2, 64], strides = [1, 1]} : vector<2x192xf32> to vector<2x64xf32>
    %433 = vector.extract_strided_slice %431 {offsets = [0, 64], sizes = [2, 64], strides = [1, 1]} : vector<2x192xf32> to vector<2x64xf32>
    %434 = vector.extract_strided_slice %431 {offsets = [0, 128], sizes = [2, 64], strides = [1, 1]} : vector<2x192xf32> to vector<2x64xf32>
    %435 = vector.extract_strided_slice %425 {offsets = [0, 192], sizes = [2, 64], strides = [1, 1]} : vector<2x256xf32> to vector<2x64xf32>
    %436 = math.tanh %435 : vector<2x64xf32>
    %437 = arith.mulf %433, %368 : vector<2x64xf32>
    %438 = arith.mulf %432, %436 : vector<2x64xf32>
    %439 = arith.addf %437, %438 : vector<2x64xf32>
    %440 = math.tanh %439 : vector<2x64xf32>
    %441 = arith.mulf %434, %440 : vector<2x64xf32>
    %442 = tpu.concatenate %441, %389 in 1 : vector<2x64xf32>, vector<2x64xf32> -> vector<2x128xf32>
    %cst_128 = arith.constant dense<0.000000e+00> : vector<2x256xf32>
    %443 = tpu.matmul %442, %30, %cst_128 {dimension_numbers = #tpu.dot_dimension_numbers<[1], [0], [0], [1], [0, 0, 1, 1], [], []>} : vector<2x128xf32>, vector<128x256xf32>, vector<2x256xf32> -> vector<2x256xf32>
    %444 = arith.addf %443, %36 : vector<2x256xf32>
    %445 = vector.extract_strided_slice %444 {offsets = [0, 0], sizes = [2, 192], strides = [1, 1]} : vector<2x256xf32> to vector<2x192xf32>
    %446 = arith.negf %445 : vector<2x192xf32>
    %447 = math.exp %446 : vector<2x192xf32>
    %cst_129 = arith.constant 1.000000e+00 : f32
    %448 = vector.broadcast %cst_129 : f32 to vector<2x192xf32>
    %449 = arith.addf %448, %447 : vector<2x192xf32>
    %450 = arith.divf %448, %449 : vector<2x192xf32>
    %451 = vector.extract_strided_slice %450 {offsets = [0, 0], sizes = [2, 64], strides = [1, 1]} : vector<2x192xf32> to vector<2x64xf32>
    %452 = vector.extract_strided_slice %450 {offsets = [0, 64], sizes = [2, 64], strides = [1, 1]} : vector<2x192xf32> to vector<2x64xf32>
    %453 = vector.extract_strided_slice %450 {offsets = [0, 128], sizes = [2, 64], strides = [1, 1]} : vector<2x192xf32> to vector<2x64xf32>
    %454 = vector.extract_strided_slice %444 {offsets = [0, 192], sizes = [2, 64], strides = [1, 1]} : vector<2x256xf32> to vector<2x64xf32>
    %455 = math.tanh %454 : vector<2x64xf32>
    %456 = arith.mulf %452, %387 : vector<2x64xf32>
    %457 = arith.mulf %451, %455 : vector<2x64xf32>
    %458 = arith.addf %456, %457 : vector<2x64xf32>
    %459 = math.tanh %458 : vector<2x64xf32>
    %460 = arith.mulf %453, %459 : vector<2x64xf32>
    %461 = tpu.concatenate %460, %408 in 1 : vector<2x64xf32>, vector<2x64xf32> -> vector<2x128xf32>
    %cst_130 = arith.constant dense<0.000000e+00> : vector<2x256xf32>
    %462 = tpu.matmul %461, %32, %cst_130 {dimension_numbers = #tpu.dot_dimension_numbers<[1], [0], [0], [1], [0, 0, 1, 1], [], []>} : vector<2x128xf32>, vector<128x256xf32>, vector<2x256xf32> -> vector<2x256xf32>
    %463 = arith.addf %462, %40 : vector<2x256xf32>
    %464 = vector.extract_strided_slice %463 {offsets = [0, 0], sizes = [2, 192], strides = [1, 1]} : vector<2x256xf32> to vector<2x192xf32>
    %465 = arith.negf %464 : vector<2x192xf32>
    %466 = math.exp %465 : vector<2x192xf32>
    %cst_131 = arith.constant 1.000000e+00 : f32
    %467 = vector.broadcast %cst_131 : f32 to vector<2x192xf32>
    %468 = arith.addf %467, %466 : vector<2x192xf32>
    %469 = arith.divf %467, %468 : vector<2x192xf32>
    %470 = vector.extract_strided_slice %469 {offsets = [0, 0], sizes = [2, 64], strides = [1, 1]} : vector<2x192xf32> to vector<2x64xf32>
    %471 = vector.extract_strided_slice %469 {offsets = [0, 64], sizes = [2, 64], strides = [1, 1]} : vector<2x192xf32> to vector<2x64xf32>
    %472 = vector.extract_strided_slice %469 {offsets = [0, 128], sizes = [2, 64], strides = [1, 1]} : vector<2x192xf32> to vector<2x64xf32>
    %473 = vector.extract_strided_slice %463 {offsets = [0, 192], sizes = [2, 64], strides = [1, 1]} : vector<2x256xf32> to vector<2x64xf32>
    %474 = math.tanh %473 : vector<2x64xf32>
    %475 = arith.mulf %471, %406 : vector<2x64xf32>
    %476 = arith.mulf %470, %474 : vector<2x64xf32>
    %477 = arith.addf %475, %476 : vector<2x64xf32>
    %478 = math.tanh %477 : vector<2x64xf32>
    %479 = arith.mulf %472, %478 : vector<2x64xf32>
    %cst_132 = arith.constant dense<0.000000e+00> : vector<2x64xf32>
    %480 = tpu.matmul %479, %1, %cst_132 {dimension_numbers = #tpu.dot_dimension_numbers<[1], [0], [0], [1], [0, 0, 1, 1], [], []>} : vector<2x64xf32>, vector<64x64xf32>, vector<2x64xf32> -> vector<2x64xf32>
    %481 = arith.addf %480, %15 : vector<2x64xf32>
    %cst_133 = arith.constant 0.000000e+00 : f32
    %482 = vector.broadcast %cst_133 : f32 to vector<2x64xf32>
    %483 = arith.maximumf %481, %482 : vector<2x64xf32>
    %cst_134 = arith.constant dense<0.000000e+00> : vector<2x64xf32>
    %484 = tpu.matmul %483, %3, %cst_134 {dimension_numbers = #tpu.dot_dimension_numbers<[1], [0], [0], [1], [0, 0, 1, 1], [], []>} : vector<2x64xf32>, vector<64x64xf32>, vector<2x64xf32> -> vector<2x64xf32>
    %485 = arith.addf %484, %19 : vector<2x64xf32>
    %cst_135 = arith.constant 0.000000e+00 : f32
    %486 = vector.broadcast %cst_135 : f32 to vector<2x64xf32>
    %487 = arith.maximumf %485, %486 : vector<2x64xf32>
    %cst_136 = arith.constant dense<0.000000e+00> : vector<2x64xf32>
    %488 = tpu.matmul %487, %7, %cst_136 {dimension_numbers = #tpu.dot_dimension_numbers<[1], [0], [0], [1], [0, 0, 1, 1], [], []>} : vector<2x64xf32>, vector<64x64xf32>, vector<2x64xf32> -> vector<2x64xf32>
    %489 = vector.extract_strided_slice %55 {offsets = [10, 0], sizes = [2, 64], strides = [1, 1]} : vector<20x64xf32> to vector<2x64xf32>
    %490 = arith.addf %488, %489 : vector<2x64xf32>
    %cst_137 = arith.constant 0.000000e+00 : f32
    %491 = vector.broadcast %cst_137 : f32 to vector<2x64xf32>
    %492 = arith.maximumf %490, %491 : vector<2x64xf32>
    %493 = arith.addf %422, %492 : vector<2x64xf32>
    %494 = vector.extract_strided_slice %62 {offsets = [12, 0], sizes = [2, 256], strides = [1, 1]} : vector<20x256xf32> to vector<2x256xf32>
    %cst_138 = arith.constant dense<0.000000e+00> : vector<2x256xf32>
    %495 = tpu.matmul %441, %28, %cst_138 {dimension_numbers = #tpu.dot_dimension_numbers<[1], [0], [0], [1], [0, 0, 1, 1], [], []>} : vector<2x64xf32>, vector<64x256xf32>, vector<2x256xf32> -> vector<2x256xf32>
    %496 = arith.addf %494, %495 : vector<2x256xf32>
    %497 = vector.extract_strided_slice %496 {offsets = [0, 0], sizes = [2, 192], strides = [1, 1]} : vector<2x256xf32> to vector<2x192xf32>
    %498 = arith.negf %497 : vector<2x192xf32>
    %499 = math.exp %498 : vector<2x192xf32>
    %cst_139 = arith.constant 1.000000e+00 : f32
    %500 = vector.broadcast %cst_139 : f32 to vector<2x192xf32>
    %501 = arith.addf %500, %499 : vector<2x192xf32>
    %502 = arith.divf %500, %501 : vector<2x192xf32>
    %503 = vector.extract_strided_slice %502 {offsets = [0, 0], sizes = [2, 64], strides = [1, 1]} : vector<2x192xf32> to vector<2x64xf32>
    %504 = vector.extract_strided_slice %502 {offsets = [0, 64], sizes = [2, 64], strides = [1, 1]} : vector<2x192xf32> to vector<2x64xf32>
    %505 = vector.extract_strided_slice %502 {offsets = [0, 128], sizes = [2, 64], strides = [1, 1]} : vector<2x192xf32> to vector<2x64xf32>
    %506 = vector.extract_strided_slice %496 {offsets = [0, 192], sizes = [2, 64], strides = [1, 1]} : vector<2x256xf32> to vector<2x64xf32>
    %507 = math.tanh %506 : vector<2x64xf32>
    %508 = arith.mulf %504, %439 : vector<2x64xf32>
    %509 = arith.mulf %503, %507 : vector<2x64xf32>
    %510 = arith.addf %508, %509 : vector<2x64xf32>
    %511 = math.tanh %510 : vector<2x64xf32>
    %512 = arith.mulf %505, %511 : vector<2x64xf32>
    %513 = tpu.concatenate %512, %460 in 1 : vector<2x64xf32>, vector<2x64xf32> -> vector<2x128xf32>
    %cst_140 = arith.constant dense<0.000000e+00> : vector<2x256xf32>
    %514 = tpu.matmul %513, %30, %cst_140 {dimension_numbers = #tpu.dot_dimension_numbers<[1], [0], [0], [1], [0, 0, 1, 1], [], []>} : vector<2x128xf32>, vector<128x256xf32>, vector<2x256xf32> -> vector<2x256xf32>
    %515 = arith.addf %514, %36 : vector<2x256xf32>
    %516 = vector.extract_strided_slice %515 {offsets = [0, 0], sizes = [2, 192], strides = [1, 1]} : vector<2x256xf32> to vector<2x192xf32>
    %517 = arith.negf %516 : vector<2x192xf32>
    %518 = math.exp %517 : vector<2x192xf32>
    %cst_141 = arith.constant 1.000000e+00 : f32
    %519 = vector.broadcast %cst_141 : f32 to vector<2x192xf32>
    %520 = arith.addf %519, %518 : vector<2x192xf32>
    %521 = arith.divf %519, %520 : vector<2x192xf32>
    %522 = vector.extract_strided_slice %521 {offsets = [0, 0], sizes = [2, 64], strides = [1, 1]} : vector<2x192xf32> to vector<2x64xf32>
    %523 = vector.extract_strided_slice %521 {offsets = [0, 64], sizes = [2, 64], strides = [1, 1]} : vector<2x192xf32> to vector<2x64xf32>
    %524 = vector.extract_strided_slice %521 {offsets = [0, 128], sizes = [2, 64], strides = [1, 1]} : vector<2x192xf32> to vector<2x64xf32>
    %525 = vector.extract_strided_slice %515 {offsets = [0, 192], sizes = [2, 64], strides = [1, 1]} : vector<2x256xf32> to vector<2x64xf32>
    %526 = math.tanh %525 : vector<2x64xf32>
    %527 = arith.mulf %523, %458 : vector<2x64xf32>
    %528 = arith.mulf %522, %526 : vector<2x64xf32>
    %529 = arith.addf %527, %528 : vector<2x64xf32>
    %530 = math.tanh %529 : vector<2x64xf32>
    %531 = arith.mulf %524, %530 : vector<2x64xf32>
    %532 = tpu.concatenate %531, %479 in 1 : vector<2x64xf32>, vector<2x64xf32> -> vector<2x128xf32>
    %cst_142 = arith.constant dense<0.000000e+00> : vector<2x256xf32>
    %533 = tpu.matmul %532, %32, %cst_142 {dimension_numbers = #tpu.dot_dimension_numbers<[1], [0], [0], [1], [0, 0, 1, 1], [], []>} : vector<2x128xf32>, vector<128x256xf32>, vector<2x256xf32> -> vector<2x256xf32>
    %534 = arith.addf %533, %40 : vector<2x256xf32>
    %535 = vector.extract_strided_slice %534 {offsets = [0, 0], sizes = [2, 192], strides = [1, 1]} : vector<2x256xf32> to vector<2x192xf32>
    %536 = arith.negf %535 : vector<2x192xf32>
    %537 = math.exp %536 : vector<2x192xf32>
    %cst_143 = arith.constant 1.000000e+00 : f32
    %538 = vector.broadcast %cst_143 : f32 to vector<2x192xf32>
    %539 = arith.addf %538, %537 : vector<2x192xf32>
    %540 = arith.divf %538, %539 : vector<2x192xf32>
    %541 = vector.extract_strided_slice %540 {offsets = [0, 0], sizes = [2, 64], strides = [1, 1]} : vector<2x192xf32> to vector<2x64xf32>
    %542 = vector.extract_strided_slice %540 {offsets = [0, 64], sizes = [2, 64], strides = [1, 1]} : vector<2x192xf32> to vector<2x64xf32>
    %543 = vector.extract_strided_slice %540 {offsets = [0, 128], sizes = [2, 64], strides = [1, 1]} : vector<2x192xf32> to vector<2x64xf32>
    %544 = vector.extract_strided_slice %534 {offsets = [0, 192], sizes = [2, 64], strides = [1, 1]} : vector<2x256xf32> to vector<2x64xf32>
    %545 = math.tanh %544 : vector<2x64xf32>
    %546 = arith.mulf %542, %477 : vector<2x64xf32>
    %547 = arith.mulf %541, %545 : vector<2x64xf32>
    %548 = arith.addf %546, %547 : vector<2x64xf32>
    %549 = math.tanh %548 : vector<2x64xf32>
    %550 = arith.mulf %543, %549 : vector<2x64xf32>
    %cst_144 = arith.constant dense<0.000000e+00> : vector<2x64xf32>
    %551 = tpu.matmul %550, %1, %cst_144 {dimension_numbers = #tpu.dot_dimension_numbers<[1], [0], [0], [1], [0, 0, 1, 1], [], []>} : vector<2x64xf32>, vector<64x64xf32>, vector<2x64xf32> -> vector<2x64xf32>
    %552 = arith.addf %551, %15 : vector<2x64xf32>
    %cst_145 = arith.constant 0.000000e+00 : f32
    %553 = vector.broadcast %cst_145 : f32 to vector<2x64xf32>
    %554 = arith.maximumf %552, %553 : vector<2x64xf32>
    %cst_146 = arith.constant dense<0.000000e+00> : vector<2x64xf32>
    %555 = tpu.matmul %554, %3, %cst_146 {dimension_numbers = #tpu.dot_dimension_numbers<[1], [0], [0], [1], [0, 0, 1, 1], [], []>} : vector<2x64xf32>, vector<64x64xf32>, vector<2x64xf32> -> vector<2x64xf32>
    %556 = arith.addf %555, %19 : vector<2x64xf32>
    %cst_147 = arith.constant 0.000000e+00 : f32
    %557 = vector.broadcast %cst_147 : f32 to vector<2x64xf32>
    %558 = arith.maximumf %556, %557 : vector<2x64xf32>
    %cst_148 = arith.constant dense<0.000000e+00> : vector<2x64xf32>
    %559 = tpu.matmul %558, %7, %cst_148 {dimension_numbers = #tpu.dot_dimension_numbers<[1], [0], [0], [1], [0, 0, 1, 1], [], []>} : vector<2x64xf32>, vector<64x64xf32>, vector<2x64xf32> -> vector<2x64xf32>
    %560 = vector.extract_strided_slice %55 {offsets = [12, 0], sizes = [2, 64], strides = [1, 1]} : vector<20x64xf32> to vector<2x64xf32>
    %561 = arith.addf %559, %560 : vector<2x64xf32>
    %cst_149 = arith.constant 0.000000e+00 : f32
    %562 = vector.broadcast %cst_149 : f32 to vector<2x64xf32>
    %563 = arith.maximumf %561, %562 : vector<2x64xf32>
    %564 = arith.addf %493, %563 : vector<2x64xf32>
    %565 = vector.extract_strided_slice %62 {offsets = [14, 0], sizes = [2, 256], strides = [1, 1]} : vector<20x256xf32> to vector<2x256xf32>
    %cst_150 = arith.constant dense<0.000000e+00> : vector<2x256xf32>
    %566 = tpu.matmul %512, %28, %cst_150 {dimension_numbers = #tpu.dot_dimension_numbers<[1], [0], [0], [1], [0, 0, 1, 1], [], []>} : vector<2x64xf32>, vector<64x256xf32>, vector<2x256xf32> -> vector<2x256xf32>
    %567 = arith.addf %565, %566 : vector<2x256xf32>
    %568 = vector.extract_strided_slice %567 {offsets = [0, 0], sizes = [2, 192], strides = [1, 1]} : vector<2x256xf32> to vector<2x192xf32>
    %569 = arith.negf %568 : vector<2x192xf32>
    %570 = math.exp %569 : vector<2x192xf32>
    %cst_151 = arith.constant 1.000000e+00 : f32
    %571 = vector.broadcast %cst_151 : f32 to vector<2x192xf32>
    %572 = arith.addf %571, %570 : vector<2x192xf32>
    %573 = arith.divf %571, %572 : vector<2x192xf32>
    %574 = vector.extract_strided_slice %573 {offsets = [0, 0], sizes = [2, 64], strides = [1, 1]} : vector<2x192xf32> to vector<2x64xf32>
    %575 = vector.extract_strided_slice %573 {offsets = [0, 64], sizes = [2, 64], strides = [1, 1]} : vector<2x192xf32> to vector<2x64xf32>
    %576 = vector.extract_strided_slice %573 {offsets = [0, 128], sizes = [2, 64], strides = [1, 1]} : vector<2x192xf32> to vector<2x64xf32>
    %577 = vector.extract_strided_slice %567 {offsets = [0, 192], sizes = [2, 64], strides = [1, 1]} : vector<2x256xf32> to vector<2x64xf32>
    %578 = math.tanh %577 : vector<2x64xf32>
    %579 = arith.mulf %575, %510 : vector<2x64xf32>
    %580 = arith.mulf %574, %578 : vector<2x64xf32>
    %581 = arith.addf %579, %580 : vector<2x64xf32>
    %582 = math.tanh %581 : vector<2x64xf32>
    %583 = arith.mulf %576, %582 : vector<2x64xf32>
    %584 = tpu.concatenate %583, %531 in 1 : vector<2x64xf32>, vector<2x64xf32> -> vector<2x128xf32>
    %cst_152 = arith.constant dense<0.000000e+00> : vector<2x256xf32>
    %585 = tpu.matmul %584, %30, %cst_152 {dimension_numbers = #tpu.dot_dimension_numbers<[1], [0], [0], [1], [0, 0, 1, 1], [], []>} : vector<2x128xf32>, vector<128x256xf32>, vector<2x256xf32> -> vector<2x256xf32>
    %586 = arith.addf %585, %36 : vector<2x256xf32>
    %587 = vector.extract_strided_slice %586 {offsets = [0, 0], sizes = [2, 192], strides = [1, 1]} : vector<2x256xf32> to vector<2x192xf32>
    %588 = arith.negf %587 : vector<2x192xf32>
    %589 = math.exp %588 : vector<2x192xf32>
    %cst_153 = arith.constant 1.000000e+00 : f32
    %590 = vector.broadcast %cst_153 : f32 to vector<2x192xf32>
    %591 = arith.addf %590, %589 : vector<2x192xf32>
    %592 = arith.divf %590, %591 : vector<2x192xf32>
    %593 = vector.extract_strided_slice %592 {offsets = [0, 0], sizes = [2, 64], strides = [1, 1]} : vector<2x192xf32> to vector<2x64xf32>
    %594 = vector.extract_strided_slice %592 {offsets = [0, 64], sizes = [2, 64], strides = [1, 1]} : vector<2x192xf32> to vector<2x64xf32>
    %595 = vector.extract_strided_slice %592 {offsets = [0, 128], sizes = [2, 64], strides = [1, 1]} : vector<2x192xf32> to vector<2x64xf32>
    %596 = vector.extract_strided_slice %586 {offsets = [0, 192], sizes = [2, 64], strides = [1, 1]} : vector<2x256xf32> to vector<2x64xf32>
    %597 = math.tanh %596 : vector<2x64xf32>
    %598 = arith.mulf %594, %529 : vector<2x64xf32>
    %599 = arith.mulf %593, %597 : vector<2x64xf32>
    %600 = arith.addf %598, %599 : vector<2x64xf32>
    %601 = math.tanh %600 : vector<2x64xf32>
    %602 = arith.mulf %595, %601 : vector<2x64xf32>
    %603 = tpu.concatenate %602, %550 in 1 : vector<2x64xf32>, vector<2x64xf32> -> vector<2x128xf32>
    %cst_154 = arith.constant dense<0.000000e+00> : vector<2x256xf32>
    %604 = tpu.matmul %603, %32, %cst_154 {dimension_numbers = #tpu.dot_dimension_numbers<[1], [0], [0], [1], [0, 0, 1, 1], [], []>} : vector<2x128xf32>, vector<128x256xf32>, vector<2x256xf32> -> vector<2x256xf32>
    %605 = arith.addf %604, %40 : vector<2x256xf32>
    %606 = vector.extract_strided_slice %605 {offsets = [0, 0], sizes = [2, 192], strides = [1, 1]} : vector<2x256xf32> to vector<2x192xf32>
    %607 = arith.negf %606 : vector<2x192xf32>
    %608 = math.exp %607 : vector<2x192xf32>
    %cst_155 = arith.constant 1.000000e+00 : f32
    %609 = vector.broadcast %cst_155 : f32 to vector<2x192xf32>
    %610 = arith.addf %609, %608 : vector<2x192xf32>
    %611 = arith.divf %609, %610 : vector<2x192xf32>
    %612 = vector.extract_strided_slice %611 {offsets = [0, 0], sizes = [2, 64], strides = [1, 1]} : vector<2x192xf32> to vector<2x64xf32>
    %613 = vector.extract_strided_slice %611 {offsets = [0, 64], sizes = [2, 64], strides = [1, 1]} : vector<2x192xf32> to vector<2x64xf32>
    %614 = vector.extract_strided_slice %611 {offsets = [0, 128], sizes = [2, 64], strides = [1, 1]} : vector<2x192xf32> to vector<2x64xf32>
    %615 = vector.extract_strided_slice %605 {offsets = [0, 192], sizes = [2, 64], strides = [1, 1]} : vector<2x256xf32> to vector<2x64xf32>
    %616 = math.tanh %615 : vector<2x64xf32>
    %617 = arith.mulf %613, %548 : vector<2x64xf32>
    %618 = arith.mulf %612, %616 : vector<2x64xf32>
    %619 = arith.addf %617, %618 : vector<2x64xf32>
    %620 = math.tanh %619 : vector<2x64xf32>
    %621 = arith.mulf %614, %620 : vector<2x64xf32>
    %cst_156 = arith.constant dense<0.000000e+00> : vector<2x64xf32>
    %622 = tpu.matmul %621, %1, %cst_156 {dimension_numbers = #tpu.dot_dimension_numbers<[1], [0], [0], [1], [0, 0, 1, 1], [], []>} : vector<2x64xf32>, vector<64x64xf32>, vector<2x64xf32> -> vector<2x64xf32>
    %623 = arith.addf %622, %15 : vector<2x64xf32>
    %cst_157 = arith.constant 0.000000e+00 : f32
    %624 = vector.broadcast %cst_157 : f32 to vector<2x64xf32>
    %625 = arith.maximumf %623, %624 : vector<2x64xf32>
    %cst_158 = arith.constant dense<0.000000e+00> : vector<2x64xf32>
    %626 = tpu.matmul %625, %3, %cst_158 {dimension_numbers = #tpu.dot_dimension_numbers<[1], [0], [0], [1], [0, 0, 1, 1], [], []>} : vector<2x64xf32>, vector<64x64xf32>, vector<2x64xf32> -> vector<2x64xf32>
    %627 = arith.addf %626, %19 : vector<2x64xf32>
    %cst_159 = arith.constant 0.000000e+00 : f32
    %628 = vector.broadcast %cst_159 : f32 to vector<2x64xf32>
    %629 = arith.maximumf %627, %628 : vector<2x64xf32>
    %cst_160 = arith.constant dense<0.000000e+00> : vector<2x64xf32>
    %630 = tpu.matmul %629, %7, %cst_160 {dimension_numbers = #tpu.dot_dimension_numbers<[1], [0], [0], [1], [0, 0, 1, 1], [], []>} : vector<2x64xf32>, vector<64x64xf32>, vector<2x64xf32> -> vector<2x64xf32>
    %631 = vector.extract_strided_slice %55 {offsets = [14, 0], sizes = [2, 64], strides = [1, 1]} : vector<20x64xf32> to vector<2x64xf32>
    %632 = arith.addf %630, %631 : vector<2x64xf32>
    %cst_161 = arith.constant 0.000000e+00 : f32
    %633 = vector.broadcast %cst_161 : f32 to vector<2x64xf32>
    %634 = arith.maximumf %632, %633 : vector<2x64xf32>
    %635 = arith.addf %564, %634 : vector<2x64xf32>
    %636 = vector.extract_strided_slice %62 {offsets = [16, 0], sizes = [2, 256], strides = [1, 1]} : vector<20x256xf32> to vector<2x256xf32>
    %cst_162 = arith.constant dense<0.000000e+00> : vector<2x256xf32>
    %637 = tpu.matmul %583, %28, %cst_162 {dimension_numbers = #tpu.dot_dimension_numbers<[1], [0], [0], [1], [0, 0, 1, 1], [], []>} : vector<2x64xf32>, vector<64x256xf32>, vector<2x256xf32> -> vector<2x256xf32>
    %638 = arith.addf %636, %637 : vector<2x256xf32>
    %639 = vector.extract_strided_slice %638 {offsets = [0, 0], sizes = [2, 192], strides = [1, 1]} : vector<2x256xf32> to vector<2x192xf32>
    %640 = arith.negf %639 : vector<2x192xf32>
    %641 = math.exp %640 : vector<2x192xf32>
    %cst_163 = arith.constant 1.000000e+00 : f32
    %642 = vector.broadcast %cst_163 : f32 to vector<2x192xf32>
    %643 = arith.addf %642, %641 : vector<2x192xf32>
    %644 = arith.divf %642, %643 : vector<2x192xf32>
    %645 = vector.extract_strided_slice %644 {offsets = [0, 0], sizes = [2, 64], strides = [1, 1]} : vector<2x192xf32> to vector<2x64xf32>
    %646 = vector.extract_strided_slice %644 {offsets = [0, 64], sizes = [2, 64], strides = [1, 1]} : vector<2x192xf32> to vector<2x64xf32>
    %647 = vector.extract_strided_slice %644 {offsets = [0, 128], sizes = [2, 64], strides = [1, 1]} : vector<2x192xf32> to vector<2x64xf32>
    %648 = vector.extract_strided_slice %638 {offsets = [0, 192], sizes = [2, 64], strides = [1, 1]} : vector<2x256xf32> to vector<2x64xf32>
    %649 = math.tanh %648 : vector<2x64xf32>
    %650 = arith.mulf %646, %581 : vector<2x64xf32>
    %651 = arith.mulf %645, %649 : vector<2x64xf32>
    %652 = arith.addf %650, %651 : vector<2x64xf32>
    %653 = math.tanh %652 : vector<2x64xf32>
    %654 = arith.mulf %647, %653 : vector<2x64xf32>
    %655 = tpu.concatenate %654, %602 in 1 : vector<2x64xf32>, vector<2x64xf32> -> vector<2x128xf32>
    %cst_164 = arith.constant dense<0.000000e+00> : vector<2x256xf32>
    %656 = tpu.matmul %655, %30, %cst_164 {dimension_numbers = #tpu.dot_dimension_numbers<[1], [0], [0], [1], [0, 0, 1, 1], [], []>} : vector<2x128xf32>, vector<128x256xf32>, vector<2x256xf32> -> vector<2x256xf32>
    %657 = arith.addf %656, %36 : vector<2x256xf32>
    %658 = vector.extract_strided_slice %657 {offsets = [0, 0], sizes = [2, 192], strides = [1, 1]} : vector<2x256xf32> to vector<2x192xf32>
    %659 = arith.negf %658 : vector<2x192xf32>
    %660 = math.exp %659 : vector<2x192xf32>
    %cst_165 = arith.constant 1.000000e+00 : f32
    %661 = vector.broadcast %cst_165 : f32 to vector<2x192xf32>
    %662 = arith.addf %661, %660 : vector<2x192xf32>
    %663 = arith.divf %661, %662 : vector<2x192xf32>
    %664 = vector.extract_strided_slice %663 {offsets = [0, 0], sizes = [2, 64], strides = [1, 1]} : vector<2x192xf32> to vector<2x64xf32>
    %665 = vector.extract_strided_slice %663 {offsets = [0, 64], sizes = [2, 64], strides = [1, 1]} : vector<2x192xf32> to vector<2x64xf32>
    %666 = vector.extract_strided_slice %663 {offsets = [0, 128], sizes = [2, 64], strides = [1, 1]} : vector<2x192xf32> to vector<2x64xf32>
    %667 = vector.extract_strided_slice %657 {offsets = [0, 192], sizes = [2, 64], strides = [1, 1]} : vector<2x256xf32> to vector<2x64xf32>
    %668 = math.tanh %667 : vector<2x64xf32>
    %669 = arith.mulf %665, %600 : vector<2x64xf32>
    %670 = arith.mulf %664, %668 : vector<2x64xf32>
    %671 = arith.addf %669, %670 : vector<2x64xf32>
    %672 = math.tanh %671 : vector<2x64xf32>
    %673 = arith.mulf %666, %672 : vector<2x64xf32>
    %674 = tpu.concatenate %673, %621 in 1 : vector<2x64xf32>, vector<2x64xf32> -> vector<2x128xf32>
    %cst_166 = arith.constant dense<0.000000e+00> : vector<2x256xf32>
    %675 = tpu.matmul %674, %32, %cst_166 {dimension_numbers = #tpu.dot_dimension_numbers<[1], [0], [0], [1], [0, 0, 1, 1], [], []>} : vector<2x128xf32>, vector<128x256xf32>, vector<2x256xf32> -> vector<2x256xf32>
    %676 = arith.addf %675, %40 : vector<2x256xf32>
    %677 = vector.extract_strided_slice %676 {offsets = [0, 0], sizes = [2, 192], strides = [1, 1]} : vector<2x256xf32> to vector<2x192xf32>
    %678 = arith.negf %677 : vector<2x192xf32>
    %679 = math.exp %678 : vector<2x192xf32>
    %cst_167 = arith.constant 1.000000e+00 : f32
    %680 = vector.broadcast %cst_167 : f32 to vector<2x192xf32>
    %681 = arith.addf %680, %679 : vector<2x192xf32>
    %682 = arith.divf %680, %681 : vector<2x192xf32>
    %683 = vector.extract_strided_slice %682 {offsets = [0, 0], sizes = [2, 64], strides = [1, 1]} : vector<2x192xf32> to vector<2x64xf32>
    %684 = vector.extract_strided_slice %682 {offsets = [0, 64], sizes = [2, 64], strides = [1, 1]} : vector<2x192xf32> to vector<2x64xf32>
    %685 = vector.extract_strided_slice %682 {offsets = [0, 128], sizes = [2, 64], strides = [1, 1]} : vector<2x192xf32> to vector<2x64xf32>
    %686 = vector.extract_strided_slice %676 {offsets = [0, 192], sizes = [2, 64], strides = [1, 1]} : vector<2x256xf32> to vector<2x64xf32>
    %687 = math.tanh %686 : vector<2x64xf32>
    %688 = arith.mulf %684, %619 : vector<2x64xf32>
    %689 = arith.mulf %683, %687 : vector<2x64xf32>
    %690 = arith.addf %688, %689 : vector<2x64xf32>
    %691 = math.tanh %690 : vector<2x64xf32>
    %692 = arith.mulf %685, %691 : vector<2x64xf32>
    %cst_168 = arith.constant dense<0.000000e+00> : vector<2x64xf32>
    %693 = tpu.matmul %692, %1, %cst_168 {dimension_numbers = #tpu.dot_dimension_numbers<[1], [0], [0], [1], [0, 0, 1, 1], [], []>} : vector<2x64xf32>, vector<64x64xf32>, vector<2x64xf32> -> vector<2x64xf32>
    %694 = arith.addf %693, %15 : vector<2x64xf32>
    %cst_169 = arith.constant 0.000000e+00 : f32
    %695 = vector.broadcast %cst_169 : f32 to vector<2x64xf32>
    %696 = arith.maximumf %694, %695 : vector<2x64xf32>
    %cst_170 = arith.constant dense<0.000000e+00> : vector<2x64xf32>
    %697 = tpu.matmul %696, %3, %cst_170 {dimension_numbers = #tpu.dot_dimension_numbers<[1], [0], [0], [1], [0, 0, 1, 1], [], []>} : vector<2x64xf32>, vector<64x64xf32>, vector<2x64xf32> -> vector<2x64xf32>
    %698 = arith.addf %697, %19 : vector<2x64xf32>
    %cst_171 = arith.constant 0.000000e+00 : f32
    %699 = vector.broadcast %cst_171 : f32 to vector<2x64xf32>
    %700 = arith.maximumf %698, %699 : vector<2x64xf32>
    %cst_172 = arith.constant dense<0.000000e+00> : vector<2x64xf32>
    %701 = tpu.matmul %700, %7, %cst_172 {dimension_numbers = #tpu.dot_dimension_numbers<[1], [0], [0], [1], [0, 0, 1, 1], [], []>} : vector<2x64xf32>, vector<64x64xf32>, vector<2x64xf32> -> vector<2x64xf32>
    %702 = vector.extract_strided_slice %55 {offsets = [16, 0], sizes = [2, 64], strides = [1, 1]} : vector<20x64xf32> to vector<2x64xf32>
    %703 = arith.addf %701, %702 : vector<2x64xf32>
    %cst_173 = arith.constant 0.000000e+00 : f32
    %704 = vector.broadcast %cst_173 : f32 to vector<2x64xf32>
    %705 = arith.maximumf %703, %704 : vector<2x64xf32>
    %706 = arith.addf %635, %705 : vector<2x64xf32>
    %707 = vector.extract_strided_slice %62 {offsets = [18, 0], sizes = [2, 256], strides = [1, 1]} : vector<20x256xf32> to vector<2x256xf32>
    %cst_174 = arith.constant dense<0.000000e+00> : vector<2x256xf32>
    %708 = tpu.matmul %654, %28, %cst_174 {dimension_numbers = #tpu.dot_dimension_numbers<[1], [0], [0], [1], [0, 0, 1, 1], [], []>} : vector<2x64xf32>, vector<64x256xf32>, vector<2x256xf32> -> vector<2x256xf32>
    %709 = arith.addf %707, %708 : vector<2x256xf32>
    %710 = vector.extract_strided_slice %709 {offsets = [0, 0], sizes = [2, 192], strides = [1, 1]} : vector<2x256xf32> to vector<2x192xf32>
    %711 = arith.negf %710 : vector<2x192xf32>
    %712 = math.exp %711 : vector<2x192xf32>
    %cst_175 = arith.constant 1.000000e+00 : f32
    %713 = vector.broadcast %cst_175 : f32 to vector<2x192xf32>
    %714 = arith.addf %713, %712 : vector<2x192xf32>
    %715 = arith.divf %713, %714 : vector<2x192xf32>
    %716 = vector.extract_strided_slice %715 {offsets = [0, 0], sizes = [2, 64], strides = [1, 1]} : vector<2x192xf32> to vector<2x64xf32>
    %717 = vector.extract_strided_slice %715 {offsets = [0, 64], sizes = [2, 64], strides = [1, 1]} : vector<2x192xf32> to vector<2x64xf32>
    %718 = vector.extract_strided_slice %715 {offsets = [0, 128], sizes = [2, 64], strides = [1, 1]} : vector<2x192xf32> to vector<2x64xf32>
    %719 = vector.extract_strided_slice %709 {offsets = [0, 192], sizes = [2, 64], strides = [1, 1]} : vector<2x256xf32> to vector<2x64xf32>
    %720 = math.tanh %719 : vector<2x64xf32>
    %721 = arith.mulf %717, %652 : vector<2x64xf32>
    %722 = arith.mulf %716, %720 : vector<2x64xf32>
    %723 = arith.addf %721, %722 : vector<2x64xf32>
    %724 = math.tanh %723 : vector<2x64xf32>
    %725 = arith.mulf %718, %724 : vector<2x64xf32>
    %726 = tpu.concatenate %725, %673 in 1 : vector<2x64xf32>, vector<2x64xf32> -> vector<2x128xf32>
    %cst_176 = arith.constant dense<0.000000e+00> : vector<2x256xf32>
    %727 = tpu.matmul %726, %30, %cst_176 {dimension_numbers = #tpu.dot_dimension_numbers<[1], [0], [0], [1], [0, 0, 1, 1], [], []>} : vector<2x128xf32>, vector<128x256xf32>, vector<2x256xf32> -> vector<2x256xf32>
    %728 = arith.addf %727, %36 : vector<2x256xf32>
    %729 = vector.extract_strided_slice %728 {offsets = [0, 0], sizes = [2, 192], strides = [1, 1]} : vector<2x256xf32> to vector<2x192xf32>
    %730 = arith.negf %729 : vector<2x192xf32>
    %731 = math.exp %730 : vector<2x192xf32>
    %cst_177 = arith.constant 1.000000e+00 : f32
    %732 = vector.broadcast %cst_177 : f32 to vector<2x192xf32>
    %733 = arith.addf %732, %731 : vector<2x192xf32>
    %734 = arith.divf %732, %733 : vector<2x192xf32>
    %735 = vector.extract_strided_slice %734 {offsets = [0, 0], sizes = [2, 64], strides = [1, 1]} : vector<2x192xf32> to vector<2x64xf32>
    %736 = vector.extract_strided_slice %734 {offsets = [0, 64], sizes = [2, 64], strides = [1, 1]} : vector<2x192xf32> to vector<2x64xf32>
    %737 = vector.extract_strided_slice %734 {offsets = [0, 128], sizes = [2, 64], strides = [1, 1]} : vector<2x192xf32> to vector<2x64xf32>
    %738 = vector.extract_strided_slice %728 {offsets = [0, 192], sizes = [2, 64], strides = [1, 1]} : vector<2x256xf32> to vector<2x64xf32>
    %739 = math.tanh %738 : vector<2x64xf32>
    %740 = arith.mulf %736, %671 : vector<2x64xf32>
    %741 = arith.mulf %735, %739 : vector<2x64xf32>
    %742 = arith.addf %740, %741 : vector<2x64xf32>
    %743 = math.tanh %742 : vector<2x64xf32>
    %744 = arith.mulf %737, %743 : vector<2x64xf32>
    %745 = tpu.concatenate %744, %692 in 1 : vector<2x64xf32>, vector<2x64xf32> -> vector<2x128xf32>
    %cst_178 = arith.constant dense<0.000000e+00> : vector<2x256xf32>
    %746 = tpu.matmul %745, %32, %cst_178 {dimension_numbers = #tpu.dot_dimension_numbers<[1], [0], [0], [1], [0, 0, 1, 1], [], []>} : vector<2x128xf32>, vector<128x256xf32>, vector<2x256xf32> -> vector<2x256xf32>
    %747 = arith.addf %746, %40 : vector<2x256xf32>
    %748 = vector.extract_strided_slice %747 {offsets = [0, 0], sizes = [2, 192], strides = [1, 1]} : vector<2x256xf32> to vector<2x192xf32>
    %749 = arith.negf %748 : vector<2x192xf32>
    %750 = math.exp %749 : vector<2x192xf32>
    %cst_179 = arith.constant 1.000000e+00 : f32
    %751 = vector.broadcast %cst_179 : f32 to vector<2x192xf32>
    %752 = arith.addf %751, %750 : vector<2x192xf32>
    %753 = arith.divf %751, %752 : vector<2x192xf32>
    %754 = vector.extract_strided_slice %753 {offsets = [0, 0], sizes = [2, 64], strides = [1, 1]} : vector<2x192xf32> to vector<2x64xf32>
    %755 = vector.extract_strided_slice %753 {offsets = [0, 64], sizes = [2, 64], strides = [1, 1]} : vector<2x192xf32> to vector<2x64xf32>
    %756 = vector.extract_strided_slice %753 {offsets = [0, 128], sizes = [2, 64], strides = [1, 1]} : vector<2x192xf32> to vector<2x64xf32>
    %757 = vector.extract_strided_slice %747 {offsets = [0, 192], sizes = [2, 64], strides = [1, 1]} : vector<2x256xf32> to vector<2x64xf32>
    %758 = math.tanh %757 : vector<2x64xf32>
    %759 = arith.mulf %755, %690 : vector<2x64xf32>
    %760 = arith.mulf %754, %758 : vector<2x64xf32>
    %761 = arith.addf %759, %760 : vector<2x64xf32>
    %762 = math.tanh %761 : vector<2x64xf32>
    %763 = arith.mulf %756, %762 : vector<2x64xf32>
    %cst_180 = arith.constant dense<0.000000e+00> : vector<2x64xf32>
    %764 = tpu.matmul %763, %1, %cst_180 {dimension_numbers = #tpu.dot_dimension_numbers<[1], [0], [0], [1], [0, 0, 1, 1], [], []>} : vector<2x64xf32>, vector<64x64xf32>, vector<2x64xf32> -> vector<2x64xf32>
    %765 = arith.addf %764, %15 : vector<2x64xf32>
    %cst_181 = arith.constant 0.000000e+00 : f32
    %766 = vector.broadcast %cst_181 : f32 to vector<2x64xf32>
    %767 = arith.maximumf %765, %766 : vector<2x64xf32>
    %cst_182 = arith.constant dense<0.000000e+00> : vector<2x64xf32>
    %768 = tpu.matmul %767, %3, %cst_182 {dimension_numbers = #tpu.dot_dimension_numbers<[1], [0], [0], [1], [0, 0, 1, 1], [], []>} : vector<2x64xf32>, vector<64x64xf32>, vector<2x64xf32> -> vector<2x64xf32>
    %769 = arith.addf %768, %19 : vector<2x64xf32>
    %cst_183 = arith.constant 0.000000e+00 : f32
    %770 = vector.broadcast %cst_183 : f32 to vector<2x64xf32>
    %771 = arith.maximumf %769, %770 : vector<2x64xf32>
    %cst_184 = arith.constant dense<0.000000e+00> : vector<2x64xf32>
    %772 = tpu.matmul %771, %7, %cst_184 {dimension_numbers = #tpu.dot_dimension_numbers<[1], [0], [0], [1], [0, 0, 1, 1], [], []>} : vector<2x64xf32>, vector<64x64xf32>, vector<2x64xf32> -> vector<2x64xf32>
    %773 = vector.extract_strided_slice %55 {offsets = [18, 0], sizes = [2, 64], strides = [1, 1]} : vector<20x64xf32> to vector<2x64xf32>
    %774 = arith.addf %772, %773 : vector<2x64xf32>
    %cst_185 = arith.constant 0.000000e+00 : f32
    %775 = vector.broadcast %cst_185 : f32 to vector<2x64xf32>
    %776 = arith.maximumf %774, %775 : vector<2x64xf32>
    %777 = arith.addf %706, %776 : vector<2x64xf32>
    %cst_186 = arith.constant dense<0.000000e+00> : vector<2x64xf32>
    %778 = tpu.matmul %777, %11, %cst_186 {dimension_numbers = #tpu.dot_dimension_numbers<[1], [0], [0], [1], [0, 0, 1, 1], [], []>} : vector<2x64xf32>, vector<64x64xf32>, vector<2x64xf32> -> vector<2x64xf32>
    %779 = vector.broadcast %27 : vector<1x64xf32> to vector<2x64xf32>
    %780 = arith.addf %778, %779 : vector<2x64xf32>
    %781 = vector.extract_strided_slice %780 {offsets = [0, 0], sizes = [2, 2], strides = [1, 1]} : vector<2x64xf32> to vector<2x2xf32>
    %c0_187 = arith.constant 0 : index
    %c0_188 = arith.constant 0 : index
    %782 = vector.load %arg10[%c0_187, %c0_188] : memref<2x2xf32, #tpu.memory_space<vmem>>, vector<2x2xf32>
    tpu.vector_store %arg10[%c0_187, %c0_188], %781 {strides = array<i32>} : memref<2x2xf32, #tpu.memory_space<vmem>>, vector<2x2xf32>,
    return
  }
  func.func @transform_0(%arg0: i32) -> (i32, i32) {
    %c0_i32 = arith.constant 0 : i32
    %c0_i32_0 = arith.constant 0 : i32
    %c0_i32_1 = arith.constant 0 : i32
    return %c0_i32, %c0_i32_0 : i32, i32
  }
  func.func @transform_1(%arg0: i32) -> (i32, i32) {
    %c0_i32 = arith.constant 0 : i32
    %c0_i32_0 = arith.constant 0 : i32
    %c0_i32_1 = arith.constant 0 : i32
    return %c0_i32, %c0_i32_0 : i32, i32
  }
  func.func @transform_2(%arg0: i32) -> (i32, i32) {
    %c0_i32 = arith.constant 0 : i32
    %c0_i32_0 = arith.constant 0 : i32
    %c0_i32_1 = arith.constant 0 : i32
    return %c0_i32, %c0_i32_0 : i32, i32
  }
  func.func @transform_3(%arg0: i32) -> (i32, i32) {
    %c0_i32 = arith.constant 0 : i32
    %c0_i32_0 = arith.constant 0 : i32
    %c0_i32_1 = arith.constant 0 : i32
    return %c0_i32, %c0_i32_0 : i32, i32
  }
  func.func @transform_4(%arg0: i32) -> (i32, i32, i32) {
    %c0_i32 = arith.constant 0 : i32
    %c0_i32_0 = arith.constant 0 : i32
    %c0_i32_1 = arith.constant 0 : i32
    %c0_i32_2 = arith.constant 0 : i32
    return %c0_i32, %c0_i32_0, %c0_i32_1 : i32, i32, i32
  }
  func.func @transform_5(%arg0: i32) -> (i32, i32, i32) {
    %c0_i32 = arith.constant 0 : i32
    %c0_i32_0 = arith.constant 0 : i32
    %c0_i32_1 = arith.constant 0 : i32
    %c0_i32_2 = arith.constant 0 : i32
    return %c0_i32, %c0_i32_0, %c0_i32_1 : i32, i32, i32
  }
  func.func @transform_6(%arg0: i32) -> (i32, i32) {
    %c0_i32 = arith.constant 0 : i32
    %c0_i32_0 = arith.constant 0 : i32
    %c0_i32_1 = arith.constant 0 : i32
    return %c0_i32, %c0_i32_0 : i32, i32
  }
  func.func @transform_7(%arg0: i32) -> (i32, i32, i32) {
    %c0_i32 = arith.constant 0 : i32
    %c0_i32_0 = arith.constant 0 : i32
    %c0_i32_1 = arith.constant 0 : i32
    %c0_i32_2 = arith.constant 0 : i32
    return %c0_i32, %c0_i32_0, %c0_i32_1 : i32, i32, i32
  }
  func.func @transform_8(%arg0: i32) -> (i32, i32, i32) {
    %c0_i32 = arith.constant 0 : i32
    %c0_i32_0 = arith.constant 0 : i32
    %c0_i32_1 = arith.constant 0 : i32
    %c0_i32_2 = arith.constant 0 : i32
    return %c0_i32, %c0_i32_0, %c0_i32_1 : i32, i32, i32
  }
  func.func @transform_9(%arg0: i32) -> (i32, i32) {
    %c0_i32 = arith.constant 0 : i32
    %c0_i32_0 = arith.constant 0 : i32
    %c0_i32_1 = arith.constant 0 : i32
    return %c0_i32, %c0_i32_0 : i32, i32
  }
}

</mosaic_0001>

<bundles_post_ra>
// kernel: tpu_custom_call.1
= control target key start
LH: loop header
LB: loop body
LE: loop exit
PB: predicated region body
PF: predicated region fallthrough
CT: control target
= control target key end

     0   :  { %14 = vsyncpa [#allocation3], 0  ;;  %s12410_s0 = inlined_call_operand.hbm [shape: f32[20,128], index: 0, kind: input, shape index: {}]   ;;  %s12411_s1 = inlined_call_operand.hbm [shape: f32[20,512], index: 1, kind: input, shape index: {}]   ;;  %s12412_s2 = inlined_call_operand.vmem [shape: f32[128,256], index: 2, kind: input, shape index: {}]   ;;  %s12413_s3 = inlined_call_operand.hbm [shape: f32[64,256], index: 3, kind: input, shape index: {}]   ;;  %s12414_s4 = inlined_call_operand.vmem [shape: f32[2,128,256], index: 4, kind: input, shape index: {}]   ;;  %s12415_s5 = inlined_call_operand.vmem [shape: f32[3,1,256], index: 5, kind: input, shape index: {}]   ;;  %s12416_s6 = inlined_call_operand.vmem [shape: f32[512,64], index: 6, kind: input, shape index: {}]   ;;  %s12417_s7 = inlined_call_operand.hbm [shape: f32[6,64,64], index: 7, kind: input, shape index: {}]   ;;  %s12418_s8 = inlined_call_operand.hbm [shape: f32[6,1,64], index: 8, kind: input, shape index: {}]   ;;  %s12419_s9 = inlined_call_operand.hbm [shape: f32[2,2], index: 9, kind: output, shape index: {}]  }
   0x1   :  { %15 = vsyncpa [#allocation6], 0 }
   0x2   :  { %16 = vsyncpa [#allocation9], 0 }
   0x3   :  { %17 = vsyncpa [#allocation4], 0  ;;  %s8457_s30 = smov [#allocation5]  }
   0x4   :  { %s35_s10 = sshll.u32 %s8457_s30, 4  ;;  %s36_s10 = int_to_ptr.vmem [resolvable:$true] %s35_s10 }
   0x5   :  { %s8337_s11 = scalar_lea.vmem %s36_s10, 1536  ;;  %p8342_p1 = scmp.lt.s32.totalorder %s36_s10, %s36_s10 }
   0x6   :  { %p8338_p0 = scmp.ne.s32.totalorder %s36_s10, %s8337_s11  ;;  %p8343_p2 = scmp.lt.s32.totalorder %s8337_s11, %s8337_s11 }
   0x8   :  { %p8344_p3 = por %p8343_p2, %p8342_p1 }
   0xa   :  { %p8345_p4 = pnand %p8344_p3, %p8338_p0 }
   0xc   :  { %8348 = shalt.err (!%p8345_p4)
}
   0xd   :  { %s8458_s12 = smov 512   ;;  %s8459_s13 = smov 32  }
   0xe   :  { %41 = dma.hbm_to_vmem [thread:$0]  %s12411_s1, 1536, %s36_s10, [#allocation6], %s8458_s12, %s8458_s12, %s8459_s13  }
   0xf   :  { %s8460_s16 = smov [#allocation8]   ;;  %s8461_s18 = smov [#allocation2]  }
  0x10   :  { %s67_s17 = sshll.u32 %s8460_s16, 4  ;;  %s23_s19 = sshll.u32 %s8461_s18, 4  ;;  %s68_s17 = int_to_ptr.vmem [resolvable:$true] %s67_s17  ;;  %s24_s19 = int_to_ptr.vmem [resolvable:$true] %s23_s19 }
  0x11   :  { %s8357_s20 = scalar_lea.vmem %s68_s17, 6144  ;;  %p8362_p6 = scmp.lt.s32.totalorder %s68_s17, %s68_s17 }
  0x12   :  { %p8358_p5 = scmp.ne.s32.totalorder %s68_s17, %s8357_s20  ;;  %p8363_p7 = scmp.lt.s32.totalorder %s8357_s20, %s8357_s20 }
  0x14   :  { %p8364_p8 = por %p8363_p7, %p8362_p6 }
  0x16   :  { %p8365_p9 = pnand %p8364_p8, %p8358_p5 }
  0x18   :  { %8368 = shalt.err (!%p8365_p9)
}
  0x19   :  { %s8462_s21 = smov 128   ;;  %s8463_s22 = smov 8  }
  0x1a   :  { %73 = dma.hbm_to_vmem [thread:$0]  %s12417_s7, 6144, %s68_s17, [#allocation9], %s8462_s21, %s8462_s21, %s8463_s22  }
  0x1b   :  { %s8377_s1 = scalar_lea.vmem %s24_s19, 384  ;;  %p8382_p11 = scmp.lt.s32.totalorder %s24_s19, %s24_s19 }
  0x1c   :  { %p8378_p10 = scmp.ne.s32.totalorder %s24_s19, %s8377_s1  ;;  %p8383_p12 = scmp.lt.s32.totalorder %s8377_s1, %s8377_s1 }
  0x1e   :  { %p8384_p13 = por %p8383_p12, %p8382_p11 }
  0x20   :  { %p8385_p0 = pnand %p8384_p13, %p8378_p10 }
  0x22   :  { %8388 = shalt.err (!%p8385_p0)
}
  0x23   :  { %29 = dma.hbm_to_vmem [thread:$0]  %s12410_s0, 384, %s24_s19, [#allocation3], %s8462_s21, %s8462_s21, %s8463_s22  }
  0x24   :  { %s8464_s27 = smov [#allocation7]  }
  0x25   :  { %s49_s28 = sshll.u32 %s8464_s27, 4  ;;  %s50_s28 = int_to_ptr.vmem [resolvable:$true] %s49_s28 }
  0x26   :  { %s8397_s29 = scalar_lea.vmem %s50_s28, 2048  ;;  %p8402_p2 = scmp.lt.s32.totalorder %s50_s28, %s50_s28 }
  0x27   :  { %p8398_p1 = scmp.ne.s32.totalorder %s50_s28, %s8397_s29  ;;  %p8403_p3 = scmp.lt.s32.totalorder %s8397_s29, %s8397_s29 }
  0x29   :  { %p8404_p4 = por %p8403_p3, %p8402_p2 }
  0x2b   :  { %p8405_p5 = pnand %p8404_p4, %p8398_p1 }
  0x2d   :  { %8408 = shalt.err (!%p8405_p5)
}
  0x2e   :  { %s8465_s7 = smov 256   ;;  %s8466_s30 = smov 16  }
  0x2f   :  { %55 = dma.hbm_to_vmem [thread:$0]  %s12413_s3, 2048, %s50_s28, [#allocation6], %s8465_s7, %s8465_s7, %s8466_s30  }
  0x30   :  { %s8467_s12 = smov [#allocation10]  }
  0x31   :  { %s79_s13 = sshll.u32 %s8467_s12, 4  ;;  %s80_s13 = int_to_ptr.vmem [resolvable:$true] %s79_s13 }
  0x32   :  { %s8417_s0 = scalar_lea.vmem %s80_s13, 96  ;;  %p8422_p7 = scmp.lt.s32.totalorder %s80_s13, %s80_s13 }
  0x33   :  { %p8418_p6 = scmp.ne.s32.totalorder %s80_s13, %s8417_s0  ;;  %p8423_p8 = scmp.lt.s32.totalorder %s8417_s0, %s8417_s0 }
  0x35   :  { %p8424_p9 = por %p8423_p8, %p8422_p7 }
  0x37   :  { %p8425_p10 = pnand %p8424_p9, %p8418_p6 }
  0x39   :  { %8428 = shalt.err (!%p8425_p10)
}
  0x3a   :  { %s8468_s14 = smov 1  }
  0x3b   :  { %85 = dma.hbm_to_vmem [thread:$0]  %s12418_s8, 96, %s80_s13, [#allocation9], %s8466_s30, %s8466_s30, %s8468_s14  }
  0x3c   :  { %8449 = dma.done.wait [#allocation3], 384  }
  0x3d   :  { %8450 = vsyncadd [#allocation3], 4294966912 }
  0x3e   :  { %8451 = dma.done.wait [#allocation6], 3584  }
  0x3f   :  { %8452 = vsyncadd [#allocation6], 4294963712 }
  0x40   :  { %8453 = dma.done.wait [#allocation9], 6240  }
  0x41   :  { %8454 = vsyncadd [#allocation9], 4294961056  ;;  %v327_v0 = vld [vmem:[%s12416_s6 + $0xf8] sm:$0xff]  ;;  %v326_v4 = vld [vmem:[%s12416_s6 + $0xf0] sm:$0xff]  ;;  %vm8470_vm0 = vmmov 0   ;;  %vm535_vm1 = vcmask 523264  }
  0x42   :  { %v359_v1 = vld [vmem:[%s12416_s6 + $0x1f8] sm:$0xff]  ;;  %6611 = vmatprep.subr.mxu0 %v327_v0  ;;  %v358_v5 = vld [vmem:[%s12416_s6 + $0x1f0] sm:$0xff]  ;;  %v325_v8 = vld [vmem:[%s12416_s6 + $0xe8] sm:$0xff]  ;;  %vm6444_vm2 = vcmask 9216  }
  0x43   :  { %v311_v2 = vld [vmem:[%s12416_s6 + $0x78] sm:$0xff]  ;;  %6652 = vmatprep.subr.mxu1 %v359_v1  ;;  %v310_v6 = vld [vmem:[%s12416_s6 + $0x70] sm:$0xff]  ;;  %v357_v9 = vld [vmem:[%s12416_s6 + $0x1e8] sm:$0xff] }
  0x44   :  { %v343_v3 = vld [vmem:[%s12416_s6 + $0x178] sm:$0xff]  ;;  %6612 = vmatpush3.msra.mxu0 %v311_v2  ;;  %v342_v7 = vld [vmem:[%s12416_s6 + $0x170] sm:$0xff]  ;;  %v309_v10 = vld [vmem:[%s12416_s6 + $0x68] sm:$0xff] }
  0x45   :  { %6653 = vmatpush3.msra.mxu1 %v343_v3  ;;  %6613 = vmatprep.subr.mxu0 %v326_v4  ;;  %v341_v11 = vld [vmem:[%s12416_s6 + $0x168] sm:$0xff]  ;;  %v324_v12 = vld [vmem:[%s12416_s6 + $0xe0] sm:$0xff]  ;;  %v323_v16 = vld [vmem:[%s12416_s6 + $0xd8] sm:$0xff] }
  0x46   :  { %6654 = vmatprep.subr.mxu1 %v358_v5  ;;  %6614 = vmatpush3.msra.mxu0 %v310_v6  ;;  %v356_v13 = vld [vmem:[%s12416_s6 + $0x1e0] sm:$0xff]  ;;  %v355_v17 = vld [vmem:[%s12416_s6 + $0x1d8] sm:$0xff]  ;;  %v322_v20 = vld [vmem:[%s12416_s6 + $0xd0] sm:$0xff] }
  0x47   :  { %6655 = vmatpush3.msra.mxu1 %v342_v7  ;;  %6615 = vmatprep.subr.mxu0 %v325_v8  ;;  %v308_v14 = vld [vmem:[%s12416_s6 + $0x60] sm:$0xff]  ;;  %v307_v18 = vld [vmem:[%s12416_s6 + $0x58] sm:$0xff]  ;;  %v354_v21 = vld [vmem:[%s12416_s6 + $0x1d0] sm:$0xff] }
  0x48   :  { %6656 = vmatprep.subr.mxu1 %v357_v9  ;;  %v340_v15 = vld [vmem:[%s12416_s6 + $0x160] sm:$0xff]  ;;  %6616 = vmatpush3.msra.mxu0 %v309_v10  ;;  %v339_v19 = vld [vmem:[%s12416_s6 + $0x158] sm:$0xff]  ;;  %v306_v22 = vld [vmem:[%s12416_s6 + $0x50] sm:$0xff] }
  0x49   :  { %6657 = vmatpush3.msra.mxu1 %v341_v11  ;;  %6617 = vmatprep.subr.mxu0 %v324_v12  ;;  %v338_v23 = vld [vmem:[%s12416_s6 + $0x150] sm:$0xff]  ;;  %v321_v24 = vld [vmem:[%s12416_s6 + $0xc8] sm:$0xff]  ;;  %v320_v28 = vld [vmem:[%s12416_s6 + $0xc0] sm:$0xff]  ;;  %v12420_v11 = vmov 0.0  }
  0x4a   :  { %6658 = vmatprep.subr.mxu1 %v356_v13  ;;  %6618 = vmatpush3.msra.mxu0 %v308_v14  ;;  %v353_v25 = vld [vmem:[%s12416_s6 + $0x1c8] sm:$0xff]  ;;  %v352_v29 = vld [vmem:[%s12416_s6 + $0x1c0] sm:$0xff]  ;;  %v319_v32 = vld [vmem:[%s12416_s6 + $0xb8] sm:$0xff] }
  0x4b   :  { %6659 = vmatpush3.msra.mxu1 %v340_v15  ;;  %6619 = vmatprep.subr.mxu0 %v323_v16  ;;  %v305_v26 = vld [vmem:[%s12416_s6 + $0x48] sm:$0xff]  ;;  %v304_v30 = vld [vmem:[%s12416_s6 + $0x40] sm:$0xff]  ;;  %v351_v33 = vld [vmem:[%s12416_s6 + $0x1b8] sm:$0xff] }
  0x4c   :  { %6660 = vmatprep.subr.mxu1 %v355_v17  ;;  %6620 = vmatpush3.msra.mxu0 %v307_v18  ;;  %v337_v27 = vld [vmem:[%s12416_s6 + $0x148] sm:$0xff]  ;;  %v336_v31 = vld [vmem:[%s12416_s6 + $0x140] sm:$0xff]  ;;  %v303_v34 = vld [vmem:[%s12416_s6 + $0x38] sm:$0xff] }
  0x4d   :  { %6661 = vmatpush3.msra.mxu1 %v339_v19  ;;  %6621 = vmatprep.subr.mxu0 %v322_v20  ;;  %v335_v35 = vld [vmem:[%s12416_s6 + $0x138] sm:$0xff]  ;;  %v318_v36 = vld [vmem:[%s12416_s6 + $0xb0] sm:$0xff]  ;;  %v317_v40 = vld [vmem:[%s12416_s6 + $0xa8] sm:$0xff] }
  0x4e   :  { %6662 = vmatprep.subr.mxu1 %v354_v21  ;;  %6622 = vmatpush3.msra.mxu0 %v306_v22  ;;  %v350_v37 = vld [vmem:[%s12416_s6 + $0x1b0] sm:$0xff]  ;;  %v349_v41 = vld [vmem:[%s12416_s6 + $0x1a8] sm:$0xff]  ;;  %v316_v44 = vld [vmem:[%s12416_s6 + $0xa0] sm:$0xff] }
  0x4f   :  { %6663 = vmatpush3.msra.mxu1 %v338_v23  ;;  %6623 = vmatprep.subr.mxu0 %v321_v24  ;;  %v302_v38 = vld [vmem:[%s12416_s6 + $0x30] sm:$0xff]  ;;  %v301_v42 = vld [vmem:[%s12416_s6 + $0x28] sm:$0xff]  ;;  %v348_v45 = vld [vmem:[%s12416_s6 + $0x1a0] sm:$0xff] }
  0x50   :  { %6664 = vmatprep.subr.mxu1 %v353_v25  ;;  %6624 = vmatpush3.msra.mxu0 %v305_v26  ;;  %v334_v39 = vld [vmem:[%s12416_s6 + $0x130] sm:$0xff]  ;;  %v333_v43 = vld [vmem:[%s12416_s6 + $0x128] sm:$0xff]  ;;  %v300_v46 = vld [vmem:[%s12416_s6 + $0x20] sm:$0xff] }
  0x51   :  { %6665 = vmatpush3.msra.mxu1 %v337_v27  ;;  %6625 = vmatprep.subr.mxu0 %v320_v28  ;;  %v332_v47 = vld [vmem:[%s12416_s6 + $0x120] sm:$0xff]  ;;  %v315_v48 = vld [vmem:[%s12416_s6 + $0x98] sm:$0xff]  ;;  %v314_v52 = vld [vmem:[%s12416_s6 + $0x90] sm:$0xff] }
  0x52   :  { %6666 = vmatprep.subr.mxu1 %v352_v29  ;;  %6626 = vmatpush3.msra.mxu0 %v304_v30  ;;  %v347_v49 = vld [vmem:[%s12416_s6 + $0x198] sm:$0xff]  ;;  %v346_v53 = vld [vmem:[%s12416_s6 + $0x190] sm:$0xff]  ;;  %v313_v56 = vld [vmem:[%s12416_s6 + $0x88] sm:$0xff] }
  0x53   :  { %6667 = vmatpush3.msra.mxu1 %v336_v31  ;;  %6627 = vmatprep.subr.mxu0 %v319_v32  ;;  %v299_v50 = vld [vmem:[%s12416_s6 + $0x18] sm:$0xff]  ;;  %v298_v54 = vld [vmem:[%s12416_s6 + $0x10] sm:$0xff]  ;;  %v345_v57 = vld [vmem:[%s12416_s6 + $0x188] sm:$0xff] }
  0x54   :  { %6668 = vmatprep.subr.mxu1 %v351_v33  ;;  %6628 = vmatpush3.msra.mxu0 %v303_v34  ;;  %v331_v51 = vld [vmem:[%s12416_s6 + $0x118] sm:$0xff]  ;;  %v330_v55 = vld [vmem:[%s12416_s6 + $0x110] sm:$0xff]  ;;  %v297_v58 = vld [vmem:[%s12416_s6 + $0x8] sm:$0xff] }
  0x55   :  { %6669 = vmatpush3.msra.mxu1 %v335_v35  ;;  %6629 = vmatprep.subr.mxu0 %v318_v36  ;;  %v329_v59 = vld [vmem:[%s12416_s6 + $0x108] sm:$0xff]  ;;  %v312_v60 = vld [vmem:[%s12416_s6 + $0x80] sm:$0xff]  ;;  %v287_v1 = vld [vmem:[#allocation5 + $0x18] sm:$0xff] }
  0x56   :  { %6670 = vmatprep.subr.mxu1 %v350_v37  ;;  %6630 = vmatpush3.msra.mxu0 %v302_v38  ;;  %v344_v61 = vld [vmem:[%s12416_s6 + $0x180] sm:$0xff]  ;;  %v284_v2 = vld [vmem:[#allocation5] sm:$0xff]  ;;  %v286_v3 = vld [vmem:[#allocation5 + $0x10] sm:$0xff] }
  0x57   :  { %6671 = vmatpush3.msra.mxu1 %v334_v39  ;;  %6631 = vmatprep.subr.mxu0 %v317_v40  ;;  %v296_v62 = vld [vmem:[%s12416_s6] sm:$0xff]  ;;  %v291_v5 = vld [vmem:[#allocation5 + $0x38] sm:$0xff]  ;;  %v288_v7 = vld [vmem:[#allocation5 + $0x20] sm:$0xff] }
  0x58   :  { %6672 = vmatprep.subr.mxu1 %v349_v41  ;;  %6632 = vmatpush3.msra.mxu0 %v301_v42  ;;  %v285_v63 = vld [vmem:[#allocation5 + $0x8] sm:$0xff]  ;;  %v126_v6 = vld [vmem:[#allocation8 + $0xb8] sm:$0xff]  ;;  %v290_v8 = vld [vmem:[#allocation5 + $0x30] sm:$0xff] }
  0x59   :  { %6673 = vmatpush3.msra.mxu1 %v333_v43  ;;  %6633 = vmatprep.subr.mxu0 %v316_v44  ;;  %v328_v0 = vld [vmem:[%s12416_s6 + $0x100] sm:$0xff]  ;;  %v295_v10 = vld [vmem:[#allocation5 + $0x58] sm:$0xf]  ;;  %v125_v12 = vld [vmem:[#allocation8 + $0xb0] sm:$0xff] }
  0x5a   :  { %6674 = vmatprep.subr.mxu1 %v348_v45  ;;  %6634 = vmatpush3.msra.mxu0 %v300_v46  ;;  %v289_v4 = vld [vmem:[#allocation5 + $0x28] sm:$0xff]  ;;  %v292_v13 = vld [vmem:[#allocation5 + $0x40] sm:$0xf]  ;;  %v294_v14 = vld [vmem:[#allocation5 + $0x50] sm:$0xf] }
  0x5b   :  { %6675 = vmatpush3.msra.mxu1 %v332_v47  ;;  %6635 = vmatprep.subr.mxu0 %v315_v48  ;;  %v293_v9 = vld [vmem:[#allocation5 + $0x48] sm:$0xf]  ;;  %v123_v16 = vld [vmem:[#allocation8 + $0xa0] sm:$0xff]  ;;  %v122_v17 = vld [vmem:[#allocation8 + $0x98] sm:$0xff] }
  0x5c   :  { %6676 = vmatprep.subr.mxu1 %v347_v49  ;;  %6636 = vmatpush3.msra.mxu0 %v299_v50  ;;  %v124_v15 = vld [vmem:[#allocation8 + $0xa8] sm:$0xff]  ;;  %v121_v18 = vld [vmem:[#allocation8 + $0x90] sm:$0xff]  ;;  %v119_v20 = vld [vmem:[#allocation8 + $0x80] sm:$0xff] }
  0x5d   :  { %6677 = vmatpush3.msra.mxu1 %v331_v51  ;;  %6637 = vmatprep.subr.mxu0 %v314_v52  ;;  %v120_v19 = vld [vmem:[#allocation8 + $0x88] sm:$0xff]  ;;  %v757_v21 = vld [vmem:[%s12412_s2 + $0xf8] sm:$0xff]  ;;  %v144_v22 = vld [vmem:[#allocation8 + $0x138] sm:$0xff] }
  0x5e   :  { %6678 = vmatprep.subr.mxu1 %v346_v53  ;;  %6638 = vmatpush3.msra.mxu0 %v298_v54  ;;  %v143_v23 = vld [vmem:[#allocation8 + $0x130] sm:$0xff]  ;;  %v142_v24 = vld [vmem:[#allocation8 + $0x128] sm:$0xff]  ;;  %v141_v25 = vld [vmem:[#allocation8 + $0x120] sm:$0xff] }
  0x5f   :  { %6679 = vmatpush3.msra.mxu1 %v330_v55  ;;  %6639 = vmatprep.subr.mxu0 %v313_v56  ;;  %v140_v26 = vld [vmem:[#allocation8 + $0x118] sm:$0xff]  ;;  %v139_v27 = vld [vmem:[#allocation8 + $0x110] sm:$0xff]  ;;  %v6499_v30 = vld [vmem:[#allocation10 + $0x2] ss:$0 sm:$0xff] }
  0x60   :  { %6680 = vmatprep.subr.mxu1 %v345_v57  ;;  %6640 = vmatpush3.msra.mxu0 %v297_v58  ;;  %v756_v47 = vld [vmem:[%s12412_s2 + $0xf0] sm:$0xff]  ;;  %v755_v50 = vld [vmem:[%s12412_s2 + $0xe8] sm:$0xff]  ;;  %v754_v54 = vld [vmem:[%s12412_s2 + $0xe0] sm:$0xff] }
  0x61   :  { %6681 = vmatpush3.msra.mxu1 %v329_v59  ;;  %6641 = vmatprep.subr.mxu0 %v312_v60  ;;  %v753_v55 = vld [vmem:[%s12412_s2 + $0xd8] sm:$0xff]  ;;  %v752_v58 = vld [vmem:[%s12412_s2 + $0xd0] sm:$0xff]  ;;  %v751_v59 = vld [vmem:[%s12412_s2 + $0xc8] sm:$0xff] }
  0x62   :  { %6682 = vmatprep.subr.mxu1 %v344_v61  ;;  %6642 = vmatpush3.msra.mxu0 %v296_v62  ;;  %v750_v61 = vld [vmem:[%s12412_s2 + $0xc0] sm:$0xff]  ;;  %v749_v62 = vld [vmem:[%s12412_s2 + $0xb8] sm:$0xff] }
  0x63   :  { %430 = vmatprep.mubr.f32.mxu0 %v285_v63  ;;  %6683 = vmatpush3.msra.mxu1 %v328_v0  ;;  %v748_v0 = vld [vmem:[%s12412_s2 + $0xb0] sm:$0xff] }
  0x64   :  { %510 = vmatprep.mubr.f32.mxu1 %v287_v1  ;;  %431 = vmatmul.mubr.f32.vlgmr.msra.gmra.mxu0 %v284_v2  ;;  %v747_v1 = vld [vmem:[%s12412_s2 + $0xa8] sm:$0xff]  ;;  %v746_v2 = vld [vmem:[%s12412_s2 + $0xa0] sm:$0xff] }
  0x65   :  { %511 = vmatmul.mubr.f32.vlgmr.msra.gmra.mxu1 %v286_v3  ;;  %435 = vmatprep.mubr.f32.mxu0 %v289_v4  ;;  %v745_v3 = vld [vmem:[%s12412_s2 + $0x98] sm:$0xff]  ;;  %v744_v4 = vld [vmem:[%s12412_s2 + $0x90] sm:$0xff] }
  0x66   :  { %515 = vmatprep.mubr.f32.mxu1 %v291_v5  ;;  %6994 = vmatprep.subr.mxu0 %v12420_v11  ;;  %v743_v5 = vld [vmem:[%s12412_s2 + $0x88] sm:$0xff] }
  0x67   :  { %7019 = vmatprep.subr.mxu1 %v12420_v11  ;;  %6995 = vmatpush3.msra.mxu0 %v126_v6  ;;  %v742_v6 = vld [vmem:[%s12412_s2 + $0x80] sm:$0xff] }
  0x68   :  { %436 = vmatmul.mubr.f32.gmra.mxu0 %v288_v7  ;;  %6996 = vmatprep.subr.mxu0 %v12420_v11  ;;  %v741_v7 = vld [vmem:[%s12412_s2 + $0x78] sm:$0xff] }
  0x69   :  { %516 = vmatmul.mubr.f32.gmra.mxu1 %v290_v8  ;;  %440 = vmatprep.mubr.f32.mxu0 %v293_v9  ;;  %v138_v8 = vld [vmem:[#allocation8 + $0x108] sm:$0xff]  ;;  %v740_v9 = vld [vmem:[%s12412_s2 + $0x70] sm:$0xff] }
  0x6a   :  { %520 = vmatprep.mubr.f32.mxu1 %v295_v10  ;;  %6997 = vmatpush3.msra.mxu0 %v125_v12  ;;  %v739_v10 = vld [vmem:[%s12412_s2 + $0x68] sm:$0xff]  ;;  %v137_v12 = vld [vmem:[#allocation8 + $0x100] sm:$0xff] }
  0x6b   :  { %6998 = vmatprep.subr.mxu0 %v12420_v11  ;;  %7020 = vmatpush3.msra.mxu1 %v144_v22  ;;  %v730_v22 = vld [vmem:[%s12412_s2 + $0x20] sm:$0xff] }
  0x6c   :  { %441 = vmatmul.mubr.f32.gmra.mxu0 %v292_v13  ;;  %7021 = vmatprep.subr.mxu1 %v12420_v11  ;;  %v738_v13 = vld [vmem:[%s12412_s2 + $0x60] sm:$0xff] }
  0x6d   :  { %521 = vmatmul.mubr.f32.gmra.mxu1 %v294_v14  ;;  %6999 = vmatpush3.msra.mxu0 %v124_v15  ;;  %v737_v14 = vld [vmem:[%s12412_s2 + $0x58] sm:$0xff]  ;;  %v8821_v15 = vld [vmem:[#allocation7 + $0x78] sm:$0xff] }
  0x6e   :  { %7000 = vmatprep.subr.mxu0 %v12420_v11  ;;  %7010 = vmatprep.mubr.msk.f32.mxu0 %vm8470_vm0, %v12420_v11 }
  0x6f   :  { %7001 = vmatpush3.msra.mxu0 %v123_v16  ;;  %7035 = vmatprep.mubr.msk.f32.mxu1 %vm8470_vm0, %v12420_v11  ;;  %v736_v16 = vld [vmem:[%s12412_s2 + $0x50] sm:$0xff] }
  0x70   :  { %7002 = vmatprep.subr.mxu0 %v12420_v11  ;;  %7022 = vmatpush3.msra.mxu1 %v143_v23  ;;  %v729_v23 = vld [vmem:[%s12412_s2 + $0x18] sm:$0xff] }
  0x71   :  { %7003 = vmatpush3.msra.mxu0 %v122_v17  ;;  %7023 = vmatprep.subr.mxu1 %v12420_v11  ;;  %v735_v17 = vld [vmem:[%s12412_s2 + $0x48] sm:$0xff] }
  0x72   :  { %7004 = vmatprep.subr.mxu0 %v12420_v11  ;;  %7024 = vmatpush3.msra.mxu1 %v142_v24  ;;  %v728_v24 = vld [vmem:[%s12412_s2 + $0x10] sm:$0xff] }
  0x73   :  { %7005 = vmatpush3.msra.mxu0 %v121_v18  ;;  %7025 = vmatprep.subr.mxu1 %v12420_v11  ;;  %v734_v18 = vld [vmem:[%s12412_s2 + $0x40] sm:$0xff] }
  0x74   :  { %7006 = vmatprep.subr.mxu0 %v12420_v11  ;;  %7026 = vmatpush3.msra.mxu1 %v141_v25  ;;  %v727_v25 = vld [vmem:[%s12412_s2 + $0x8] sm:$0xff] }
  0x75   :  { %7007 = vmatpush3.msra.mxu0 %v120_v19  ;;  %7027 = vmatprep.subr.mxu1 %v12420_v11  ;;  %v733_v19 = vld [vmem:[%s12412_s2 + $0x38] sm:$0xff] }
  0x76   :  { %7008 = vmatprep.subr.mxu0 %v12420_v11  ;;  %7028 = vmatpush3.msra.mxu1 %v140_v26  ;;  %v726_v26 = vld [vmem:[%s12412_s2] sm:$0xff] }
  0x77   :  { %7009 = vmatpush3.msra.mxu0 %v119_v20  ;;  %7029 = vmatprep.subr.mxu1 %v12420_v11  ;;  %v732_v20 = vld [vmem:[%s12412_s2 + $0x30] sm:$0xff] }
  0x78   :  { %770 = vmatprep.subr.mxu0 %v757_v21  ;;  %7030 = vmatpush3.msra.mxu1 %v139_v27  ;;  %v731_v21 = vld [vmem:[%s12412_s2 + $0x28] sm:$0xff]  ;;  %v723_v27 = vld [vmem:[#allocation2] sm:$0xff] }
  0x79   :  { %7031 = vmatprep.subr.mxu1 %v12420_v11 }
  0x7a   :  { %7032 = vmatpush3.msra.mxu1 %v138_v8 }
  0x7b   :  { %7033 = vmatprep.subr.mxu1 %v12420_v11 }
  0x7c   :  { %7034 = vmatpush3.msra.mxu1 %v137_v12 }
  0x7d   :  { %872 = vmatprep.subr.mxu1 %v8821_v15 }
 0x124   :  { %v6643_v28 = vpop.f32.mrf.mxu0 }
 0x125   :  { %v6684_v29 = vpop.f32.mrf.mxu1 }
 0x126   :  { %v6644_v31 = vpop.f32.mrf.mxu0 }
 0x127   :  { %v6685_v32 = vpop.f32.mrf.mxu1  ;;  %v6645_v33 = vadd.f32 %v6644_v31, %v6643_v28  ;;  %v6500_v28 = vld [vmem:[#allocation10 + $0x3] ss:$0 sm:$0xff] }
 0x128   :  { %v6646_v34 = vpop.f32.mrf.mxu0  ;;  %v6686_v37 = vadd.f32 %v6685_v32, %v6684_v29 }
 0x129   :  { %v6687_v35 = vpop.f32.mrf.mxu1  ;;  %v433_v36 = vadd.f32 %v6645_v33, %v6499_v30  ;;  %v8858_v33 = vld [vmem:[#allocation7 + $0x70] sm:$0xff] }
 0x12a   :  { %v6647_v38 = vpop.f32.mrf.mxu0 }
 0x12b   :  { %v6688_v39 = vpop.f32.mrf.mxu1  ;;  %v513_v40 = vadd.f32 %v6686_v37, %v433_v36  ;;  %v6648_v41 = vadd.f32 %v6647_v38, %v6646_v34  ;;  %v8863_v37 = vld [vmem:[#allocation7 + $0x60] sm:$0xff] }
 0x12c   :  { %v6689_v42 = vadd.f32 %v6688_v39, %v6687_v35  ;;  %v6649_v43 = vpop.f32.mrf.mxu0  ;;  %v8860_v35 = vld [vmem:[#allocation7 + $0x68] sm:$0xff]  ;;  %v8868_v39 = vld [vmem:[#allocation7 + $0x58] sm:$0xff] }
 0x12d   :  { %v6690_v44 = vpop.f32.mrf.mxu1  ;;  %v526_v45 = vmax.f32 %v513_v40, 0.0  ;;  %v438_v46 = vadd.f32 %v6648_v41, %v6499_v30  ;;  %v8871_v41 = vld [vmem:[#allocation7 + $0x50] sm:$0xff] }
 0x12e   :  { %v6650_v48 = vpop.f32.mrf.mxu0 }
 0x12f   :  { %v6691_v49 = vpop.f32.mrf.mxu1  ;;  %v518_v51 = vadd.f32 %v6689_v42, %v438_v46  ;;  %v6651_v52 = vadd.f32 %v6650_v48, %v6649_v43  ;;  %7011 = vmatmul.mubr.msk.f32.vlgmr.msra.gmra.mxu0 %vm535_vm1, %v526_v45  ;;  %v8874_v43 = vld [vmem:[#allocation7 + $0x48] sm:$0xff]  ;;  %v8878_v45 = vld [vmem:[#allocation7 + $0x40] sm:$0xff] }
 0x130   :  { %v6692_v53 = vadd.f32 %v6691_v49, %v6690_v44  ;;  %7013 = vmatprep.mubr.msk.f32.mxu0 %vm8470_vm0, %v12420_v11  ;;  %771 = vmatpush1.msra.mxu0 %v756_v47  ;;  %v8883_v47 = vld [vmem:[#allocation7 + $0x38] sm:$0xff]  ;;  %v8886_v49 = vld [vmem:[#allocation7 + $0x30] sm:$0xff] }
 0x131   :  { %v527_v56 = vmax.f32 %v518_v51, 0.0  ;;  %v443_v57 = vadd.f32 %v6651_v52, %v6499_v30  ;;  %772 = vmatprep.subr.mxu0 %v755_v50  ;;  %v8889_v50 = vld [vmem:[#allocation7 + $0x28] sm:$0xff]  ;;  %v8893_v51 = vld [vmem:[#allocation7 + $0x20] sm:$0xff]  ;;  %v8896_v52 = vld [vmem:[#allocation7 + $0x18] sm:$0xff] }
 0x132   :  { %773 = vmatpush1.msra.mxu0 %v754_v54  ;;  %v8903_v54 = vld [vmem:[#allocation7 + $0x8] sm:$0xff] }
 0x133   :  { %v523_v60 = vadd.f32 %v6692_v53, %v443_v57  ;;  %7014 = vmatmul.mubr.msk.f32.gmra.mxu0 %vm535_vm1, %v527_v56  ;;  %774 = vmatprep.subr.mxu0 %v753_v55  ;;  %v8900_v53 = vld [vmem:[#allocation7 + $0x10] sm:$0xff]  ;;  %v8906_v55 = vld [vmem:[#allocation7] sm:$0xff]  ;;  %v261_v56 = vlaneseq }
 0x134   :  { %7016 = vmatprep.mubr.msk.f32.mxu0 %vm8470_vm0, %v12420_v11  ;;  %775 = vmatpush1.msra.mxu0 %v752_v58  ;;  %v8916_v58 = vld [vmem:[%s12415_s5 + $0x2] sm:$0x3] }
 0x135   :  { %v528_v63 = vmax.f32 %v523_v60, 0.0  ;;  %776 = vmatprep.subr.mxu0 %v751_v59  ;;  %v262_v57 = vshrl.u32 %v261_v56, 7  ;;  %v8921_v59 = vld [vmem:[%s12415_s5 + $0x4] sm:$0x3]  ;;  %v758_v60 = vld [vmem:[%s12415_s5] sm:$0x3] }
 0x136   :  { %777 = vmatpush1.msra.mxu0 %v750_v61  ;;  %s8471_s5 = smov 64   ;;  %v9052_v56 = vld [vmem:[%s12414_s4 + $0x80] sm:$0xff] }
 0x137   :  { %7017 = vmatmul.mubr.msk.f32.gmra.mxu0 %vm535_vm1, %v528_v63  ;;  %778 = vmatprep.subr.mxu0 %v749_v62  ;;  %v263_v61 = vsub.s32 0, %v262_v57  ;;  %12776 = vst [vmem:[#allocation40_spill] sm:$0xff] %v9052_v56 }
 0x138   :  { %779 = vmatpush1.msra.mxu0 %v748_v0  ;;  %834 = vmatprep.mubr.f32.mxu0 %v12420_v11 }
 0x139   :  { %780 = vmatprep.subr.mxu0 %v747_v1  ;;  %v8927_v62 = vrot.slane %v8916_v58, %v263_v61  ;;  %v8930_v63 = vrot.slane %v8921_v59, %v263_v61  ;;  %v8932_v0 = vrot.slane %v758_v60, %v263_v61  ;;  %v9070_v61 = vld [vmem:[%s12414_s4 + $0x68] sm:$0xff] }
 0x13a   :  { %781 = vmatpush1.msra.mxu0 %v746_v2  ;;  %12779 = vst [vmem:[#allocation43_spill] sm:$0xff] %v9070_v61 }
 0x13b   :  { %782 = vmatprep.subr.mxu0 %v745_v3  ;;  %12752 = vst [vmem:[#allocation16_spill] sm:$0xff] %v8927_v62  ;;  %12753 = vst [vmem:[#allocation17_spill] sm:$0xff] %v8930_v63 }
 0x13c   :  { %783 = vmatpush1.msra.mxu0 %v744_v4  ;;  %12754 = vst [vmem:[#allocation18_spill] sm:$0xff] %v8932_v0 }
 0x13d   :  { %784 = vmatprep.subr.mxu0 %v743_v5 }
 0x13e   :  { %785 = vmatpush1.msra.mxu0 %v742_v6  ;;  %v8940_v6 = vsub.s32 1, %v262_v57  ;;  %v9058_v57 = vld [vmem:[%s12414_s4 + $0x78] sm:$0xff] }
 0x13f   :  { %786 = vmatprep.subr.mxu0 %v741_v7  ;;  %12777 = vst [vmem:[#allocation41_spill] sm:$0xff] %v9058_v57 }
 0x140   :  { %787 = vmatpush1.msra.mxu0 %v740_v9  ;;  %v8943_v9 = vrot.slane %v758_v60, %v8940_v6  ;;  %v9064_v60 = vld [vmem:[%s12414_s4 + $0x70] sm:$0xff] }
 0x141   :  { %788 = vmatprep.subr.mxu0 %v739_v10  ;;  %12778 = vst [vmem:[#allocation42_spill] sm:$0xff] %v9064_v60 }
 0x142   :  { %789 = vmatpush1.msra.mxu0 %v738_v13  ;;  %12758 = vst [vmem:[#allocation22_spill] sm:$0xff] %v8943_v9 }
 0x143   :  { %790 = vmatprep.subr.mxu0 %v737_v14 }
 0x144   :  { %791 = vmatpush1.msra.mxu0 %v736_v16 }
 0x145   :  { %792 = vmatprep.subr.mxu0 %v735_v17 }
 0x146   :  { %793 = vmatpush1.msra.mxu0 %v734_v18 }
 0x147   :  { %794 = vmatprep.subr.mxu0 %v733_v19 }
 0x148   :  { %795 = vmatpush1.msra.mxu0 %v732_v20 }
 0x149   :  { %796 = vmatprep.subr.mxu0 %v731_v21 }
 0x14a   :  { %797 = vmatpush1.msra.mxu0 %v730_v22 }
 0x14b   :  { %798 = vmatprep.subr.mxu0 %v729_v23 }
 0x14c   :  { %799 = vmatpush1.msra.mxu0 %v728_v24 }
 0x14d   :  { %800 = vmatprep.subr.mxu0 %v727_v25 }
 0x14e   :  { %801 = vmatpush1.msra.mxu0 %v726_v26  ;;  %v8964_v26 = vld [vmem:[%s12414_s4 + $0xf8] sm:$0xff] }
 0x14f   :  { %835 = vmatmul.mubr.f32.vlgmr.msra.gmra.mxu0 %v723_v27  ;;  %12761 = vst [vmem:[#allocation25_spill] sm:$0xff] %v8964_v26  ;;  %v8969_v27 = vld [vmem:[%s12414_s4 + $0xf0] sm:$0xff] }
 0x150   :  { %840 = vmatprep.mubr.f32.mxu0 %v12420_v11  ;;  %12762 = vst [vmem:[#allocation26_spill] sm:$0xff] %v8969_v27 }
 0x1ef   :  { %v611_v29 = vpop.f32.mrf.mxu0 }
 0x1f0   :  { %v612_v30 = vadd.f32 %v6500_v28, %v611_v29  ;;  %v8980_v29 = vld [vmem:[%s12414_s4 + $0xe0] sm:$0xff] }
 0x1f1   :  { %v7012_v31 = vpop.f32.mrf.mxu0  ;;  %12764 = vst [vmem:[#allocation28_spill] sm:$0xff] %v8980_v29 }
 0x1f2   :  { %v625_v32 = vmax.f32 %v612_v30, 0.0  ;;  %v8986_v30 = vld [vmem:[%s12414_s4 + $0xd8] sm:$0xff]  ;;  %v8992_v31 = vld [vmem:[%s12414_s4 + $0xd0] sm:$0xff] }
 0x1f3   :  { %v616_v34 = vpop.f32.mrf.mxu0  ;;  %12765 = vst [vmem:[#allocation29_spill] sm:$0xff] %v8986_v30  ;;  %12766 = vst [vmem:[#allocation30_spill] sm:$0xff] %v8992_v31 }
 0x1f4   :  { %v617_v36 = vadd.f32 %v6500_v28, %v616_v34  ;;  %7036 = vmatmul.mubr.msk.f32.vlgmr.msra.gmra.mxu1 %vm535_vm1, %v625_v32  ;;  %v8998_v32 = vld [vmem:[%s12414_s4 + $0xc8] sm:$0xff]  ;;  %v9004_v34 = vld [vmem:[%s12414_s4 + $0xc0] sm:$0xff] }
 0x1f5   :  { %873 = vmatpush1.msra.mxu1 %v8858_v33  ;;  %v7015_v38 = vpop.f32.mrf.mxu0  ;;  %7038 = vmatprep.mubr.msk.f32.mxu1 %vm8470_vm0, %v12420_v11  ;;  %12767 = vst [vmem:[#allocation31_spill] sm:$0xff] %v8998_v32  ;;  %12768 = vst [vmem:[#allocation32_spill] sm:$0xff] %v9004_v34 }
 0x1f6   :  { %v626_v40 = vmax.f32 %v617_v36, 0.0  ;;  %874 = vmatprep.subr.mxu1 %v8860_v35  ;;  %v9010_v36 = vld [vmem:[%s12414_s4 + $0xb8] sm:$0xff]  ;;  %v9016_v38 = vld [vmem:[%s12414_s4 + $0xb0] sm:$0xff] }
 0x1f7   :  { %875 = vmatpush1.msra.mxu1 %v8863_v37  ;;  %v621_v42 = vpop.f32.mrf.mxu0  ;;  %12769 = vst [vmem:[#allocation33_spill] sm:$0xff] %v9010_v36  ;;  %12770 = vst [vmem:[#allocation34_spill] sm:$0xff] %v9016_v38 }
 0x1f8   :  { %v622_v44 = vadd.f32 %v6500_v28, %v621_v42  ;;  %876 = vmatprep.subr.mxu1 %v8868_v39  ;;  %7039 = vmatmul.mubr.msk.f32.gmra.mxu1 %vm535_vm1, %v626_v40  ;;  %v8974_v28 = vld [vmem:[%s12414_s4 + $0xe8] sm:$0xff]  ;;  %v9028_v42 = vld [vmem:[%s12414_s4 + $0xa0] sm:$0xff] }
 0x1f9   :  { %877 = vmatpush1.msra.mxu1 %v8871_v41  ;;  %v7018_v46 = vpop.f32.mrf.mxu0  ;;  %7041 = vmatprep.mubr.msk.f32.mxu1 %vm8470_vm0, %v12420_v11  ;;  %12763 = vst [vmem:[#allocation27_spill] sm:$0xff] %v8974_v28  ;;  %v9022_v40 = vld [vmem:[%s12414_s4 + $0xa8] sm:$0xff]  ;;  %12772 = vst [vmem:[#allocation36_spill] sm:$0xff] %v9028_v42 }
 0x1fa   :  { %v627_v48 = vmax.f32 %v622_v44, 0.0  ;;  %878 = vmatprep.subr.mxu1 %v8874_v43  ;;  %12771 = vst [vmem:[#allocation35_spill] sm:$0xff] %v9022_v40  ;;  %v9034_v44 = vld [vmem:[%s12414_s4 + $0x98] sm:$0xff]  ;;  %v9040_v46 = vld [vmem:[%s12414_s4 + $0x90] sm:$0xff] }
 0x1fb   :  { %879 = vmatpush1.msra.mxu1 %v8878_v45  ;;  %12773 = vst [vmem:[#allocation37_spill] sm:$0xff] %v9034_v44  ;;  %12774 = vst [vmem:[#allocation38_spill] sm:$0xff] %v9040_v46 }
 0x1fc   :  { %880 = vmatprep.subr.mxu1 %v8883_v47  ;;  %7042 = vmatmul.mubr.msk.f32.gmra.mxu1 %vm535_vm1, %v627_v48  ;;  %v9046_v48 = vld [vmem:[%s12414_s4 + $0x88] sm:$0xff] }
 0x1fd   :  { %881 = vmatpush1.msra.mxu1 %v8886_v49  ;;  %920 = vmatprep.mubr.f32.mxu1 %v12420_v11  ;;  %12775 = vst [vmem:[#allocation39_spill] sm:$0xff] %v9046_v48 }
 0x1fe   :  { %882 = vmatprep.subr.mxu1 %v8889_v50 }
 0x1ff   :  { %883 = vmatpush1.msra.mxu1 %v8893_v51 }
 0x200   :  { %884 = vmatprep.subr.mxu1 %v8896_v52 }
 0x201   :  { %885 = vmatpush1.msra.mxu1 %v8900_v53 }
 0x202   :  { %886 = vmatprep.subr.mxu1 %v8903_v54 }
 0x203   :  { %887 = vmatpush1.msra.mxu1 %v8906_v55 }
 0x204   :  { %921 = vmatmul.mubr.f32.vlgmr.msra.gmra.mxu1 %v12420_v11  ;;  %960 = vmatprep.subr.mxu1 %v8964_v26 }
 0x205   :  { %1024 = vmatprep.mubr.f32.mxu1 %v12420_v11  ;;  %961 = vmatpush1.msra.mxu1 %v8969_v27  ;;  %v9148_v11 = vld [vmem:[%s12414_s4 + $0x8] sm:$0xff] }
 0x206   :  { %962 = vmatprep.subr.mxu1 %v8974_v28  ;;  %12792 = vst [vmem:[#allocation56_spill] sm:$0xff] %v9148_v11 }
 0x207   :  { %963 = vmatpush1.msra.mxu1 %v8980_v29 }
 0x208   :  { %964 = vmatprep.subr.mxu1 %v8986_v30 }
 0x209   :  { %965 = vmatpush1.msra.mxu1 %v8992_v31 }
 0x20a   :  { %966 = vmatprep.subr.mxu1 %v8998_v32  ;;  %v9375_v32 = vld [vmem:[%s12414_s4 + $0x100] sm:$0xff] }
 0x20b   :  { %967 = vmatpush1.msra.mxu1 %v9004_v34  ;;  %v9369_v34 = vld [vmem:[%s12414_s4 + $0x108] sm:$0xff]  ;;  %12797 = vst [vmem:[#allocation60_spill] sm:$0xff] %v9375_v32 }
 0x20c   :  { %968 = vmatprep.subr.mxu1 %v9010_v36 }
 0x20d   :  { %969 = vmatpush1.msra.mxu1 %v9016_v38 }
 0x20e   :  { %970 = vmatprep.subr.mxu1 %v9022_v40 }
 0x20f   :  { %v836_v8 = vpop.f32.mrf.mxu0  ;;  %971 = vmatpush1.msra.mxu1 %v9028_v42  ;;  %v9357_v42 = vld [vmem:[%s12414_s4 + $0x110] sm:$0xff] }
 0x210   :  { %v8954_v18 = vadd.f32 %v836_v8, %v8932_v0  ;;  %972 = vmatprep.subr.mxu1 %v9034_v44  ;;  %v9094_v8 = vld [vmem:[%s12414_s4 + $0x48] sm:$0xff]  ;;  %v9351_v44 = vld [vmem:[%s12414_s4 + $0x118] sm:$0xff] }
 0x211   :  { %v838_v10 = vpop.f32.mrf.mxu0  ;;  %973 = vmatpush1.msra.mxu1 %v9040_v46  ;;  %12783 = vst [vmem:[#allocation47_spill] sm:$0xff] %v9094_v8  ;;  %v9345_v46 = vld [vmem:[%s12414_s4 + $0x120] sm:$0xff] }
 0x212   :  { %v8946_v13 = vadd.f32 %v838_v10, %v8943_v9  ;;  %12760 = vst [vmem:[#allocation24_spill] sm:$0xff] %v8954_v18  ;;  %974 = vmatprep.subr.mxu1 %v9046_v48  ;;  %v9100_v10 = vld [vmem:[%s12414_s4 + $0x40] sm:$0xff]  ;;  %v9339_v48 = vld [vmem:[%s12414_s4 + $0x128] sm:$0xff] }
 0x213   :  { %975 = vmatpush1.msra.mxu1 %v9052_v56  ;;  %12784 = vst [vmem:[#allocation48_spill] sm:$0xff] %v9100_v10  ;;  %v9333_v56 = vld [vmem:[%s12414_s4 + $0x130] sm:$0xff] }
 0x214   :  { %12759 = vst [vmem:[#allocation23_spill] sm:$0xff] %v8946_v13  ;;  %976 = vmatprep.subr.mxu1 %v9058_v57  ;;  %v9321_v57 = vld [vmem:[%s12414_s4 + $0x140] sm:$0xff] }
 0x215   :  { %977 = vmatpush1.msra.mxu1 %v9064_v60  ;;  %v9315_v60 = vld [vmem:[%s12414_s4 + $0x148] sm:$0xff] }
 0x216   :  { %978 = vmatprep.subr.mxu1 %v9070_v61  ;;  %v9309_v61 = vld [vmem:[%s12414_s4 + $0x150] sm:$0xff] }
 0x2b4   :  { %v8934_v1 = vpop.f32.mrf.mxu1 }
 0x2b5   :  { %12755 = vst [vmem:[#allocation19_spill] sm:$0xff] %v8934_v1 }
 0x2b6   :  { %v7037_v2 = vpop.f32.mrf.mxu1 }
 0x2b7   :  { %v9076_v2 = vld [vmem:[%s12414_s4 + $0x60] sm:$0xff] }
 0x2b8   :  { %v8936_v3 = vpop.f32.mrf.mxu1  ;;  %12780 = vst [vmem:[#allocation44_spill] sm:$0xff] %v9076_v2  ;;  %979 = vmatpush1.msra.mxu1 %v9076_v2  ;;  %v9303_v2 = vld [vmem:[%s12414_s4 + $0x158] sm:$0xff] }
 0x2b9   :  { %12756 = vst [vmem:[#allocation20_spill] sm:$0xff] %v8936_v3 }
 0x2ba   :  { %v7040_v4 = vpop.f32.mrf.mxu1 }
 0x2bb   :  { %v9082_v4 = vld [vmem:[%s12414_s4 + $0x58] sm:$0xff] }
 0x2bc   :  { %v8938_v5 = vpop.f32.mrf.mxu1  ;;  %12781 = vst [vmem:[#allocation45_spill] sm:$0xff] %v9082_v4  ;;  %980 = vmatprep.subr.mxu1 %v9082_v4  ;;  %v9297_v4 = vld [vmem:[%s12414_s4 + $0x160] sm:$0xff] }
 0x2bd   :  { %12757 = vst [vmem:[#allocation21_spill] sm:$0xff] %v8938_v5  ;;  %v9154_v5 = vld [vmem:[%s12414_s4] sm:$0xff] }
 0x2be   :  { %v7043_v7 = vpop.f32.mrf.mxu1  ;;  %12793 = vst [vmem:[#allocation57_spill] sm:$0xff] %v9154_v5 }
 0x2bf   :  { %v9088_v7 = vld [vmem:[%s12414_s4 + $0x50] sm:$0xff] }
 0x2c0   :  { %12782 = vst [vmem:[#allocation46_spill] sm:$0xff] %v9088_v7  ;;  %981 = vmatpush1.msra.mxu1 %v9088_v7  ;;  %v9285_v7 = vld [vmem:[%s12414_s4 + $0x170] sm:$0xff] }
 0x2c1   :  { %982 = vmatprep.subr.mxu1 %v9094_v8  ;;  %v9278_v8 = vld [vmem:[%s12414_s4 + $0x178] sm:$0xff] }
 0x2c2   :  { %983 = vmatpush1.msra.mxu1 %v9100_v10  ;;  %v9272_v10 = vld [vmem:[%s12414_s4 + $0x180] sm:$0xff] }
 0x2c4   :  { %v922_v12 = vpop.f32.mrf.mxu1 }
 0x2c5   :  { %v927_v19 = vadd.f32 %v922_v12, %v8954_v18  ;;  %v9106_v12 = vld [vmem:[%s12414_s4 + $0x38] sm:$0xff]  ;;  %v9168_v18 = vrot.slane %v8916_v58, %v8940_v6 }
 0x2c6   :  { %v924_v14 = vpop.f32.mrf.mxu1  ;;  %12785 = vst [vmem:[#allocation49_spill] sm:$0xff] %v9106_v12  ;;  %984 = vmatprep.subr.mxu1 %v9106_v12  ;;  %v9260_v12 = vld [vmem:[%s12414_s4 + $0x190] sm:$0xff] }
 0x2c7   :  { %v8949_v16 = vadd.f32 %v924_v14, %v8946_v13  ;;  %v6508_v20 = vmul.f32 -1.442695, %v927_v19  ;;  %v9112_v14 = vld [vmem:[%s12414_s4 + $0x30] sm:$0xff]  ;;  %v9124_v19 = vld [vmem:[%s12414_s4 + $0x20] sm:$0xff]  ;;  %12795 = vst [vmem:[#allocation58_spill] sm:$0xff] %v9168_v18  ;;  %v9327_v13 = vld [vmem:[%s12414_s4 + $0x138] sm:$0xff] }
 0x2c8   :  { %12786 = vst [vmem:[#allocation50_spill] sm:$0xff] %v9112_v14  ;;  %12788 = vst [vmem:[#allocation52_spill] sm:$0xff] %v9124_v19  ;;  %985 = vmatpush1.msra.mxu1 %v9112_v14  ;;  %v725_v14 = vld [vmem:[#allocation2 + $0x10] sm:$0xf] }
 0x2c9   :  { %7649 = vtanh.f32 %v8949_v16 }
 0x2ca   :  { %7651 = vpow2.f32 %v6508_v20  ;;  %v9130_v20 = vld [vmem:[%s12414_s4 + $0x18] sm:$0xff] }
 0x2cb   :  { %12789 = vst [vmem:[#allocation53_spill] sm:$0xff] %v9130_v20 }
 0x2d6   :  { %v7650_v17 = vpop.eup %7649 }
 0x2d7   :  { %944 = vrot.lane.b32.xlu0 %v7650_v17, %s8471_s5  ;;  %v7652_v21 = vpop.eup %7651  ;;  %v9118_v17 = vld [vmem:[%s12414_s4 + $0x28] sm:$0xff] }
 0x2d8   :  { %v935_v22 = vadd.f32 1.0, %v7652_v21  ;;  %12787 = vst [vmem:[#allocation51_spill] sm:$0xff] %v9118_v17  ;;  %986 = vmatprep.subr.mxu1 %v9118_v17  ;;  %v9136_v21 = vld [vmem:[%s12414_s4 + $0x10] sm:$0xff]  ;;  %v9253_v17 = vld [vmem:[%s12414_s4 + $0x198] sm:$0xff] }
 0x2d9   :  { %12790 = vst [vmem:[#allocation54_spill] sm:$0xff] %v9136_v21  ;;  %987 = vmatpush1.msra.mxu1 %v9124_v19  ;;  %v9247_v19 = vld [vmem:[%s12414_s4 + $0x1a0] sm:$0xff] }
 0x2da   :  { %7653 = vrcp.f32 %v935_v22  ;;  %988 = vmatprep.subr.mxu1 %v9130_v20  ;;  %v9241_v20 = vld [vmem:[%s12414_s4 + $0x1a8] sm:$0xff] }
 0x2db   :  { %989 = vmatpush1.msra.mxu1 %v9136_v21 }
 0x2dc   :  { %990 = vmatprep.subr.mxu1 %v9148_v11 }
 0x2dd   :  { %991 = vmatpush1.msra.mxu1 %v9154_v5 }
 0x2e7   :  { %v8957_v23 = vpop.eup %7653 }
 0x2e8   :  { %v942_v22 = vmul.f32 0.0, %v8957_v23 }
 0x349   :  { %v945_v24 = vpop.permute.xlu0 %944 }
 0x34a   :  { %v947_v25 = vmul.f32 %v8957_v23, %v945_v24  ;;  %v12794_v23 = vmov 0.0  }
 0x34b   :  { %7044 = vmatprep.subr.mxu1 %v12794_v23 }
 0x34c   :  { %949 = vrot.lane.b32.xlu0 %v947_v25, %s8471_s5 }
 0x3be   :  { %v950_v24 = vpop.permute.xlu0 %949 }
 0x3bf   :  { %v9142_v25 = vadd.f32 %v950_v24, %v942_v22  ;;  %v6509_v24 = vmul.f32 -1.442695, %v8949_v16 }
 0x3c1   :  { %12791 = vst [vmem:[#allocation55_spill] sm:$0xff] %v9142_v25  ;;  %7655 = vtanh.f32 %v9142_v25 }
 0x3c2   :  { %7657 = vpow2.f32 %v6509_v24 }
 0x3ce   :  { %v7656_v22 = vpop.eup %7655 }
 0x3cf   :  { %955 = vrot.lane.b32.xlu1 %v7656_v22, %s8471_s5  ;;  %v7658_v3 = vpop.eup %7657 }
 0x3d0   :  { %v936_v0 = vadd.f32 1.0, %v7658_v3 }
 0x3d2   :  { %7659 = vrcp.f32 %v936_v0 }
 0x3df   :  { %v7660_v9 = vpop.eup %7659 }
 0x441   :  { %v956_v25 = vpop.permute.xlu1 %955 }
 0x442   :  { %v9160_v1 = vmul.f32 %v7660_v9, %v956_v25 }
 0x444   :  { %6510 = vmatmul.mubr.msk.f32.vlgmr.msra.gmra.mxu1 %vm535_vm1, %v9160_v1 }
 0x445   :  { %7060 = vmatprep.mubr.msk.f32.mxu1 %vm8470_vm0, %v12794_v23 }
 0x504   :  { %v1026_v22 = vpop.f32.mrf.mxu1 }
 0x505   :  { %v1027_v3 = vadd.f32 %v1026_v22, %v8927_v62  ;;  %v9188_v22 = vld [vmem:[%s12414_s4 + $0x1f0] sm:$0xff] }
 0x506   :  { %v1028_v16 = vpop.f32.mrf.mxu1  ;;  %v9235_v62 = vld [vmem:[%s12414_s4 + $0x1b0] sm:$0xff] }
 0x507   :  { %v9171_v24 = vadd.f32 %v1028_v16, %v9168_v18  ;;  %v6511_v9 = vmul.f32 -1.442695, %v1027_v3  ;;  %v9183_v16 = vld [vmem:[%s12414_s4 + $0x1f8] sm:$0xff]  ;;  %v9211_v3 = vld [vmem:[%s12414_s4 + $0x1d0] sm:$0xff]  ;;  %v724_v18 = vld [vmem:[#allocation2 + $0x8] sm:$0xff] }
 0x508   :  { %1062 = vmatprep.subr.mxu0 %v9183_v16  ;;  %841 = vmatmul.mubr.f32.gmra.mxu0 %v724_v18  ;;  %v9266_v18 = vld [vmem:[%s12414_s4 + $0x188] sm:$0xff] }
 0x509   :  { %7661 = vtanh.f32 %v9171_v24  ;;  %1063 = vmatpush1.msra.mxu0 %v9188_v22  ;;  %846 = vmatprep.mubr.f32.mxu0 %v12794_v23 }
 0x50a   :  { %7663 = vpow2.f32 %v6511_v9  ;;  %v9217_v9 = vld [vmem:[%s12414_s4 + $0x1c8] sm:$0xff] }
 0x50c   :  { %847 = vmatmul.mubr.f32.gmra.mxu0 %v725_v14  ;;  %v9291_v14 = vld [vmem:[%s12414_s4 + $0x168] sm:$0xff] }
 0x50d   :  { %1126 = vmatprep.mubr.f32.mxu0 %v12794_v23 }
 0x516   :  { %v7662_v0 = vpop.eup %7661 }
 0x517   :  { %1046 = vrot.lane.b32.xlu1 %v7662_v0, %s8471_s5  ;;  %v7664_v25 = vpop.eup %7663  ;;  %v9205_v0 = vld [vmem:[%s12414_s4 + $0x1d8] sm:$0xff] }
 0x518   :  { %v1037_v5 = vadd.f32 1.0, %v7664_v25  ;;  %v9223_v25 = vld [vmem:[%s12414_s4 + $0x1c0] sm:$0xff] }
 0x51a   :  { %7665 = vrcp.f32 %v1037_v5  ;;  %v9193_v5 = vld [vmem:[%s12414_s4 + $0x1e8] sm:$0xff] }
 0x51b   :  { %1064 = vmatprep.subr.mxu0 %v9193_v5 }
 0x527   :  { %v9176_v11 = vpop.eup %7665 }
 0x528   :  { %v1044_v40 = vmul.f32 0.0, %v9176_v11 }
 0x589   :  { %v1047_v58 = vpop.permute.xlu1 %1046 }
 0x58a   :  { %v1049_v21 = vmul.f32 %v9176_v11, %v1047_v58  ;;  %v9229_v58 = vld [vmem:[%s12414_s4 + $0x1b8] sm:$0xff] }
 0x58c   :  { %1051 = vrot.lane.b32.xlu0 %v1049_v21, %s8471_s5  ;;  %v9199_v21 = vld [vmem:[%s12414_s4 + $0x1e0] sm:$0xff] }
 0x58d   :  { %1065 = vmatpush1.msra.mxu0 %v9199_v21 }
 0x58e   :  { %1066 = vmatprep.subr.mxu0 %v9205_v0 }
 0x58f   :  { %1067 = vmatpush1.msra.mxu0 %v9211_v3 }
 0x590   :  { %1068 = vmatprep.subr.mxu0 %v9217_v9 }
 0x591   :  { %1069 = vmatpush1.msra.mxu0 %v9223_v25 }
 0x592   :  { %1070 = vmatprep.subr.mxu0 %v9229_v58 }
 0x593   :  { %1071 = vmatpush1.msra.mxu0 %v9235_v62 }
 0x594   :  { %1072 = vmatprep.subr.mxu0 %v9241_v20 }
 0x595   :  { %1073 = vmatpush1.msra.mxu0 %v9247_v19 }
 0x596   :  { %1074 = vmatprep.subr.mxu0 %v9253_v17 }
 0x597   :  { %1075 = vmatpush1.msra.mxu0 %v9260_v12 }
 0x598   :  { %1076 = vmatprep.subr.mxu0 %v9266_v18 }
 0x599   :  { %1077 = vmatpush1.msra.mxu0 %v9272_v10 }
 0x59a   :  { %1078 = vmatprep.subr.mxu0 %v9278_v8 }
 0x59b   :  { %1079 = vmatpush1.msra.mxu0 %v9285_v7 }
 0x59c   :  { %1080 = vmatprep.subr.mxu0 %v9291_v14 }
 0x59d   :  { %1081 = vmatpush1.msra.mxu0 %v9297_v4 }
 0x59e   :  { %1082 = vmatprep.subr.mxu0 %v9303_v2 }
 0x59f   :  { %1083 = vmatpush1.msra.mxu0 %v9309_v61 }
 0x5a0   :  { %1084 = vmatprep.subr.mxu0 %v9315_v60 }
 0x5a1   :  { %1085 = vmatpush1.msra.mxu0 %v9321_v57 }
 0x5a2   :  { %1086 = vmatprep.subr.mxu0 %v9327_v13 }
 0x5a3   :  { %1087 = vmatpush1.msra.mxu0 %v9333_v56 }
 0x5a4   :  { %1088 = vmatprep.subr.mxu0 %v9339_v48 }
 0x5a5   :  { %1089 = vmatpush1.msra.mxu0 %v9345_v46 }
 0x5a6   :  { %1090 = vmatprep.subr.mxu0 %v9351_v44 }
 0x5a7   :  { %1091 = vmatpush1.msra.mxu0 %v9357_v42 }
 0x5a8   :  { %1092 = vmatprep.subr.mxu0 %v9369_v34 }
 0x5a9   :  { %1093 = vmatpush1.msra.mxu0 %v9375_v32 }
 0x5aa   :  { %7063 = vmatprep.subr.mxu0 %v12794_v23 }
 0x5c8   :  { %v9387_v28 = vpop.f32.mrf.mxu0 }
 0x5c9   :  { %12799 = vst [vmem:[#allocation62_spill] sm:$0xff] %v9387_v28 }
 0x5ca   :  { %v9389_v27 = vpop.f32.mrf.mxu0 }
 0x5cb   :  { %12800 = vst [vmem:[#allocation63_spill] sm:$0xff] %v9389_v27 }
 0x5fe   :  { %v1052_v38 = vpop.permute.xlu0 %1051 }
 0x5ff   :  { %v9363_v36 = vadd.f32 %v1052_v38, %v1044_v40  ;;  %v6512_v38 = vmul.f32 -1.442695, %v9171_v24 }
 0x601   :  { %12796 = vst [vmem:[#allocation59_spill] sm:$0xff] %v9363_v36  ;;  %7667 = vtanh.f32 %v9363_v36 }
 0x602   :  { %7669 = vpow2.f32 %v6512_v38 }
 0x60e   :  { %v7668_v11 = vpop.eup %7667 }
 0x60f   :  { %1057 = vrot.lane.b32.xlu1 %v7668_v11, %s8471_s5  ;;  %v7670_v40 = vpop.eup %7669  ;;  %v9391_v11 = vpop.f32.mrf.mxu0 }
 0x610   :  { %v1038_v36 = vadd.f32 1.0, %v7670_v40  ;;  %12801 = vst [vmem:[#allocation64_spill] sm:$0xff] %v9391_v11 }
 0x611   :  { %v9393_v24 = vpop.f32.mrf.mxu0 }
 0x612   :  { %7671 = vrcp.f32 %v1038_v36  ;;  %12802 = vst [vmem:[#allocation65_spill] sm:$0xff] %v9393_v24  ;;  %v9397_v36 = vrot.slane %v8921_v59, %v8940_v6  ;;  %v9403_v59 = vld [vmem:[#allocation8 + $0x38] sm:$0xff]  ;;  %v9405_v6 = vld [vmem:[#allocation8 + $0x30] sm:$0xff] }
 0x613   :  { %7045 = vmatpush3.msra.mxu1 %v9403_v59 }
 0x614   :  { %12803 = vst [vmem:[#allocation66_spill] sm:$0xff] %v9397_v36  ;;  %7046 = vmatprep.subr.mxu1 %v12794_v23 }
 0x615   :  { %7047 = vmatpush3.msra.mxu1 %v9405_v6 }
 0x616   :  { %7048 = vmatprep.subr.mxu1 %v12794_v23 }
 0x61f   :  { %v7672_v31 = vpop.eup %7671 }
 0x681   :  { %v1058_v30 = vpop.permute.xlu1 %1057 }
 0x682   :  { %v9381_v29 = vmul.f32 %v7672_v31, %v1058_v30 }
 0x684   :  { %12798 = vst [vmem:[#allocation61_spill] sm:$0xff] %v9381_v29  ;;  %6513 = vmatmul.mubr.msk.f32.vlgmr.msra.gmra.mxu0 %vm535_vm1, %v9381_v29 }
 0x685   :  { %7079 = vmatprep.mubr.msk.f32.mxu0 %vm8470_vm0, %v12794_v23 }
 0x744   :  { %v1128_v30 = vpop.f32.mrf.mxu0 }
 0x745   :  { %v1129_v28 = vadd.f32 %v1128_v30, %v8930_v63  ;;  %v9429_v30 = vld [vmem:[#allocation8 + $0x8] sm:$0xff]  ;;  %v9437_v63 = vld [vmem:[#allocation8 + $0x78] sm:$0xff] }
 0x746   :  { %v1130_v31 = vpop.f32.mrf.mxu0  ;;  %12808 = vst [vmem:[#allocation71_spill] sm:$0xff] %v9429_v30  ;;  %12810 = vst [vmem:[#allocation73_spill] sm:$0xff] %v9437_v63  ;;  %7064 = vmatpush3.msra.mxu0 %v9437_v63 }
 0x747   :  { %v1131_v38 = vadd.f32 %v1130_v31, %v9397_v36  ;;  %v6514_v29 = vmul.f32 -1.442695, %v1129_v28  ;;  %v9409_v31 = vld [vmem:[#allocation8 + $0x28] sm:$0xff]  ;;  %v9421_v28 = vld [vmem:[#allocation8 + $0x10] sm:$0xff]  ;;  %7065 = vmatprep.subr.mxu0 %v12794_v23 }
 0x748   :  { %7049 = vmatpush3.msra.mxu1 %v9409_v31  ;;  %12806 = vst [vmem:[#allocation69_spill] sm:$0xff] %v9421_v28  ;;  %v9439_v36 = vld [vmem:[#allocation8 + $0x70] sm:$0xff] }
 0x749   :  { %7673 = vtanh.f32 %v1131_v38  ;;  %7050 = vmatprep.subr.mxu1 %v12794_v23  ;;  %12811 = vst [vmem:[#allocation74_spill] sm:$0xff] %v9439_v36  ;;  %7066 = vmatpush3.msra.mxu0 %v9439_v36 }
 0x74a   :  { %7675 = vpow2.f32 %v6514_v29  ;;  %7067 = vmatprep.subr.mxu0 %v12794_v23 }
 0x756   :  { %v7674_v40 = vpop.eup %7673 }
 0x757   :  { %1148 = vrot.lane.b32.xlu0 %v7674_v40, %s8471_s5  ;;  %v7676_v27 = vpop.eup %7675  ;;  %v9434_v40 = vld [vmem:[#allocation8] sm:$0xff] }
 0x758   :  { %v1139_v11 = vadd.f32 1.0, %v7676_v27  ;;  %v9413_v27 = vld [vmem:[#allocation8 + $0x20] sm:$0xff]  ;;  %12809 = vst [vmem:[#allocation72_spill] sm:$0xff] %v9434_v40 }
 0x759   :  { %12804 = vst [vmem:[#allocation67_spill] sm:$0xff] %v9413_v27  ;;  %7051 = vmatpush3.msra.mxu1 %v9413_v27 }
 0x75a   :  { %7677 = vrcp.f32 %v1139_v11  ;;  %7052 = vmatprep.subr.mxu1 %v12794_v23 }
 0x767   :  { %v7678_v24 = vpop.eup %7677 }
 0x768   :  { %v1146_v29 = vmul.f32 0.0, %v7678_v24 }
 0x7c9   :  { %v1149_v26 = vpop.permute.xlu0 %1148 }
 0x7ca   :  { %v1151_v32 = vmul.f32 %v7678_v24, %v1149_v26  ;;  %v9417_v26 = vld [vmem:[#allocation8 + $0x18] sm:$0xff]  ;;  %v9444_v24 = vld [vmem:[#allocation8 + $0x68] sm:$0xff] }
 0x7cb   :  { %12805 = vst [vmem:[#allocation68_spill] sm:$0xff] %v9417_v26  ;;  %7053 = vmatpush3.msra.mxu1 %v9417_v26  ;;  %12812 = vst [vmem:[#allocation75_spill] sm:$0xff] %v9444_v24  ;;  %7068 = vmatpush3.msra.mxu0 %v9444_v24  ;;  %v6515_v24 = vmul.f32 -1.442695, %v1131_v38  ;;  %v9473_v38 = vld [vmem:[#allocation8 + $0x40] sm:$0xff] }
 0x7cc   :  { %1153 = vrot.lane.b32.xlu1 %v1151_v32, %s8471_s5  ;;  %7054 = vmatprep.subr.mxu1 %v12794_v23  ;;  %12817 = vst [vmem:[#allocation80_spill] sm:$0xff] %v9473_v38 }
 0x7cd   :  { %7055 = vmatpush3.msra.mxu1 %v9421_v28  ;;  %7069 = vmatprep.subr.mxu0 %v12794_v23 }
 0x7ce   :  { %7056 = vmatprep.subr.mxu1 %v12794_v23 }
 0x7cf   :  { %7057 = vmatpush3.msra.mxu1 %v9429_v30 }
 0x7d0   :  { %7058 = vmatprep.subr.mxu1 %v12794_v23 }
 0x7d1   :  { %7059 = vmatpush3.msra.mxu1 %v9434_v40 }
 0x7d2   :  { %7082 = vmatprep.subr.mxu1 %v12794_v23 }
 0x83e   :  { %v1154_v32 = vpop.permute.xlu1 %1153 }
 0x83f   :  { %v9427_v11 = vadd.f32 %v1154_v32, %v1146_v29  ;;  %v9448_v29 = vld [vmem:[#allocation8 + $0x60] sm:$0xff]  ;;  %v9452_v32 = vld [vmem:[#allocation8 + $0x58] sm:$0xff] }
 0x840   :  { %12813 = vst [vmem:[#allocation76_spill] sm:$0xff] %v9448_v29  ;;  %12814 = vst [vmem:[#allocation77_spill] sm:$0xff] %v9452_v32  ;;  %7070 = vmatpush3.msra.mxu0 %v9448_v29 }
 0x841   :  { %12807 = vst [vmem:[#allocation70_spill] sm:$0xff] %v9427_v11  ;;  %7679 = vtanh.f32 %v9427_v11  ;;  %7071 = vmatprep.subr.mxu0 %v12794_v23  ;;  %v9456_v11 = vld [vmem:[#allocation8 + $0x50] sm:$0xff] }
 0x842   :  { %12815 = vst [vmem:[#allocation78_spill] sm:$0xff] %v9456_v11  ;;  %7072 = vmatpush3.msra.mxu0 %v9452_v32  ;;  %7681 = vpow2.f32 %v6515_v24  ;;  %v9487_v24 = vld [vmem:[#allocation8 + $0xe0] sm:$0xff] }
 0x843   :  { %7073 = vmatprep.subr.mxu0 %v12794_v23 }
 0x844   :  { %7074 = vmatpush3.msra.mxu0 %v9456_v11 }
 0x845   :  { %7075 = vmatprep.subr.mxu0 %v12794_v23 }
 0x84e   :  { %v7680_v63 = vpop.eup %7679 }
 0x84f   :  { %1159 = vrot.lane.b32.xlu0 %v7680_v63, %s8471_s5  ;;  %v7682_v36 = vpop.eup %7681  ;;  %v9469_v63 = vld [vmem:[#allocation8 + $0x48] sm:$0xff] }
 0x850   :  { %v1140_v40 = vadd.f32 1.0, %v7682_v36  ;;  %12816 = vst [vmem:[#allocation79_spill] sm:$0xff] %v9469_v63  ;;  %7076 = vmatpush3.msra.mxu0 %v9469_v63  ;;  %v9477_v36 = vld [vmem:[#allocation8 + $0xf8] sm:$0xff] }
 0x851   :  { %7077 = vmatprep.subr.mxu0 %v12794_v23  ;;  %12818 = vst [vmem:[#allocation81_spill] sm:$0xff] %v9477_v36 }
 0x852   :  { %7683 = vrcp.f32 %v1140_v40  ;;  %7078 = vmatpush3.msra.mxu0 %v9473_v38  ;;  %v9483_v40 = vld [vmem:[#allocation8 + $0xe8] sm:$0xff] }
 0x853   :  { %1404 = vmatprep.subr.mxu0 %v8821_v15  ;;  %v9491_v15 = vld [vmem:[#allocation8 + $0xd8] sm:$0xff] }
 0x85f   :  { %v7684_v29 = vpop.eup %7683 }
 0x8c1   :  { %v1160_v30 = vpop.permute.xlu0 %1159 }
 0x8c2   :  { %v9463_v28 = vmul.f32 %v7684_v29, %v1160_v30  ;;  %v9479_v30 = vld [vmem:[#allocation8 + $0xf0] sm:$0xff]  ;;  %v9497_v29 = vld [vmem:[#allocation10] ss:$0 sm:$0xff] }
 0x8c3   :  { %12819 = vst [vmem:[#allocation82_spill] sm:$0xff] %v9479_v30 }
 0x8c4   :  { %7061 = vmatmul.mubr.msk.f32.vlgmr.msra.gmra.mxu1 %vm535_vm1, %v9463_v28 }
 0x8c5   :  { %7098 = vmatprep.mubr.msk.f32.mxu1 %vm8470_vm0, %v12794_v23  ;;  %7083 = vmatpush3.msra.mxu1 %v9477_v36 }
 0x8c6   :  { %7084 = vmatprep.subr.mxu1 %v12794_v23 }
 0x8c7   :  { %7085 = vmatpush3.msra.mxu1 %v9479_v30 }
 0x8c8   :  { %7086 = vmatprep.subr.mxu1 %v12794_v23 }
 0x8c9   :  { %7087 = vmatpush3.msra.mxu1 %v9483_v40 }
 0x8ca   :  { %7088 = vmatprep.subr.mxu1 %v12794_v23 }
 0x8cb   :  { %7089 = vmatpush3.msra.mxu1 %v9487_v24 }
 0x8cc   :  { %7090 = vmatprep.subr.mxu1 %v12794_v23 }
 0x8cd   :  { %7091 = vmatpush3.msra.mxu1 %v9491_v15 }
 0x8ce   :  { %7092 = vmatprep.subr.mxu1 %v12794_v23 }
 0x984   :  { %v1232_v30 = vpop.f32.mrf.mxu1 }
 0x985   :  { %v1233_v36 = vadd.f32 %v9497_v29, %v1232_v30  ;;  %v12832_v30 = vld [vmem:[#allocation35_spill] sm:$0xff] }
 0x986   :  { %v7062_v38 = vpop.f32.mrf.mxu1 }
 0x987   :  { %v1236_v63 = vmax.f32 %v1233_v36, 0.0  ;;  %v12830_v38 = vld [vmem:[#allocation33_spill] sm:$0xff]  ;;  %v12831_v36 = vld [vmem:[#allocation34_spill] sm:$0xff] }
 0x989   :  { %7080 = vmatmul.mubr.msk.f32.vlgmr.msra.gmra.mxu0 %vm535_vm1, %v1236_v63  ;;  %v12829_v63 = vld [vmem:[#allocation32_spill] sm:$0xff] }
 0x98a   :  { %1405 = vmatpush1.msra.mxu0 %v8858_v33  ;;  %1452 = vmatprep.mubr.f32.mxu0 %v12794_v23  ;;  %v12820_v33 = vld [vmem:[#allocation60_spill] sm:$0xff] }
 0x98b   :  { %1406 = vmatprep.subr.mxu0 %v8860_v35  ;;  %v9553_v35 = vld [vmem:[#allocation8 + $0xd0] sm:$0xff] }
 0x98c   :  { %1407 = vmatpush1.msra.mxu0 %v8863_v37  ;;  %7093 = vmatpush3.msra.mxu1 %v9553_v35  ;;  %v9557_v37 = vld [vmem:[#allocation8 + $0xc8] sm:$0xff] }
 0x98d   :  { %1408 = vmatprep.subr.mxu0 %v8868_v39  ;;  %7094 = vmatprep.subr.mxu1 %v12794_v23  ;;  %v9560_v39 = vld [vmem:[#allocation8 + $0xc0] sm:$0xff] }
 0x98e   :  { %1409 = vmatpush1.msra.mxu0 %v8871_v41  ;;  %7095 = vmatpush3.msra.mxu1 %v9557_v37  ;;  %v12821_v41 = vld [vmem:[#allocation25_spill] sm:$0xff] }
 0x98f   :  { %1410 = vmatprep.subr.mxu0 %v8874_v43  ;;  %7096 = vmatprep.subr.mxu1 %v12794_v23  ;;  %v9565_v43 = vld [vmem:[#allocation10 + $0x1] ss:$0 sm:$0xff] }
 0x990   :  { %1411 = vmatpush1.msra.mxu0 %v8878_v45  ;;  %7097 = vmatpush3.msra.mxu1 %v9560_v39  ;;  %12822 = vst [vmem:[#allocation60_spill] sm:$0xff] %v9565_v43 }
 0x991   :  { %1412 = vmatprep.subr.mxu0 %v8883_v47  ;;  %1509 = vmatprep.subr.mxu1 %v12821_v41 }
 0x992   :  { %1413 = vmatpush1.msra.mxu0 %v8886_v49 }
 0x993   :  { %1414 = vmatprep.subr.mxu0 %v8889_v50 }
 0x994   :  { %1415 = vmatpush1.msra.mxu0 %v8893_v51  ;;  %v12823_v51 = vld [vmem:[#allocation26_spill] sm:$0xff] }
 0x995   :  { %1416 = vmatprep.subr.mxu0 %v8896_v52  ;;  %v12824_v52 = vld [vmem:[#allocation27_spill] sm:$0xff] }
 0x996   :  { %1417 = vmatpush1.msra.mxu0 %v8900_v53  ;;  %v12825_v53 = vld [vmem:[#allocation28_spill] sm:$0xff] }
 0x997   :  { %1418 = vmatprep.subr.mxu0 %v8903_v54  ;;  %v12826_v54 = vld [vmem:[#allocation29_spill] sm:$0xff] }
 0x998   :  { %1419 = vmatpush1.msra.mxu0 %v8906_v55  ;;  %v12827_v55 = vld [vmem:[#allocation30_spill] sm:$0xff] }
 0x999   :  { %6519 = vmatmul.mubr.msk.f32.vlgmr.msra.gmra.mxu0 %vm535_vm1, %v9160_v1  ;;  %1614 = vmatprep.subr.mxu0 %v9183_v16  ;;  %v12828_v1 = vld [vmem:[#allocation31_spill] sm:$0xff] }
 0x99a   :  { %1615 = vmatpush1.msra.mxu0 %v9188_v22  ;;  %1678 = vmatprep.mubr.f32.mxu0 %v12794_v23 }
 0x99b   :  { %1616 = vmatprep.subr.mxu0 %v9193_v5 }
 0x99c   :  { %1617 = vmatpush1.msra.mxu0 %v9199_v21 }
 0x99d   :  { %1618 = vmatprep.subr.mxu0 %v9205_v0 }
 0x99e   :  { %1619 = vmatpush1.msra.mxu0 %v9211_v3 }
 0x99f   :  { %1620 = vmatprep.subr.mxu0 %v9217_v9 }
 0x9a0   :  { %1621 = vmatpush1.msra.mxu0 %v9223_v25 }
 0x9a1   :  { %1622 = vmatprep.subr.mxu0 %v9229_v58 }
 0x9a2   :  { %1623 = vmatpush1.msra.mxu0 %v9235_v62 }
 0x9a3   :  { %1624 = vmatprep.subr.mxu0 %v9241_v20 }
 0x9a4   :  { %1625 = vmatpush1.msra.mxu0 %v9247_v19 }
 0x9a5   :  { %1626 = vmatprep.subr.mxu0 %v9253_v17 }
 0x9a6   :  { %1627 = vmatpush1.msra.mxu0 %v9260_v12 }
 0x9a7   :  { %1628 = vmatprep.subr.mxu0 %v9266_v18 }
 0x9a8   :  { %1629 = vmatpush1.msra.mxu0 %v9272_v10 }
 0x9a9   :  { %1630 = vmatprep.subr.mxu0 %v9278_v8 }
 0x9aa   :  { %1631 = vmatpush1.msra.mxu0 %v9285_v7 }
 0x9ab   :  { %1632 = vmatprep.subr.mxu0 %v9291_v14 }
 0x9ac   :  { %1633 = vmatpush1.msra.mxu0 %v9297_v4 }
 0x9ad   :  { %1634 = vmatprep.subr.mxu0 %v9303_v2 }
 0x9ae   :  { %1635 = vmatpush1.msra.mxu0 %v9309_v61 }
 0x9af   :  { %1636 = vmatprep.subr.mxu0 %v9315_v60 }
 0x9b0   :  { %1637 = vmatpush1.msra.mxu0 %v9321_v57 }
 0x9b1   :  { %1638 = vmatprep.subr.mxu0 %v9327_v13 }
 0x9b2   :  { %1639 = vmatpush1.msra.mxu0 %v9333_v56 }
 0x9b3   :  { %1640 = vmatprep.subr.mxu0 %v9339_v48 }
 0x9b4   :  { %1641 = vmatpush1.msra.mxu0 %v9345_v46 }
 0x9b5   :  { %1642 = vmatprep.subr.mxu0 %v9351_v44 }
 0x9b6   :  { %1643 = vmatpush1.msra.mxu0 %v9357_v42 }
 0x9b7   :  { %1644 = vmatprep.subr.mxu0 %v9369_v34 }
 0x9b8   :  { %1645 = vmatpush1.msra.mxu0 %v12820_v33 }
 0x9b9   :  { %7120 = vmatprep.subr.mxu0 %v12794_v23 }
 0xa49   :  { %v1306_v45 = vpop.f32.mrf.mxu0 }
 0xa4a   :  { %v1307_v47 = vadd.f32 %v9565_v43, %v1306_v45  ;;  %v12833_v45 = vld [vmem:[#allocation36_spill] sm:$0xff]  ;;  %v12857_v43 = vld [vmem:[#allocation19_spill] sm:$0xff] }
 0xa4b   :  { %v7081_v49 = vpop.f32.mrf.mxu0 }
 0xa4c   :  { %v1310_v50 = vmax.f32 %v1307_v47, 0.0  ;;  %v12834_v47 = vld [vmem:[#allocation37_spill] sm:$0xff] }
 0xa4e   :  { %7099 = vmatmul.mubr.msk.f32.vlgmr.msra.gmra.mxu1 %vm535_vm1, %v1310_v50  ;;  %v12835_v50 = vld [vmem:[#allocation38_spill] sm:$0xff] }
 0xa4f   :  { %1510 = vmatpush1.msra.mxu1 %v12823_v51  ;;  %1573 = vmatprep.mubr.f32.mxu1 %v12794_v23 }
 0xa50   :  { %1511 = vmatprep.subr.mxu1 %v12824_v52  ;;  %v12836_v52 = vld [vmem:[#allocation39_spill] sm:$0xff] }
 0xa51   :  { %1512 = vmatpush1.msra.mxu1 %v12825_v53  ;;  %v12837_v53 = vld [vmem:[#allocation40_spill] sm:$0xff] }
 0xa52   :  { %1513 = vmatprep.subr.mxu1 %v12826_v54  ;;  %v12838_v54 = vld [vmem:[#allocation23_spill] sm:$0xff] }
 0xa53   :  { %1514 = vmatpush1.msra.mxu1 %v12827_v55 }
 0xa54   :  { %1515 = vmatprep.subr.mxu1 %v12828_v1  ;;  %v12839_v1 = vld [vmem:[#allocation41_spill] sm:$0xff] }
 0xa55   :  { %1516 = vmatpush1.msra.mxu1 %v12829_v63  ;;  %v12840_v63 = vld [vmem:[#allocation42_spill] sm:$0xff] }
 0xa56   :  { %1517 = vmatprep.subr.mxu1 %v12830_v38  ;;  %v12841_v38 = vld [vmem:[#allocation43_spill] sm:$0xff] }
 0xa57   :  { %1518 = vmatpush1.msra.mxu1 %v12831_v36  ;;  %v12842_v36 = vld [vmem:[#allocation44_spill] sm:$0xff] }
 0xa58   :  { %1519 = vmatprep.subr.mxu1 %v12832_v30  ;;  %v12843_v30 = vld [vmem:[#allocation45_spill] sm:$0xff] }
 0xa59   :  { %v1454_v41 = vpop.f32.mrf.mxu0  ;;  %1520 = vmatpush1.msra.mxu1 %v12833_v45  ;;  %v12844_v45 = vld [vmem:[#allocation46_spill] sm:$0xff] }
 0xa5a   :  { %1521 = vmatprep.subr.mxu1 %v12834_v47  ;;  %v12845_v47 = vld [vmem:[#allocation47_spill] sm:$0xff] }
 0xa5b   :  { %v1456_v49 = vpop.f32.mrf.mxu0  ;;  %1522 = vmatpush1.msra.mxu1 %v12835_v50  ;;  %v12847_v50 = vld [vmem:[#allocation49_spill] sm:$0xff] }
 0xa5c   :  { %v1462_v51 = vrot.slane %v1456_v49, 6  ;;  %1523 = vmatprep.subr.mxu1 %v12836_v52  ;;  %v12846_v49 = vld [vmem:[#allocation48_spill] sm:$0xff]  ;;  %v12849_v52 = vld [vmem:[#allocation51_spill] sm:$0xff] }
 0xa5d   :  { %1524 = vmatpush1.msra.mxu1 %v12837_v53  ;;  %v12850_v53 = vld [vmem:[#allocation52_spill] sm:$0xff] }
 0xa5e   :  { %v1466_v55 = vadd.f32 %v1462_v51, %v12838_v54  ;;  %1525 = vmatprep.subr.mxu1 %v12839_v1  ;;  %v12848_v51 = vld [vmem:[#allocation50_spill] sm:$0xff]  ;;  %v12851_v1 = vld [vmem:[#allocation53_spill] sm:$0xff]  ;;  %v6504_v54 = vld [vmem:[#allocation10 + $0x4] ss:$0 sm:$0xff] }
 0xa5f   :  { %1526 = vmatpush1.msra.mxu1 %v12840_v63  ;;  %v12852_v63 = vld [vmem:[#allocation54_spill] sm:$0xff] }
 0xa60   :  { %1527 = vmatprep.subr.mxu1 %v12841_v38  ;;  %7685 = vtanh.f32 %v1466_v55  ;;  %v12853_v38 = vld [vmem:[#allocation56_spill] sm:$0xff] }
 0xa61   :  { %1528 = vmatpush1.msra.mxu1 %v12842_v36  ;;  %v12854_v36 = vld [vmem:[#allocation57_spill] sm:$0xff] }
 0xa62   :  { %1529 = vmatprep.subr.mxu1 %v12843_v30 }
 0xa63   :  { %1530 = vmatpush1.msra.mxu1 %v12844_v45  ;;  %v1461_v45 = vrot.slane %v1454_v41, 6 }
 0xa64   :  { %1531 = vmatprep.subr.mxu1 %v12845_v47  ;;  %v12855_v47 = vld [vmem:[#allocation24_spill] sm:$0xff] }
 0xa65   :  { %1532 = vmatpush1.msra.mxu1 %v12846_v49  ;;  %v1465_v49 = vadd.f32 %v1461_v45, %v12855_v47 }
 0xa66   :  { %1533 = vmatprep.subr.mxu1 %v12847_v50 }
 0xa67   :  { %1534 = vmatpush1.msra.mxu1 %v12848_v51  ;;  %v6520_v50 = vmul.f32 -1.442695, %v1465_v49 }
 0xa68   :  { %1535 = vmatprep.subr.mxu1 %v12849_v52 }
 0xa69   :  { %1536 = vmatpush1.msra.mxu1 %v12850_v53  ;;  %7687 = vpow2.f32 %v6520_v50  ;;  %v12859_v50 = vld [vmem:[#allocation55_spill] sm:$0xff] }
 0xa6a   :  { %1537 = vmatprep.subr.mxu1 %v12851_v1 }
 0xa6b   :  { %1538 = vmatpush1.msra.mxu1 %v12852_v63 }
 0xa6c   :  { %1539 = vmatprep.subr.mxu1 %v12853_v38  ;;  %v12856_v38 = vld [vmem:[#allocation61_spill] sm:$0xff] }
 0xa6d   :  { %1540 = vmatpush1.msra.mxu1 %v12854_v36  ;;  %v7686_v30 = vpop.eup %7685  ;;  %v1501_v36 = vrot.slane %v12856_v38, 6  ;;  %v6521_v38 = vmul.f32 -1.442695, %v1466_v55  ;;  %v12860_v55 = vld [vmem:[#allocation69_spill] sm:$0xff] }
 0xa6e   :  { %7101 = vmatprep.subr.mxu1 %v12794_v23  ;;  %1485 = vrot.lane.b32.xlu1 %v7686_v30, %s8471_s5  ;;  %v9609_v30 = vadd.f32 %v6504_v54, %v12857_v43 }
 0xa76   :  { %v7688_v51 = vpop.eup %7687 }
 0xa77   :  { %v1473_v52 = vadd.f32 1.0, %v7688_v51  ;;  %v1481_v51 = vrot.slane %v12859_v50, 6  ;;  %v12861_v50 = vld [vmem:[#allocation71_spill] sm:$0xff] }
 0xa79   :  { %7689 = vrcp.f32 %v1473_v52 }
 0xa86   :  { %v7690_v53 = vpop.eup %7689 }
 0xa87   :  { %v1483_v52 = vmul.f32 %v7690_v53, %v1481_v51  ;;  %v12862_v51 = vld [vmem:[#allocation72_spill] sm:$0xff] }
 0xae0   :  { %v1486_v1 = vpop.permute.xlu1 %1485 }
 0xae1   :  { %v1488_v63 = vmul.f32 %v7690_v53, %v1486_v1 }
 0xae3   :  { %1490 = vrot.lane.b32.xlu0 %v1488_v63, %s8471_s5 }
 0xae7   :  { %1502 = vrot.lane.b32.xlu0 %v1501_v36, %s8471_s5 }
 0xb0e   :  { %v1380_v41 = vpop.f32.mrf.mxu1 }
 0xb0f   :  { %v9612_v45 = vadd.f32 %v1380_v41, %v9609_v30 }
 0xb10   :  { %v7100_v49 = vpop.f32.mrf.mxu1 }
 0xb11   :  { %12858 = vst [vmem:[#allocation25_spill] sm:$0xff] %v9612_v45 }
 0xb55   :  { %v1491_v47 = vpop.permute.xlu0 %1490 }
 0xb56   :  { %v9615_v1 = vadd.f32 %v1491_v47, %v1483_v52 }
 0xb58   :  { %7691 = vtanh.f32 %v9615_v1 }
 0xb59   :  { %7693 = vpow2.f32 %v6521_v38  ;;  %v1503_v49 = vpop.permute.xlu0 %1502  ;;  %v12863_v38 = vld [vmem:[#allocation58_spill] sm:$0xff] }
 0xb65   :  { %v7692_v63 = vpop.eup %7691 }
 0xb66   :  { %1496 = vrot.lane.b32.xlu1 %v7692_v63, %s8471_s5  ;;  %v7694_v43 = vpop.eup %7693 }
 0xb67   :  { %v1474_v54 = vadd.f32 1.0, %v7694_v43 }
 0xb69   :  { %7695 = vrcp.f32 %v1474_v54 }
 0xb76   :  { %v7696_v36 = vpop.eup %7695 }
 0xbd8   :  { %v1497_v41 = vpop.permute.xlu1 %1496 }
 0xbd9   :  { %v9619_v45 = vmul.f32 %v7696_v36, %v1497_v41  ;;  %v12864_v36 = vld [vmem:[#allocation16_spill] sm:$0xff] }
 0xbdb   :  { %v1505_v53 = vsel %vm535_vm1, %v9619_v45, %v1503_v49 }
 0xbdc   :  { %v1507_v47 = vrot.slane %v1505_v53, 2 }
 0xbde   :  { %1574 = vmatmul.mubr.f32.vlgmr.msra.gmra.mxu1 %v1507_v47 }
 0xbdf   :  { %7102 = vmatpush3.msra.mxu1 %v9403_v59  ;;  %7117 = vmatprep.mubr.msk.f32.mxu1 %vm8470_vm0, %v12794_v23 }
 0xbe0   :  { %7103 = vmatprep.subr.mxu1 %v12794_v23 }
 0xbe1   :  { %7104 = vmatpush3.msra.mxu1 %v9405_v6 }
 0xbe2   :  { %7105 = vmatprep.subr.mxu1 %v12794_v23 }
 0xbe3   :  { %7106 = vmatpush3.msra.mxu1 %v9409_v31 }
 0xbe4   :  { %7107 = vmatprep.subr.mxu1 %v12794_v23 }
 0xbe5   :  { %7108 = vmatpush3.msra.mxu1 %v9413_v27 }
 0xbe6   :  { %7109 = vmatprep.subr.mxu1 %v12794_v23 }
 0xbe7   :  { %7110 = vmatpush3.msra.mxu1 %v9417_v26 }
 0xbe8   :  { %7111 = vmatprep.subr.mxu1 %v12794_v23 }
 0xbe9   :  { %7112 = vmatpush3.msra.mxu1 %v12860_v55 }
 0xbea   :  { %7113 = vmatprep.subr.mxu1 %v12794_v23 }
 0xbeb   :  { %7114 = vmatpush3.msra.mxu1 %v12861_v50 }
 0xbec   :  { %7115 = vmatprep.subr.mxu1 %v12794_v23 }
 0xbed   :  { %7116 = vmatpush3.msra.mxu1 %v12862_v51 }
 0xbee   :  { %7139 = vmatprep.subr.mxu1 %v12794_v23 }
 0xc9e   :  { %v1575_v52 = vpop.f32.mrf.mxu1 }
 0xc9f   :  { %v1576_v41 = vadd.f32 %v1575_v52, %v12864_v36 }
 0xca0   :  { %v1577_v63 = vpop.f32.mrf.mxu1 }
 0xca1   :  { %v1578_v43 = vadd.f32 %v1577_v63, %v12863_v38  ;;  %v6522_v49 = vmul.f32 -1.442695, %v1576_v41  ;;  %v12865_v63 = vld [vmem:[#allocation59_spill] sm:$0xff] }
 0xca3   :  { %7697 = vtanh.f32 %v1578_v43 }
 0xca4   :  { %7699 = vpow2.f32 %v6522_v49 }
 0xcb0   :  { %v7698_v54 = vpop.eup %7697 }
 0xcb1   :  { %1595 = vrot.lane.b32.xlu1 %v7698_v54, %s8471_s5  ;;  %v7700_v53 = vpop.eup %7699  ;;  %v6523_v54 = vmul.f32 -1.442695, %v1578_v43  ;;  %v12869_v43 = vld [vmem:[#allocation75_spill] sm:$0xff] }
 0xcb2   :  { %v1586_v47 = vadd.f32 1.0, %v7700_v53 }
 0xcb4   :  { %7701 = vrcp.f32 %v1586_v47  ;;  %v12870_v47 = vld [vmem:[#allocation76_spill] sm:$0xff] }
 0xcc1   :  { %v7702_v50 = vpop.eup %7701 }
 0xcc2   :  { %v1593_v38 = vmul.f32 %v7702_v50, %v12865_v63  ;;  %v12871_v63 = vld [vmem:[#allocation79_spill] sm:$0xff] }
 0xd23   :  { %v1596_v55 = vpop.permute.xlu1 %1595 }
 0xd24   :  { %v1598_v51 = vmul.f32 %v7702_v50, %v1596_v55 }
 0xd26   :  { %1600 = vrot.lane.b32.xlu0 %v1598_v51, %s8471_s5 }
 0xd2a   :  { %1610 = vrot.lane.b32.xlu0 %v9463_v28, %s8471_s5 }
 0xd98   :  { %v1601_v26 = vpop.permute.xlu0 %1600 }
 0xd99   :  { %v9648_v27 = vadd.f32 %v1601_v26, %v1593_v38  ;;  %v12867_v26 = vld [vmem:[#allocation73_spill] sm:$0xff]  ;;  %v12868_v38 = vld [vmem:[#allocation74_spill] sm:$0xff] }
 0xd9b   :  { %12866 = vst [vmem:[#allocation26_spill] sm:$0xff] %v9648_v27  ;;  %7703 = vtanh.f32 %v9648_v27 }
 0xd9c   :  { %7705 = vpow2.f32 %v6523_v54  ;;  %v1611_v28 = vpop.permute.xlu0 %1610  ;;  %v9673_v54 = vld [vmem:[#allocation7 + $0x78] sm:$0xff] }
 0xd9d   :  { %12873 = vst [vmem:[#allocation27_spill] sm:$0xff] %v9673_v54 }
 0xda8   :  { %v7704_v52 = vpop.eup %7703 }
 0xda9   :  { %1606 = vrot.lane.b32.xlu1 %v7704_v52, %s8471_s5  ;;  %v7706_v41 = vpop.eup %7705  ;;  %v12872_v52 = vld [vmem:[#allocation80_spill] sm:$0xff] }
 0xdaa   :  { %v1587_v49 = vadd.f32 1.0, %v7706_v41 }
 0xdac   :  { %7707 = vrcp.f32 %v1587_v49 }
 0xdb9   :  { %v7708_v55 = vpop.eup %7707 }
 0xe1b   :  { %v1607_v51 = vpop.permute.xlu1 %1606 }
 0xe1c   :  { %v9652_v53 = vmul.f32 %v7708_v55, %v1607_v51  ;;  %v12874_v55 = vld [vmem:[#allocation66_spill] sm:$0xff] }
 0xe1e   :  { %v1613_v50 = vsel %vm535_vm1, %v9652_v53, %v1611_v28 }
 0xe1f   :  { %1679 = vmatmul.mubr.f32.vlgmr.msra.gmra.mxu0 %v1613_v50  ;;  %v12875_v50 = vld [vmem:[#allocation17_spill] sm:$0xff] }
 0xe20   :  { %7121 = vmatpush3.msra.mxu0 %v12867_v26  ;;  %7136 = vmatprep.mubr.msk.f32.mxu0 %vm8470_vm0, %v12794_v23 }
 0xe21   :  { %7122 = vmatprep.subr.mxu0 %v12794_v23 }
 0xe22   :  { %7123 = vmatpush3.msra.mxu0 %v12868_v38 }
 0xe23   :  { %7124 = vmatprep.subr.mxu0 %v12794_v23 }
 0xe24   :  { %7125 = vmatpush3.msra.mxu0 %v12869_v43 }
 0xe25   :  { %7126 = vmatprep.subr.mxu0 %v12794_v23 }
 0xe26   :  { %7127 = vmatpush3.msra.mxu0 %v12870_v47 }
 0xe27   :  { %7128 = vmatprep.subr.mxu0 %v12794_v23 }
 0xe28   :  { %7129 = vmatpush3.msra.mxu0 %v9452_v32 }
 0xe29   :  { %7130 = vmatprep.subr.mxu0 %v12794_v23 }
 0xe2a   :  { %7131 = vmatpush3.msra.mxu0 %v9456_v11 }
 0xe2b   :  { %7132 = vmatprep.subr.mxu0 %v12794_v23 }
 0xe2c   :  { %7133 = vmatpush3.msra.mxu0 %v12871_v63 }
 0xe2d   :  { %7134 = vmatprep.subr.mxu0 %v12794_v23 }
 0xe2e   :  { %7135 = vmatpush3.msra.mxu0 %v12872_v52 }
 0xe2f   :  { %1961 = vmatprep.subr.mxu0 %v9673_v54  ;;  %v12876_v54 = vld [vmem:[#allocation70_spill] sm:$0xff] }
 0xedf   :  { %v1680_v41 = vpop.f32.mrf.mxu0 }
 0xee0   :  { %v1681_v11 = vadd.f32 %v1680_v41, %v12875_v50 }
 0xee1   :  { %v1682_v49 = vpop.f32.mrf.mxu0 }
 0xee2   :  { %v1683_v51 = vadd.f32 %v1682_v49, %v12874_v55  ;;  %v6524_v32 = vmul.f32 -1.442695, %v1681_v11 }
 0xee4   :  { %7709 = vtanh.f32 %v1683_v51  ;;  %v6525_v11 = vmul.f32 -1.442695, %v1683_v51  ;;  %v9718_v51 = vld [vmem:[#allocation7 + $0x68] sm:$0xff] }
 0xee5   :  { %7711 = vpow2.f32 %v6524_v32 }
 0xef1   :  { %v7710_v28 = vpop.eup %7709 }
 0xef2   :  { %1700 = vrot.lane.b32.xlu1 %v7710_v28, %s8471_s5  ;;  %v7712_v63 = vpop.eup %7711 }
 0xef3   :  { %v1691_v47 = vadd.f32 1.0, %v7712_v63 }
 0xef5   :  { %7713 = vrcp.f32 %v1691_v47 }
 0xf02   :  { %v7714_v52 = vpop.eup %7713 }
 0xf03   :  { %v1698_v26 = vmul.f32 %v7714_v52, %v12876_v54  ;;  %v9714_v54 = vld [vmem:[#allocation7 + $0x70] sm:$0xff] }
 0xf64   :  { %v1701_v43 = vpop.permute.xlu1 %1700 }
 0xf65   :  { %v1703_v38 = vmul.f32 %v7714_v52, %v1701_v43 }
 0xf67   :  { %1705 = vrot.lane.b32.xlu0 %v1703_v38, %s8471_s5  ;;  %v12877_v38 = vld [vmem:[#allocation81_spill] sm:$0xff] }
 0xfd9   :  { %v1706_v27 = vpop.permute.xlu0 %1705 }
 0xfda   :  { %v9681_v49 = vadd.f32 %v1706_v27, %v1698_v26  ;;  %v12878_v27 = vld [vmem:[#allocation82_spill] sm:$0xff] }
 0xfdc   :  { %7715 = vtanh.f32 %v9681_v49 }
 0xfdd   :  { %7717 = vpow2.f32 %v6525_v11  ;;  %v9724_v11 = vld [vmem:[#allocation7 + $0x58] sm:$0xff] }
 0xfe9   :  { %v7716_v28 = vpop.eup %7715 }
 0xfea   :  { %1711 = vrot.lane.b32.xlu1 %v7716_v28, %s8471_s5  ;;  %v7718_v32 = vpop.eup %7717  ;;  %v9721_v28 = vld [vmem:[#allocation7 + $0x60] sm:$0xff] }
 0xfeb   :  { %v1692_v63 = vadd.f32 1.0, %v7718_v32  ;;  %v9730_v32 = vld [vmem:[#allocation7 + $0x48] sm:$0xff] }
 0xfed   :  { %7719 = vrcp.f32 %v1692_v63  ;;  %v9733_v63 = vld [vmem:[#allocation7 + $0x40] sm:$0xff] }
 0xffa   :  { %v7720_v47 = vpop.eup %7719 }
0x105c   :  { %v1712_v41 = vpop.permute.xlu1 %1711 }
0x105d   :  { %v9685_v43 = vmul.f32 %v7720_v47, %v1712_v41  ;;  %v9736_v47 = vld [vmem:[#allocation7 + $0x38] sm:$0xff]  ;;  %v9739_v41 = vld [vmem:[#allocation7 + $0x30] sm:$0xff] }
0x105e   :  { %12879 = vst [vmem:[#allocation28_spill] sm:$0xff] %v9739_v41 }
0x105f   :  { %7118 = vmatmul.mubr.msk.f32.vlgmr.msra.gmra.mxu1 %vm535_vm1, %v9685_v43 }
0x1060   :  { %7140 = vmatpush3.msra.mxu1 %v12877_v38  ;;  %7155 = vmatprep.mubr.msk.f32.mxu1 %vm8470_vm0, %v12794_v23  ;;  %v9742_v38 = vld [vmem:[#allocation7 + $0x28] sm:$0xff] }
0x1061   :  { %7141 = vmatprep.subr.mxu1 %v12794_v23 }
0x1062   :  { %7142 = vmatpush3.msra.mxu1 %v12878_v27  ;;  %v9745_v27 = vld [vmem:[#allocation7 + $0x20] sm:$0xff] }
0x1063   :  { %7143 = vmatprep.subr.mxu1 %v12794_v23 }
0x1064   :  { %7144 = vmatpush3.msra.mxu1 %v9483_v40  ;;  %v9709_v40 = vld [vmem:[%s12414_s4 + $0xf8] sm:$0xff] }
0x1065   :  { %7145 = vmatprep.subr.mxu1 %v12794_v23 }
0x1066   :  { %7146 = vmatpush3.msra.mxu1 %v9487_v24 }
0x1067   :  { %7147 = vmatprep.subr.mxu1 %v12794_v23 }
0x1068   :  { %7148 = vmatpush3.msra.mxu1 %v9491_v15 }
0x1069   :  { %7149 = vmatprep.subr.mxu1 %v12794_v23 }
0x106a   :  { %7150 = vmatpush3.msra.mxu1 %v9553_v35 }
0x106b   :  { %7151 = vmatprep.subr.mxu1 %v12794_v23 }
0x106c   :  { %7152 = vmatpush3.msra.mxu1 %v9557_v37 }
0x106d   :  { %7153 = vmatprep.subr.mxu1 %v12794_v23 }
0x106e   :  { %7154 = vmatpush3.msra.mxu1 %v9560_v39 }
0x106f   :  { %2066 = vmatprep.subr.mxu1 %v9709_v40 }
0x111f   :  { %v1784_v24 = vpop.f32.mrf.mxu1 }
0x1120   :  { %v1785_v15 = vadd.f32 %v9497_v29, %v1784_v24  ;;  %v9727_v29 = vld [vmem:[#allocation7 + $0x50] sm:$0xff]  ;;  %v9748_v24 = vld [vmem:[#allocation7 + $0x18] sm:$0xff] }
0x1121   :  { %v7119_v26 = vpop.f32.mrf.mxu1 }
0x1122   :  { %v1788_v52 = vmax.f32 %v1785_v15, 0.0  ;;  %v9751_v15 = vld [vmem:[#allocation7 + $0x10] sm:$0xff]  ;;  %v1942_v26 = vrot.slane %v9619_v45, 2  ;;  %v9938_v45 = vld [vmem:[%s12414_s4 + $0x40] sm:$0xff] }
0x1123   :  { %12887 = vst [vmem:[#allocation34_spill] sm:$0xff] %v9938_v45 }
0x1124   :  { %7137 = vmatmul.mubr.msk.f32.vlgmr.msra.gmra.mxu0 %vm535_vm1, %v1788_v52  ;;  %v9755_v52 = vld [vmem:[#allocation7 + $0x8] sm:$0xff] }
0x1125   :  { %1962 = vmatpush1.msra.mxu0 %v9714_v54  ;;  %2009 = vmatprep.mubr.f32.mxu0 %v12794_v23 }
0x1126   :  { %1963 = vmatprep.subr.mxu0 %v9718_v51 }
0x1127   :  { %1964 = vmatpush1.msra.mxu0 %v9721_v28 }
0x1128   :  { %1965 = vmatprep.subr.mxu0 %v9724_v11 }
0x1129   :  { %1966 = vmatpush1.msra.mxu0 %v9727_v29 }
0x112a   :  { %1967 = vmatprep.subr.mxu0 %v9730_v32 }
0x112b   :  { %1968 = vmatpush1.msra.mxu0 %v9733_v63 }
0x112c   :  { %1969 = vmatprep.subr.mxu0 %v9736_v47 }
0x112d   :  { %1970 = vmatpush1.msra.mxu0 %v9739_v41  ;;  %v9758_v41 = vld [vmem:[#allocation7] sm:$0xff] }
0x112e   :  { %1971 = vmatprep.subr.mxu0 %v9742_v38 }
0x112f   :  { %1972 = vmatpush1.msra.mxu0 %v9745_v27 }
0x1130   :  { %1973 = vmatprep.subr.mxu0 %v9748_v24 }
0x1131   :  { %1974 = vmatpush1.msra.mxu0 %v9751_v15 }
0x1132   :  { %1975 = vmatprep.subr.mxu0 %v9755_v52 }
0x1133   :  { %1976 = vmatpush1.msra.mxu0 %v9758_v41 }
0x1134   :  { %6529 = vmatmul.mubr.msk.f32.vlgmr.msra.gmra.mxu0 %vm535_vm1, %v1942_v26  ;;  %2171 = vmatprep.subr.mxu0 %v9183_v16  ;;  %v9944_v26 = vld [vmem:[%s12414_s4 + $0x38] sm:$0xff] }
0x1135   :  { %2172 = vmatpush1.msra.mxu0 %v9188_v22  ;;  %2235 = vmatprep.mubr.f32.mxu0 %v12794_v23  ;;  %v9880_v22 = vld [vmem:[%s12414_s4 + $0x88] sm:$0xff]  ;;  %12888 = vst [vmem:[#allocation35_spill] sm:$0xff] %v9944_v26 }
0x1136   :  { %2173 = vmatprep.subr.mxu0 %v9193_v5  ;;  %v9886_v5 = vld [vmem:[%s12414_s4 + $0x80] sm:$0xff] }
0x1137   :  { %2174 = vmatpush1.msra.mxu0 %v9199_v21  ;;  %v12881_v21 = vld [vmem:[#allocation23_spill] sm:$0xff] }
0x1138   :  { %2175 = vmatprep.subr.mxu0 %v9205_v0 }
0x1139   :  { %2176 = vmatpush1.msra.mxu0 %v9211_v3  ;;  %v9895_v3 = vld [vmem:[%s12414_s4 + $0x78] sm:$0xff] }
0x113a   :  { %2177 = vmatprep.subr.mxu0 %v9217_v9  ;;  %v9901_v9 = vld [vmem:[%s12414_s4 + $0x70] sm:$0xff] }
0x113b   :  { %2178 = vmatpush1.msra.mxu0 %v9223_v25  ;;  %v9907_v25 = vld [vmem:[%s12414_s4 + $0x68] sm:$0xff] }
0x113c   :  { %2179 = vmatprep.subr.mxu0 %v9229_v58  ;;  %12882 = vst [vmem:[#allocation29_spill] sm:$0xff] %v9907_v25  ;;  %v9914_v58 = vld [vmem:[%s12414_s4 + $0x60] sm:$0xff] }
0x113d   :  { %2180 = vmatpush1.msra.mxu0 %v9235_v62  ;;  %12883 = vst [vmem:[#allocation30_spill] sm:$0xff] %v9914_v58 }
0x113e   :  { %2181 = vmatprep.subr.mxu0 %v9241_v20  ;;  %v9874_v20 = vld [vmem:[%s12414_s4 + $0x90] sm:$0xff] }
0x113f   :  { %2182 = vmatpush1.msra.mxu0 %v9247_v19 }
0x1140   :  { %2183 = vmatprep.subr.mxu0 %v9253_v17  ;;  %v9868_v17 = vld [vmem:[%s12414_s4 + $0x98] sm:$0xff] }
0x1141   :  { %2184 = vmatpush1.msra.mxu0 %v9260_v12  ;;  %v9862_v12 = vld [vmem:[%s12414_s4 + $0xa0] sm:$0xff] }
0x1142   :  { %2185 = vmatprep.subr.mxu0 %v9266_v18  ;;  %v9920_v18 = vld [vmem:[%s12414_s4 + $0x58] sm:$0xff] }
0x1143   :  { %2186 = vmatpush1.msra.mxu0 %v9272_v10  ;;  %12884 = vst [vmem:[#allocation31_spill] sm:$0xff] %v9920_v18 }
0x1144   :  { %2187 = vmatprep.subr.mxu0 %v9278_v8  ;;  %v9856_v8 = vld [vmem:[%s12414_s4 + $0xa8] sm:$0xff] }
0x1145   :  { %2188 = vmatpush1.msra.mxu0 %v9285_v7  ;;  %v9850_v7 = vld [vmem:[%s12414_s4 + $0xb0] sm:$0xff] }
0x1146   :  { %2189 = vmatprep.subr.mxu0 %v9291_v14  ;;  %v9926_v14 = vld [vmem:[%s12414_s4 + $0x50] sm:$0xff] }
0x1147   :  { %2190 = vmatpush1.msra.mxu0 %v9297_v4  ;;  %v9844_v4 = vld [vmem:[%s12414_s4 + $0xb8] sm:$0xff]  ;;  %12885 = vst [vmem:[#allocation32_spill] sm:$0xff] %v9926_v14 }
0x1148   :  { %2191 = vmatprep.subr.mxu0 %v9303_v2  ;;  %v9838_v2 = vld [vmem:[%s12414_s4 + $0xc0] sm:$0xff] }
0x1149   :  { %2192 = vmatpush1.msra.mxu0 %v9309_v61 }
0x114a   :  { %2193 = vmatprep.subr.mxu0 %v9315_v60 }
0x114b   :  { %2194 = vmatpush1.msra.mxu0 %v9321_v57  ;;  %v12880_v57 = vld [vmem:[#allocation60_spill] sm:$0xff] }
0x114c   :  { %2195 = vmatprep.subr.mxu0 %v9327_v13 }
0x114d   :  { %2196 = vmatpush1.msra.mxu0 %v9333_v56  ;;  %v9832_v56 = vld [vmem:[%s12414_s4 + $0xc8] sm:$0xff] }
0x114e   :  { %2197 = vmatprep.subr.mxu0 %v9339_v48  ;;  %v9826_v48 = vld [vmem:[%s12414_s4 + $0xd0] sm:$0xff] }
0x114f   :  { %2198 = vmatpush1.msra.mxu0 %v9345_v46  ;;  %v9801_v46 = vld [vmem:[%s12414_s4 + $0xf0] sm:$0xff] }
0x1150   :  { %2199 = vmatprep.subr.mxu0 %v9351_v44  ;;  %v9820_v44 = vld [vmem:[%s12414_s4 + $0xd8] sm:$0xff] }
0x1151   :  { %2200 = vmatpush1.msra.mxu0 %v9357_v42  ;;  %v9814_v42 = vld [vmem:[%s12414_s4 + $0xe0] sm:$0xff] }
0x1152   :  { %2201 = vmatprep.subr.mxu0 %v9369_v34  ;;  %v9808_v34 = vld [vmem:[%s12414_s4 + $0xe8] sm:$0xff] }
0x1153   :  { %2202 = vmatpush1.msra.mxu0 %v12820_v33  ;;  %v9932_v33 = vld [vmem:[%s12414_s4 + $0x48] sm:$0xff] }
0x1154   :  { %7177 = vmatprep.subr.mxu0 %v12794_v23  ;;  %12886 = vst [vmem:[#allocation33_spill] sm:$0xff] %v9932_v33 }
0x11e4   :  { %v1858_v62 = vpop.f32.mrf.mxu0 }
0x11e5   :  { %v1859_v60 = vadd.f32 %v12880_v57, %v1858_v62  ;;  %v9950_v62 = vld [vmem:[%s12414_s4 + $0x30] sm:$0xff]  ;;  %v9956_v57 = vld [vmem:[%s12414_s4 + $0x28] sm:$0xff] }
0x11e6   :  { %v7138_v13 = vpop.f32.mrf.mxu0  ;;  %12889 = vst [vmem:[#allocation36_spill] sm:$0xff] %v9950_v62  ;;  %12890 = vst [vmem:[#allocation37_spill] sm:$0xff] %v9956_v57 }
0x11e7   :  { %v1862_v61 = vmax.f32 %v1859_v60, 0.0  ;;  %v9962_v60 = vld [vmem:[%s12414_s4 + $0x20] sm:$0xff]  ;;  %v9968_v13 = vld [vmem:[%s12414_s4 + $0x18] sm:$0xff] }
0x11e8   :  { %12891 = vst [vmem:[#allocation38_spill] sm:$0xff] %v9962_v60  ;;  %12892 = vst [vmem:[#allocation39_spill] sm:$0xff] %v9968_v13 }
0x11e9   :  { %7156 = vmatmul.mubr.msk.f32.vlgmr.msra.gmra.mxu1 %vm535_vm1, %v1862_v61  ;;  %v9974_v61 = vld [vmem:[%s12414_s4 + $0x10] sm:$0xff] }
0x11ea   :  { %2067 = vmatpush1.msra.mxu1 %v9801_v46  ;;  %2130 = vmatprep.mubr.f32.mxu1 %v12794_v23  ;;  %12893 = vst [vmem:[#allocation40_spill] sm:$0xff] %v9974_v61 }
0x11eb   :  { %2068 = vmatprep.subr.mxu1 %v9808_v34 }
0x11ec   :  { %2069 = vmatpush1.msra.mxu1 %v9814_v42 }
0x11ed   :  { %2070 = vmatprep.subr.mxu1 %v9820_v44 }
0x11ee   :  { %2071 = vmatpush1.msra.mxu1 %v9826_v48 }
0x11ef   :  { %2072 = vmatprep.subr.mxu1 %v9832_v56 }
0x11f0   :  { %2073 = vmatpush1.msra.mxu1 %v9838_v2 }
0x11f1   :  { %2074 = vmatprep.subr.mxu1 %v9844_v4 }
0x11f2   :  { %2075 = vmatpush1.msra.mxu1 %v9850_v7 }
0x11f3   :  { %2076 = vmatprep.subr.mxu1 %v9856_v8 }
0x11f4   :  { %v2011_v10 = vpop.f32.mrf.mxu0  ;;  %2077 = vmatpush1.msra.mxu1 %v9862_v12 }
0x11f5   :  { %2078 = vmatprep.subr.mxu1 %v9868_v17 }
0x11f6   :  { %v2013_v19 = vpop.f32.mrf.mxu0  ;;  %2079 = vmatpush1.msra.mxu1 %v9874_v20 }
0x11f7   :  { %v2019_v16 = vrot.slane %v2013_v19, 4  ;;  %2080 = vmatprep.subr.mxu1 %v9880_v22  ;;  %v9980_v19 = vld [vmem:[%s12414_s4 + $0x8] sm:$0xff] }
0x11f8   :  { %2081 = vmatpush1.msra.mxu1 %v9886_v5  ;;  %12894 = vst [vmem:[#allocation41_spill] sm:$0xff] %v9980_v19 }
0x11f9   :  { %v9890_v0 = vadd.f32 %v2019_v16, %v12881_v21  ;;  %2082 = vmatprep.subr.mxu1 %v9895_v3  ;;  %v9986_v16 = vld [vmem:[%s12414_s4] sm:$0xff] }
0x11fa   :  { %2083 = vmatpush1.msra.mxu1 %v9901_v9  ;;  %12895 = vst [vmem:[#allocation42_spill] sm:$0xff] %v9986_v16 }
0x11fb   :  { %2084 = vmatprep.subr.mxu1 %v9907_v25  ;;  %7721 = vtanh.f32 %v9890_v0 }
0x11fc   :  { %2085 = vmatpush1.msra.mxu1 %v9914_v58 }
0x11fd   :  { %2086 = vmatprep.subr.mxu1 %v9920_v18  ;;  %v1864_v18 = vrot.slane %v9609_v30, 2 }
0x11fe   :  { %2087 = vmatpush1.msra.mxu1 %v9926_v14 }
0x11ff   :  { %2088 = vmatprep.subr.mxu1 %v9932_v33 }
0x1200   :  { %2089 = vmatpush1.msra.mxu1 %v9938_v45 }
0x1201   :  { %2090 = vmatprep.subr.mxu1 %v9944_v26 }
0x1202   :  { %2091 = vmatpush1.msra.mxu1 %v9950_v62 }
0x1203   :  { %2092 = vmatprep.subr.mxu1 %v9956_v57 }
0x1204   :  { %2093 = vmatpush1.msra.mxu1 %v9962_v60  ;;  %v12896_v60 = vld [vmem:[#allocation24_spill] sm:$0xff] }
0x1205   :  { %2094 = vmatprep.subr.mxu1 %v9968_v13 }
0x1206   :  { %2095 = vmatpush1.msra.mxu1 %v9974_v61  ;;  %v2018_v61 = vrot.slane %v2011_v10, 4 }
0x1207   :  { %2096 = vmatprep.subr.mxu1 %v9980_v19 }
0x1208   :  { %2097 = vmatpush1.msra.mxu1 %v9986_v16  ;;  %v7722_v13 = vpop.eup %7721  ;;  %v2022_v57 = vadd.f32 %v2018_v61, %v12896_v60  ;;  %v2058_v16 = vrot.slane %v9652_v53, 4  ;;  %v12897_v61 = vld [vmem:[#allocation25_spill] sm:$0xff] }
0x1209   :  { %7158 = vmatprep.subr.mxu1 %v12794_v23  ;;  %2042 = vrot.lane.b32.xlu0 %v7722_v13, %s8471_s5 }
0x120a   :  { %v6530_v62 = vmul.f32 -1.442695, %v2022_v57  ;;  %v1384_v57 = vmax.f32 %v12897_v61, 0.0 }
0x120c   :  { %7723 = vpow2.f32 %v6530_v62 }
0x1219   :  { %v7724_v26 = vpop.eup %7723 }
0x121a   :  { %v2030_v45 = vadd.f32 1.0, %v7724_v26 }
0x121c   :  { %7725 = vrcp.f32 %v2030_v45  ;;  %v2038_v45 = vrot.slane %v9615_v1, 6 }
0x1229   :  { %v7726_v19 = vpop.eup %7725 }
0x122a   :  { %v2040_v26 = vmul.f32 %v7726_v19, %v2038_v45 }
0x127b   :  { %v2043_v33 = vpop.permute.xlu0 %2042 }
0x127c   :  { %v2045_v14 = vmul.f32 %v7726_v19, %v2043_v33 }
0x127e   :  { %2047 = vrot.lane.b32.xlu1 %v2045_v14, %s8471_s5  ;;  %v6531_v14 = vmul.f32 -1.442695, %v9890_v0  ;;  %v12898_v0 = vld [vmem:[#allocation67_spill] sm:$0xff] }
0x1282   :  { %2059 = vrot.lane.b32.xlu1 %v2058_v16, %s8471_s5 }
0x12a9   :  { %v1935_v13 = vpop.f32.mrf.mxu1 }
0x12aa   :  { %v1936_v10 = vadd.f32 %v1935_v13, %v1864_v18 }
0x12ab   :  { %v7157_v58 = vpop.f32.mrf.mxu1 }
0x12ac   :  { %v1939_v62 = vmax.f32 %v1936_v10, 0.0 }
0x12ae   :  { %v9997_v60 = vadd.f32 %v1939_v62, %v1384_v57  ;;  %v12899_v57 = vld [vmem:[#allocation68_spill] sm:$0xff]  ;;  %v12901_v62 = vld [vmem:[#allocation71_spill] sm:$0xff] }
0x12f0   :  { %v2048_v33 = vpop.permute.xlu1 %2047 }
0x12f1   :  { %v10000_v25 = vadd.f32 %v2048_v33, %v2040_v26  ;;  %v12903_v26 = vld [vmem:[#allocation58_spill] sm:$0xff] }
0x12f3   :  { %7727 = vtanh.f32 %v10000_v25 }
0x12f4   :  { %7729 = vpow2.f32 %v6531_v14  ;;  %v2060_v1 = vpop.permute.xlu1 %2059 }
0x1300   :  { %v7728_v53 = vpop.eup %7727 }
0x1301   :  { %2053 = vrot.lane.b32.xlu0 %v7728_v53, %s8471_s5  ;;  %v7730_v58 = vpop.eup %7729 }
0x1302   :  { %v2031_v18 = vadd.f32 1.0, %v7730_v58 }
0x1304   :  { %7731 = vrcp.f32 %v2031_v18 }
0x1311   :  { %v7732_v16 = vpop.eup %7731 }
0x1373   :  { %v2054_v13 = vpop.permute.xlu0 %2053 }
0x1374   :  { %v10005_v10 = vmul.f32 %v7732_v16, %v2054_v13 }
0x1376   :  { %v2062_v19 = vsel %vm535_vm1, %v10005_v10, %v2060_v1 }
0x1377   :  { %v2064_v61 = vrot.slane %v2062_v19, 4 }
0x1379   :  { %2131 = vmatmul.mubr.f32.vlgmr.msra.gmra.mxu1 %v2064_v61  ;;  %v12904_v61 = vld [vmem:[#allocation26_spill] sm:$0xff] }
0x137a   :  { %7159 = vmatpush3.msra.mxu1 %v9403_v59  ;;  %7174 = vmatprep.mubr.msk.f32.mxu1 %vm8470_vm0, %v12794_v23  ;;  %v12900_v59 = vld [vmem:[#allocation69_spill] sm:$0xff] }
0x137b   :  { %7160 = vmatprep.subr.mxu1 %v12794_v23 }
0x137c   :  { %7161 = vmatpush3.msra.mxu1 %v9405_v6  ;;  %v12902_v6 = vld [vmem:[#allocation72_spill] sm:$0xff] }
0x137d   :  { %7162 = vmatprep.subr.mxu1 %v12794_v23 }
0x137e   :  { %7163 = vmatpush3.msra.mxu1 %v9409_v31 }
0x137f   :  { %7164 = vmatprep.subr.mxu1 %v12794_v23 }
0x1380   :  { %7165 = vmatpush3.msra.mxu1 %v12898_v0 }
0x1381   :  { %7166 = vmatprep.subr.mxu1 %v12794_v23 }
0x1382   :  { %7167 = vmatpush3.msra.mxu1 %v12899_v57 }
0x1383   :  { %7168 = vmatprep.subr.mxu1 %v12794_v23 }
0x1384   :  { %7169 = vmatpush3.msra.mxu1 %v12900_v59 }
0x1385   :  { %7170 = vmatprep.subr.mxu1 %v12794_v23 }
0x1386   :  { %7171 = vmatpush3.msra.mxu1 %v12901_v62 }
0x1387   :  { %7172 = vmatprep.subr.mxu1 %v12794_v23 }
0x1388   :  { %7173 = vmatpush3.msra.mxu1 %v12902_v6 }
0x1389   :  { %7196 = vmatprep.subr.mxu1 %v12794_v23 }
0x1439   :  { %v2132_v31 = vpop.f32.mrf.mxu1 }
0x143a   :  { %v2133_v14 = vadd.f32 %v2132_v31, %v12864_v36 }
0x143b   :  { %v2134_v45 = vpop.f32.mrf.mxu1 }
0x143c   :  { %v2135_v33 = vadd.f32 %v2134_v45, %v12903_v26  ;;  %v6532_v58 = vmul.f32 -1.442695, %v2133_v14 }
0x143e   :  { %7733 = vtanh.f32 %v2135_v33  ;;  %v6533_v6 = vmul.f32 -1.442695, %v2135_v33  ;;  %v12906_v33 = vld [vmem:[#allocation74_spill] sm:$0xff] }
0x143f   :  { %7735 = vpow2.f32 %v6532_v58 }
0x144b   :  { %v7734_v53 = vpop.eup %7733 }
0x144c   :  { %2152 = vrot.lane.b32.xlu0 %v7734_v53, %s8471_s5  ;;  %v7736_v18 = vpop.eup %7735 }
0x144d   :  { %v2143_v16 = vadd.f32 1.0, %v7736_v18 }
0x144f   :  { %7737 = vrcp.f32 %v2143_v16  ;;  %v12905_v16 = vld [vmem:[#allocation73_spill] sm:$0xff] }
0x145c   :  { %v7738_v13 = vpop.eup %7737 }
0x145d   :  { %v2150_v0 = vmul.f32 %v7738_v13, %v12904_v61  ;;  %v12910_v61 = vld [vmem:[#allocation78_spill] sm:$0xff] }
0x14be   :  { %v2153_v1 = vpop.permute.xlu0 %2152 }
0x14bf   :  { %v2155_v19 = vmul.f32 %v7738_v13, %v2153_v1  ;;  %v12907_v13 = vld [vmem:[#allocation75_spill] sm:$0xff]  ;;  %v12908_v1 = vld [vmem:[#allocation76_spill] sm:$0xff] }
0x14c1   :  { %2157 = vrot.lane.b32.xlu1 %v2155_v19, %s8471_s5  ;;  %v12909_v19 = vld [vmem:[#allocation77_spill] sm:$0xff] }
0x14c5   :  { %2167 = vrot.lane.b32.xlu1 %v9685_v43, %s8471_s5 }
0x1533   :  { %v2158_v57 = vpop.permute.xlu1 %2157 }
0x1534   :  { %v10034_v59 = vadd.f32 %v2158_v57, %v2150_v0  ;;  %v12911_v0 = vld [vmem:[#allocation79_spill] sm:$0xff]  ;;  %v12912_v57 = vld [vmem:[#allocation80_spill] sm:$0xff] }
0x1536   :  { %7739 = vtanh.f32 %v10034_v59 }
0x1537   :  { %7741 = vpow2.f32 %v6533_v6  ;;  %v2168_v43 = vpop.permute.xlu1 %2167 }
0x1543   :  { %v7740_v62 = vpop.eup %7739 }
0x1544   :  { %2163 = vrot.lane.b32.xlu0 %v7740_v62, %s8471_s5  ;;  %v7742_v31 = vpop.eup %7741  ;;  %v12913_v62 = vld [vmem:[#allocation27_spill] sm:$0xff] }
0x1545   :  { %v2144_v45 = vadd.f32 1.0, %v7742_v31 }
0x1547   :  { %7743 = vrcp.f32 %v2144_v45 }
0x1554   :  { %v7744_v53 = vpop.eup %7743 }
0x15b6   :  { %v2164_v14 = vpop.permute.xlu0 %2163 }
0x15b7   :  { %v10038_v58 = vmul.f32 %v7744_v53, %v2164_v14 }
0x15b9   :  { %v2170_v18 = vsel %vm535_vm1, %v10038_v58, %v2168_v43 }
0x15ba   :  { %2236 = vmatmul.mubr.f32.vlgmr.msra.gmra.mxu0 %v2170_v18 }
0x15bb   :  { %7178 = vmatpush3.msra.mxu0 %v12905_v16  ;;  %7193 = vmatprep.mubr.msk.f32.mxu0 %vm8470_vm0, %v12794_v23 }
0x15bc   :  { %7179 = vmatprep.subr.mxu0 %v12794_v23 }
0x15bd   :  { %7180 = vmatpush3.msra.mxu0 %v12906_v33 }
0x15be   :  { %7181 = vmatprep.subr.mxu0 %v12794_v23 }
0x15bf   :  { %7182 = vmatpush3.msra.mxu0 %v12907_v13 }
0x15c0   :  { %7183 = vmatprep.subr.mxu0 %v12794_v23 }
0x15c1   :  { %7184 = vmatpush3.msra.mxu0 %v12908_v1 }
0x15c2   :  { %7185 = vmatprep.subr.mxu0 %v12794_v23 }
0x15c3   :  { %7186 = vmatpush3.msra.mxu0 %v12909_v19 }
0x15c4   :  { %7187 = vmatprep.subr.mxu0 %v12794_v23 }
0x15c5   :  { %7188 = vmatpush3.msra.mxu0 %v12910_v61 }
0x15c6   :  { %7189 = vmatprep.subr.mxu0 %v12794_v23 }
0x15c7   :  { %7190 = vmatpush3.msra.mxu0 %v12911_v0 }
0x15c8   :  { %7191 = vmatprep.subr.mxu0 %v12794_v23 }
0x15c9   :  { %7192 = vmatpush3.msra.mxu0 %v12912_v57 }
0x15ca   :  { %2517 = vmatprep.subr.mxu0 %v12913_v62 }
0x167a   :  { %v2237_v6 = vpop.f32.mrf.mxu0 }
0x167b   :  { %v2238_v14 = vadd.f32 %v2237_v6, %v12875_v50 }
0x167c   :  { %v2239_v31 = vpop.f32.mrf.mxu0 }
0x167d   :  { %v2240_v45 = vadd.f32 %v2239_v31, %v12874_v55  ;;  %v6534_v43 = vmul.f32 -1.442695, %v2238_v14 }
0x167f   :  { %7745 = vtanh.f32 %v2240_v45  ;;  %v6535_v62 = vmul.f32 -1.442695, %v2240_v45  ;;  %v10079_v45 = vld [vmem:[#allocation8 + $0xf0] sm:$0xff] }
0x1680   :  { %7747 = vpow2.f32 %v6534_v43 }
0x168c   :  { %v7746_v53 = vpop.eup %7745 }
0x168d   :  { %2257 = vrot.lane.b32.xlu0 %v7746_v53, %s8471_s5  ;;  %v7748_v18 = vpop.eup %7747 }
0x168e   :  { %v2248_v16 = vadd.f32 1.0, %v7748_v18  ;;  %v10083_v18 = vld [vmem:[#allocation8 + $0xe8] sm:$0xff] }
0x1690   :  { %7749 = vrcp.f32 %v2248_v16  ;;  %v10087_v16 = vld [vmem:[#allocation8 + $0xe0] sm:$0xff] }
0x169d   :  { %v7750_v33 = vpop.eup %7749 }
0x169e   :  { %v2255_v19 = vmul.f32 %v7750_v33, %v9681_v49  ;;  %v10073_v49 = vld [vmem:[#allocation8 + $0xf8] sm:$0xff] }
0x16ff   :  { %v2258_v13 = vpop.permute.xlu0 %2257 }
0x1700   :  { %v2260_v1 = vmul.f32 %v7750_v33, %v2258_v13  ;;  %v10091_v33 = vld [vmem:[#allocation8 + $0xd8] sm:$0xff] }
0x1702   :  { %2262 = vrot.lane.b32.xlu1 %v2260_v1, %s8471_s5  ;;  %v10101_v1 = vld [vmem:[#allocation10] ss:$0 sm:$0xff] }
0x1774   :  { %v2263_v61 = vpop.permute.xlu1 %2262 }
0x1775   :  { %v10065_v0 = vadd.f32 %v2263_v61, %v2255_v19 }
0x1777   :  { %7751 = vtanh.f32 %v10065_v0 }
0x1778   :  { %7753 = vpow2.f32 %v6535_v62  ;;  %v10229_v62 = vld [vmem:[%s12414_s4 + $0x170] sm:$0xff] }
0x1779   :  { %12921 = vst [vmem:[#allocation49_spill] sm:$0xff] %v10229_v62 }
0x1784   :  { %v7752_v57 = vpop.eup %7751 }
0x1785   :  { %2268 = vrot.lane.b32.xlu0 %v7752_v57, %s8471_s5  ;;  %v7754_v6 = vpop.eup %7753 }
0x1786   :  { %v2249_v31 = vadd.f32 1.0, %v7754_v6  ;;  %v10235_v6 = vld [vmem:[%s12414_s4 + $0x168] sm:$0xff] }
0x1787   :  { %12922 = vst [vmem:[#allocation50_spill] sm:$0xff] %v10235_v6 }
0x1788   :  { %7755 = vrcp.f32 %v2249_v31  ;;  %v10241_v31 = vld [vmem:[%s12414_s4 + $0x160] sm:$0xff] }
0x1789   :  { %12923 = vst [vmem:[#allocation51_spill] sm:$0xff] %v10241_v31 }
0x1795   :  { %v7756_v53 = vpop.eup %7755 }
0x17f7   :  { %v2269_v14 = vpop.permute.xlu0 %2268 }
0x17f8   :  { %v10069_v43 = vmul.f32 %v7756_v53, %v2269_v14  ;;  %v10247_v53 = vld [vmem:[%s12414_s4 + $0x158] sm:$0xff]  ;;  %v10253_v14 = vld [vmem:[%s12414_s4 + $0x150] sm:$0xff] }
0x17f9   :  { %12924 = vst [vmem:[#allocation52_spill] sm:$0xff] %v10247_v53  ;;  %12925 = vst [vmem:[#allocation53_spill] sm:$0xff] %v10253_v14 }
0x17fa   :  { %7175 = vmatmul.mubr.msk.f32.vlgmr.msra.gmra.mxu1 %vm535_vm1, %v10069_v43 }
0x17fb   :  { %7197 = vmatpush3.msra.mxu1 %v10073_v49  ;;  %7212 = vmatprep.mubr.msk.f32.mxu1 %vm8470_vm0, %v12794_v23 }
0x17fc   :  { %7198 = vmatprep.subr.mxu1 %v12794_v23 }
0x17fd   :  { %7199 = vmatpush3.msra.mxu1 %v10079_v45 }
0x17fe   :  { %7200 = vmatprep.subr.mxu1 %v12794_v23 }
0x17ff   :  { %7201 = vmatpush3.msra.mxu1 %v10083_v18 }
0x1800   :  { %7202 = vmatprep.subr.mxu1 %v12794_v23 }
0x1801   :  { %7203 = vmatpush3.msra.mxu1 %v10087_v16 }
0x1802   :  { %7204 = vmatprep.subr.mxu1 %v12794_v23 }
0x1803   :  { %7205 = vmatpush3.msra.mxu1 %v10091_v33 }
0x1804   :  { %7206 = vmatprep.subr.mxu1 %v12794_v23 }
0x1805   :  { %7207 = vmatpush3.msra.mxu1 %v9553_v35  ;;  %v12914_v35 = vld [vmem:[#allocation28_spill] sm:$0xff] }
0x1806   :  { %7208 = vmatprep.subr.mxu1 %v12794_v23 }
0x1807   :  { %7209 = vmatpush3.msra.mxu1 %v9557_v37  ;;  %v2498_v37 = vrot.slane %v10005_v10, 4  ;;  %v10223_v10 = vld [vmem:[%s12414_s4 + $0x178] sm:$0xff] }
0x1808   :  { %7210 = vmatprep.subr.mxu1 %v12794_v23  ;;  %12920 = vst [vmem:[#allocation48_spill] sm:$0xff] %v10223_v10 }
0x1809   :  { %7211 = vmatpush3.msra.mxu1 %v9560_v39  ;;  %v10126_v39 = vld [vmem:[%s12414_s4 + $0x1f8] sm:$0xff] }
0x180a   :  { %2622 = vmatprep.subr.mxu1 %v9709_v40  ;;  %v10132_v40 = vld [vmem:[%s12414_s4 + $0x1f0] sm:$0xff] }
0x18ba   :  { %v2341_v13 = vpop.f32.mrf.mxu1 }
0x18bb   :  { %v2342_v19 = vadd.f32 %v10101_v1, %v2341_v13  ;;  %v10259_v13 = vld [vmem:[%s12414_s4 + $0x148] sm:$0xff] }
0x18bc   :  { %v7176_v61 = vpop.f32.mrf.mxu1  ;;  %12926 = vst [vmem:[#allocation54_spill] sm:$0xff] %v10259_v13 }
0x18bd   :  { %v2345_v57 = vmax.f32 %v2342_v19, 0.0  ;;  %v10265_v19 = vld [vmem:[%s12414_s4 + $0x140] sm:$0xff]  ;;  %v10271_v61 = vld [vmem:[%s12414_s4 + $0x138] sm:$0xff] }
0x18be   :  { %12927 = vst [vmem:[#allocation56_spill] sm:$0xff] %v10265_v19  ;;  %12928 = vst [vmem:[#allocation57_spill] sm:$0xff] %v10271_v61 }
0x18bf   :  { %7194 = vmatmul.mubr.msk.f32.vlgmr.msra.gmra.mxu0 %vm535_vm1, %v2345_v57  ;;  %v10277_v57 = vld [vmem:[%s12414_s4 + $0x130] sm:$0xff] }
0x18c0   :  { %2518 = vmatpush1.msra.mxu0 %v9714_v54  ;;  %2565 = vmatprep.mubr.f32.mxu0 %v12794_v23  ;;  %v10139_v54 = vld [vmem:[%s12414_s4 + $0x1e8] sm:$0xff]  ;;  %12929 = vst [vmem:[#allocation61_spill] sm:$0xff] %v10277_v57 }
0x18c1   :  { %2519 = vmatprep.subr.mxu0 %v9718_v51  ;;  %v10145_v51 = vld [vmem:[%s12414_s4 + $0x1e0] sm:$0xff] }
0x18c2   :  { %2520 = vmatpush1.msra.mxu0 %v9721_v28  ;;  %v10151_v28 = vld [vmem:[%s12414_s4 + $0x1d8] sm:$0xff] }
0x18c3   :  { %2521 = vmatprep.subr.mxu0 %v9724_v11  ;;  %v10157_v11 = vld [vmem:[%s12414_s4 + $0x1d0] sm:$0xff] }
0x18c4   :  { %2522 = vmatpush1.msra.mxu0 %v9727_v29  ;;  %v10163_v29 = vld [vmem:[%s12414_s4 + $0x1c8] sm:$0xff] }
0x18c5   :  { %2523 = vmatprep.subr.mxu0 %v9730_v32  ;;  %v10169_v32 = vld [vmem:[%s12414_s4 + $0x1c0] sm:$0xff] }
0x18c6   :  { %2524 = vmatpush1.msra.mxu0 %v9733_v63  ;;  %v10175_v63 = vld [vmem:[%s12414_s4 + $0x1b8] sm:$0xff] }
0x18c7   :  { %2525 = vmatprep.subr.mxu0 %v9736_v47  ;;  %v10181_v47 = vld [vmem:[%s12414_s4 + $0x1b0] sm:$0xff] }
0x18c8   :  { %2526 = vmatpush1.msra.mxu0 %v12914_v35  ;;  %v10283_v35 = vld [vmem:[%s12414_s4 + $0x128] sm:$0xff] }
0x18c9   :  { %2527 = vmatprep.subr.mxu0 %v9742_v38  ;;  %v10193_v38 = vld [vmem:[%s12414_s4 + $0x1a0] sm:$0xff]  ;;  %12930 = vst [vmem:[#allocation19_spill] sm:$0xff] %v10283_v35 }
0x18ca   :  { %2528 = vmatpush1.msra.mxu0 %v9745_v27  ;;  %12915 = vst [vmem:[#allocation43_spill] sm:$0xff] %v10193_v38  ;;  %v10199_v27 = vld [vmem:[%s12414_s4 + $0x198] sm:$0xff] }
0x18cb   :  { %2529 = vmatprep.subr.mxu0 %v9748_v24  ;;  %12916 = vst [vmem:[#allocation44_spill] sm:$0xff] %v10199_v27  ;;  %v10205_v24 = vld [vmem:[%s12414_s4 + $0x190] sm:$0xff] }
0x18cc   :  { %2530 = vmatpush1.msra.mxu0 %v9751_v15  ;;  %12917 = vst [vmem:[#allocation45_spill] sm:$0xff] %v10205_v24  ;;  %v10211_v15 = vld [vmem:[%s12414_s4 + $0x188] sm:$0xff] }
0x18cd   :  { %2531 = vmatprep.subr.mxu0 %v9755_v52  ;;  %12918 = vst [vmem:[#allocation46_spill] sm:$0xff] %v10211_v15  ;;  %v10217_v52 = vld [vmem:[%s12414_s4 + $0x180] sm:$0xff] }
0x18ce   :  { %2532 = vmatpush1.msra.mxu0 %v9758_v41  ;;  %v10187_v41 = vld [vmem:[%s12414_s4 + $0x1a8] sm:$0xff]  ;;  %12919 = vst [vmem:[#allocation47_spill] sm:$0xff] %v10217_v52 }
0x18cf   :  { %6539 = vmatmul.mubr.msk.f32.vlgmr.msra.gmra.mxu0 %vm535_vm1, %v2498_v37  ;;  %2727 = vmatprep.subr.mxu0 %v10126_v39  ;;  %v10289_v37 = vld [vmem:[%s12414_s4 + $0x120] sm:$0xff] }
0x18d0   :  { %2728 = vmatpush1.msra.mxu0 %v10132_v40  ;;  %2791 = vmatprep.mubr.f32.mxu0 %v12794_v23  ;;  %12931 = vst [vmem:[#allocation55_spill] sm:$0xff] %v10289_v37 }
0x18d1   :  { %2729 = vmatprep.subr.mxu0 %v10139_v54 }
0x18d2   :  { %2730 = vmatpush1.msra.mxu0 %v10145_v51 }
0x18d3   :  { %2731 = vmatprep.subr.mxu0 %v10151_v28 }
0x18d4   :  { %2732 = vmatpush1.msra.mxu0 %v10157_v11 }
0x18d5   :  { %2733 = vmatprep.subr.mxu0 %v10163_v29 }
0x18d6   :  { %2734 = vmatpush1.msra.mxu0 %v10169_v32 }
0x18d7   :  { %2735 = vmatprep.subr.mxu0 %v10175_v63 }
0x18d8   :  { %2736 = vmatpush1.msra.mxu0 %v10181_v47 }
0x18d9   :  { %2737 = vmatprep.subr.mxu0 %v10187_v41 }
0x18da   :  { %2738 = vmatpush1.msra.mxu0 %v10193_v38 }
0x18db   :  { %2739 = vmatprep.subr.mxu0 %v10199_v27 }
0x18dc   :  { %2740 = vmatpush1.msra.mxu0 %v10205_v24 }
0x18dd   :  { %2741 = vmatprep.subr.mxu0 %v10211_v15 }
0x18de   :  { %2742 = vmatpush1.msra.mxu0 %v10217_v52 }
0x18df   :  { %2743 = vmatprep.subr.mxu0 %v10223_v10 }
0x18e0   :  { %2744 = vmatpush1.msra.mxu0 %v10229_v62 }
0x18e1   :  { %2745 = vmatprep.subr.mxu0 %v10235_v6 }
0x18e2   :  { %2746 = vmatpush1.msra.mxu0 %v10241_v31 }
0x18e3   :  { %2747 = vmatprep.subr.mxu0 %v10247_v53 }
0x18e4   :  { %2748 = vmatpush1.msra.mxu0 %v10253_v14 }
0x18e5   :  { %2749 = vmatprep.subr.mxu0 %v10259_v13 }
0x18e6   :  { %2750 = vmatpush1.msra.mxu0 %v10265_v19  ;;  %v10317_v19 = vld [vmem:[#allocation10 + $0x1] ss:$0 sm:$0xff] }
0x18e7   :  { %2751 = vmatprep.subr.mxu0 %v10271_v61  ;;  %v10295_v61 = vld [vmem:[%s12414_s4 + $0x118] sm:$0xff]  ;;  %12936 = vst [vmem:[#allocation70_spill] sm:$0xff] %v10317_v19 }
0x18e8   :  { %2752 = vmatpush1.msra.mxu0 %v10277_v57  ;;  %12932 = vst [vmem:[#allocation16_spill] sm:$0xff] %v10295_v61  ;;  %v10301_v57 = vld [vmem:[%s12414_s4 + $0x110] sm:$0xff] }
0x18e9   :  { %2753 = vmatprep.subr.mxu0 %v10283_v35  ;;  %12933 = vst [vmem:[#allocation59_spill] sm:$0xff] %v10301_v57  ;;  %v10307_v35 = vld [vmem:[%s12414_s4 + $0x108] sm:$0xff] }
0x18ea   :  { %2754 = vmatpush1.msra.mxu0 %v10289_v37  ;;  %12934 = vst [vmem:[#allocation66_spill] sm:$0xff] %v10307_v35  ;;  %v10313_v37 = vld [vmem:[%s12414_s4 + $0x100] sm:$0xff] }
0x18eb   :  { %2755 = vmatprep.subr.mxu0 %v10295_v61  ;;  %12935 = vst [vmem:[#allocation17_spill] sm:$0xff] %v10313_v37 }
0x18ec   :  { %2756 = vmatpush1.msra.mxu0 %v10301_v57 }
0x18ed   :  { %2757 = vmatprep.subr.mxu0 %v10307_v35 }
0x18ee   :  { %2758 = vmatpush1.msra.mxu0 %v10313_v37 }
0x18ef   :  { %7234 = vmatprep.subr.mxu0 %v12794_v23 }
0x197f   :  { %v2415_v61 = vpop.f32.mrf.mxu0 }
0x1980   :  { %v2416_v57 = vadd.f32 %v10317_v19, %v2415_v61  ;;  %v12951_v61 = vld [vmem:[#allocation24_spill] sm:$0xff] }
0x1981   :  { %v7195_v13 = vpop.f32.mrf.mxu0 }
0x1982   :  { %v2419_v14 = vmax.f32 %v2416_v57, 0.0 }
0x1984   :  { %7213 = vmatmul.mubr.msk.f32.vlgmr.msra.gmra.mxu1 %vm535_vm1, %v2419_v14 }
0x1985   :  { %2623 = vmatpush1.msra.mxu1 %v9801_v46  ;;  %2686 = vmatprep.mubr.f32.mxu1 %v12794_v23 }
0x1986   :  { %2624 = vmatprep.subr.mxu1 %v9808_v34 }
0x1987   :  { %2625 = vmatpush1.msra.mxu1 %v9814_v42 }
0x1988   :  { %2626 = vmatprep.subr.mxu1 %v9820_v44 }
0x1989   :  { %2627 = vmatpush1.msra.mxu1 %v9826_v48  ;;  %v12937_v48 = vld [vmem:[#allocation29_spill] sm:$0xff] }
0x198a   :  { %2628 = vmatprep.subr.mxu1 %v9832_v56  ;;  %v12938_v56 = vld [vmem:[#allocation30_spill] sm:$0xff] }
0x198b   :  { %2629 = vmatpush1.msra.mxu1 %v9838_v2  ;;  %v12939_v2 = vld [vmem:[#allocation31_spill] sm:$0xff] }
0x198c   :  { %2630 = vmatprep.subr.mxu1 %v9844_v4  ;;  %v12940_v4 = vld [vmem:[#allocation32_spill] sm:$0xff] }
0x198d   :  { %2631 = vmatpush1.msra.mxu1 %v9850_v7  ;;  %v12941_v7 = vld [vmem:[#allocation33_spill] sm:$0xff] }
0x198e   :  { %2632 = vmatprep.subr.mxu1 %v9856_v8  ;;  %v12942_v8 = vld [vmem:[#allocation34_spill] sm:$0xff] }
0x198f   :  { %v2567_v46 = vpop.f32.mrf.mxu0  ;;  %2633 = vmatpush1.msra.mxu1 %v9862_v12  ;;  %v12943_v12 = vld [vmem:[#allocation35_spill] sm:$0xff] }
0x1990   :  { %2634 = vmatprep.subr.mxu1 %v9868_v17  ;;  %v12944_v17 = vld [vmem:[#allocation36_spill] sm:$0xff]  ;;  %v2574_v13 = vrot.slane %v2567_v46, 2 }
0x1991   :  { %v2569_v34 = vpop.f32.mrf.mxu0  ;;  %2635 = vmatpush1.msra.mxu1 %v9874_v20  ;;  %v12945_v20 = vld [vmem:[#allocation37_spill] sm:$0xff] }
0x1992   :  { %v2575_v42 = vrot.slane %v2569_v34, 2  ;;  %2636 = vmatprep.subr.mxu1 %v9880_v22  ;;  %v12946_v22 = vld [vmem:[#allocation38_spill] sm:$0xff]  ;;  %v2578_v57 = vadd.f32 %v2574_v13, %v12951_v61 }
0x1993   :  { %2637 = vmatpush1.msra.mxu1 %v9886_v5  ;;  %v12947_v5 = vld [vmem:[#allocation39_spill] sm:$0xff] }
0x1994   :  { %v2579_v44 = vadd.f32 %v2575_v42, %v12881_v21  ;;  %2638 = vmatprep.subr.mxu1 %v9895_v3  ;;  %v12948_v21 = vld [vmem:[#allocation40_spill] sm:$0xff]  ;;  %v12949_v3 = vld [vmem:[#allocation41_spill] sm:$0xff]  ;;  %v6540_v34 = vmul.f32 -1.442695, %v2578_v57 }
0x1995   :  { %2639 = vmatpush1.msra.mxu1 %v9901_v9  ;;  %v12950_v9 = vld [vmem:[#allocation42_spill] sm:$0xff] }
0x1996   :  { %2640 = vmatprep.subr.mxu1 %v12937_v48  ;;  %7757 = vtanh.f32 %v2579_v44 }
0x1997   :  { %2641 = vmatpush1.msra.mxu1 %v12938_v56  ;;  %7759 = vpow2.f32 %v6540_v34 }
0x1998   :  { %2642 = vmatprep.subr.mxu1 %v12939_v2 }
0x1999   :  { %2643 = vmatpush1.msra.mxu1 %v12940_v4 }
0x199a   :  { %2644 = vmatprep.subr.mxu1 %v12941_v7  ;;  %v2614_v7 = vrot.slane %v10038_v58, 2 }
0x199b   :  { %2645 = vmatpush1.msra.mxu1 %v12942_v8  ;;  %v2420_v8 = vrot.slane %v9609_v30, 4 }
0x199c   :  { %2646 = vmatprep.subr.mxu1 %v12943_v12 }
0x199d   :  { %2647 = vmatpush1.msra.mxu1 %v12944_v17 }
0x199e   :  { %2648 = vmatprep.subr.mxu1 %v12945_v20 }
0x199f   :  { %2649 = vmatpush1.msra.mxu1 %v12946_v22 }
0x19a0   :  { %2650 = vmatprep.subr.mxu1 %v12947_v5  ;;  %v2594_v5 = vrot.slane %v10000_v25, 6 }
0x19a1   :  { %2651 = vmatpush1.msra.mxu1 %v12948_v21 }
0x19a2   :  { %2652 = vmatprep.subr.mxu1 %v12949_v3 }
0x19a3   :  { %2653 = vmatpush1.msra.mxu1 %v12950_v9  ;;  %v7758_v14 = vpop.eup %7757 }
0x19a4   :  { %7215 = vmatprep.subr.mxu1 %v12794_v23  ;;  %2598 = vrot.lane.b32.xlu1 %v7758_v14, %s8471_s5  ;;  %v7760_v42 = vpop.eup %7759  ;;  %v6541_v14 = vmul.f32 -1.442695, %v2579_v44  ;;  %v10379_v44 = vld [vmem:[#allocation8 + $0x30] sm:$0xff] }
0x19a5   :  { %v2586_v48 = vadd.f32 1.0, %v7760_v42 }
0x19a7   :  { %7761 = vrcp.f32 %v2586_v48 }
0x19b4   :  { %v7762_v56 = vpop.eup %7761 }
0x19b5   :  { %v2596_v21 = vmul.f32 %v7762_v56, %v2594_v5 }
0x1a16   :  { %v2599_v2 = vpop.permute.xlu1 %2598 }
0x1a17   :  { %v2601_v4 = vmul.f32 %v7762_v56, %v2599_v2  ;;  %v10373_v56 = vld [vmem:[#allocation8 + $0x38] sm:$0xff]  ;;  %v10383_v2 = vld [vmem:[#allocation8 + $0x28] sm:$0xff] }
0x1a19   :  { %2603 = vrot.lane.b32.xlu0 %v2601_v4, %s8471_s5  ;;  %v10387_v4 = vld [vmem:[#allocation8 + $0x20] sm:$0xff] }
0x1a1d   :  { %2615 = vrot.lane.b32.xlu0 %v2614_v7, %s8471_s5  ;;  %v10391_v7 = vld [vmem:[#allocation8 + $0x18] sm:$0xff] }
0x1a44   :  { %v2491_v12 = vpop.f32.mrf.mxu1 }
0x1a45   :  { %v2492_v46 = vadd.f32 %v2491_v12, %v2420_v8  ;;  %v10395_v8 = vld [vmem:[#allocation8 + $0x10] sm:$0xff]  ;;  %v10399_v12 = vld [vmem:[#allocation8 + $0x8] sm:$0xff] }
0x1a46   :  { %v7214_v17 = vpop.f32.mrf.mxu1 }
0x1a47   :  { %v2495_v20 = vmax.f32 %v2492_v46, 0.0  ;;  %v10403_v46 = vld [vmem:[#allocation8] sm:$0xff] }
0x1a49   :  { %v10362_v22 = vadd.f32 %v2495_v20, %v9997_v60 }
0x1a8b   :  { %v2604_v3 = vpop.permute.xlu0 %2603 }
0x1a8c   :  { %v10365_v9 = vadd.f32 %v2604_v3, %v2596_v21 }
0x1a8e   :  { %7763 = vtanh.f32 %v10365_v9 }
0x1a8f   :  { %7765 = vpow2.f32 %v6541_v14  ;;  %v2616_v42 = vpop.permute.xlu0 %2615 }
0x1a9b   :  { %v7764_v58 = vpop.eup %7763 }
0x1a9c   :  { %2609 = vrot.lane.b32.xlu1 %v7764_v58, %s8471_s5  ;;  %v7766_v13 = vpop.eup %7765 }
0x1a9d   :  { %v2587_v61 = vadd.f32 1.0, %v7766_v13 }
0x1a9f   :  { %7767 = vrcp.f32 %v2587_v61 }
0x1aac   :  { %v7768_v57 = vpop.eup %7767 }
0x1b0e   :  { %v2610_v34 = vpop.permute.xlu1 %2609 }
0x1b0f   :  { %v10369_v60 = vmul.f32 %v7768_v57, %v2610_v34 }
0x1b11   :  { %v2618_v25 = vsel %vm535_vm1, %v10369_v60, %v2616_v42 }
0x1b12   :  { %v2620_v48 = vrot.slane %v2618_v25, 6 }
0x1b14   :  { %2687 = vmatmul.mubr.f32.vlgmr.msra.gmra.mxu1 %v2620_v48 }
0x1b15   :  { %7216 = vmatpush3.msra.mxu1 %v10373_v56  ;;  %7231 = vmatprep.mubr.msk.f32.mxu1 %vm8470_vm0, %v12794_v23 }
0x1b16   :  { %7217 = vmatprep.subr.mxu1 %v12794_v23 }
0x1b17   :  { %7218 = vmatpush3.msra.mxu1 %v10379_v44 }
0x1b18   :  { %7219 = vmatprep.subr.mxu1 %v12794_v23 }
0x1b19   :  { %7220 = vmatpush3.msra.mxu1 %v10383_v2 }
0x1b1a   :  { %7221 = vmatprep.subr.mxu1 %v12794_v23 }
0x1b1b   :  { %7222 = vmatpush3.msra.mxu1 %v10387_v4 }
0x1b1c   :  { %7223 = vmatprep.subr.mxu1 %v12794_v23 }
0x1b1d   :  { %7224 = vmatpush3.msra.mxu1 %v10391_v7 }
0x1b1e   :  { %7225 = vmatprep.subr.mxu1 %v12794_v23 }
0x1b1f   :  { %7226 = vmatpush3.msra.mxu1 %v10395_v8 }
0x1b20   :  { %7227 = vmatprep.subr.mxu1 %v12794_v23 }
0x1b21   :  { %7228 = vmatpush3.msra.mxu1 %v10399_v12 }
0x1b22   :  { %7229 = vmatprep.subr.mxu1 %v12794_v23 }
0x1b23   :  { %7230 = vmatpush3.msra.mxu1 %v10403_v46 }
0x1b24   :  { %7253 = vmatprep.subr.mxu1 %v12794_v23 }
0x1bd4   :  { %v2688_v17 = vpop.f32.mrf.mxu1 }
0x1bd5   :  { %v2689_v3 = vadd.f32 %v2688_v17, %v12864_v36 }
0x1bd6   :  { %v2690_v20 = vpop.f32.mrf.mxu1 }
0x1bd7   :  { %v2691_v5 = vadd.f32 %v2690_v20, %v12903_v26  ;;  %v6542_v58 = vmul.f32 -1.442695, %v2689_v3 }
0x1bd9   :  { %7769 = vtanh.f32 %v2691_v5  ;;  %v6543_v20 = vmul.f32 -1.442695, %v2691_v5  ;;  %v10428_v5 = vld [vmem:[#allocation8 + $0x70] sm:$0xff] }
0x1bda   :  { %7771 = vpow2.f32 %v6542_v58  ;;  %12952 = vst [vmem:[#allocation81_spill] sm:$0xff] %v10428_v5 }
0x1be6   :  { %v7770_v21 = vpop.eup %7769 }
0x1be7   :  { %2708 = vrot.lane.b32.xlu1 %v7770_v21, %s8471_s5  ;;  %v7772_v14 = vpop.eup %7771 }
0x1be8   :  { %v2699_v13 = vadd.f32 1.0, %v7772_v14 }
0x1bea   :  { %7773 = vrcp.f32 %v2699_v13 }
0x1bf7   :  { %v7774_v61 = vpop.eup %7773 }
0x1bf8   :  { %v2706_v42 = vmul.f32 %v7774_v61, %v10034_v59 }
0x1c59   :  { %v2709_v57 = vpop.permute.xlu1 %2708 }
0x1c5a   :  { %v2711_v34 = vmul.f32 %v7774_v61, %v2709_v57  ;;  %v10422_v61 = vld [vmem:[#allocation8 + $0x78] sm:$0xff]  ;;  %v10432_v57 = vld [vmem:[#allocation8 + $0x68] sm:$0xff] }
0x1c5b   :  { %12953 = vst [vmem:[#allocation82_spill] sm:$0xff] %v10432_v57 }
0x1c5c   :  { %2713 = vrot.lane.b32.xlu0 %v2711_v34, %s8471_s5  ;;  %v10436_v34 = vld [vmem:[#allocation8 + $0x60] sm:$0xff] }
0x1c5d   :  { %12954 = vst [vmem:[#allocation60_spill] sm:$0xff] %v10436_v34 }
0x1c60   :  { %2723 = vrot.lane.b32.xlu0 %v10069_v43, %s8471_s5 }
0x1cce   :  { %v2714_v25 = vpop.permute.xlu0 %2713 }
0x1ccf   :  { %v10414_v48 = vadd.f32 %v2714_v25, %v2706_v42  ;;  %v10440_v42 = vld [vmem:[#allocation8 + $0x58] sm:$0xff]  ;;  %v10444_v25 = vld [vmem:[#allocation8 + $0x50] sm:$0xff] }
0x1cd0   :  { %12955 = vst [vmem:[#allocation23_spill] sm:$0xff] %v10440_v42  ;;  %12956 = vst [vmem:[#allocation25_spill] sm:$0xff] %v10444_v25 }
0x1cd1   :  { %7775 = vtanh.f32 %v10414_v48 }
0x1cd2   :  { %7777 = vpow2.f32 %v6543_v20  ;;  %v2724_v43 = vpop.permute.xlu0 %2723  ;;  %v10452_v20 = vld [vmem:[#allocation8 + $0x40] sm:$0xff] }
0x1cd3   :  { %12958 = vst [vmem:[#allocation68_spill] sm:$0xff] %v10452_v20 }
0x1cde   :  { %v7776_v17 = vpop.eup %7775 }
0x1cdf   :  { %2719 = vrot.lane.b32.xlu1 %v7776_v17, %s8471_s5  ;;  %v7778_v21 = vpop.eup %7777  ;;  %v10448_v17 = vld [vmem:[#allocation8 + $0x48] sm:$0xff] }
0x1ce0   :  { %v2700_v3 = vadd.f32 1.0, %v7778_v21  ;;  %12957 = vst [vmem:[#allocation67_spill] sm:$0xff] %v10448_v17  ;;  %v10455_v21 = vld [vmem:[#allocation7 + $0x78] sm:$0xff] }
0x1ce1   :  { %12959 = vst [vmem:[#allocation69_spill] sm:$0xff] %v10455_v21 }
0x1ce2   :  { %7779 = vrcp.f32 %v2700_v3 }
0x1cef   :  { %v7780_v58 = vpop.eup %7779 }
0x1d51   :  { %v2720_v14 = vpop.permute.xlu1 %2719 }
0x1d52   :  { %v10418_v13 = vmul.f32 %v7780_v58, %v2720_v14 }
0x1d54   :  { %v2726_v59 = vsel %vm535_vm1, %v10418_v13, %v2724_v43 }
0x1d55   :  { %2792 = vmatmul.mubr.f32.vlgmr.msra.gmra.mxu0 %v2726_v59 }
0x1d56   :  { %7235 = vmatpush3.msra.mxu0 %v10422_v61  ;;  %7250 = vmatprep.mubr.msk.f32.mxu0 %vm8470_vm0, %v12794_v23 }
0x1d57   :  { %7236 = vmatprep.subr.mxu0 %v12794_v23 }
0x1d58   :  { %7237 = vmatpush3.msra.mxu0 %v10428_v5 }
0x1d59   :  { %7238 = vmatprep.subr.mxu0 %v12794_v23 }
0x1d5a   :  { %7239 = vmatpush3.msra.mxu0 %v10432_v57 }
0x1d5b   :  { %7240 = vmatprep.subr.mxu0 %v12794_v23 }
0x1d5c   :  { %7241 = vmatpush3.msra.mxu0 %v10436_v34 }
0x1d5d   :  { %7242 = vmatprep.subr.mxu0 %v12794_v23 }
0x1d5e   :  { %7243 = vmatpush3.msra.mxu0 %v10440_v42 }
0x1d5f   :  { %7244 = vmatprep.subr.mxu0 %v12794_v23 }
0x1d60   :  { %7245 = vmatpush3.msra.mxu0 %v10444_v25 }
0x1d61   :  { %7246 = vmatprep.subr.mxu0 %v12794_v23 }
0x1d62   :  { %7247 = vmatpush3.msra.mxu0 %v10448_v17 }
0x1d63   :  { %7248 = vmatprep.subr.mxu0 %v12794_v23 }
0x1d64   :  { %7249 = vmatpush3.msra.mxu0 %v10452_v20 }
0x1d65   :  { %3073 = vmatprep.subr.mxu0 %v10455_v21 }
0x1e15   :  { %v2793_v3 = vpop.f32.mrf.mxu0 }
0x1e16   :  { %v2794_v59 = vadd.f32 %v2793_v3, %v12875_v50 }
0x1e17   :  { %v2795_v58 = vpop.f32.mrf.mxu0 }
0x1e18   :  { %v2796_v14 = vadd.f32 %v2795_v58, %v12874_v55  ;;  %v6544_v17 = vmul.f32 -1.442695, %v2794_v59 }
0x1e1a   :  { %7781 = vtanh.f32 %v2796_v14  ;;  %v6545_v3 = vmul.f32 -1.442695, %v2796_v14 }
0x1e1b   :  { %7783 = vpow2.f32 %v6544_v17 }
0x1e27   :  { %v7782_v43 = vpop.eup %7781 }
0x1e28   :  { %2813 = vrot.lane.b32.xlu1 %v7782_v43, %s8471_s5  ;;  %v7784_v25 = vpop.eup %7783 }
0x1e29   :  { %v2804_v42 = vadd.f32 1.0, %v7784_v25 }
0x1e2b   :  { %7785 = vrcp.f32 %v2804_v42 }
0x1e38   :  { %v7786_v20 = vpop.eup %7785 }
0x1e39   :  { %v2811_v21 = vmul.f32 %v7786_v20, %v10065_v0  ;;  %v10483_v0 = vld [vmem:[#allocation8 + $0xd0] sm:$0xff] }
0x1e9a   :  { %v2814_v34 = vpop.permute.xlu1 %2813 }
0x1e9b   :  { %v2816_v57 = vmul.f32 %v7786_v20, %v2814_v34  ;;  %v10497_v20 = vld [vmem:[%s12414_s4 + $0xf8] sm:$0xff] }
0x1e9d   :  { %2818 = vrot.lane.b32.xlu0 %v2816_v57, %s8471_s5  ;;  %v10491_v57 = vld [vmem:[#allocation8 + $0xc0] sm:$0xff] }
0x1f0f   :  { %v2819_v5 = vpop.permute.xlu0 %2818 }
0x1f10   :  { %v10463_v58 = vadd.f32 %v2819_v5, %v2811_v21  ;;  %v10487_v5 = vld [vmem:[#allocation8 + $0xc8] sm:$0xff] }
0x1f12   :  { %7787 = vtanh.f32 %v10463_v58 }
0x1f13   :  { %7789 = vpow2.f32 %v6545_v3 }
0x1f1f   :  { %v7788_v43 = vpop.eup %7787 }
0x1f20   :  { %2824 = vrot.lane.b32.xlu1 %v7788_v43, %s8471_s5  ;;  %v7790_v17 = vpop.eup %7789 }
0x1f21   :  { %v2805_v25 = vadd.f32 1.0, %v7790_v17  ;;  %v10502_v17 = vld [vmem:[#allocation7 + $0x70] sm:$0xff] }
0x1f23   :  { %7791 = vrcp.f32 %v2805_v25  ;;  %v10506_v25 = vld [vmem:[#allocation7 + $0x68] sm:$0xff] }
0x1f24   :  { %12960 = vst [vmem:[#allocation71_spill] sm:$0xff] %v10506_v25 }
0x1f30   :  { %v7792_v42 = vpop.eup %7791 }
0x1f92   :  { %v2825_v59 = vpop.permute.xlu1 %2824 }
0x1f93   :  { %v10467_v34 = vmul.f32 %v7792_v42, %v2825_v59  ;;  %v10509_v42 = vld [vmem:[#allocation7 + $0x60] sm:$0xff]  ;;  %v10512_v59 = vld [vmem:[#allocation7 + $0x58] sm:$0xff] }
0x1f94   :  { %12961 = vst [vmem:[#allocation72_spill] sm:$0xff] %v10509_v42  ;;  %12962 = vst [vmem:[#allocation26_spill] sm:$0xff] %v10512_v59 }
0x1f95   :  { %7232 = vmatmul.mubr.msk.f32.vlgmr.msra.gmra.mxu1 %vm535_vm1, %v10467_v34 }
0x1f96   :  { %7254 = vmatpush3.msra.mxu1 %v10073_v49  ;;  %7269 = vmatprep.mubr.msk.f32.mxu1 %vm8470_vm0, %v12794_v23 }
0x1f97   :  { %7255 = vmatprep.subr.mxu1 %v12794_v23 }
0x1f98   :  { %7256 = vmatpush3.msra.mxu1 %v10079_v45 }
0x1f99   :  { %7257 = vmatprep.subr.mxu1 %v12794_v23 }
0x1f9a   :  { %7258 = vmatpush3.msra.mxu1 %v10083_v18 }
0x1f9b   :  { %7259 = vmatprep.subr.mxu1 %v12794_v23 }
0x1f9c   :  { %7260 = vmatpush3.msra.mxu1 %v10087_v16 }
0x1f9d   :  { %7261 = vmatprep.subr.mxu1 %v12794_v23 }
0x1f9e   :  { %7262 = vmatpush3.msra.mxu1 %v10091_v33 }
0x1f9f   :  { %7263 = vmatprep.subr.mxu1 %v12794_v23 }
0x1fa0   :  { %7264 = vmatpush3.msra.mxu1 %v10483_v0 }
0x1fa1   :  { %7265 = vmatprep.subr.mxu1 %v12794_v23 }
0x1fa2   :  { %7266 = vmatpush3.msra.mxu1 %v10487_v5 }
0x1fa3   :  { %7267 = vmatprep.subr.mxu1 %v12794_v23 }
0x1fa4   :  { %7268 = vmatpush3.msra.mxu1 %v10491_v57 }
0x1fa5   :  { %3168 = vmatprep.subr.mxu1 %v10497_v20 }
0x2055   :  { %v2897_v21 = vpop.f32.mrf.mxu1 }
0x2056   :  { %v2898_v14 = vadd.f32 %v10101_v1, %v2897_v21  ;;  %v10515_v21 = vld [vmem:[#allocation7 + $0x50] sm:$0xff] }
0x2057   :  { %v7233_v43 = vpop.f32.mrf.mxu1  ;;  %12963 = vst [vmem:[#allocation73_spill] sm:$0xff] %v10515_v21 }
0x2058   :  { %v2901_v3 = vmax.f32 %v2898_v14, 0.0  ;;  %v10518_v14 = vld [vmem:[#allocation7 + $0x48] sm:$0xff]  ;;  %v10521_v43 = vld [vmem:[#allocation7 + $0x40] sm:$0xff] }
0x2059   :  { %12964 = vst [vmem:[#allocation74_spill] sm:$0xff] %v10518_v14  ;;  %12965 = vst [vmem:[#allocation75_spill] sm:$0xff] %v10521_v43 }
0x205a   :  { %7251 = vmatmul.mubr.msk.f32.vlgmr.msra.gmra.mxu0 %vm535_vm1, %v2901_v3  ;;  %v10524_v3 = vld [vmem:[#allocation7 + $0x38] sm:$0xff] }
0x205b   :  { %3074 = vmatpush1.msra.mxu0 %v10502_v17  ;;  %3121 = vmatprep.mubr.f32.mxu0 %v12794_v23  ;;  %12966 = vst [vmem:[#allocation76_spill] sm:$0xff] %v10524_v3 }
0x205c   :  { %3075 = vmatprep.subr.mxu0 %v10506_v25  ;;  %v10543_v25 = vld [vmem:[#allocation7 + $0x8] sm:$0xff] }
0x205d   :  { %3076 = vmatpush1.msra.mxu0 %v10509_v42  ;;  %v10527_v42 = vld [vmem:[#allocation7 + $0x30] sm:$0xff] }
0x205e   :  { %3077 = vmatprep.subr.mxu0 %v10512_v59  ;;  %12967 = vst [vmem:[#allocation77_spill] sm:$0xff] %v10527_v42  ;;  %v10530_v59 = vld [vmem:[#allocation7 + $0x28] sm:$0xff] }
0x205f   :  { %3078 = vmatpush1.msra.mxu0 %v10515_v21  ;;  %v10533_v21 = vld [vmem:[#allocation7 + $0x20] sm:$0xff] }
0x2060   :  { %3079 = vmatprep.subr.mxu0 %v10518_v14  ;;  %v10536_v14 = vld [vmem:[#allocation7 + $0x18] sm:$0xff] }
0x2061   :  { %3080 = vmatpush1.msra.mxu0 %v10521_v43  ;;  %v10539_v43 = vld [vmem:[#allocation7 + $0x10] sm:$0xff] }
0x2062   :  { %3081 = vmatprep.subr.mxu0 %v10524_v3  ;;  %v3054_v3 = vrot.slane %v10369_v60, 6  ;;  %v12968_v60 = vld [vmem:[#allocation53_spill] sm:$0xff] }
0x2063   :  { %3082 = vmatpush1.msra.mxu0 %v10527_v42  ;;  %v10546_v42 = vld [vmem:[#allocation7] sm:$0xff] }
0x2064   :  { %3083 = vmatprep.subr.mxu0 %v10530_v59 }
0x2065   :  { %3084 = vmatpush1.msra.mxu0 %v10533_v21 }
0x2066   :  { %3085 = vmatprep.subr.mxu0 %v10536_v14 }
0x2067   :  { %3086 = vmatpush1.msra.mxu0 %v10539_v43 }
0x2068   :  { %3087 = vmatprep.subr.mxu0 %v10543_v25 }
0x2069   :  { %3088 = vmatpush1.msra.mxu0 %v10546_v42 }
0x206a   :  { %6549 = vmatmul.mubr.msk.f32.vlgmr.msra.gmra.mxu0 %vm535_vm1, %v3054_v3  ;;  %3273 = vmatprep.subr.mxu0 %v10126_v39  ;;  %v12969_v3 = vld [vmem:[#allocation54_spill] sm:$0xff] }
0x206b   :  { %3274 = vmatpush1.msra.mxu0 %v10132_v40  ;;  %3337 = vmatprep.mubr.f32.mxu0 %v12794_v23 }
0x206c   :  { %3275 = vmatprep.subr.mxu0 %v10139_v54 }
0x206d   :  { %3276 = vmatpush1.msra.mxu0 %v10145_v51 }
0x206e   :  { %3277 = vmatprep.subr.mxu0 %v10151_v28 }
0x206f   :  { %3278 = vmatpush1.msra.mxu0 %v10157_v11 }
0x2070   :  { %3279 = vmatprep.subr.mxu0 %v10163_v29 }
0x2071   :  { %3280 = vmatpush1.msra.mxu0 %v10169_v32 }
0x2072   :  { %3281 = vmatprep.subr.mxu0 %v10175_v63 }
0x2073   :  { %3282 = vmatpush1.msra.mxu0 %v10181_v47 }
0x2074   :  { %3283 = vmatprep.subr.mxu0 %v10187_v41 }
0x2075   :  { %3284 = vmatpush1.msra.mxu0 %v10193_v38 }
0x2076   :  { %3285 = vmatprep.subr.mxu0 %v10199_v27  ;;  %v12970_v27 = vld [vmem:[#allocation56_spill] sm:$0xff] }
0x2077   :  { %3286 = vmatpush1.msra.mxu0 %v10205_v24  ;;  %v12971_v24 = vld [vmem:[#allocation57_spill] sm:$0xff] }
0x2078   :  { %3287 = vmatprep.subr.mxu0 %v10211_v15  ;;  %v12972_v15 = vld [vmem:[#allocation61_spill] sm:$0xff] }
0x2079   :  { %3288 = vmatpush1.msra.mxu0 %v10217_v52  ;;  %v12973_v52 = vld [vmem:[#allocation19_spill] sm:$0xff] }
0x207a   :  { %3289 = vmatprep.subr.mxu0 %v10223_v10  ;;  %v12974_v10 = vld [vmem:[#allocation55_spill] sm:$0xff] }
0x207b   :  { %3290 = vmatpush1.msra.mxu0 %v10229_v62  ;;  %v12975_v62 = vld [vmem:[#allocation16_spill] sm:$0xff] }
0x207c   :  { %3291 = vmatprep.subr.mxu0 %v10235_v6  ;;  %v12976_v6 = vld [vmem:[#allocation59_spill] sm:$0xff] }
0x207d   :  { %3292 = vmatpush1.msra.mxu0 %v10241_v31 }
0x207e   :  { %3293 = vmatprep.subr.mxu0 %v10247_v53 }
0x207f   :  { %3294 = vmatpush1.msra.mxu0 %v12968_v60 }
0x2080   :  { %3295 = vmatprep.subr.mxu0 %v12969_v3 }
0x2081   :  { %3296 = vmatpush1.msra.mxu0 %v12970_v27 }
0x2082   :  { %3297 = vmatprep.subr.mxu0 %v12971_v24 }
0x2083   :  { %3298 = vmatpush1.msra.mxu0 %v12972_v15 }
0x2084   :  { %3299 = vmatprep.subr.mxu0 %v12973_v52 }
0x2085   :  { %3300 = vmatpush1.msra.mxu0 %v12974_v10  ;;  %v10589_v10 = vld [vmem:[%s12414_s4 + $0xf0] sm:$0xff] }
0x2086   :  { %3301 = vmatprep.subr.mxu0 %v12975_v62  ;;  %12977 = vst [vmem:[#allocation78_spill] sm:$0xff] %v10589_v10 }
0x2087   :  { %3302 = vmatpush1.msra.mxu0 %v12976_v6 }
0x2088   :  { %3303 = vmatprep.subr.mxu0 %v10307_v35  ;;  %v10666_v35 = vld [vmem:[%s12414_s4 + $0x90] sm:$0xff] }
0x2089   :  { %3304 = vmatpush1.msra.mxu0 %v10313_v37  ;;  %v10596_v37 = vld [vmem:[%s12414_s4 + $0xe8] sm:$0xff]  ;;  %12992 = vst [vmem:[#allocation37_spill] sm:$0xff] %v10666_v35 }
0x208a   :  { %7291 = vmatprep.subr.mxu0 %v12794_v23  ;;  %12978 = vst [vmem:[#allocation79_spill] sm:$0xff] %v10596_v37 }
0x211a   :  { %v2971_v3 = vpop.f32.mrf.mxu0 }
0x211b   :  { %v2972_v27 = vadd.f32 %v10317_v19, %v2971_v3  ;;  %v10620_v3 = vld [vmem:[%s12414_s4 + $0xc8] sm:$0xff] }
0x211c   :  { %v7252_v24 = vpop.f32.mrf.mxu0  ;;  %12982 = vst [vmem:[#allocation29_spill] sm:$0xff] %v10620_v3 }
0x211d   :  { %v2975_v60 = vmax.f32 %v2972_v27, 0.0  ;;  %v10602_v27 = vld [vmem:[%s12414_s4 + $0xe0] sm:$0xff]  ;;  %v10608_v24 = vld [vmem:[%s12414_s4 + $0xd8] sm:$0xff] }
0x211e   :  { %12979 = vst [vmem:[#allocation80_spill] sm:$0xff] %v10602_v27  ;;  %12980 = vst [vmem:[#allocation27_spill] sm:$0xff] %v10608_v24 }
0x211f   :  { %7270 = vmatmul.mubr.msk.f32.vlgmr.msra.gmra.mxu1 %vm535_vm1, %v2975_v60  ;;  %v10614_v60 = vld [vmem:[%s12414_s4 + $0xd0] sm:$0xff] }
0x2120   :  { %3169 = vmatpush1.msra.mxu1 %v10589_v10  ;;  %3232 = vmatprep.mubr.f32.mxu1 %v12794_v23  ;;  %12981 = vst [vmem:[#allocation28_spill] sm:$0xff] %v10614_v60  ;;  %v12989_v10 = vld [vmem:[#allocation63_spill] sm:$0xff] }
0x2121   :  { %3170 = vmatprep.subr.mxu1 %v10596_v37  ;;  %v10650_v37 = vld [vmem:[%s12414_s4 + $0xa0] sm:$0xff] }
0x2122   :  { %3171 = vmatpush1.msra.mxu1 %v10602_v27  ;;  %v10626_v27 = vld [vmem:[%s12414_s4 + $0xc0] sm:$0xff]  ;;  %12987 = vst [vmem:[#allocation34_spill] sm:$0xff] %v10650_v37 }
0x2123   :  { %3172 = vmatprep.subr.mxu1 %v10608_v24  ;;  %12983 = vst [vmem:[#allocation30_spill] sm:$0xff] %v10626_v27  ;;  %v10632_v24 = vld [vmem:[%s12414_s4 + $0xb8] sm:$0xff] }
0x2124   :  { %3173 = vmatpush1.msra.mxu1 %v10614_v60  ;;  %12984 = vst [vmem:[#allocation31_spill] sm:$0xff] %v10632_v24  ;;  %v10638_v60 = vld [vmem:[%s12414_s4 + $0xb0] sm:$0xff] }
0x2125   :  { %3174 = vmatprep.subr.mxu1 %v10620_v3  ;;  %12985 = vst [vmem:[#allocation32_spill] sm:$0xff] %v10638_v60  ;;  %v10644_v3 = vld [vmem:[%s12414_s4 + $0xa8] sm:$0xff] }
0x2126   :  { %3175 = vmatpush1.msra.mxu1 %v10626_v27  ;;  %12986 = vst [vmem:[#allocation33_spill] sm:$0xff] %v10644_v3 }
0x2127   :  { %3176 = vmatprep.subr.mxu1 %v10632_v24  ;;  %v12988_v24 = vld [vmem:[#allocation22_spill] sm:$0xff] }
0x2128   :  { %3177 = vmatpush1.msra.mxu1 %v10638_v60  ;;  %v10655_v19 = vadd.f32 %v12989_v10, %v12988_v24  ;;  %v10660_v60 = vld [vmem:[%s12414_s4 + $0x98] sm:$0xff]  ;;  %v10675_v10 = vld [vmem:[%s12414_s4 + $0x88] sm:$0xff]  ;;  %v10681_v24 = vld [vmem:[%s12414_s4 + $0x80] sm:$0xff] }
0x2129   :  { %3178 = vmatprep.subr.mxu1 %v10644_v3  ;;  %12991 = vst [vmem:[#allocation36_spill] sm:$0xff] %v10660_v60  ;;  %12993 = vst [vmem:[#allocation38_spill] sm:$0xff] %v10675_v10 }
0x212a   :  { %v3123_v27 = vpop.f32.mrf.mxu0  ;;  %3179 = vmatpush1.msra.mxu1 %v10650_v37  ;;  %12990 = vst [vmem:[#allocation35_spill] sm:$0xff] %v10655_v19  ;;  %12994 = vst [vmem:[#allocation39_spill] sm:$0xff] %v10681_v24 }
0x212b   :  { %3180 = vmatprep.subr.mxu1 %v10660_v60 }
0x212c   :  { %v3125_v3 = vpop.f32.mrf.mxu0  ;;  %3181 = vmatpush1.msra.mxu1 %v10666_v35  ;;  %v10687_v35 = vld [vmem:[%s12414_s4 + $0x78] sm:$0xff] }
0x212d   :  { %v10670_v37 = vadd.f32 %v3125_v3, %v10655_v19  ;;  %3182 = vmatprep.subr.mxu1 %v10675_v10  ;;  %12995 = vst [vmem:[#allocation40_spill] sm:$0xff] %v10687_v35  ;;  %v10694_v3 = vld [vmem:[%s12414_s4 + $0x70] sm:$0xff]  ;;  %v10700_v19 = vld [vmem:[%s12414_s4 + $0x68] sm:$0xff] }
0x212e   :  { %3183 = vmatpush1.msra.mxu1 %v10681_v24  ;;  %12996 = vst [vmem:[#allocation41_spill] sm:$0xff] %v10694_v3  ;;  %12997 = vst [vmem:[#allocation42_spill] sm:$0xff] %v10700_v19  ;;  %v10712_v24 = vld [vmem:[%s12414_s4 + $0x58] sm:$0xff]  ;;  %v10772_v10 = vld [vmem:[%s12414_s4 + $0x8] sm:$0xff] }
0x212f   :  { %3184 = vmatprep.subr.mxu1 %v10687_v35  ;;  %7793 = vtanh.f32 %v10670_v37  ;;  %v10706_v35 = vld [vmem:[%s12414_s4 + $0x60] sm:$0xff]  ;;  %12999 = vst [vmem:[#allocation63_spill] sm:$0xff] %v10712_v24  ;;  %13009 = vst [vmem:[#allocation92_spill] sm:$0xff] %v10772_v10 }
0x2130   :  { %3185 = vmatpush1.msra.mxu1 %v10694_v3  ;;  %12998 = vst [vmem:[#allocation24_spill] sm:$0xff] %v10706_v35  ;;  %v10718_v3 = vld [vmem:[%s12414_s4 + $0x50] sm:$0xff] }
0x2131   :  { %3186 = vmatprep.subr.mxu1 %v10700_v19  ;;  %13000 = vst [vmem:[#allocation83_spill] sm:$0xff] %v10718_v3  ;;  %v10724_v19 = vld [vmem:[%s12414_s4 + $0x48] sm:$0xff] }
0x2132   :  { %3187 = vmatpush1.msra.mxu1 %v10706_v35  ;;  %13001 = vst [vmem:[#allocation84_spill] sm:$0xff] %v10724_v19  ;;  %v10730_v35 = vld [vmem:[%s12414_s4 + $0x40] sm:$0xff] }
0x2133   :  { %3188 = vmatprep.subr.mxu1 %v10712_v24  ;;  %13002 = vst [vmem:[#allocation85_spill] sm:$0xff] %v10730_v35  ;;  %v10736_v24 = vld [vmem:[%s12414_s4 + $0x38] sm:$0xff] }
0x2134   :  { %3189 = vmatpush1.msra.mxu1 %v10718_v3  ;;  %13003 = vst [vmem:[#allocation86_spill] sm:$0xff] %v10736_v24  ;;  %v10742_v3 = vld [vmem:[%s12414_s4 + $0x30] sm:$0xff] }
0x2135   :  { %3190 = vmatprep.subr.mxu1 %v10724_v19  ;;  %13004 = vst [vmem:[#allocation87_spill] sm:$0xff] %v10742_v3  ;;  %v10748_v19 = vld [vmem:[%s12414_s4 + $0x28] sm:$0xff] }
0x2136   :  { %3191 = vmatpush1.msra.mxu1 %v10730_v35  ;;  %13005 = vst [vmem:[#allocation88_spill] sm:$0xff] %v10748_v19  ;;  %v10754_v35 = vld [vmem:[%s12414_s4 + $0x20] sm:$0xff] }
0x2137   :  { %3192 = vmatprep.subr.mxu1 %v10736_v24  ;;  %13006 = vst [vmem:[#allocation89_spill] sm:$0xff] %v10754_v35  ;;  %v10760_v24 = vld [vmem:[%s12414_s4 + $0x18] sm:$0xff] }
0x2138   :  { %3193 = vmatpush1.msra.mxu1 %v10742_v3  ;;  %13007 = vst [vmem:[#allocation90_spill] sm:$0xff] %v10760_v24  ;;  %v10766_v3 = vld [vmem:[%s12414_s4 + $0x10] sm:$0xff] }
0x2139   :  { %3194 = vmatprep.subr.mxu1 %v10748_v19  ;;  %13008 = vst [vmem:[#allocation91_spill] sm:$0xff] %v10766_v3 }
0x213a   :  { %3195 = vmatpush1.msra.mxu1 %v10754_v35  ;;  %v13012_v35 = vld [vmem:[#allocation62_spill] sm:$0xff] }
0x213b   :  { %3196 = vmatprep.subr.mxu1 %v10760_v24  ;;  %v10779_v24 = vld [vmem:[%s12414_s4] sm:$0xff] }
0x213c   :  { %3197 = vmatpush1.msra.mxu1 %v10766_v3  ;;  %v7794_v19 = vpop.eup %7793  ;;  %13010 = vst [vmem:[#allocation93_spill] sm:$0xff] %v10779_v24  ;;  %v13011_v3 = vld [vmem:[#allocation18_spill] sm:$0xff] }
0x213d   :  { %3198 = vmatprep.subr.mxu1 %v10772_v10  ;;  %3148 = vrot.lane.b32.xlu0 %v7794_v19, %s8471_s5  ;;  %v10785_v60 = vadd.f32 %v13012_v35, %v13011_v3 }
0x213e   :  { %3199 = vmatpush1.msra.mxu1 %v10779_v24  ;;  %v2976_v24 = vrot.slane %v9609_v30, 6  ;;  %v6551_v30 = vmul.f32 -1.442695, %v10670_v37 }
0x213f   :  { %7272 = vmatprep.subr.mxu1 %v12794_v23  ;;  %13013 = vst [vmem:[#allocation62_spill] sm:$0xff] %v10785_v60  ;;  %v3128_v6 = vadd.f32 %v3123_v27, %v10785_v60 }
0x2141   :  { %v6550_v62 = vmul.f32 -1.442695, %v3128_v6 }
0x2143   :  { %7795 = vpow2.f32 %v6550_v62  ;;  %v3144_v62 = vrot.slane %v10365_v9, 6 }
0x2150   :  { %v7796_v10 = vpop.eup %7795 }
0x2151   :  { %v3136_v52 = vadd.f32 1.0, %v7796_v10 }
0x2153   :  { %7797 = vrcp.f32 %v3136_v52 }
0x2160   :  { %v7798_v19 = vpop.eup %7797 }
0x2161   :  { %v3146_v52 = vmul.f32 %v7798_v19, %v3144_v62 }
0x21af   :  { %v3149_v15 = vpop.permute.xlu0 %3148 }
0x21b0   :  { %v3151_v53 = vmul.f32 %v7798_v19, %v3149_v15 }
0x21b2   :  { %3153 = vrot.lane.b32.xlu1 %v3151_v53, %s8471_s5 }
0x21b6   :  { %3164 = vrot.lane.b32.xlu1 %v10418_v13, %s8471_s5 }
0x21df   :  { %v3047_v31 = vpop.f32.mrf.mxu1 }
0x21e0   :  { %v3048_v35 = vadd.f32 %v3047_v31, %v2976_v24 }
0x21e1   :  { %v7271_v3 = vpop.f32.mrf.mxu1 }
0x21e2   :  { %v3051_v38 = vmax.f32 %v3048_v35, 0.0 }
0x21e4   :  { %v10793_v6 = vadd.f32 %v3051_v38, %v10362_v22 }
0x2224   :  { %v3154_v27 = vpop.permute.xlu1 %3153 }
0x2225   :  { %v10796_v10 = vadd.f32 %v3154_v27, %v3146_v52 }
0x2227   :  { %7799 = vtanh.f32 %v10796_v10 }
0x2228   :  { %7801 = vpow2.f32 %v6551_v30  ;;  %v3165_v9 = vpop.permute.xlu1 %3164 }
0x2234   :  { %v7800_v15 = vpop.eup %7799 }
0x2235   :  { %3159 = vrot.lane.b32.xlu0 %v7800_v15, %s8471_s5  ;;  %v7802_v31 = vpop.eup %7801 }
0x2236   :  { %v3137_v53 = vadd.f32 1.0, %v7802_v31 }
0x2238   :  { %7803 = vrcp.f32 %v3137_v53 }
0x2245   :  { %v7804_v13 = vpop.eup %7803 }
0x22a7   :  { %v3160_v38 = vpop.permute.xlu0 %3159 }
0x22a8   :  { %v10801_v22 = vmul.f32 %v7804_v13, %v3160_v38 }
0x22aa   :  { %v3167_v24 = vsel %vm535_vm1, %v10801_v22, %v3165_v9 }
0x22ab   :  { %3233 = vmatmul.mubr.f32.vlgmr.msra.gmra.mxu1 %v3167_v24 }
0x22ac   :  { %7273 = vmatpush3.msra.mxu1 %v10373_v56  ;;  %7288 = vmatprep.mubr.msk.f32.mxu1 %vm8470_vm0, %v12794_v23 }
0x22ad   :  { %7274 = vmatprep.subr.mxu1 %v12794_v23 }
0x22ae   :  { %7275 = vmatpush3.msra.mxu1 %v10379_v44 }
0x22af   :  { %7276 = vmatprep.subr.mxu1 %v12794_v23 }
0x22b0   :  { %7277 = vmatpush3.msra.mxu1 %v10383_v2 }
0x22b1   :  { %7278 = vmatprep.subr.mxu1 %v12794_v23 }
0x22b2   :  { %7279 = vmatpush3.msra.mxu1 %v10387_v4 }
0x22b3   :  { %7280 = vmatprep.subr.mxu1 %v12794_v23 }
0x22b4   :  { %7281 = vmatpush3.msra.mxu1 %v10391_v7 }
0x22b5   :  { %7282 = vmatprep.subr.mxu1 %v12794_v23 }
0x22b6   :  { %7283 = vmatpush3.msra.mxu1 %v10395_v8 }
0x22b7   :  { %7284 = vmatprep.subr.mxu1 %v12794_v23 }
0x22b8   :  { %7285 = vmatpush3.msra.mxu1 %v10399_v12 }
0x22b9   :  { %7286 = vmatprep.subr.mxu1 %v12794_v23 }
0x22ba   :  { %7287 = vmatpush3.msra.mxu1 %v10403_v46 }
0x22bb   :  { %7310 = vmatprep.subr.mxu1 %v12794_v23 }
0x236b   :  { %v3234_v37 = vpop.f32.mrf.mxu1 }
0x236c   :  { %v3235_v62 = vadd.f32 %v3234_v37, %v12864_v36 }
0x236d   :  { %v3236_v3 = vpop.f32.mrf.mxu1 }
0x236e   :  { %v3237_v19 = vadd.f32 %v3236_v3, %v12903_v26  ;;  %v6552_v52 = vmul.f32 -1.442695, %v3235_v62 }
0x2370   :  { %7805 = vtanh.f32 %v3237_v19  ;;  %v6553_v37 = vmul.f32 -1.442695, %v3237_v19  ;;  %v13014_v19 = vld [vmem:[#allocation81_spill] sm:$0xff] }
0x2371   :  { %7807 = vpow2.f32 %v6552_v52 }
0x237d   :  { %v7806_v35 = vpop.eup %7805 }
0x237e   :  { %3254 = vrot.lane.b32.xlu0 %v7806_v35, %s8471_s5  ;;  %v7808_v27 = vpop.eup %7807 }
0x237f   :  { %v3245_v15 = vadd.f32 1.0, %v7808_v27 }
0x2381   :  { %7809 = vrcp.f32 %v3245_v15  ;;  %v13015_v15 = vld [vmem:[#allocation82_spill] sm:$0xff] }
0x238e   :  { %v7810_v30 = vpop.eup %7809 }
0x238f   :  { %v3252_v13 = vmul.f32 %v7810_v30, %v10414_v48 }
0x23f0   :  { %v3255_v31 = vpop.permute.xlu0 %3254 }
0x23f1   :  { %v3257_v53 = vmul.f32 %v7810_v30, %v3255_v31  ;;  %v13016_v30 = vld [vmem:[#allocation60_spill] sm:$0xff]  ;;  %v13017_v31 = vld [vmem:[#allocation23_spill] sm:$0xff] }
0x23f3   :  { %3259 = vrot.lane.b32.xlu1 %v3257_v53, %s8471_s5  ;;  %v13018_v53 = vld [vmem:[#allocation25_spill] sm:$0xff] }
0x23f7   :  { %3269 = vrot.lane.b32.xlu1 %v10467_v34, %s8471_s5 }
0x2465   :  { %v3260_v38 = vpop.permute.xlu1 %3259 }
0x2466   :  { %v10830_v9 = vadd.f32 %v3260_v38, %v3252_v13  ;;  %v13019_v13 = vld [vmem:[#allocation67_spill] sm:$0xff]  ;;  %v13020_v38 = vld [vmem:[#allocation68_spill] sm:$0xff] }
0x2468   :  { %7811 = vtanh.f32 %v10830_v9 }
0x2469   :  { %7813 = vpow2.f32 %v6553_v37  ;;  %v3270_v34 = vpop.permute.xlu1 %3269 }
0x2475   :  { %v7812_v24 = vpop.eup %7811 }
0x2476   :  { %3265 = vrot.lane.b32.xlu0 %v7812_v24, %s8471_s5  ;;  %v7814_v3 = vpop.eup %7813  ;;  %v13021_v24 = vld [vmem:[#allocation69_spill] sm:$0xff] }
0x2477   :  { %v3246_v35 = vadd.f32 1.0, %v7814_v3 }
0x2479   :  { %7815 = vrcp.f32 %v3246_v35 }
0x2486   :  { %v7816_v62 = vpop.eup %7815 }
0x24e8   :  { %v3266_v52 = vpop.permute.xlu0 %3265 }
0x24e9   :  { %v10834_v27 = vmul.f32 %v7816_v62, %v3266_v52 }
0x24eb   :  { %v3272_v48 = vsel %vm535_vm1, %v10834_v27, %v3270_v34 }
0x24ec   :  { %3338 = vmatmul.mubr.f32.vlgmr.msra.gmra.mxu0 %v3272_v48 }
0x24ed   :  { %7292 = vmatpush3.msra.mxu0 %v10422_v61  ;;  %7307 = vmatprep.mubr.msk.f32.mxu0 %vm8470_vm0, %v12794_v23 }
0x24ee   :  { %7293 = vmatprep.subr.mxu0 %v12794_v23 }
0x24ef   :  { %7294 = vmatpush3.msra.mxu0 %v13014_v19 }
0x24f0   :  { %7295 = vmatprep.subr.mxu0 %v12794_v23 }
0x24f1   :  { %7296 = vmatpush3.msra.mxu0 %v13015_v15 }
0x24f2   :  { %7297 = vmatprep.subr.mxu0 %v12794_v23 }
0x24f3   :  { %7298 = vmatpush3.msra.mxu0 %v13016_v30 }
0x24f4   :  { %7299 = vmatprep.subr.mxu0 %v12794_v23 }
0x24f5   :  { %7300 = vmatpush3.msra.mxu0 %v13017_v31 }
0x24f6   :  { %7301 = vmatprep.subr.mxu0 %v12794_v23 }
0x24f7   :  { %7302 = vmatpush3.msra.mxu0 %v13018_v53 }
0x24f8   :  { %7303 = vmatprep.subr.mxu0 %v12794_v23 }
0x24f9   :  { %7304 = vmatpush3.msra.mxu0 %v13019_v13 }
0x24fa   :  { %7305 = vmatprep.subr.mxu0 %v12794_v23 }
0x24fb   :  { %7306 = vmatpush3.msra.mxu0 %v13020_v38 }
0x24fc   :  { %3616 = vmatprep.subr.mxu0 %v13021_v24 }
0x25ac   :  { %v3339_v37 = vpop.f32.mrf.mxu0 }
0x25ad   :  { %v3340_v52 = vadd.f32 %v3339_v37, %v12875_v50 }
0x25ae   :  { %v3341_v3 = vpop.f32.mrf.mxu0 }
0x25af   :  { %v3342_v35 = vadd.f32 %v3341_v3, %v12874_v55  ;;  %v6554_v34 = vmul.f32 -1.442695, %v3340_v52 }
0x25b1   :  { %7817 = vtanh.f32 %v3342_v35  ;;  %v6555_v37 = vmul.f32 -1.442695, %v3342_v35  ;;  %v13029_v35 = vld [vmem:[#allocation77_spill] sm:$0xff] }
0x25b2   :  { %7819 = vpow2.f32 %v6554_v34 }
0x25be   :  { %v7818_v62 = vpop.eup %7817 }
0x25bf   :  { %3359 = vrot.lane.b32.xlu0 %v7818_v62, %s8471_s5  ;;  %v7820_v48 = vpop.eup %7819 }
0x25c0   :  { %v3350_v13 = vadd.f32 1.0, %v7820_v48 }
0x25c2   :  { %7821 = vrcp.f32 %v3350_v13 }
0x25cf   :  { %v7822_v53 = vpop.eup %7821 }
0x25d0   :  { %v3357_v24 = vmul.f32 %v7822_v53, %v10463_v58  ;;  %v13023_v58 = vld [vmem:[#allocation72_spill] sm:$0xff] }
0x2631   :  { %v3360_v31 = vpop.permute.xlu0 %3359 }
0x2632   :  { %v3362_v38 = vmul.f32 %v7822_v53, %v3360_v31  ;;  %v13025_v53 = vld [vmem:[#allocation73_spill] sm:$0xff] }
0x2634   :  { %3364 = vrot.lane.b32.xlu1 %v3362_v38, %s8471_s5  ;;  %v13026_v38 = vld [vmem:[#allocation74_spill] sm:$0xff] }
0x26a6   :  { %v3365_v30 = vpop.permute.xlu1 %3364 }
0x26a7   :  { %v10861_v3 = vadd.f32 %v3365_v30, %v3357_v24  ;;  %v13024_v30 = vld [vmem:[#allocation26_spill] sm:$0xff]  ;;  %v13027_v24 = vld [vmem:[#allocation75_spill] sm:$0xff] }
0x26a9   :  { %7823 = vtanh.f32 %v10861_v3 }
0x26aa   :  { %7825 = vpow2.f32 %v6555_v37  ;;  %v13043_v37 = vld [vmem:[#allocation57_spill] sm:$0xff] }
0x26b6   :  { %v7824_v62 = vpop.eup %7823 }
0x26b7   :  { %3370 = vrot.lane.b32.xlu0 %v7824_v62, %s8471_s5  ;;  %v7826_v52 = vpop.eup %7825  ;;  %v13042_v62 = vld [vmem:[#allocation56_spill] sm:$0xff] }
0x26b8   :  { %v3351_v34 = vadd.f32 1.0, %v7826_v52  ;;  %v13044_v52 = vld [vmem:[#allocation61_spill] sm:$0xff] }
0x26ba   :  { %7827 = vrcp.f32 %v3351_v34  ;;  %v13045_v34 = vld [vmem:[#allocation19_spill] sm:$0xff] }
0x26c7   :  { %v7828_v13 = vpop.eup %7827 }
0x2729   :  { %v3371_v48 = vpop.permute.xlu0 %3370 }
0x272a   :  { %v10865_v31 = vmul.f32 %v7828_v13, %v3371_v48  ;;  %v13046_v13 = vld [vmem:[#allocation55_spill] sm:$0xff]  ;;  %v13047_v48 = vld [vmem:[#allocation16_spill] sm:$0xff] }
0x272c   :  { %7289 = vmatmul.mubr.msk.f32.vlgmr.msra.gmra.mxu1 %vm535_vm1, %v10865_v31 }
0x272d   :  { %7311 = vmatpush3.msra.mxu1 %v10073_v49  ;;  %7326 = vmatprep.mubr.msk.f32.mxu1 %vm8470_vm0, %v12794_v23 }
0x272e   :  { %7312 = vmatprep.subr.mxu1 %v12794_v23 }
0x272f   :  { %7313 = vmatpush3.msra.mxu1 %v10079_v45 }
0x2730   :  { %7314 = vmatprep.subr.mxu1 %v12794_v23 }
0x2731   :  { %7315 = vmatpush3.msra.mxu1 %v10083_v18 }
0x2732   :  { %7316 = vmatprep.subr.mxu1 %v12794_v23 }
0x2733   :  { %7317 = vmatpush3.msra.mxu1 %v10087_v16 }
0x2734   :  { %7318 = vmatprep.subr.mxu1 %v12794_v23 }
0x2735   :  { %7319 = vmatpush3.msra.mxu1 %v10091_v33  ;;  %v13022_v33 = vld [vmem:[#allocation71_spill] sm:$0xff] }
0x2736   :  { %7320 = vmatprep.subr.mxu1 %v12794_v23 }
0x2737   :  { %7321 = vmatpush3.msra.mxu1 %v10483_v0 }
0x2738   :  { %7322 = vmatprep.subr.mxu1 %v12794_v23 }
0x2739   :  { %7323 = vmatpush3.msra.mxu1 %v10487_v5 }
0x273a   :  { %7324 = vmatprep.subr.mxu1 %v12794_v23 }
0x273b   :  { %7325 = vmatpush3.msra.mxu1 %v10491_v57 }
0x273c   :  { %3721 = vmatprep.subr.mxu1 %v10497_v20 }
0x27ec   :  { %v3443_v49 = vpop.f32.mrf.mxu1 }
0x27ed   :  { %v3444_v45 = vadd.f32 %v10101_v1, %v3443_v49  ;;  %v13028_v1 = vld [vmem:[#allocation76_spill] sm:$0xff]  ;;  %v13048_v49 = vld [vmem:[#allocation59_spill] sm:$0xff] }
0x27ee   :  { %v7290_v18 = vpop.f32.mrf.mxu1 }
0x27ef   :  { %v3447_v16 = vmax.f32 %v3444_v45, 0.0  ;;  %v13049_v45 = vld [vmem:[#allocation66_spill] sm:$0xff]  ;;  %v13050_v18 = vld [vmem:[#allocation17_spill] sm:$0xff] }
0x27f1   :  { %7308 = vmatmul.mubr.msk.f32.vlgmr.msra.gmra.mxu0 %vm535_vm1, %v3447_v16 }
0x27f2   :  { %3617 = vmatpush1.msra.mxu0 %v10502_v17  ;;  %3664 = vmatprep.mubr.f32.mxu0 %v12794_v23 }
0x27f3   :  { %3618 = vmatprep.subr.mxu0 %v13022_v33 }
0x27f4   :  { %3619 = vmatpush1.msra.mxu0 %v13023_v58 }
0x27f5   :  { %3620 = vmatprep.subr.mxu0 %v13024_v30 }
0x27f6   :  { %3621 = vmatpush1.msra.mxu0 %v13025_v53 }
0x27f7   :  { %3622 = vmatprep.subr.mxu0 %v13026_v38 }
0x27f8   :  { %3623 = vmatpush1.msra.mxu0 %v13027_v24 }
0x27f9   :  { %3624 = vmatprep.subr.mxu0 %v13028_v1 }
0x27fa   :  { %3625 = vmatpush1.msra.mxu0 %v13029_v35 }
0x27fb   :  { %3626 = vmatprep.subr.mxu0 %v10530_v59 }
0x27fc   :  { %3627 = vmatpush1.msra.mxu0 %v10533_v21 }
0x27fd   :  { %3628 = vmatprep.subr.mxu0 %v10536_v14 }
0x27fe   :  { %3629 = vmatpush1.msra.mxu0 %v10539_v43 }
0x27ff   :  { %3630 = vmatprep.subr.mxu0 %v10543_v25 }
0x2800   :  { %3631 = vmatpush1.msra.mxu0 %v10546_v42 }
0x2801   :  { %6559 = vmatmul.mubr.msk.f32.vlgmr.msra.gmra.mxu0 %vm535_vm1, %v10801_v22  ;;  %3826 = vmatprep.subr.mxu0 %v10126_v39  ;;  %v13030_v39 = vld [vmem:[#allocation43_spill] sm:$0xff]  ;;  %v13041_v22 = vld [vmem:[#allocation54_spill] sm:$0xff] }
0x2802   :  { %3827 = vmatpush1.msra.mxu0 %v10132_v40  ;;  %3890 = vmatprep.mubr.f32.mxu0 %v12794_v23  ;;  %v13031_v40 = vld [vmem:[#allocation44_spill] sm:$0xff] }
0x2803   :  { %3828 = vmatprep.subr.mxu0 %v10139_v54  ;;  %v13032_v54 = vld [vmem:[#allocation45_spill] sm:$0xff] }
0x2804   :  { %3829 = vmatpush1.msra.mxu0 %v10145_v51  ;;  %v13033_v51 = vld [vmem:[#allocation46_spill] sm:$0xff] }
0x2805   :  { %3830 = vmatprep.subr.mxu0 %v10151_v28  ;;  %v13034_v28 = vld [vmem:[#allocation47_spill] sm:$0xff] }
0x2806   :  { %3831 = vmatpush1.msra.mxu0 %v10157_v11  ;;  %v13035_v11 = vld [vmem:[#allocation48_spill] sm:$0xff] }
0x2807   :  { %3832 = vmatprep.subr.mxu0 %v10163_v29  ;;  %v13036_v29 = vld [vmem:[#allocation49_spill] sm:$0xff] }
0x2808   :  { %3833 = vmatpush1.msra.mxu0 %v10169_v32  ;;  %v13037_v32 = vld [vmem:[#allocation50_spill] sm:$0xff] }
0x2809   :  { %3834 = vmatprep.subr.mxu0 %v10175_v63  ;;  %v13038_v63 = vld [vmem:[#allocation51_spill] sm:$0xff] }
0x280a   :  { %3835 = vmatpush1.msra.mxu0 %v10181_v47  ;;  %v13039_v47 = vld [vmem:[#allocation52_spill] sm:$0xff] }
0x280b   :  { %3836 = vmatprep.subr.mxu0 %v10187_v41  ;;  %v13040_v41 = vld [vmem:[#allocation53_spill] sm:$0xff] }
0x280c   :  { %3837 = vmatpush1.msra.mxu0 %v13030_v39  ;;  %v13051_v39 = vld [vmem:[#allocation70_spill] sm:$0xff] }
0x280d   :  { %3838 = vmatprep.subr.mxu0 %v13031_v40 }
0x280e   :  { %3839 = vmatpush1.msra.mxu0 %v13032_v54 }
0x280f   :  { %3840 = vmatprep.subr.mxu0 %v13033_v51 }
0x2810   :  { %3841 = vmatpush1.msra.mxu0 %v13034_v28  ;;  %v13052_v28 = vld [vmem:[#allocation78_spill] sm:$0xff] }
0x2811   :  { %3842 = vmatprep.subr.mxu0 %v13035_v11  ;;  %v13053_v11 = vld [vmem:[#allocation79_spill] sm:$0xff] }
0x2812   :  { %3843 = vmatpush1.msra.mxu0 %v13036_v29  ;;  %v13054_v29 = vld [vmem:[#allocation80_spill] sm:$0xff] }
0x2813   :  { %3844 = vmatprep.subr.mxu0 %v13037_v32  ;;  %v13055_v32 = vld [vmem:[#allocation27_spill] sm:$0xff] }
0x2814   :  { %3845 = vmatpush1.msra.mxu0 %v13038_v63  ;;  %v13056_v63 = vld [vmem:[#allocation28_spill] sm:$0xff] }
0x2815   :  { %3846 = vmatprep.subr.mxu0 %v13039_v47  ;;  %v13057_v47 = vld [vmem:[#allocation29_spill] sm:$0xff] }
0x2816   :  { %3847 = vmatpush1.msra.mxu0 %v13040_v41  ;;  %v13058_v41 = vld [vmem:[#allocation30_spill] sm:$0xff] }
0x2817   :  { %3848 = vmatprep.subr.mxu0 %v13041_v22  ;;  %v13059_v22 = vld [vmem:[#allocation31_spill] sm:$0xff] }
0x2818   :  { %3849 = vmatpush1.msra.mxu0 %v13042_v62  ;;  %v13060_v62 = vld [vmem:[#allocation32_spill] sm:$0xff] }
0x2819   :  { %3850 = vmatprep.subr.mxu0 %v13043_v37  ;;  %v13061_v37 = vld [vmem:[#allocation33_spill] sm:$0xff] }
0x281a   :  { %3851 = vmatpush1.msra.mxu0 %v13044_v52 }
0x281b   :  { %3852 = vmatprep.subr.mxu0 %v13045_v34  ;;  %v13062_v34 = vld [vmem:[#allocation34_spill] sm:$0xff] }
0x281c   :  { %3853 = vmatpush1.msra.mxu0 %v13046_v13  ;;  %v13063_v13 = vld [vmem:[#allocation36_spill] sm:$0xff] }
0x281d   :  { %3854 = vmatprep.subr.mxu0 %v13047_v48 }
0x281e   :  { %3855 = vmatpush1.msra.mxu0 %v13048_v49  ;;  %v13064_v49 = vld [vmem:[#allocation37_spill] sm:$0xff] }
0x281f   :  { %3856 = vmatprep.subr.mxu0 %v13049_v45 }
0x2820   :  { %3857 = vmatpush1.msra.mxu0 %v13050_v18  ;;  %v13065_v18 = vld [vmem:[#allocation38_spill] sm:$0xff] }
0x2821   :  { %7348 = vmatprep.subr.mxu0 %v12794_v23 }
0x28b1   :  { %v3517_v16 = vpop.f32.mrf.mxu0 }
0x28b2   :  { %v3518_v40 = vadd.f32 %v13051_v39, %v3517_v16  ;;  %v13066_v16 = vld [vmem:[#allocation39_spill] sm:$0xff] }
0x28b3   :  { %v7309_v54 = vpop.f32.mrf.mxu0  ;;  %v13067_v39 = vld [vmem:[#allocation35_spill] sm:$0xff] }
0x28b4   :  { %v3521_v51 = vmax.f32 %v3518_v40, 0.0  ;;  %v13068_v54 = vld [vmem:[#allocation40_spill] sm:$0xff] }
0x28b6   :  { %7327 = vmatmul.mubr.msk.f32.vlgmr.msra.gmra.mxu1 %vm535_vm1, %v3521_v51  ;;  %v13069_v51 = vld [vmem:[#allocation41_spill] sm:$0xff] }
0x28b7   :  { %3722 = vmatpush1.msra.mxu1 %v13052_v28  ;;  %3785 = vmatprep.mubr.f32.mxu1 %v12794_v23 }
0x28b8   :  { %3723 = vmatprep.subr.mxu1 %v13053_v11 }
0x28b9   :  { %3724 = vmatpush1.msra.mxu1 %v13054_v29 }
0x28ba   :  { %3725 = vmatprep.subr.mxu1 %v13055_v32 }
0x28bb   :  { %3726 = vmatpush1.msra.mxu1 %v13056_v63 }
0x28bc   :  { %3727 = vmatprep.subr.mxu1 %v13057_v47 }
0x28bd   :  { %3728 = vmatpush1.msra.mxu1 %v13058_v41 }
0x28be   :  { %3729 = vmatprep.subr.mxu1 %v13059_v22 }
0x28bf   :  { %3730 = vmatpush1.msra.mxu1 %v13060_v62  ;;  %v13073_v62 = vld [vmem:[#allocation83_spill] sm:$0xff] }
0x28c0   :  { %3731 = vmatprep.subr.mxu1 %v13061_v37  ;;  %v13070_v37 = vld [vmem:[#allocation42_spill] sm:$0xff] }
0x28c1   :  { %v3666_v52 = vpop.f32.mrf.mxu0  ;;  %3732 = vmatpush1.msra.mxu1 %v13062_v34  ;;  %v13071_v34 = vld [vmem:[#allocation24_spill] sm:$0xff] }
0x28c2   :  { %3733 = vmatprep.subr.mxu1 %v13063_v13  ;;  %v13072_v13 = vld [vmem:[#allocation63_spill] sm:$0xff] }
0x28c3   :  { %v3668_v48 = vpop.f32.mrf.mxu0  ;;  %3734 = vmatpush1.msra.mxu1 %v13064_v49  ;;  %v13084_v49 = vld [vmem:[#allocation20_spill] sm:$0xff] }
0x28c4   :  { %v3674_v45 = vrot.slane %v3668_v48, 6  ;;  %3735 = vmatprep.subr.mxu1 %v13065_v18  ;;  %v13074_v48 = vld [vmem:[#allocation84_spill] sm:$0xff]  ;;  %v13075_v18 = vld [vmem:[#allocation85_spill] sm:$0xff] }
0x28c5   :  { %3736 = vmatpush1.msra.mxu1 %v13066_v16  ;;  %v13076_v16 = vld [vmem:[#allocation86_spill] sm:$0xff] }
0x28c6   :  { %v3678_v40 = vadd.f32 %v3674_v45, %v13067_v39  ;;  %3737 = vmatprep.subr.mxu1 %v13068_v54  ;;  %v13077_v45 = vld [vmem:[#allocation87_spill] sm:$0xff]  ;;  %v13078_v54 = vld [vmem:[#allocation88_spill] sm:$0xff] }
0x28c7   :  { %3738 = vmatpush1.msra.mxu1 %v13069_v51  ;;  %v13079_v51 = vld [vmem:[#allocation89_spill] sm:$0xff]  ;;  %v13081_v39 = vld [vmem:[#allocation91_spill] sm:$0xff] }
0x28c8   :  { %3739 = vmatprep.subr.mxu1 %v13070_v37  ;;  %7829 = vtanh.f32 %v3678_v40  ;;  %v13080_v37 = vld [vmem:[#allocation90_spill] sm:$0xff] }
0x28c9   :  { %3740 = vmatpush1.msra.mxu1 %v13071_v34  ;;  %v13082_v34 = vld [vmem:[#allocation92_spill] sm:$0xff] }
0x28ca   :  { %3741 = vmatprep.subr.mxu1 %v13072_v13  ;;  %v13083_v13 = vld [vmem:[#allocation93_spill] sm:$0xff] }
0x28cb   :  { %3742 = vmatpush1.msra.mxu1 %v13073_v62 }
0x28cc   :  { %3743 = vmatprep.subr.mxu1 %v13074_v48 }
0x28cd   :  { %3744 = vmatpush1.msra.mxu1 %v13075_v18 }
0x28ce   :  { %3745 = vmatprep.subr.mxu1 %v13076_v16  ;;  %v3673_v16 = vrot.slane %v3666_v52, 6 }
0x28cf   :  { %3746 = vmatpush1.msra.mxu1 %v13077_v45 }
0x28d0   :  { %3747 = vmatprep.subr.mxu1 %v13078_v54  ;;  %v3677_v45 = vadd.f32 %v3673_v16, %v10785_v60 }
0x28d1   :  { %3748 = vmatpush1.msra.mxu1 %v13079_v51 }
0x28d2   :  { %3749 = vmatprep.subr.mxu1 %v13080_v37  ;;  %v6560_v18 = vmul.f32 -1.442695, %v3677_v45 }
0x28d3   :  { %3750 = vmatpush1.msra.mxu1 %v13081_v39 }
0x28d4   :  { %3751 = vmatprep.subr.mxu1 %v13082_v34  ;;  %7831 = vpow2.f32 %v6560_v18  ;;  %v8163_v34 = vld [vmem:[#allocation10 + $0x4] ss:$0 sm:$0xff] }
0x28d5   :  { %3752 = vmatpush1.msra.mxu1 %v13083_v13  ;;  %v7830_v62 = vpop.eup %7829  ;;  %v3713_v13 = vrot.slane %v10834_v27, 6 }
0x28d6   :  { %7329 = vmatprep.subr.mxu1 %v12794_v23  ;;  %3697 = vrot.lane.b32.xlu1 %v7830_v62, %s8471_s5  ;;  %v10983_v62 = vadd.f32 %v8163_v34, %v13084_v49  ;;  %v6561_v34 = vmul.f32 -1.442695, %v3678_v40 }
0x28e1   :  { %v7832_v54 = vpop.eup %7831 }
0x28e2   :  { %v3685_v51 = vadd.f32 1.0, %v7832_v54 }
0x28e4   :  { %7833 = vrcp.f32 %v3685_v51  ;;  %v3693_v51 = vrot.slane %v10796_v10, 6 }
0x28f1   :  { %v7834_v37 = vpop.eup %7833 }
0x2948   :  { %v3698_v48 = vpop.permute.xlu1 %3697 }
0x2949   :  { %v3700_v39 = vmul.f32 %v7834_v37, %v3698_v48  ;;  %v3695_v48 = vmul.f32 %v7834_v37, %v3693_v51 }
0x294b   :  { %3702 = vrot.lane.b32.xlu0 %v3700_v39, %s8471_s5 }
0x294f   :  { %3714 = vrot.lane.b32.xlu0 %v3713_v13, %s8471_s5 }
0x2976   :  { %v3591_v52 = vpop.f32.mrf.mxu1 }
0x2977   :  { %v3592_v16 = vadd.f32 %v3591_v52, %v10983_v62 }
0x2978   :  { %v7328_v18 = vpop.f32.mrf.mxu1 }
0x2979   :  { %v3595_v45 = vmax.f32 %v3592_v16, 0.0 }
0x297b   :  { %v10987_v54 = vadd.f32 %v3595_v45, %v10793_v6 }
0x29bd   :  { %v3703_v39 = vpop.permute.xlu0 %3702 }
0x29be   :  { %v10990_v60 = vadd.f32 %v3703_v39, %v3695_v48 }
0x29c0   :  { %7835 = vtanh.f32 %v10990_v60 }
0x29c1   :  { %7837 = vpow2.f32 %v6561_v34  ;;  %v3715_v18 = vpop.permute.xlu0 %3714 }
0x29cd   :  { %v7836_v27 = vpop.eup %7835 }
0x29ce   :  { %3708 = vrot.lane.b32.xlu1 %v7836_v27, %s8471_s5  ;;  %v7838_v13 = vpop.eup %7837 }
0x29cf   :  { %v3686_v49 = vadd.f32 1.0, %v7838_v13 }
0x29d1   :  { %7839 = vrcp.f32 %v3686_v49 }
0x29de   :  { %v7840_v52 = vpop.eup %7839 }
0x2a40   :  { %v3709_v16 = vpop.permute.xlu1 %3708 }
0x2a41   :  { %v10994_v6 = vmul.f32 %v7840_v52, %v3709_v16 }
0x2a43   :  { %v3717_v10 = vsel %vm535_vm1, %v10994_v6, %v3715_v18 }
0x2a44   :  { %v3719_v37 = vrot.slane %v3717_v10, 2 }
0x2a46   :  { %3786 = vmatmul.mubr.f32.vlgmr.msra.gmra.mxu1 %v3719_v37  ;;  %v13085_v37 = vld [vmem:[#allocation60_spill] sm:$0xff] }
0x2a47   :  { %7330 = vmatpush3.msra.mxu1 %v10373_v56  ;;  %7345 = vmatprep.mubr.msk.f32.mxu1 %vm8470_vm0, %v12794_v23 }
0x2a48   :  { %7331 = vmatprep.subr.mxu1 %v12794_v23 }
0x2a49   :  { %7332 = vmatpush3.msra.mxu1 %v10379_v44 }
0x2a4a   :  { %7333 = vmatprep.subr.mxu1 %v12794_v23 }
0x2a4b   :  { %7334 = vmatpush3.msra.mxu1 %v10383_v2 }
0x2a4c   :  { %7335 = vmatprep.subr.mxu1 %v12794_v23 }
0x2a4d   :  { %7336 = vmatpush3.msra.mxu1 %v10387_v4 }
0x2a4e   :  { %7337 = vmatprep.subr.mxu1 %v12794_v23 }
0x2a4f   :  { %7338 = vmatpush3.msra.mxu1 %v10391_v7 }
0x2a50   :  { %7339 = vmatprep.subr.mxu1 %v12794_v23 }
0x2a51   :  { %7340 = vmatpush3.msra.mxu1 %v10395_v8 }
0x2a52   :  { %7341 = vmatprep.subr.mxu1 %v12794_v23 }
0x2a53   :  { %7342 = vmatpush3.msra.mxu1 %v10399_v12 }
0x2a54   :  { %7343 = vmatprep.subr.mxu1 %v12794_v23 }
0x2a55   :  { %7344 = vmatpush3.msra.mxu1 %v10403_v46 }
0x2a56   :  { %7367 = vmatprep.subr.mxu1 %v12794_v23 }
0x2b06   :  { %v3787_v56 = vpop.f32.mrf.mxu1 }
0x2b07   :  { %v3788_v7 = vadd.f32 %v3787_v56, %v12864_v36  ;;  %v13086_v56 = vld [vmem:[#allocation23_spill] sm:$0xff] }
0x2b08   :  { %v3789_v44 = vpop.f32.mrf.mxu1 }
0x2b09   :  { %v3790_v2 = vadd.f32 %v3789_v44, %v12903_v26  ;;  %v6562_v8 = vmul.f32 -1.442695, %v3788_v7  ;;  %v13088_v44 = vld [vmem:[#allocation67_spill] sm:$0xff] }
0x2b0b   :  { %7841 = vtanh.f32 %v3790_v2  ;;  %v6563_v13 = vmul.f32 -1.442695, %v3790_v2 }
0x2b0c   :  { %7843 = vpow2.f32 %v6562_v8 }
0x2b18   :  { %v7842_v4 = vpop.eup %7841 }
0x2b19   :  { %3807 = vrot.lane.b32.xlu1 %v7842_v4, %s8471_s5  ;;  %v7844_v40 = vpop.eup %7843 }
0x2b1a   :  { %v3798_v12 = vadd.f32 1.0, %v7844_v40 }
0x2b1c   :  { %7845 = vrcp.f32 %v3798_v12 }
0x2b29   :  { %v7846_v45 = vpop.eup %7845 }
0x2b2a   :  { %v3805_v48 = vmul.f32 %v7846_v45, %v10830_v9 }
0x2b8b   :  { %v3808_v51 = vpop.permute.xlu1 %3807 }
0x2b8c   :  { %v3810_v46 = vmul.f32 %v7846_v45, %v3808_v51 }
0x2b8e   :  { %3812 = vrot.lane.b32.xlu0 %v3810_v46, %s8471_s5 }
0x2b92   :  { %3822 = vrot.lane.b32.xlu0 %v10865_v31, %s8471_s5 }
0x2c00   :  { %v3813_v39 = vpop.permute.xlu0 %3812 }
0x2c01   :  { %v11023_v27 = vadd.f32 %v3813_v39, %v3805_v48 }
0x2c03   :  { %7847 = vtanh.f32 %v11023_v27 }
0x2c04   :  { %7849 = vpow2.f32 %v6563_v13  ;;  %v3823_v31 = vpop.permute.xlu0 %3822 }
0x2c10   :  { %v7848_v34 = vpop.eup %7847 }
0x2c11   :  { %3818 = vrot.lane.b32.xlu1 %v7848_v34, %s8471_s5  ;;  %v7850_v49 = vpop.eup %7849 }
0x2c12   :  { %v3799_v52 = vadd.f32 1.0, %v7850_v49 }
0x2c14   :  { %7851 = vrcp.f32 %v3799_v52 }
0x2c21   :  { %v7852_v16 = vpop.eup %7851 }
0x2c83   :  { %v3819_v18 = vpop.permute.xlu1 %3818 }
0x2c84   :  { %v11027_v10 = vmul.f32 %v7852_v16, %v3819_v18 }
0x2c86   :  { %v3825_v9 = vsel %vm535_vm1, %v11027_v10, %v3823_v31 }
0x2c87   :  { %3891 = vmatmul.mubr.f32.vlgmr.msra.gmra.mxu0 %v3825_v9 }
0x2c88   :  { %7349 = vmatpush3.msra.mxu0 %v10422_v61  ;;  %7364 = vmatprep.mubr.msk.f32.mxu0 %vm8470_vm0, %v12794_v23  ;;  %v13087_v61 = vld [vmem:[#allocation25_spill] sm:$0xff] }
0x2c89   :  { %7350 = vmatprep.subr.mxu0 %v12794_v23 }
0x2c8a   :  { %7351 = vmatpush3.msra.mxu0 %v13014_v19  ;;  %v13089_v19 = vld [vmem:[#allocation68_spill] sm:$0xff] }
0x2c8b   :  { %7352 = vmatprep.subr.mxu0 %v12794_v23 }
0x2c8c   :  { %7353 = vmatpush3.msra.mxu0 %v13015_v15  ;;  %v13090_v15 = vld [vmem:[#allocation69_spill] sm:$0xff] }
0x2c8d   :  { %7354 = vmatprep.subr.mxu0 %v12794_v23 }
0x2c8e   :  { %7355 = vmatpush3.msra.mxu0 %v13085_v37 }
0x2c8f   :  { %7356 = vmatprep.subr.mxu0 %v12794_v23 }
0x2c90   :  { %7357 = vmatpush3.msra.mxu0 %v13086_v56 }
0x2c91   :  { %7358 = vmatprep.subr.mxu0 %v12794_v23 }
0x2c92   :  { %7359 = vmatpush3.msra.mxu0 %v13087_v61  ;;  %v11068_v61 = vld [vmem:[#allocation8 + $0xf0] sm:$0xff] }
0x2c93   :  { %7360 = vmatprep.subr.mxu0 %v12794_v23 }
0x2c94   :  { %7361 = vmatpush3.msra.mxu0 %v13088_v44  ;;  %v11072_v44 = vld [vmem:[#allocation8 + $0xe8] sm:$0xff] }
0x2c95   :  { %7362 = vmatprep.subr.mxu0 %v12794_v23 }
0x2c96   :  { %7363 = vmatpush3.msra.mxu0 %v13089_v19  ;;  %v11076_v19 = vld [vmem:[#allocation8 + $0xe0] sm:$0xff] }
0x2c97   :  { %4173 = vmatprep.subr.mxu0 %v13090_v15  ;;  %v11080_v15 = vld [vmem:[#allocation8 + $0xd8] sm:$0xff] }
0x2d47   :  { %v3892_v2 = vpop.f32.mrf.mxu0 }
0x2d48   :  { %v3893_v40 = vadd.f32 %v3892_v2, %v12875_v50 }
0x2d49   :  { %v3894_v4 = vpop.f32.mrf.mxu0 }
0x2d4a   :  { %v3895_v7 = vadd.f32 %v3894_v4, %v12874_v55  ;;  %v6564_v12 = vmul.f32 -1.442695, %v3893_v40  ;;  %v11090_v4 = vld [vmem:[#allocation10] ss:$0 sm:$0xff] }
0x2d4c   :  { %7853 = vtanh.f32 %v3895_v7  ;;  %v6565_v16 = vmul.f32 -1.442695, %v3895_v7 }
0x2d4d   :  { %7855 = vpow2.f32 %v6564_v12  ;;  %v11230_v12 = vld [vmem:[%s12414_s4 + $0x160] sm:$0xff] }
0x2d59   :  { %v7854_v8 = vpop.eup %7853 }
0x2d5a   :  { %3912 = vrot.lane.b32.xlu1 %v7854_v8, %s8471_s5  ;;  %v7856_v45 = vpop.eup %7855 }
0x2d5b   :  { %v3903_v51 = vadd.f32 1.0, %v7856_v45  ;;  %v11236_v45 = vld [vmem:[%s12414_s4 + $0x158] sm:$0xff] }
0x2d5d   :  { %7857 = vrcp.f32 %v3903_v51  ;;  %v11242_v51 = vld [vmem:[%s12414_s4 + $0x150] sm:$0xff] }
0x2d6a   :  { %v7858_v46 = vpop.eup %7857 }
0x2d6b   :  { %v3910_v34 = vmul.f32 %v7858_v46, %v10861_v3  ;;  %v11062_v3 = vld [vmem:[#allocation8 + $0xf8] sm:$0xff] }
0x2dcc   :  { %v3913_v48 = vpop.permute.xlu1 %3912 }
0x2dcd   :  { %v3915_v39 = vmul.f32 %v7858_v46, %v3913_v48  ;;  %v11248_v46 = vld [vmem:[%s12414_s4 + $0x148] sm:$0xff]  ;;  %v11254_v48 = vld [vmem:[%s12414_s4 + $0x140] sm:$0xff] }
0x2dcf   :  { %3917 = vrot.lane.b32.xlu0 %v3915_v39, %s8471_s5  ;;  %v11260_v39 = vld [vmem:[%s12414_s4 + $0x138] sm:$0xff] }
0x2e41   :  { %v3918_v13 = vpop.permute.xlu0 %3917 }
0x2e42   :  { %v11054_v49 = vadd.f32 %v3918_v13, %v3910_v34  ;;  %v11266_v34 = vld [vmem:[%s12414_s4 + $0x130] sm:$0xff]  ;;  %v11272_v13 = vld [vmem:[%s12414_s4 + $0x128] sm:$0xff] }
0x2e44   :  { %7859 = vtanh.f32 %v11054_v49 }
0x2e45   :  { %7861 = vpow2.f32 %v6565_v16  ;;  %v11284_v16 = vld [vmem:[%s12414_s4 + $0x118] sm:$0xff] }
0x2e51   :  { %v7860_v52 = vpop.eup %7859 }
0x2e52   :  { %3923 = vrot.lane.b32.xlu1 %v7860_v52, %s8471_s5  ;;  %v7862_v18 = vpop.eup %7861  ;;  %v11278_v52 = vld [vmem:[%s12414_s4 + $0x120] sm:$0xff] }
0x2e53   :  { %v3904_v31 = vadd.f32 1.0, %v7862_v18  ;;  %v11290_v18 = vld [vmem:[%s12414_s4 + $0x110] sm:$0xff] }
0x2e55   :  { %7863 = vrcp.f32 %v3904_v31  ;;  %v11296_v31 = vld [vmem:[%s12414_s4 + $0x108] sm:$0xff] }
0x2e62   :  { %v7864_v9 = vpop.eup %7863 }
0x2ec4   :  { %v3924_v37 = vpop.permute.xlu1 %3923 }
0x2ec5   :  { %v11058_v56 = vmul.f32 %v7864_v9, %v3924_v37  ;;  %v11302_v9 = vld [vmem:[%s12414_s4 + $0x100] sm:$0xff] }
0x2ec6   :  { %13091 = vst [vmem:[#allocation81_spill] sm:$0xff] %v11302_v9 }
0x2ec7   :  { %7346 = vmatmul.mubr.msk.f32.vlgmr.msra.gmra.mxu1 %vm535_vm1, %v11058_v56 }
0x2ec8   :  { %7368 = vmatpush3.msra.mxu1 %v11062_v3  ;;  %7383 = vmatprep.mubr.msk.f32.mxu1 %vm8470_vm0, %v12794_v23 }
0x2ec9   :  { %7369 = vmatprep.subr.mxu1 %v12794_v23 }
0x2eca   :  { %7370 = vmatpush3.msra.mxu1 %v11068_v61 }
0x2ecb   :  { %7371 = vmatprep.subr.mxu1 %v12794_v23 }
0x2ecc   :  { %7372 = vmatpush3.msra.mxu1 %v11072_v44 }
0x2ecd   :  { %7373 = vmatprep.subr.mxu1 %v12794_v23 }
0x2ece   :  { %7374 = vmatpush3.msra.mxu1 %v11076_v19 }
0x2ecf   :  { %7375 = vmatprep.subr.mxu1 %v12794_v23 }
0x2ed0   :  { %7376 = vmatpush3.msra.mxu1 %v11080_v15 }
0x2ed1   :  { %7377 = vmatprep.subr.mxu1 %v12794_v23 }
0x2ed2   :  { %7378 = vmatpush3.msra.mxu1 %v10483_v0  ;;  %v4154_v0 = vrot.slane %v10994_v6, 2  ;;  %v11224_v6 = vld [vmem:[%s12414_s4 + $0x168] sm:$0xff] }
0x2ed3   :  { %7379 = vmatprep.subr.mxu1 %v12794_v23 }
0x2ed4   :  { %7380 = vmatpush3.msra.mxu1 %v10487_v5  ;;  %v11115_v5 = vld [vmem:[%s12414_s4 + $0x1f8] sm:$0xff] }
0x2ed5   :  { %7381 = vmatprep.subr.mxu1 %v12794_v23 }
0x2ed6   :  { %7382 = vmatpush3.msra.mxu1 %v10491_v57  ;;  %v11121_v57 = vld [vmem:[%s12414_s4 + $0x1f0] sm:$0xff] }
0x2ed7   :  { %4278 = vmatprep.subr.mxu1 %v10497_v20  ;;  %v11128_v20 = vld [vmem:[%s12414_s4 + $0x1e8] sm:$0xff] }
0x2f87   :  { %v3996_v2 = vpop.f32.mrf.mxu1 }
0x2f88   :  { %v3997_v7 = vadd.f32 %v11090_v4, %v3996_v2  ;;  %v11306_v2 = vld [vmem:[#allocation10 + $0x1] ss:$0 sm:$0xff] }
0x2f89   :  { %v7347_v8 = vpop.f32.mrf.mxu1  ;;  %13092 = vst [vmem:[#allocation82_spill] sm:$0xff] %v11306_v2 }
0x2f8a   :  { %v4000_v40 = vmax.f32 %v3997_v7, 0.0 }
0x2f8c   :  { %7365 = vmatmul.mubr.msk.f32.vlgmr.msra.gmra.mxu0 %vm535_vm1, %v4000_v40 }
0x2f8d   :  { %4174 = vmatpush1.msra.mxu0 %v10502_v17  ;;  %4221 = vmatprep.mubr.f32.mxu0 %v12794_v23  ;;  %v11134_v17 = vld [vmem:[%s12414_s4 + $0x1e0] sm:$0xff] }
0x2f8e   :  { %4175 = vmatprep.subr.mxu0 %v13022_v33  ;;  %v11176_v33 = vld [vmem:[%s12414_s4 + $0x1a8] sm:$0xff] }
0x2f8f   :  { %4176 = vmatpush1.msra.mxu0 %v13023_v58  ;;  %v11182_v58 = vld [vmem:[%s12414_s4 + $0x1a0] sm:$0xff] }
0x2f90   :  { %4177 = vmatprep.subr.mxu0 %v13024_v30  ;;  %v11188_v30 = vld [vmem:[%s12414_s4 + $0x198] sm:$0xff] }
0x2f91   :  { %4178 = vmatpush1.msra.mxu0 %v13025_v53  ;;  %v11194_v53 = vld [vmem:[%s12414_s4 + $0x190] sm:$0xff] }
0x2f92   :  { %4179 = vmatprep.subr.mxu0 %v13026_v38  ;;  %v11200_v38 = vld [vmem:[%s12414_s4 + $0x188] sm:$0xff] }
0x2f93   :  { %4180 = vmatpush1.msra.mxu0 %v13027_v24  ;;  %v11206_v24 = vld [vmem:[%s12414_s4 + $0x180] sm:$0xff] }
0x2f94   :  { %4181 = vmatprep.subr.mxu0 %v13028_v1  ;;  %v11212_v1 = vld [vmem:[%s12414_s4 + $0x178] sm:$0xff] }
0x2f95   :  { %4182 = vmatpush1.msra.mxu0 %v13029_v35  ;;  %v11218_v35 = vld [vmem:[%s12414_s4 + $0x170] sm:$0xff] }
0x2f96   :  { %4183 = vmatprep.subr.mxu0 %v10530_v59  ;;  %v11152_v59 = vld [vmem:[%s12414_s4 + $0x1c8] sm:$0xff] }
0x2f97   :  { %4184 = vmatpush1.msra.mxu0 %v10533_v21  ;;  %v11158_v21 = vld [vmem:[%s12414_s4 + $0x1c0] sm:$0xff] }
0x2f98   :  { %4185 = vmatprep.subr.mxu0 %v10536_v14  ;;  %v11164_v14 = vld [vmem:[%s12414_s4 + $0x1b8] sm:$0xff] }
0x2f99   :  { %4186 = vmatpush1.msra.mxu0 %v10539_v43  ;;  %v11170_v43 = vld [vmem:[%s12414_s4 + $0x1b0] sm:$0xff] }
0x2f9a   :  { %4187 = vmatprep.subr.mxu0 %v10543_v25  ;;  %v11140_v25 = vld [vmem:[%s12414_s4 + $0x1d8] sm:$0xff] }
0x2f9b   :  { %4188 = vmatpush1.msra.mxu0 %v10546_v42  ;;  %v11146_v42 = vld [vmem:[%s12414_s4 + $0x1d0] sm:$0xff] }
0x2f9c   :  { %6569 = vmatmul.mubr.msk.f32.vlgmr.msra.gmra.mxu0 %vm535_vm1, %v4154_v0  ;;  %4383 = vmatprep.subr.mxu0 %v11115_v5  ;;  %v13093_v0 = vld [vmem:[#allocation32_spill] sm:$0xff] }
0x2f9d   :  { %4384 = vmatpush1.msra.mxu0 %v11121_v57  ;;  %4447 = vmatprep.mubr.f32.mxu0 %v12794_v23 }
0x2f9e   :  { %4385 = vmatprep.subr.mxu0 %v11128_v20 }
0x2f9f   :  { %4386 = vmatpush1.msra.mxu0 %v11134_v17 }
0x2fa0   :  { %4387 = vmatprep.subr.mxu0 %v11140_v25 }
0x2fa1   :  { %4388 = vmatpush1.msra.mxu0 %v11146_v42 }
0x2fa2   :  { %4389 = vmatprep.subr.mxu0 %v11152_v59 }
0x2fa3   :  { %4390 = vmatpush1.msra.mxu0 %v11158_v21 }
0x2fa4   :  { %4391 = vmatprep.subr.mxu0 %v11164_v14 }
0x2fa5   :  { %4392 = vmatpush1.msra.mxu0 %v11170_v43 }
0x2fa6   :  { %4393 = vmatprep.subr.mxu0 %v11176_v33 }
0x2fa7   :  { %4394 = vmatpush1.msra.mxu0 %v11182_v58 }
0x2fa8   :  { %4395 = vmatprep.subr.mxu0 %v11188_v30 }
0x2fa9   :  { %4396 = vmatpush1.msra.mxu0 %v11194_v53 }
0x2faa   :  { %4397 = vmatprep.subr.mxu0 %v11200_v38 }
0x2fab   :  { %4398 = vmatpush1.msra.mxu0 %v11206_v24 }
0x2fac   :  { %4399 = vmatprep.subr.mxu0 %v11212_v1 }
0x2fad   :  { %4400 = vmatpush1.msra.mxu0 %v11218_v35 }
0x2fae   :  { %4401 = vmatprep.subr.mxu0 %v11224_v6 }
0x2faf   :  { %4402 = vmatpush1.msra.mxu0 %v11230_v12 }
0x2fb0   :  { %4403 = vmatprep.subr.mxu0 %v11236_v45 }
0x2fb1   :  { %4404 = vmatpush1.msra.mxu0 %v11242_v51 }
0x2fb2   :  { %4405 = vmatprep.subr.mxu0 %v11248_v46 }
0x2fb3   :  { %4406 = vmatpush1.msra.mxu0 %v11254_v48 }
0x2fb4   :  { %4407 = vmatprep.subr.mxu0 %v11260_v39 }
0x2fb5   :  { %4408 = vmatpush1.msra.mxu0 %v11266_v34 }
0x2fb6   :  { %4409 = vmatprep.subr.mxu0 %v11272_v13 }
0x2fb7   :  { %4410 = vmatpush1.msra.mxu0 %v11278_v52 }
0x2fb8   :  { %4411 = vmatprep.subr.mxu0 %v11284_v16 }
0x2fb9   :  { %4412 = vmatpush1.msra.mxu0 %v11290_v18 }
0x2fba   :  { %4413 = vmatprep.subr.mxu0 %v11296_v31 }
0x2fbb   :  { %4414 = vmatpush1.msra.mxu0 %v11302_v9 }
0x2fbc   :  { %7405 = vmatprep.subr.mxu0 %v12794_v23 }
0x304c   :  { %v4070_v37 = vpop.f32.mrf.mxu0 }
0x304d   :  { %v4071_v7 = vadd.f32 %v11306_v2, %v4070_v37  ;;  %v13094_v37 = vld [vmem:[#allocation33_spill] sm:$0xff]  ;;  %v13106_v2 = vld [vmem:[#allocation83_spill] sm:$0xff] }
0x304e   :  { %v7366_v8 = vpop.f32.mrf.mxu0 }
0x304f   :  { %v4074_v40 = vmax.f32 %v4071_v7, 0.0  ;;  %v13095_v7 = vld [vmem:[#allocation34_spill] sm:$0xff]  ;;  %v13097_v8 = vld [vmem:[#allocation37_spill] sm:$0xff] }
0x3051   :  { %7384 = vmatmul.mubr.msk.f32.vlgmr.msra.gmra.mxu1 %vm535_vm1, %v4074_v40 }
0x3052   :  { %4279 = vmatpush1.msra.mxu1 %v13052_v28  ;;  %4342 = vmatprep.mubr.f32.mxu1 %v12794_v23 }
0x3053   :  { %4280 = vmatprep.subr.mxu1 %v13053_v11  ;;  %v13096_v11 = vld [vmem:[#allocation36_spill] sm:$0xff] }
0x3054   :  { %4281 = vmatpush1.msra.mxu1 %v13054_v29 }
0x3055   :  { %4282 = vmatprep.subr.mxu1 %v13055_v32 }
0x3056   :  { %4283 = vmatpush1.msra.mxu1 %v13056_v63  ;;  %v13098_v63 = vld [vmem:[#allocation38_spill] sm:$0xff] }
0x3057   :  { %4284 = vmatprep.subr.mxu1 %v13057_v47  ;;  %v13099_v47 = vld [vmem:[#allocation39_spill] sm:$0xff] }
0x3058   :  { %4285 = vmatpush1.msra.mxu1 %v13058_v41  ;;  %v13100_v41 = vld [vmem:[#allocation35_spill] sm:$0xff] }
0x3059   :  { %4286 = vmatprep.subr.mxu1 %v13059_v22  ;;  %v13101_v22 = vld [vmem:[#allocation40_spill] sm:$0xff] }
0x305a   :  { %4287 = vmatpush1.msra.mxu1 %v13093_v0  ;;  %v13102_v0 = vld [vmem:[#allocation41_spill] sm:$0xff] }
0x305b   :  { %4288 = vmatprep.subr.mxu1 %v13094_v37  ;;  %v13103_v37 = vld [vmem:[#allocation42_spill] sm:$0xff] }
0x305c   :  { %v4223_v28 = vpop.f32.mrf.mxu0  ;;  %4289 = vmatpush1.msra.mxu1 %v13095_v7  ;;  %v13104_v7 = vld [vmem:[#allocation24_spill] sm:$0xff] }
0x305d   :  { %4290 = vmatprep.subr.mxu1 %v13096_v11  ;;  %v13105_v11 = vld [vmem:[#allocation63_spill] sm:$0xff] }
0x305e   :  { %v4225_v29 = vpop.f32.mrf.mxu0  ;;  %4291 = vmatpush1.msra.mxu1 %v13097_v8  ;;  %v13108_v8 = vld [vmem:[#allocation85_spill] sm:$0xff] }
0x305f   :  { %v4231_v32 = vrot.slane %v4225_v29, 4  ;;  %4292 = vmatprep.subr.mxu1 %v13098_v63  ;;  %v13107_v29 = vld [vmem:[#allocation84_spill] sm:$0xff]  ;;  %v13109_v63 = vld [vmem:[#allocation86_spill] sm:$0xff] }
0x3060   :  { %4293 = vmatpush1.msra.mxu1 %v13099_v47  ;;  %v13111_v47 = vld [vmem:[#allocation88_spill] sm:$0xff] }
0x3061   :  { %v4235_v40 = vadd.f32 %v4231_v32, %v13100_v41  ;;  %4294 = vmatprep.subr.mxu1 %v13101_v22  ;;  %v13110_v32 = vld [vmem:[#allocation87_spill] sm:$0xff]  ;;  %v13112_v22 = vld [vmem:[#allocation89_spill] sm:$0xff] }
0x3062   :  { %4295 = vmatpush1.msra.mxu1 %v13102_v0  ;;  %v13113_v0 = vld [vmem:[#allocation90_spill] sm:$0xff] }
0x3063   :  { %4296 = vmatprep.subr.mxu1 %v13103_v37  ;;  %7865 = vtanh.f32 %v4235_v40  ;;  %v13114_v37 = vld [vmem:[#allocation91_spill] sm:$0xff] }
0x3064   :  { %4297 = vmatpush1.msra.mxu1 %v13104_v7  ;;  %v13115_v7 = vld [vmem:[#allocation92_spill] sm:$0xff] }
0x3065   :  { %4298 = vmatprep.subr.mxu1 %v13105_v11  ;;  %v13116_v11 = vld [vmem:[#allocation93_spill] sm:$0xff] }
0x3066   :  { %4299 = vmatpush1.msra.mxu1 %v13106_v2 }
0x3067   :  { %4300 = vmatprep.subr.mxu1 %v13107_v29  ;;  %v4230_v29 = vrot.slane %v4223_v28, 4 }
0x3068   :  { %4301 = vmatpush1.msra.mxu1 %v13108_v8  ;;  %v13117_v8 = vld [vmem:[#allocation62_spill] sm:$0xff] }
0x3069   :  { %4302 = vmatprep.subr.mxu1 %v13109_v63  ;;  %v4234_v63 = vadd.f32 %v4230_v29, %v13117_v8 }
0x306a   :  { %4303 = vmatpush1.msra.mxu1 %v13110_v32 }
0x306b   :  { %4304 = vmatprep.subr.mxu1 %v13111_v47  ;;  %v6570_v32 = vmul.f32 -1.442695, %v4234_v63 }
0x306c   :  { %4305 = vmatpush1.msra.mxu1 %v13112_v22 }
0x306d   :  { %4306 = vmatprep.subr.mxu1 %v13113_v0  ;;  %7867 = vpow2.f32 %v6570_v32  ;;  %v4250_v32 = vrot.slane %v10990_v60, 6 }
0x306e   :  { %4307 = vmatpush1.msra.mxu1 %v13114_v37 }
0x306f   :  { %4308 = vmatprep.subr.mxu1 %v13115_v7  ;;  %v4270_v7 = vrot.slane %v11027_v10, 4 }
0x3070   :  { %4309 = vmatpush1.msra.mxu1 %v13116_v11  ;;  %v7866_v2 = vpop.eup %7865  ;;  %v4076_v11 = vrot.slane %v10983_v62, 2 }
0x3071   :  { %7386 = vmatprep.subr.mxu1 %v12794_v23  ;;  %4254 = vrot.lane.b32.xlu0 %v7866_v2, %s8471_s5 }
0x307a   :  { %v7868_v47 = vpop.eup %7867 }
0x307b   :  { %v4242_v22 = vadd.f32 1.0, %v7868_v47 }
0x307d   :  { %7869 = vrcp.f32 %v4242_v22 }
0x308a   :  { %v7870_v0 = vpop.eup %7869 }
0x308b   :  { %v4252_v47 = vmul.f32 %v7870_v0, %v4250_v32  ;;  %v11372_v32 = vld [vmem:[#allocation8 + $0x28] sm:$0xff] }
0x308c   :  { %13118 = vst [vmem:[#allocation71_spill] sm:$0xff] %v11372_v32 }
0x30e3   :  { %v4255_v41 = vpop.permute.xlu0 %4254 }
0x30e4   :  { %v4257_v37 = vmul.f32 %v7870_v0, %v4255_v41 }
0x30e6   :  { %4259 = vrot.lane.b32.xlu1 %v4257_v37, %s8471_s5  ;;  %v6571_v37 = vmul.f32 -1.442695, %v4235_v40  ;;  %v11368_v40 = vld [vmem:[#allocation8 + $0x30] sm:$0xff] }
0x30ea   :  { %4271 = vrot.lane.b32.xlu1 %v4270_v7, %s8471_s5 }
0x3111   :  { %v4147_v2 = vpop.f32.mrf.mxu1 }
0x3112   :  { %v4148_v28 = vadd.f32 %v4147_v2, %v4076_v11 }
0x3113   :  { %v7385_v9 = vpop.f32.mrf.mxu1 }
0x3114   :  { %v4151_v29 = vmax.f32 %v4148_v28, 0.0 }
0x3116   :  { %v11351_v63 = vadd.f32 %v4151_v29, %v10987_v54  ;;  %v11362_v29 = vld [vmem:[#allocation8 + $0x38] sm:$0xff] }
0x3158   :  { %v4260_v22 = vpop.permute.xlu1 %4259 }
0x3159   :  { %v11354_v41 = vadd.f32 %v4260_v22, %v4252_v47  ;;  %v11376_v47 = vld [vmem:[#allocation8 + $0x20] sm:$0xff]  ;;  %v11380_v22 = vld [vmem:[#allocation8 + $0x18] sm:$0xff] }
0x315a   :  { %13119 = vst [vmem:[#allocation72_spill] sm:$0xff] %v11376_v47  ;;  %13120 = vst [vmem:[#allocation26_spill] sm:$0xff] %v11380_v22 }
0x315b   :  { %7871 = vtanh.f32 %v11354_v41 }
0x315c   :  { %7873 = vpow2.f32 %v6571_v37  ;;  %v4272_v28 = vpop.permute.xlu1 %4271  ;;  %v11388_v37 = vld [vmem:[#allocation8 + $0x8] sm:$0xff] }
0x315d   :  { %13122 = vst [vmem:[#allocation74_spill] sm:$0xff] %v11388_v37 }
0x3168   :  { %v7872_v10 = vpop.eup %7871 }
0x3169   :  { %4265 = vrot.lane.b32.xlu0 %v7872_v10, %s8471_s5  ;;  %v7874_v7 = vpop.eup %7873  ;;  %v11384_v10 = vld [vmem:[#allocation8 + $0x10] sm:$0xff] }
0x316a   :  { %v4243_v11 = vadd.f32 1.0, %v7874_v7  ;;  %13121 = vst [vmem:[#allocation73_spill] sm:$0xff] %v11384_v10  ;;  %v11392_v7 = vld [vmem:[#allocation8] sm:$0xff] }
0x316b   :  { %13123 = vst [vmem:[#allocation75_spill] sm:$0xff] %v11392_v7 }
0x316c   :  { %7875 = vrcp.f32 %v4243_v11 }
0x3179   :  { %v7876_v9 = vpop.eup %7875 }
0x31db   :  { %v4266_v2 = vpop.permute.xlu0 %4265 }
0x31dc   :  { %v11358_v54 = vmul.f32 %v7876_v9, %v4266_v2 }
0x31de   :  { %v4274_v60 = vsel %vm535_vm1, %v11358_v54, %v4272_v28 }
0x31df   :  { %v4276_v0 = vrot.slane %v4274_v60, 4 }
0x31e1   :  { %4343 = vmatmul.mubr.f32.vlgmr.msra.gmra.mxu1 %v4276_v0 }
0x31e2   :  { %7387 = vmatpush3.msra.mxu1 %v11362_v29  ;;  %7402 = vmatprep.mubr.msk.f32.mxu1 %vm8470_vm0, %v12794_v23 }
0x31e3   :  { %7388 = vmatprep.subr.mxu1 %v12794_v23 }
0x31e4   :  { %7389 = vmatpush3.msra.mxu1 %v11368_v40 }
0x31e5   :  { %7390 = vmatprep.subr.mxu1 %v12794_v23 }
0x31e6   :  { %7391 = vmatpush3.msra.mxu1 %v11372_v32 }
0x31e7   :  { %7392 = vmatprep.subr.mxu1 %v12794_v23 }
0x31e8   :  { %7393 = vmatpush3.msra.mxu1 %v11376_v47 }
0x31e9   :  { %7394 = vmatprep.subr.mxu1 %v12794_v23 }
0x31ea   :  { %7395 = vmatpush3.msra.mxu1 %v11380_v22 }
0x31eb   :  { %7396 = vmatprep.subr.mxu1 %v12794_v23 }
0x31ec   :  { %7397 = vmatpush3.msra.mxu1 %v11384_v10 }
0x31ed   :  { %7398 = vmatprep.subr.mxu1 %v12794_v23 }
0x31ee   :  { %7399 = vmatpush3.msra.mxu1 %v11388_v37 }
0x31ef   :  { %7400 = vmatprep.subr.mxu1 %v12794_v23 }
0x31f0   :  { %7401 = vmatpush3.msra.mxu1 %v11392_v7 }
0x31f1   :  { %7424 = vmatprep.subr.mxu1 %v12794_v23 }
0x32a1   :  { %v4344_v11 = vpop.f32.mrf.mxu1 }
0x32a2   :  { %v4345_v60 = vadd.f32 %v4344_v11, %v12864_v36 }
0x32a3   :  { %v4346_v9 = vpop.f32.mrf.mxu1 }
0x32a4   :  { %v4347_v2 = vadd.f32 %v4346_v9, %v12903_v26  ;;  %v6572_v0 = vmul.f32 -1.442695, %v4345_v60 }
0x32a6   :  { %7877 = vtanh.f32 %v4347_v2 }
0x32a7   :  { %7879 = vpow2.f32 %v6572_v0  ;;  %v11425_v0 = vld [vmem:[#allocation8 + $0x60] sm:$0xff] }
0x32a8   :  { %13127 = vst [vmem:[#allocation44_spill] sm:$0xff] %v11425_v0 }
0x32b3   :  { %v7878_v28 = vpop.eup %7877 }
0x32b4   :  { %4364 = vrot.lane.b32.xlu0 %v7878_v28, %s8471_s5  ;;  %v7880_v37 = vpop.eup %7879 }
0x32b5   :  { %v4355_v10 = vadd.f32 1.0, %v7880_v37  ;;  %v6573_v37 = vmul.f32 -1.442695, %v4347_v2  ;;  %v11421_v2 = vld [vmem:[#allocation8 + $0x68] sm:$0xff] }
0x32b6   :  { %13126 = vst [vmem:[#allocation43_spill] sm:$0xff] %v11421_v2 }
0x32b7   :  { %7881 = vrcp.f32 %v4355_v10 }
0x32c4   :  { %v7882_v22 = vpop.eup %7881 }
0x32c5   :  { %v4362_v9 = vmul.f32 %v7882_v22, %v11023_v27 }
0x3326   :  { %v4365_v47 = vpop.permute.xlu0 %4364 }
0x3327   :  { %v4367_v7 = vmul.f32 %v7882_v22, %v4365_v47  ;;  %v11417_v22 = vld [vmem:[#allocation8 + $0x70] sm:$0xff] }
0x3328   :  { %13125 = vst [vmem:[#allocation77_spill] sm:$0xff] %v11417_v22 }
0x3329   :  { %4369 = vrot.lane.b32.xlu1 %v4367_v7, %s8471_s5 }
0x332d   :  { %4379 = vrot.lane.b32.xlu1 %v11058_v56, %s8471_s5 }
0x339b   :  { %v4370_v26 = vpop.permute.xlu1 %4369 }
0x339c   :  { %v11403_v32 = vadd.f32 %v4370_v26, %v4362_v9  ;;  %v11411_v26 = vld [vmem:[#allocation8 + $0x78] sm:$0xff] }
0x339d   :  { %13124 = vst [vmem:[#allocation76_spill] sm:$0xff] %v11411_v26  ;;  %v11429_v9 = vld [vmem:[#allocation8 + $0x58] sm:$0xff] }
0x339e   :  { %7883 = vtanh.f32 %v11403_v32  ;;  %13128 = vst [vmem:[#allocation45_spill] sm:$0xff] %v11429_v9 }
0x339f   :  { %7885 = vpow2.f32 %v6573_v37  ;;  %v4380_v56 = vpop.permute.xlu1 %4379  ;;  %v11437_v37 = vld [vmem:[#allocation8 + $0x48] sm:$0xff] }
0x33a0   :  { %13130 = vst [vmem:[#allocation47_spill] sm:$0xff] %v11437_v37 }
0x33ab   :  { %v7884_v11 = vpop.eup %7883 }
0x33ac   :  { %4375 = vrot.lane.b32.xlu0 %v7884_v11, %s8471_s5  ;;  %v7886_v10 = vpop.eup %7885  ;;  %v11433_v11 = vld [vmem:[#allocation8 + $0x50] sm:$0xff] }
0x33ad   :  { %v4356_v28 = vadd.f32 1.0, %v7886_v10  ;;  %13129 = vst [vmem:[#allocation46_spill] sm:$0xff] %v11433_v11  ;;  %v11441_v10 = vld [vmem:[#allocation8 + $0x40] sm:$0xff] }
0x33ae   :  { %13131 = vst [vmem:[#allocation48_spill] sm:$0xff] %v11441_v10 }
0x33af   :  { %7887 = vrcp.f32 %v4356_v28  ;;  %v11444_v28 = vld [vmem:[#allocation7 + $0x78] sm:$0xff] }
0x33b0   :  { %13132 = vst [vmem:[#allocation49_spill] sm:$0xff] %v11444_v28 }
0x33bc   :  { %v7888_v47 = vpop.eup %7887 }
0x341e   :  { %v4376_v7 = vpop.permute.xlu0 %4375 }
0x341f   :  { %v11407_v60 = vmul.f32 %v7888_v47, %v4376_v7 }
0x3421   :  { %v4382_v27 = vsel %vm535_vm1, %v11407_v60, %v4380_v56 }
0x3422   :  { %4448 = vmatmul.mubr.f32.vlgmr.msra.gmra.mxu0 %v4382_v27 }
0x3423   :  { %7406 = vmatpush3.msra.mxu0 %v11411_v26  ;;  %7421 = vmatprep.mubr.msk.f32.mxu0 %vm8470_vm0, %v12794_v23 }
0x3424   :  { %7407 = vmatprep.subr.mxu0 %v12794_v23 }
0x3425   :  { %7408 = vmatpush3.msra.mxu0 %v11417_v22 }
0x3426   :  { %7409 = vmatprep.subr.mxu0 %v12794_v23 }
0x3427   :  { %7410 = vmatpush3.msra.mxu0 %v11421_v2 }
0x3428   :  { %7411 = vmatprep.subr.mxu0 %v12794_v23 }
0x3429   :  { %7412 = vmatpush3.msra.mxu0 %v11425_v0 }
0x342a   :  { %7413 = vmatprep.subr.mxu0 %v12794_v23 }
0x342b   :  { %7414 = vmatpush3.msra.mxu0 %v11429_v9 }
0x342c   :  { %7415 = vmatprep.subr.mxu0 %v12794_v23 }
0x342d   :  { %7416 = vmatpush3.msra.mxu0 %v11433_v11 }
0x342e   :  { %7417 = vmatprep.subr.mxu0 %v12794_v23 }
0x342f   :  { %7418 = vmatpush3.msra.mxu0 %v11437_v37 }
0x3430   :  { %7419 = vmatprep.subr.mxu0 %v12794_v23 }
0x3431   :  { %7420 = vmatpush3.msra.mxu0 %v11441_v10 }
0x3432   :  { %4729 = vmatprep.subr.mxu0 %v11444_v28 }
0x34e2   :  { %v4449_v47 = vpop.f32.mrf.mxu0 }
0x34e3   :  { %v4450_v37 = vadd.f32 %v4449_v47, %v12875_v50 }
0x34e4   :  { %v4451_v7 = vpop.f32.mrf.mxu0 }
0x34e5   :  { %v4452_v56 = vadd.f32 %v4451_v7, %v12874_v55  ;;  %v6574_v11 = vmul.f32 -1.442695, %v4450_v37 }
0x34e7   :  { %7889 = vtanh.f32 %v4452_v56  ;;  %v6575_v37 = vmul.f32 -1.442695, %v4452_v56  ;;  %v11498_v56 = vld [vmem:[#allocation7 + $0x60] sm:$0xff] }
0x34e8   :  { %7891 = vpow2.f32 %v6574_v11 }
0x34f4   :  { %v7890_v27 = vpop.eup %7889 }
0x34f5   :  { %4469 = vrot.lane.b32.xlu0 %v7890_v27, %s8471_s5  ;;  %v7892_v9 = vpop.eup %7891 }
0x34f6   :  { %v4460_v0 = vadd.f32 1.0, %v7892_v9 }
0x34f8   :  { %7893 = vrcp.f32 %v4460_v0 }
0x3505   :  { %v7894_v10 = vpop.eup %7893 }
0x3506   :  { %v4467_v28 = vmul.f32 %v7894_v10, %v11054_v49  ;;  %v11472_v49 = vld [vmem:[#allocation8 + $0xd0] sm:$0xff] }
0x3567   :  { %v4470_v2 = vpop.permute.xlu0 %4469 }
0x3568   :  { %v4472_v22 = vmul.f32 %v7894_v10, %v4470_v2  ;;  %v11491_v10 = vld [vmem:[#allocation7 + $0x70] sm:$0xff] }
0x356a   :  { %4474 = vrot.lane.b32.xlu1 %v4472_v22, %s8471_s5 }
0x35dc   :  { %v4475_v26 = vpop.permute.xlu1 %4474 }
0x35dd   :  { %v11452_v7 = vadd.f32 %v4475_v26, %v4467_v28  ;;  %v11495_v28 = vld [vmem:[#allocation7 + $0x68] sm:$0xff] }
0x35df   :  { %7895 = vtanh.f32 %v11452_v7 }
0x35e0   :  { %7897 = vpow2.f32 %v6575_v37  ;;  %v11507_v37 = vld [vmem:[#allocation7 + $0x48] sm:$0xff] }
0x35ec   :  { %v7896_v27 = vpop.eup %7895 }
0x35ed   :  { %4480 = vrot.lane.b32.xlu0 %v7896_v27, %s8471_s5  ;;  %v7898_v11 = vpop.eup %7897  ;;  %v11501_v27 = vld [vmem:[#allocation7 + $0x58] sm:$0xff] }
0x35ee   :  { %v4461_v9 = vadd.f32 1.0, %v7898_v11  ;;  %v11510_v11 = vld [vmem:[#allocation7 + $0x40] sm:$0xff] }
0x35f0   :  { %7899 = vrcp.f32 %v4461_v9  ;;  %v11513_v9 = vld [vmem:[#allocation7 + $0x38] sm:$0xff] }
0x35f1   :  { %13133 = vst [vmem:[#allocation50_spill] sm:$0xff] %v11513_v9 }
0x35fd   :  { %v7900_v0 = vpop.eup %7899 }
0x365f   :  { %v4481_v47 = vpop.permute.xlu0 %4480 }
0x3660   :  { %v11456_v2 = vmul.f32 %v7900_v0, %v4481_v47  ;;  %v11516_v0 = vld [vmem:[#allocation7 + $0x30] sm:$0xff]  ;;  %v11519_v47 = vld [vmem:[#allocation7 + $0x28] sm:$0xff] }
0x3661   :  { %13134 = vst [vmem:[#allocation51_spill] sm:$0xff] %v11516_v0 }
0x3662   :  { %7403 = vmatmul.mubr.msk.f32.vlgmr.msra.gmra.mxu1 %vm535_vm1, %v11456_v2 }
0x3663   :  { %7425 = vmatpush3.msra.mxu1 %v11062_v3  ;;  %7440 = vmatprep.mubr.msk.f32.mxu1 %vm8470_vm0, %v12794_v23  ;;  %v11476_v3 = vld [vmem:[#allocation8 + $0xc8] sm:$0xff] }
0x3664   :  { %7426 = vmatprep.subr.mxu1 %v12794_v23 }
0x3665   :  { %7427 = vmatpush3.msra.mxu1 %v11068_v61  ;;  %v11480_v61 = vld [vmem:[#allocation8 + $0xc0] sm:$0xff] }
0x3666   :  { %7428 = vmatprep.subr.mxu1 %v12794_v23 }
0x3667   :  { %7429 = vmatpush3.msra.mxu1 %v11072_v44  ;;  %v11486_v44 = vld [vmem:[%s12414_s4 + $0xf8] sm:$0xff] }
0x3668   :  { %7430 = vmatprep.subr.mxu1 %v12794_v23 }
0x3669   :  { %7431 = vmatpush3.msra.mxu1 %v11076_v19 }
0x366a   :  { %7432 = vmatprep.subr.mxu1 %v12794_v23 }
0x366b   :  { %7433 = vmatpush3.msra.mxu1 %v11080_v15 }
0x366c   :  { %7434 = vmatprep.subr.mxu1 %v12794_v23 }
0x366d   :  { %7435 = vmatpush3.msra.mxu1 %v11472_v49 }
0x366e   :  { %7436 = vmatprep.subr.mxu1 %v12794_v23 }
0x366f   :  { %7437 = vmatpush3.msra.mxu1 %v11476_v3 }
0x3670   :  { %7438 = vmatprep.subr.mxu1 %v12794_v23 }
0x3671   :  { %7439 = vmatpush3.msra.mxu1 %v11480_v61 }
0x3672   :  { %4834 = vmatprep.subr.mxu1 %v11486_v44 }
0x3722   :  { %v4553_v19 = vpop.f32.mrf.mxu1 }
0x3723   :  { %v4554_v15 = vadd.f32 %v11090_v4, %v4553_v19  ;;  %v11504_v4 = vld [vmem:[#allocation7 + $0x50] sm:$0xff]  ;;  %v11522_v19 = vld [vmem:[#allocation7 + $0x20] sm:$0xff] }
0x3724   :  { %v7404_v26 = vpop.f32.mrf.mxu1 }
0x3725   :  { %v4557_v22 = vmax.f32 %v4554_v15, 0.0  ;;  %v11525_v15 = vld [vmem:[#allocation7 + $0x18] sm:$0xff]  ;;  %v11528_v26 = vld [vmem:[#allocation7 + $0x10] sm:$0xff] }
0x3727   :  { %7422 = vmatmul.mubr.msk.f32.vlgmr.msra.gmra.mxu0 %vm535_vm1, %v4557_v22  ;;  %v4710_v22 = vrot.slane %v11358_v54, 4  ;;  %v11700_v54 = vld [vmem:[%s12414_s4 + $0x50] sm:$0xff] }
0x3728   :  { %4730 = vmatpush1.msra.mxu0 %v11491_v10  ;;  %4777 = vmatprep.mubr.f32.mxu0 %v12794_v23  ;;  %13152 = vst [vmem:[#allocation79_spill] sm:$0xff] %v11700_v54 }
0x3729   :  { %4731 = vmatprep.subr.mxu0 %v11495_v28 }
0x372a   :  { %4732 = vmatpush1.msra.mxu0 %v11498_v56 }
0x372b   :  { %4733 = vmatprep.subr.mxu0 %v11501_v27 }
0x372c   :  { %4734 = vmatpush1.msra.mxu0 %v11504_v4 }
0x372d   :  { %4735 = vmatprep.subr.mxu0 %v11507_v37 }
0x372e   :  { %4736 = vmatpush1.msra.mxu0 %v11510_v11 }
0x372f   :  { %4737 = vmatprep.subr.mxu0 %v11513_v9  ;;  %v11532_v9 = vld [vmem:[#allocation7 + $0x8] sm:$0xff] }
0x3730   :  { %4738 = vmatpush1.msra.mxu0 %v11516_v0  ;;  %13135 = vst [vmem:[#allocation52_spill] sm:$0xff] %v11532_v9  ;;  %v11535_v0 = vld [vmem:[#allocation7] sm:$0xff] }
0x3731   :  { %4739 = vmatprep.subr.mxu0 %v11519_v47  ;;  %13136 = vst [vmem:[#allocation53_spill] sm:$0xff] %v11535_v0 }
0x3732   :  { %4740 = vmatpush1.msra.mxu0 %v11522_v19 }
0x3733   :  { %4741 = vmatprep.subr.mxu0 %v11525_v15 }
0x3734   :  { %4742 = vmatpush1.msra.mxu0 %v11528_v26 }
0x3735   :  { %4743 = vmatprep.subr.mxu0 %v11532_v9 }
0x3736   :  { %4744 = vmatpush1.msra.mxu0 %v11535_v0 }
0x3737   :  { %6579 = vmatmul.mubr.msk.f32.vlgmr.msra.gmra.mxu0 %vm535_vm1, %v4710_v22  ;;  %4939 = vmatprep.subr.mxu0 %v11115_v5  ;;  %v13137_v5 = vld [vmem:[#allocation81_spill] sm:$0xff] }
0x3738   :  { %4940 = vmatpush1.msra.mxu0 %v11121_v57  ;;  %5003 = vmatprep.mubr.f32.mxu0 %v12794_v23  ;;  %v11706_v22 = vld [vmem:[%s12414_s4 + $0x48] sm:$0xff] }
0x3739   :  { %4941 = vmatprep.subr.mxu0 %v11128_v20  ;;  %v13138_v20 = vld [vmem:[#allocation82_spill] sm:$0xff]  ;;  %13153 = vst [vmem:[#allocation80_spill] sm:$0xff] %v11706_v22 }
0x373a   :  { %4942 = vmatpush1.msra.mxu0 %v11134_v17 }
0x373b   :  { %4943 = vmatprep.subr.mxu0 %v11140_v25 }
0x373c   :  { %4944 = vmatpush1.msra.mxu0 %v11146_v42 }
0x373d   :  { %4945 = vmatprep.subr.mxu0 %v11152_v59  ;;  %v11578_v59 = vld [vmem:[%s12414_s4 + $0xf0] sm:$0xff] }
0x373e   :  { %4946 = vmatpush1.msra.mxu0 %v11158_v21  ;;  %v11585_v21 = vld [vmem:[%s12414_s4 + $0xe8] sm:$0xff] }
0x373f   :  { %4947 = vmatprep.subr.mxu0 %v11164_v14  ;;  %v11591_v14 = vld [vmem:[%s12414_s4 + $0xe0] sm:$0xff] }
0x3740   :  { %4948 = vmatpush1.msra.mxu0 %v11170_v43  ;;  %v11597_v43 = vld [vmem:[%s12414_s4 + $0xd8] sm:$0xff] }
0x3741   :  { %4949 = vmatprep.subr.mxu0 %v11176_v33  ;;  %v11603_v33 = vld [vmem:[%s12414_s4 + $0xd0] sm:$0xff] }
0x3742   :  { %4950 = vmatpush1.msra.mxu0 %v11182_v58  ;;  %13139 = vst [vmem:[#allocation54_spill] sm:$0xff] %v11603_v33  ;;  %v11609_v58 = vld [vmem:[%s12414_s4 + $0xc8] sm:$0xff] }
0x3743   :  { %4951 = vmatprep.subr.mxu0 %v11188_v30  ;;  %v11615_v30 = vld [vmem:[%s12414_s4 + $0xc0] sm:$0xff] }
0x3744   :  { %4952 = vmatpush1.msra.mxu0 %v11194_v53  ;;  %13140 = vst [vmem:[#allocation56_spill] sm:$0xff] %v11615_v30  ;;  %v11621_v53 = vld [vmem:[%s12414_s4 + $0xb8] sm:$0xff] }
0x3745   :  { %4953 = vmatprep.subr.mxu0 %v11200_v38  ;;  %v11627_v38 = vld [vmem:[%s12414_s4 + $0xb0] sm:$0xff] }
0x3746   :  { %4954 = vmatpush1.msra.mxu0 %v11206_v24  ;;  %v11633_v24 = vld [vmem:[%s12414_s4 + $0xa8] sm:$0xff] }
0x3747   :  { %4955 = vmatprep.subr.mxu0 %v11212_v1 }
0x3748   :  { %4956 = vmatpush1.msra.mxu0 %v11218_v35  ;;  %v11639_v35 = vld [vmem:[%s12414_s4 + $0xa0] sm:$0xff] }
0x3749   :  { %4957 = vmatprep.subr.mxu0 %v11224_v6  ;;  %13141 = vst [vmem:[#allocation57_spill] sm:$0xff] %v11639_v35  ;;  %v11645_v6 = vld [vmem:[%s12414_s4 + $0x98] sm:$0xff] }
0x374a   :  { %4958 = vmatpush1.msra.mxu0 %v11230_v12  ;;  %13142 = vst [vmem:[#allocation61_spill] sm:$0xff] %v11645_v6 }
0x374b   :  { %4959 = vmatprep.subr.mxu0 %v11236_v45  ;;  %v11651_v45 = vld [vmem:[%s12414_s4 + $0x90] sm:$0xff] }
0x374c   :  { %4960 = vmatpush1.msra.mxu0 %v11242_v51  ;;  %13143 = vst [vmem:[#allocation19_spill] sm:$0xff] %v11651_v45 }
0x374d   :  { %4961 = vmatprep.subr.mxu0 %v11248_v46  ;;  %v11657_v46 = vld [vmem:[%s12414_s4 + $0x88] sm:$0xff] }
0x374e   :  { %4962 = vmatpush1.msra.mxu0 %v11254_v48  ;;  %13144 = vst [vmem:[#allocation55_spill] sm:$0xff] %v11657_v46  ;;  %v11663_v48 = vld [vmem:[%s12414_s4 + $0x80] sm:$0xff] }
0x374f   :  { %4963 = vmatprep.subr.mxu0 %v11260_v39  ;;  %13145 = vst [vmem:[#allocation16_spill] sm:$0xff] %v11663_v48  ;;  %v13146_v39 = vld [vmem:[#allocation35_spill] sm:$0xff] }
0x3750   :  { %4964 = vmatpush1.msra.mxu0 %v11266_v34 }
0x3751   :  { %4965 = vmatprep.subr.mxu0 %v11272_v13  ;;  %v11670_v13 = vld [vmem:[%s12414_s4 + $0x78] sm:$0xff] }
0x3752   :  { %4966 = vmatpush1.msra.mxu0 %v11278_v52  ;;  %13147 = vst [vmem:[#allocation59_spill] sm:$0xff] %v11670_v13  ;;  %v11676_v52 = vld [vmem:[%s12414_s4 + $0x70] sm:$0xff] }
0x3753   :  { %4967 = vmatprep.subr.mxu0 %v11284_v16  ;;  %13148 = vst [vmem:[#allocation66_spill] sm:$0xff] %v11676_v52  ;;  %v11682_v16 = vld [vmem:[%s12414_s4 + $0x68] sm:$0xff] }
0x3754   :  { %4968 = vmatpush1.msra.mxu0 %v11290_v18  ;;  %13149 = vst [vmem:[#allocation17_spill] sm:$0xff] %v11682_v16  ;;  %v11688_v18 = vld [vmem:[%s12414_s4 + $0x60] sm:$0xff] }
0x3755   :  { %4969 = vmatprep.subr.mxu0 %v11296_v31  ;;  %13150 = vst [vmem:[#allocation70_spill] sm:$0xff] %v11688_v18  ;;  %v11694_v31 = vld [vmem:[%s12414_s4 + $0x58] sm:$0xff] }
0x3756   :  { %4970 = vmatpush1.msra.mxu0 %v13137_v5  ;;  %13151 = vst [vmem:[#allocation78_spill] sm:$0xff] %v11694_v31  ;;  %v11712_v5 = vld [vmem:[%s12414_s4 + $0x40] sm:$0xff] }
0x3757   :  { %7462 = vmatprep.subr.mxu0 %v12794_v23  ;;  %13154 = vst [vmem:[#allocation27_spill] sm:$0xff] %v11712_v5 }
0x37e7   :  { %v4627_v57 = vpop.f32.mrf.mxu0 }
0x37e8   :  { %v4628_v17 = vadd.f32 %v13138_v20, %v4627_v57  ;;  %v11718_v57 = vld [vmem:[%s12414_s4 + $0x38] sm:$0xff]  ;;  %v11724_v20 = vld [vmem:[%s12414_s4 + $0x30] sm:$0xff] }
0x37e9   :  { %v7423_v25 = vpop.f32.mrf.mxu0  ;;  %13155 = vst [vmem:[#allocation28_spill] sm:$0xff] %v11718_v57  ;;  %13156 = vst [vmem:[#allocation29_spill] sm:$0xff] %v11724_v20 }
0x37ea   :  { %v4631_v42 = vmax.f32 %v4628_v17, 0.0  ;;  %v11730_v17 = vld [vmem:[%s12414_s4 + $0x28] sm:$0xff]  ;;  %v11736_v25 = vld [vmem:[%s12414_s4 + $0x20] sm:$0xff] }
0x37eb   :  { %13157 = vst [vmem:[#allocation30_spill] sm:$0xff] %v11730_v17  ;;  %13158 = vst [vmem:[#allocation31_spill] sm:$0xff] %v11736_v25 }
0x37ec   :  { %7441 = vmatmul.mubr.msk.f32.vlgmr.msra.gmra.mxu1 %vm535_vm1, %v4631_v42  ;;  %v11742_v42 = vld [vmem:[%s12414_s4 + $0x18] sm:$0xff] }
0x37ed   :  { %4835 = vmatpush1.msra.mxu1 %v11578_v59  ;;  %4898 = vmatprep.mubr.f32.mxu1 %v12794_v23  ;;  %13159 = vst [vmem:[#allocation20_spill] sm:$0xff] %v11742_v42 }
0x37ee   :  { %4836 = vmatprep.subr.mxu1 %v11585_v21 }
0x37ef   :  { %4837 = vmatpush1.msra.mxu1 %v11591_v14 }
0x37f0   :  { %4838 = vmatprep.subr.mxu1 %v11597_v43 }
0x37f1   :  { %4839 = vmatpush1.msra.mxu1 %v11603_v33 }
0x37f2   :  { %4840 = vmatprep.subr.mxu1 %v11609_v58 }
0x37f3   :  { %4841 = vmatpush1.msra.mxu1 %v11615_v30 }
0x37f4   :  { %4842 = vmatprep.subr.mxu1 %v11621_v53 }
0x37f5   :  { %4843 = vmatpush1.msra.mxu1 %v11627_v38 }
0x37f6   :  { %4844 = vmatprep.subr.mxu1 %v11633_v24 }
0x37f7   :  { %v4779_v1 = vpop.f32.mrf.mxu0  ;;  %4845 = vmatpush1.msra.mxu1 %v11639_v35 }
0x37f8   :  { %4846 = vmatprep.subr.mxu1 %v11645_v6 }
0x37f9   :  { %v4781_v12 = vpop.f32.mrf.mxu0  ;;  %4847 = vmatpush1.msra.mxu1 %v11651_v45 }
0x37fa   :  { %v4787_v51 = vrot.slane %v4781_v12, 2  ;;  %4848 = vmatprep.subr.mxu1 %v11657_v46  ;;  %v11748_v12 = vld [vmem:[%s12414_s4 + $0x10] sm:$0xff] }
0x37fb   :  { %4849 = vmatpush1.msra.mxu1 %v11663_v48  ;;  %13160 = vst [vmem:[#allocation60_spill] sm:$0xff] %v11748_v12 }
0x37fc   :  { %v4791_v34 = vadd.f32 %v4787_v51, %v13146_v39  ;;  %4850 = vmatprep.subr.mxu1 %v11670_v13  ;;  %v11754_v51 = vld [vmem:[%s12414_s4 + $0x8] sm:$0xff]  ;;  %v11760_v39 = vld [vmem:[%s12414_s4] sm:$0xff] }
0x37fd   :  { %4851 = vmatpush1.msra.mxu1 %v11676_v52  ;;  %13161 = vst [vmem:[#allocation23_spill] sm:$0xff] %v11754_v51  ;;  %13162 = vst [vmem:[#allocation25_spill] sm:$0xff] %v11760_v39 }
0x37fe   :  { %4852 = vmatprep.subr.mxu1 %v11682_v16  ;;  %7901 = vtanh.f32 %v4791_v34 }
0x37ff   :  { %4853 = vmatpush1.msra.mxu1 %v11688_v18 }
0x3800   :  { %4854 = vmatprep.subr.mxu1 %v11694_v31 }
0x3801   :  { %4855 = vmatpush1.msra.mxu1 %v11700_v54  ;;  %v4632_v54 = vrot.slane %v10983_v62, 4 }
0x3802   :  { %4856 = vmatprep.subr.mxu1 %v11706_v22 }
0x3803   :  { %4857 = vmatpush1.msra.mxu1 %v11712_v5 }
0x3804   :  { %4858 = vmatprep.subr.mxu1 %v11718_v57 }
0x3805   :  { %4859 = vmatpush1.msra.mxu1 %v11724_v20 }
0x3806   :  { %4860 = vmatprep.subr.mxu1 %v11730_v17 }
0x3807   :  { %4861 = vmatpush1.msra.mxu1 %v11736_v25 }
0x3808   :  { %4862 = vmatprep.subr.mxu1 %v11742_v42 }
0x3809   :  { %4863 = vmatpush1.msra.mxu1 %v11748_v12  ;;  %v4786_v12 = vrot.slane %v4779_v1, 2 }
0x380a   :  { %4864 = vmatprep.subr.mxu1 %v11754_v51 }
0x380b   :  { %4865 = vmatpush1.msra.mxu1 %v11760_v39  ;;  %v7902_v42 = vpop.eup %7901  ;;  %v4790_v25 = vadd.f32 %v4786_v12, %v13117_v8  ;;  %v4826_v39 = vrot.slane %v11407_v60, 2 }
0x380c   :  { %7443 = vmatprep.subr.mxu1 %v12794_v23  ;;  %4810 = vrot.lane.b32.xlu1 %v7902_v42, %s8471_s5 }
0x380d   :  { %v6580_v17 = vmul.f32 -1.442695, %v4790_v25 }
0x380f   :  { %7903 = vpow2.f32 %v6580_v17 }
0x381c   :  { %v7904_v20 = vpop.eup %7903 }
0x381d   :  { %v4798_v57 = vadd.f32 1.0, %v7904_v20 }
0x381f   :  { %7905 = vrcp.f32 %v4798_v57  ;;  %v4806_v57 = vrot.slane %v11354_v41, 6 }
0x382c   :  { %v7906_v51 = vpop.eup %7905 }
0x382d   :  { %v4808_v20 = vmul.f32 %v7906_v51, %v4806_v57  ;;  %v13166_v57 = vld [vmem:[#allocation73_spill] sm:$0xff] }
0x387e   :  { %v4811_v5 = vpop.permute.xlu1 %4810 }
0x387f   :  { %v4813_v22 = vmul.f32 %v7906_v51, %v4811_v5 }
0x3881   :  { %4815 = vrot.lane.b32.xlu0 %v4813_v22, %s8471_s5  ;;  %v6581_v22 = vmul.f32 -1.442695, %v4791_v34  ;;  %v13163_v34 = vld [vmem:[#allocation71_spill] sm:$0xff] }
0x3885   :  { %4827 = vrot.lane.b32.xlu0 %v4826_v39, %s8471_s5 }
0x38ac   :  { %v4703_v42 = vpop.f32.mrf.mxu1 }
0x38ad   :  { %v4704_v1 = vadd.f32 %v4703_v42, %v4632_v54 }
0x38ae   :  { %v7442_v31 = vpop.f32.mrf.mxu1 }
0x38af   :  { %v4707_v8 = vmax.f32 %v4704_v1, 0.0  ;;  %v13164_v1 = vld [vmem:[#allocation72_spill] sm:$0xff] }
0x38b1   :  { %v11771_v17 = vadd.f32 %v4707_v8, %v11351_v63  ;;  %v13165_v8 = vld [vmem:[#allocation26_spill] sm:$0xff] }
0x38f3   :  { %v4816_v25 = vpop.permute.xlu0 %4815 }
0x38f4   :  { %v11774_v5 = vadd.f32 %v4816_v25, %v4808_v20  ;;  %v13167_v20 = vld [vmem:[#allocation74_spill] sm:$0xff]  ;;  %v13168_v25 = vld [vmem:[#allocation75_spill] sm:$0xff] }
0x38f6   :  { %7907 = vtanh.f32 %v11774_v5 }
0x38f7   :  { %7909 = vpow2.f32 %v6581_v22  ;;  %v4828_v42 = vpop.permute.xlu0 %4827 }
0x3903   :  { %v7908_v60 = vpop.eup %7907 }
0x3904   :  { %4821 = vrot.lane.b32.xlu1 %v7908_v60, %s8471_s5  ;;  %v7910_v12 = vpop.eup %7909 }
0x3905   :  { %v4799_v54 = vadd.f32 1.0, %v7910_v12  ;;  %v13169_v12 = vld [vmem:[#allocation58_spill] sm:$0xff] }
0x3907   :  { %7911 = vrcp.f32 %v4799_v54 }
0x3914   :  { %v7912_v31 = vpop.eup %7911 }
0x3976   :  { %v4822_v39 = vpop.permute.xlu1 %4821 }
0x3977   :  { %v11778_v63 = vmul.f32 %v7912_v31, %v4822_v39 }
0x3979   :  { %v4830_v41 = vsel %vm535_vm1, %v11778_v63, %v4828_v42 }
0x397a   :  { %v4832_v51 = vrot.slane %v4830_v41, 6 }
0x397c   :  { %4899 = vmatmul.mubr.f32.vlgmr.msra.gmra.mxu1 %v4832_v51 }
0x397d   :  { %7444 = vmatpush3.msra.mxu1 %v11362_v29  ;;  %7459 = vmatprep.mubr.msk.f32.mxu1 %vm8470_vm0, %v12794_v23 }
0x397e   :  { %7445 = vmatprep.subr.mxu1 %v12794_v23 }
0x397f   :  { %7446 = vmatpush3.msra.mxu1 %v11368_v40 }
0x3980   :  { %7447 = vmatprep.subr.mxu1 %v12794_v23 }
0x3981   :  { %7448 = vmatpush3.msra.mxu1 %v13163_v34 }
0x3982   :  { %7449 = vmatprep.subr.mxu1 %v12794_v23 }
0x3983   :  { %7450 = vmatpush3.msra.mxu1 %v13164_v1 }
0x3984   :  { %7451 = vmatprep.subr.mxu1 %v12794_v23 }
0x3985   :  { %7452 = vmatpush3.msra.mxu1 %v13165_v8 }
0x3986   :  { %7453 = vmatprep.subr.mxu1 %v12794_v23 }
0x3987   :  { %7454 = vmatpush3.msra.mxu1 %v13166_v57 }
0x3988   :  { %7455 = vmatprep.subr.mxu1 %v12794_v23 }
0x3989   :  { %7456 = vmatpush3.msra.mxu1 %v13167_v20 }
0x398a   :  { %7457 = vmatprep.subr.mxu1 %v12794_v23 }
0x398b   :  { %7458 = vmatpush3.msra.mxu1 %v13168_v25 }
0x398c   :  { %7481 = vmatprep.subr.mxu1 %v12794_v23 }
0x3a3c   :  { %v4900_v60 = vpop.f32.mrf.mxu1 }
0x3a3d   :  { %v4901_v39 = vadd.f32 %v4900_v60, %v12864_v36 }
0x3a3e   :  { %v4902_v22 = vpop.f32.mrf.mxu1 }
0x3a3f   :  { %v4903_v54 = vadd.f32 %v4902_v22, %v13169_v12  ;;  %v6582_v42 = vmul.f32 -1.442695, %v4901_v39 }
0x3a41   :  { %7913 = vtanh.f32 %v4903_v54 }
0x3a42   :  { %7915 = vpow2.f32 %v6582_v42 }
0x3a4e   :  { %v7914_v31 = vpop.eup %7913 }
0x3a4f   :  { %4920 = vrot.lane.b32.xlu1 %v7914_v31, %s8471_s5  ;;  %v7916_v41 = vpop.eup %7915  ;;  %v6583_v31 = vmul.f32 -1.442695, %v4903_v54  ;;  %v13172_v54 = vld [vmem:[#allocation43_spill] sm:$0xff] }
0x3a50   :  { %v4911_v51 = vadd.f32 1.0, %v7916_v41 }
0x3a52   :  { %7917 = vrcp.f32 %v4911_v51  ;;  %v13173_v51 = vld [vmem:[#allocation44_spill] sm:$0xff] }
0x3a5f   :  { %v7918_v20 = vpop.eup %7917 }
0x3a60   :  { %v4918_v22 = vmul.f32 %v7918_v20, %v11403_v32 }
0x3ac1   :  { %v4921_v57 = vpop.permute.xlu1 %4920 }
0x3ac2   :  { %v4923_v25 = vmul.f32 %v7918_v20, %v4921_v57  ;;  %v13170_v20 = vld [vmem:[#allocation76_spill] sm:$0xff] }
0x3ac4   :  { %4925 = vrot.lane.b32.xlu0 %v4923_v25, %s8471_s5 }
0x3ac8   :  { %4935 = vrot.lane.b32.xlu0 %v11456_v2, %s8471_s5 }
0x3b36   :  { %v4926_v12 = vpop.permute.xlu0 %4925 }
0x3b37   :  { %v11807_v8 = vadd.f32 %v4926_v12, %v4918_v22  ;;  %v13171_v12 = vld [vmem:[#allocation77_spill] sm:$0xff] }
0x3b38   :  { %v13174_v22 = vld [vmem:[#allocation45_spill] sm:$0xff] }
0x3b39   :  { %7919 = vtanh.f32 %v11807_v8 }
0x3b3a   :  { %7921 = vpow2.f32 %v6583_v31  ;;  %v4936_v2 = vpop.permute.xlu0 %4935  ;;  %v13176_v31 = vld [vmem:[#allocation47_spill] sm:$0xff] }
0x3b46   :  { %v7920_v60 = vpop.eup %7919 }
0x3b47   :  { %4931 = vrot.lane.b32.xlu1 %v7920_v60, %s8471_s5  ;;  %v7922_v39 = vpop.eup %7921  ;;  %v13175_v60 = vld [vmem:[#allocation46_spill] sm:$0xff] }
0x3b48   :  { %v4912_v42 = vadd.f32 1.0, %v7922_v39  ;;  %v13177_v39 = vld [vmem:[#allocation48_spill] sm:$0xff] }
0x3b4a   :  { %7923 = vrcp.f32 %v4912_v42  ;;  %v13178_v42 = vld [vmem:[#allocation49_spill] sm:$0xff] }
0x3b57   :  { %v7924_v57 = vpop.eup %7923 }
0x3bb9   :  { %v4932_v25 = vpop.permute.xlu1 %4931 }
0x3bba   :  { %v11811_v41 = vmul.f32 %v7924_v57, %v4932_v25 }
0x3bbc   :  { %v4938_v32 = vsel %vm535_vm1, %v11811_v41, %v4936_v2 }
0x3bbd   :  { %5004 = vmatmul.mubr.f32.vlgmr.msra.gmra.mxu0 %v4938_v32 }
0x3bbe   :  { %7463 = vmatpush3.msra.mxu0 %v13170_v20  ;;  %7478 = vmatprep.mubr.msk.f32.mxu0 %vm8470_vm0, %v12794_v23 }
0x3bbf   :  { %7464 = vmatprep.subr.mxu0 %v12794_v23 }
0x3bc0   :  { %7465 = vmatpush3.msra.mxu0 %v13171_v12 }
0x3bc1   :  { %7466 = vmatprep.subr.mxu0 %v12794_v23 }
0x3bc2   :  { %7467 = vmatpush3.msra.mxu0 %v13172_v54 }
0x3bc3   :  { %7468 = vmatprep.subr.mxu0 %v12794_v23 }
0x3bc4   :  { %7469 = vmatpush3.msra.mxu0 %v13173_v51 }
0x3bc5   :  { %7470 = vmatprep.subr.mxu0 %v12794_v23 }
0x3bc6   :  { %7471 = vmatpush3.msra.mxu0 %v13174_v22 }
0x3bc7   :  { %7472 = vmatprep.subr.mxu0 %v12794_v23 }
0x3bc8   :  { %7473 = vmatpush3.msra.mxu0 %v13175_v60 }
0x3bc9   :  { %7474 = vmatprep.subr.mxu0 %v12794_v23 }
0x3bca   :  { %7475 = vmatpush3.msra.mxu0 %v13176_v31 }
0x3bcb   :  { %7476 = vmatprep.subr.mxu0 %v12794_v23 }
0x3bcc   :  { %7477 = vmatpush3.msra.mxu0 %v13177_v39 }
0x3bcd   :  { %5285 = vmatprep.subr.mxu0 %v13178_v42 }
0x3c7d   :  { %v5005_v57 = vpop.f32.mrf.mxu0 }
0x3c7e   :  { %v5006_v60 = vadd.f32 %v5005_v57, %v12875_v50 }
0x3c7f   :  { %v5007_v25 = vpop.f32.mrf.mxu0 }
0x3c80   :  { %v5008_v2 = vadd.f32 %v5007_v25, %v12874_v55  ;;  %v6584_v22 = vmul.f32 -1.442695, %v5006_v60 }
0x3c82   :  { %7925 = vtanh.f32 %v5008_v2  ;;  %v6585_v60 = vmul.f32 -1.442695, %v5008_v2 }
0x3c83   :  { %7927 = vpow2.f32 %v6584_v22 }
0x3c8f   :  { %v7926_v32 = vpop.eup %7925 }
0x3c90   :  { %5025 = vrot.lane.b32.xlu1 %v7926_v32, %s8471_s5  ;;  %v7928_v51 = vpop.eup %7927 }
0x3c91   :  { %v5016_v31 = vadd.f32 1.0, %v7928_v51 }
0x3c93   :  { %7929 = vrcp.f32 %v5016_v31 }
0x3ca0   :  { %v7930_v54 = vpop.eup %7929 }
0x3ca1   :  { %v5023_v42 = vmul.f32 %v7930_v54, %v11452_v7  ;;  %v11846_v7 = vld [vmem:[#allocation8 + $0xf8] sm:$0xff] }
0x3d02   :  { %v5026_v12 = vpop.permute.xlu1 %5025 }
0x3d03   :  { %v5028_v39 = vmul.f32 %v7930_v54, %v5026_v12  ;;  %v11856_v54 = vld [vmem:[#allocation8 + $0xe8] sm:$0xff] }
0x3d05   :  { %5030 = vrot.lane.b32.xlu0 %v5028_v39, %s8471_s5  ;;  %v11860_v39 = vld [vmem:[#allocation8 + $0xe0] sm:$0xff] }
0x3d77   :  { %v5031_v20 = vpop.permute.xlu0 %5030 }
0x3d78   :  { %v11838_v25 = vadd.f32 %v5031_v20, %v5023_v42  ;;  %v11852_v20 = vld [vmem:[#allocation8 + $0xf0] sm:$0xff]  ;;  %v11864_v42 = vld [vmem:[#allocation8 + $0xd8] sm:$0xff] }
0x3d7a   :  { %7931 = vtanh.f32 %v11838_v25 }
0x3d7b   :  { %7933 = vpow2.f32 %v6585_v60 }
0x3d87   :  { %v7932_v32 = vpop.eup %7931 }
0x3d88   :  { %5036 = vrot.lane.b32.xlu1 %v7932_v32, %s8471_s5  ;;  %v7934_v22 = vpop.eup %7933  ;;  %v11874_v32 = vld [vmem:[#allocation10] ss:$0 sm:$0xff] }
0x3d89   :  { %v5017_v51 = vadd.f32 1.0, %v7934_v22 }
0x3d8b   :  { %7935 = vrcp.f32 %v5017_v51 }
0x3d98   :  { %v7936_v31 = vpop.eup %7935 }
0x3dfa   :  { %v5037_v57 = vpop.permute.xlu1 %5036 }
0x3dfb   :  { %v11842_v12 = vmul.f32 %v7936_v31, %v5037_v57  ;;  %v13179_v31 = vld [vmem:[#allocation50_spill] sm:$0xff]  ;;  %v13180_v57 = vld [vmem:[#allocation51_spill] sm:$0xff] }
0x3dfd   :  { %7460 = vmatmul.mubr.msk.f32.vlgmr.msra.gmra.mxu1 %vm535_vm1, %v11842_v12 }
0x3dfe   :  { %7482 = vmatpush3.msra.mxu1 %v11846_v7  ;;  %7497 = vmatprep.mubr.msk.f32.mxu1 %vm8470_vm0, %v12794_v23 }
0x3dff   :  { %7483 = vmatprep.subr.mxu1 %v12794_v23 }
0x3e00   :  { %7484 = vmatpush3.msra.mxu1 %v11852_v20 }
0x3e01   :  { %7485 = vmatprep.subr.mxu1 %v12794_v23 }
0x3e02   :  { %7486 = vmatpush3.msra.mxu1 %v11856_v54 }
0x3e03   :  { %7487 = vmatprep.subr.mxu1 %v12794_v23 }
0x3e04   :  { %7488 = vmatpush3.msra.mxu1 %v11860_v39 }
0x3e05   :  { %7489 = vmatprep.subr.mxu1 %v12794_v23 }
0x3e06   :  { %7490 = vmatpush3.msra.mxu1 %v11864_v42 }
0x3e07   :  { %7491 = vmatprep.subr.mxu1 %v12794_v23 }
0x3e08   :  { %7492 = vmatpush3.msra.mxu1 %v11472_v49 }
0x3e09   :  { %7493 = vmatprep.subr.mxu1 %v12794_v23 }
0x3e0a   :  { %7494 = vmatpush3.msra.mxu1 %v11476_v3 }
0x3e0b   :  { %7495 = vmatprep.subr.mxu1 %v12794_v23 }
0x3e0c   :  { %7496 = vmatpush3.msra.mxu1 %v11480_v61 }
0x3e0d   :  { %5380 = vmatprep.subr.mxu1 %v11486_v44 }
0x3ebd   :  { %v5109_v2 = vpop.f32.mrf.mxu1 }
0x3ebe   :  { %v5110_v60 = vadd.f32 %v11874_v32, %v5109_v2  ;;  %v5266_v2 = vrot.slane %v11778_v63, 6  ;;  %v11912_v63 = vld [vmem:[%s12414_s4 + $0x1e8] sm:$0xff] }
0x3ebf   :  { %v7461_v22 = vpop.f32.mrf.mxu1  ;;  %13183 = vst [vmem:[#allocation69_spill] sm:$0xff] %v11912_v63 }
0x3ec0   :  { %v5113_v51 = vmax.f32 %v5110_v60, 0.0  ;;  %v11899_v60 = vld [vmem:[%s12414_s4 + $0x1f8] sm:$0xff]  ;;  %v11905_v22 = vld [vmem:[%s12414_s4 + $0x1f0] sm:$0xff] }
0x3ec1   :  { %13181 = vst [vmem:[#allocation67_spill] sm:$0xff] %v11899_v60  ;;  %13182 = vst [vmem:[#allocation68_spill] sm:$0xff] %v11905_v22 }
0x3ec2   :  { %7479 = vmatmul.mubr.msk.f32.vlgmr.msra.gmra.mxu0 %vm535_vm1, %v5113_v51  ;;  %v11918_v51 = vld [vmem:[%s12414_s4 + $0x1e0] sm:$0xff] }
0x3ec3   :  { %5286 = vmatpush1.msra.mxu0 %v11491_v10  ;;  %5333 = vmatprep.mubr.f32.mxu0 %v12794_v23  ;;  %13184 = vst [vmem:[#allocation32_spill] sm:$0xff] %v11918_v51 }
0x3ec4   :  { %5287 = vmatprep.subr.mxu0 %v11495_v28 }
0x3ec5   :  { %5288 = vmatpush1.msra.mxu0 %v11498_v56 }
0x3ec6   :  { %5289 = vmatprep.subr.mxu0 %v11501_v27 }
0x3ec7   :  { %5290 = vmatpush1.msra.mxu0 %v11504_v4 }
0x3ec8   :  { %5291 = vmatprep.subr.mxu0 %v11507_v37 }
0x3ec9   :  { %5292 = vmatpush1.msra.mxu0 %v11510_v11 }
0x3eca   :  { %5293 = vmatprep.subr.mxu0 %v13179_v31 }
0x3ecb   :  { %5294 = vmatpush1.msra.mxu0 %v13180_v57 }
0x3ecc   :  { %5295 = vmatprep.subr.mxu0 %v11519_v47 }
0x3ecd   :  { %5296 = vmatpush1.msra.mxu0 %v11522_v19 }
0x3ece   :  { %5297 = vmatprep.subr.mxu0 %v11525_v15 }
0x3ecf   :  { %5298 = vmatpush1.msra.mxu0 %v11528_v26 }
0x3ed0   :  { %5299 = vmatprep.subr.mxu0 %v11532_v9 }
0x3ed1   :  { %5300 = vmatpush1.msra.mxu0 %v11535_v0 }
0x3ed2   :  { %6589 = vmatmul.mubr.msk.f32.vlgmr.msra.gmra.mxu0 %vm535_vm1, %v5266_v2  ;;  %5485 = vmatprep.subr.mxu0 %v11899_v60  ;;  %v11924_v2 = vld [vmem:[%s12414_s4 + $0x1d8] sm:$0xff] }
0x3ed3   :  { %5486 = vmatpush1.msra.mxu0 %v11905_v22  ;;  %5549 = vmatprep.mubr.f32.mxu0 %v12794_v23  ;;  %13185 = vst [vmem:[#allocation33_spill] sm:$0xff] %v11924_v2  ;;  %v11930_v22 = vld [vmem:[%s12414_s4 + $0x1d0] sm:$0xff]  ;;  %v12090_v60 = vld [vmem:[#allocation10 + $0x1] ss:$0 sm:$0xff] }
0x3ed4   :  { %5487 = vmatprep.subr.mxu0 %v11912_v63  ;;  %13186 = vst [vmem:[#allocation34_spill] sm:$0xff] %v11930_v22  ;;  %v11936_v63 = vld [vmem:[%s12414_s4 + $0x1c8] sm:$0xff] }
0x3ed5   :  { %5488 = vmatpush1.msra.mxu0 %v11918_v51  ;;  %13187 = vst [vmem:[#allocation36_spill] sm:$0xff] %v11936_v63  ;;  %v11942_v51 = vld [vmem:[%s12414_s4 + $0x1c0] sm:$0xff] }
0x3ed6   :  { %5489 = vmatprep.subr.mxu0 %v11924_v2  ;;  %13188 = vst [vmem:[#allocation37_spill] sm:$0xff] %v11942_v51  ;;  %v11948_v2 = vld [vmem:[%s12414_s4 + $0x1b8] sm:$0xff] }
0x3ed7   :  { %5490 = vmatpush1.msra.mxu0 %v11930_v22  ;;  %13189 = vst [vmem:[#allocation38_spill] sm:$0xff] %v11948_v2  ;;  %v11954_v22 = vld [vmem:[%s12414_s4 + $0x1b0] sm:$0xff] }
0x3ed8   :  { %5491 = vmatprep.subr.mxu0 %v11936_v63  ;;  %13190 = vst [vmem:[#allocation39_spill] sm:$0xff] %v11954_v22  ;;  %v11960_v63 = vld [vmem:[%s12414_s4 + $0x1a8] sm:$0xff] }
0x3ed9   :  { %5492 = vmatpush1.msra.mxu0 %v11942_v51  ;;  %13191 = vst [vmem:[#allocation40_spill] sm:$0xff] %v11960_v63  ;;  %v11966_v51 = vld [vmem:[%s12414_s4 + $0x1a0] sm:$0xff] }
0x3eda   :  { %5493 = vmatprep.subr.mxu0 %v11948_v2  ;;  %13192 = vst [vmem:[#allocation41_spill] sm:$0xff] %v11966_v51  ;;  %v11972_v2 = vld [vmem:[%s12414_s4 + $0x198] sm:$0xff] }
0x3edb   :  { %5494 = vmatpush1.msra.mxu0 %v11954_v22  ;;  %13193 = vst [vmem:[#allocation42_spill] sm:$0xff] %v11972_v2  ;;  %v11978_v22 = vld [vmem:[%s12414_s4 + $0x190] sm:$0xff] }
0x3edc   :  { %5495 = vmatprep.subr.mxu0 %v11960_v63  ;;  %13194 = vst [vmem:[#allocation24_spill] sm:$0xff] %v11978_v22  ;;  %v11984_v63 = vld [vmem:[%s12414_s4 + $0x188] sm:$0xff] }
0x3edd   :  { %5496 = vmatpush1.msra.mxu0 %v11966_v51  ;;  %13195 = vst [vmem:[#allocation63_spill] sm:$0xff] %v11984_v63  ;;  %v11990_v51 = vld [vmem:[%s12414_s4 + $0x180] sm:$0xff] }
0x3ede   :  { %5497 = vmatprep.subr.mxu0 %v11972_v2  ;;  %13196 = vst [vmem:[#allocation83_spill] sm:$0xff] %v11990_v51  ;;  %v11996_v2 = vld [vmem:[%s12414_s4 + $0x178] sm:$0xff] }
0x3edf   :  { %5498 = vmatpush1.msra.mxu0 %v11978_v22  ;;  %13197 = vst [vmem:[#allocation84_spill] sm:$0xff] %v11996_v2  ;;  %v12002_v22 = vld [vmem:[%s12414_s4 + $0x170] sm:$0xff] }
0x3ee0   :  { %5499 = vmatprep.subr.mxu0 %v11984_v63  ;;  %13198 = vst [vmem:[#allocation85_spill] sm:$0xff] %v12002_v22  ;;  %v12008_v63 = vld [vmem:[%s12414_s4 + $0x168] sm:$0xff] }
0x3ee1   :  { %5500 = vmatpush1.msra.mxu0 %v11990_v51  ;;  %13199 = vst [vmem:[#allocation86_spill] sm:$0xff] %v12008_v63  ;;  %v12014_v51 = vld [vmem:[%s12414_s4 + $0x160] sm:$0xff] }
0x3ee2   :  { %5501 = vmatprep.subr.mxu0 %v11996_v2  ;;  %13200 = vst [vmem:[#allocation87_spill] sm:$0xff] %v12014_v51  ;;  %v12020_v2 = vld [vmem:[%s12414_s4 + $0x158] sm:$0xff] }
0x3ee3   :  { %5502 = vmatpush1.msra.mxu0 %v12002_v22  ;;  %13201 = vst [vmem:[#allocation88_spill] sm:$0xff] %v12020_v2  ;;  %v12026_v22 = vld [vmem:[%s12414_s4 + $0x150] sm:$0xff] }
0x3ee4   :  { %5503 = vmatprep.subr.mxu0 %v12008_v63  ;;  %13202 = vst [vmem:[#allocation89_spill] sm:$0xff] %v12026_v22  ;;  %v12032_v63 = vld [vmem:[%s12414_s4 + $0x148] sm:$0xff] }
0x3ee5   :  { %5504 = vmatpush1.msra.mxu0 %v12014_v51  ;;  %13203 = vst [vmem:[#allocation90_spill] sm:$0xff] %v12032_v63  ;;  %v12038_v51 = vld [vmem:[%s12414_s4 + $0x140] sm:$0xff] }
0x3ee6   :  { %5505 = vmatprep.subr.mxu0 %v12020_v2  ;;  %13204 = vst [vmem:[#allocation91_spill] sm:$0xff] %v12038_v51  ;;  %v12044_v2 = vld [vmem:[%s12414_s4 + $0x138] sm:$0xff] }
0x3ee7   :  { %5506 = vmatpush1.msra.mxu0 %v12026_v22  ;;  %13205 = vst [vmem:[#allocation92_spill] sm:$0xff] %v12044_v2  ;;  %v12050_v22 = vld [vmem:[%s12414_s4 + $0x130] sm:$0xff] }
0x3ee8   :  { %5507 = vmatprep.subr.mxu0 %v12032_v63  ;;  %13206 = vst [vmem:[#allocation93_spill] sm:$0xff] %v12050_v22  ;;  %v12056_v63 = vld [vmem:[%s12414_s4 + $0x128] sm:$0xff] }
0x3ee9   :  { %5508 = vmatpush1.msra.mxu0 %v12038_v51  ;;  %13207 = vst [vmem:[#allocation62_spill] sm:$0xff] %v12056_v63  ;;  %v12062_v51 = vld [vmem:[%s12414_s4 + $0x120] sm:$0xff] }
0x3eea   :  { %5509 = vmatprep.subr.mxu0 %v12044_v2  ;;  %13208 = vst [vmem:[#allocation81_spill] sm:$0xff] %v12062_v51  ;;  %v12068_v2 = vld [vmem:[%s12414_s4 + $0x118] sm:$0xff] }
0x3eeb   :  { %5510 = vmatpush1.msra.mxu0 %v12050_v22  ;;  %13209 = vst [vmem:[#allocation82_spill] sm:$0xff] %v12068_v2  ;;  %v12074_v22 = vld [vmem:[%s12414_s4 + $0x110] sm:$0xff] }
0x3eec   :  { %5511 = vmatprep.subr.mxu0 %v12056_v63  ;;  %13210 = vst [vmem:[#allocation35_spill] sm:$0xff] %v12074_v22  ;;  %v12080_v63 = vld [vmem:[%s12414_s4 + $0x108] sm:$0xff] }
0x3eed   :  { %5512 = vmatpush1.msra.mxu0 %v12062_v51  ;;  %v12086_v51 = vld [vmem:[%s12414_s4 + $0x100] sm:$0xff]  ;;  %s8472_s4 = smov [#allocation11]  }
0x3eee   :  { %5513 = vmatprep.subr.mxu0 %v12068_v2 }
0x3eef   :  { %5514 = vmatpush1.msra.mxu0 %v12074_v22 }
0x3ef0   :  { %5515 = vmatprep.subr.mxu0 %v12080_v63 }
0x3ef1   :  { %5516 = vmatpush1.msra.mxu0 %v12086_v51 }
0x3ef2   :  { %7519 = vmatprep.subr.mxu0 %v12794_v23 }
0x3f82   :  { %v5183_v2 = vpop.f32.mrf.mxu0 }
0x3f83   :  { %v5184_v22 = vadd.f32 %v12090_v60, %v5183_v2 }
0x3f84   :  { %v7480_v0 = vpop.f32.mrf.mxu0 }
0x3f85   :  { %v5187_v9 = vmax.f32 %v5184_v22, 0.0  ;;  %v13211_v0 = vld [vmem:[#allocation22_spill] sm:$0xff]  ;;  %v13212_v22 = vld [vmem:[#allocation65_spill] sm:$0xff] }
0x3f86   :  { %v12108_v2 = vadd.f32 %v13212_v22, %v13211_v0  ;;  %v13214_v0 = vld [vmem:[#allocation78_spill] sm:$0xff]  ;;  %v13215_v22 = vld [vmem:[#allocation79_spill] sm:$0xff] }
0x3f87   :  { %7498 = vmatmul.mubr.msk.f32.vlgmr.msra.gmra.mxu1 %vm535_vm1, %v5187_v9 }
0x3f88   :  { %5381 = vmatpush1.msra.mxu1 %v11578_v59  ;;  %5444 = vmatprep.mubr.f32.mxu1 %v12794_v23  ;;  %13213 = vst [vmem:[#allocation71_spill] sm:$0xff] %v12108_v2 }
0x3f89   :  { %5382 = vmatprep.subr.mxu1 %v11585_v21 }
0x3f8a   :  { %5383 = vmatpush1.msra.mxu1 %v11591_v14 }
0x3f8b   :  { %5384 = vmatprep.subr.mxu1 %v11597_v43 }
0x3f8c   :  { %5385 = vmatpush1.msra.mxu1 %v11603_v33 }
0x3f8d   :  { %5386 = vmatprep.subr.mxu1 %v11609_v58 }
0x3f8e   :  { %5387 = vmatpush1.msra.mxu1 %v11615_v30 }
0x3f8f   :  { %5388 = vmatprep.subr.mxu1 %v11621_v53 }
0x3f90   :  { %5389 = vmatpush1.msra.mxu1 %v11627_v38 }
0x3f91   :  { %5390 = vmatprep.subr.mxu1 %v11633_v24 }
0x3f92   :  { %v5335_v9 = vpop.f32.mrf.mxu0  ;;  %5391 = vmatpush1.msra.mxu1 %v11639_v35 }
0x3f93   :  { %5392 = vmatprep.subr.mxu1 %v11645_v6 }
0x3f94   :  { %v5337_v33 = vpop.f32.mrf.mxu0  ;;  %5393 = vmatpush1.msra.mxu1 %v11651_v45  ;;  %v13216_v45 = vld [vmem:[#allocation80_spill] sm:$0xff] }
0x3f95   :  { %v5341_v30 = vadd.f32 %v5337_v33, %v12108_v2  ;;  %5394 = vmatprep.subr.mxu1 %v11657_v46  ;;  %v13217_v33 = vld [vmem:[#allocation27_spill] sm:$0xff]  ;;  %v13218_v2 = vld [vmem:[#allocation28_spill] sm:$0xff] }
0x3f96   :  { %5395 = vmatpush1.msra.mxu1 %v11663_v48  ;;  %v13219_v48 = vld [vmem:[#allocation29_spill] sm:$0xff]  ;;  %v13221_v46 = vld [vmem:[#allocation31_spill] sm:$0xff] }
0x3f97   :  { %5396 = vmatprep.subr.mxu1 %v11670_v13  ;;  %7937 = vtanh.f32 %v5341_v30  ;;  %v13220_v13 = vld [vmem:[#allocation30_spill] sm:$0xff] }
0x3f98   :  { %5397 = vmatpush1.msra.mxu1 %v11676_v52  ;;  %v13222_v52 = vld [vmem:[#allocation20_spill] sm:$0xff] }
0x3f99   :  { %5398 = vmatprep.subr.mxu1 %v11682_v16  ;;  %v13223_v16 = vld [vmem:[#allocation60_spill] sm:$0xff] }
0x3f9a   :  { %5399 = vmatpush1.msra.mxu1 %v11688_v18 }
0x3f9b   :  { %5400 = vmatprep.subr.mxu1 %v13214_v0  ;;  %v13224_v0 = vld [vmem:[#allocation23_spill] sm:$0xff] }
0x3f9c   :  { %5401 = vmatpush1.msra.mxu1 %v13215_v22 }
0x3f9d   :  { %5402 = vmatprep.subr.mxu1 %v13216_v45  ;;  %v13225_v45 = vld [vmem:[#allocation25_spill] sm:$0xff] }
0x3f9e   :  { %5403 = vmatpush1.msra.mxu1 %v13217_v33  ;;  %v13227_v33 = vld [vmem:[#allocation64_spill] sm:$0xff] }
0x3f9f   :  { %5404 = vmatprep.subr.mxu1 %v13218_v2  ;;  %v13226_v2 = vld [vmem:[#allocation18_spill] sm:$0xff] }
0x3fa0   :  { %5405 = vmatpush1.msra.mxu1 %v13219_v48  ;;  %v12135_v48 = vadd.f32 %v13227_v33, %v13226_v2 }
0x3fa1   :  { %5406 = vmatprep.subr.mxu1 %v13220_v13 }
0x3fa2   :  { %5407 = vmatpush1.msra.mxu1 %v13221_v46  ;;  %v5340_v13 = vadd.f32 %v5335_v9, %v12135_v48 }
0x3fa3   :  { %5408 = vmatprep.subr.mxu1 %v13222_v52 }
0x3fa4   :  { %5409 = vmatpush1.msra.mxu1 %v13223_v16  ;;  %v7938_v18 = vpop.eup %7937  ;;  %v6590_v46 = vmul.f32 -1.442695, %v5340_v13 }
0x3fa5   :  { %5410 = vmatprep.subr.mxu1 %v13224_v0  ;;  %5360 = vrot.lane.b32.xlu0 %v7938_v18, %s8471_s5  ;;  %v5188_v18 = vrot.slane %v10983_v62, 6 }
0x3fa6   :  { %5411 = vmatpush1.msra.mxu1 %v13225_v45  ;;  %7939 = vpow2.f32 %v6590_v46  ;;  %v5356_v46 = vrot.slane %v11774_v5, 6  ;;  %v13230_v5 = vld [vmem:[#allocation74_spill] sm:$0xff] }
0x3fa7   :  { %7500 = vmatprep.subr.mxu1 %v12794_v23 }
0x3fb3   :  { %v7940_v52 = vpop.eup %7939 }
0x3fb4   :  { %v5348_v22 = vadd.f32 1.0, %v7940_v52 }
0x3fb6   :  { %7941 = vrcp.f32 %v5348_v22 }
0x3fc3   :  { %v7942_v16 = vpop.eup %7941 }
0x3fc4   :  { %v5358_v52 = vmul.f32 %v7942_v16, %v5356_v46 }
0x4017   :  { %v5361_v6 = vpop.permute.xlu0 %5360 }
0x4018   :  { %v5363_v0 = vmul.f32 %v7942_v16, %v5361_v6 }
0x401a   :  { %5365 = vrot.lane.b32.xlu1 %v5363_v0, %s8471_s5 }
0x401e   :  { %5376 = vrot.lane.b32.xlu1 %v11811_v41, %s8471_s5  ;;  %v6591_v41 = vmul.f32 -1.442695, %v5341_v30  ;;  %v13228_v30 = vld [vmem:[#allocation26_spill] sm:$0xff] }
0x4047   :  { %v5259_v45 = vpop.f32.mrf.mxu1 }
0x4048   :  { %v5260_v2 = vadd.f32 %v5259_v45, %v5188_v18 }
0x4049   :  { %v7499_v33 = vpop.f32.mrf.mxu1 }
0x404a   :  { %v5263_v35 = vmax.f32 %v5260_v2, 0.0  ;;  %v13232_v2 = vld [vmem:[#allocation58_spill] sm:$0xff] }
0x404c   :  { %v12143_v13 = vadd.f32 %v5263_v35, %v11771_v17 }
0x408c   :  { %v5366_v9 = vpop.permute.xlu1 %5365 }
0x408d   :  { %v12146_v22 = vadd.f32 %v5366_v9, %v5358_v52 }
0x408f   :  { %7943 = vtanh.f32 %v12146_v22 }
0x4090   :  { %7945 = vpow2.f32 %v6591_v41  ;;  %v5377_v17 = vpop.permute.xlu1 %5376 }
0x409c   :  { %v7944_v6 = vpop.eup %7943 }
0x409d   :  { %5371 = vrot.lane.b32.xlu0 %v7944_v6, %s8471_s5  ;;  %v7946_v62 = vpop.eup %7945 }
0x409e   :  { %v5349_v45 = vadd.f32 1.0, %v7946_v62 }
0x40a0   :  { %7947 = vrcp.f32 %v5349_v45 }
0x40ad   :  { %v7948_v0 = vpop.eup %7947 }
0x410f   :  { %v5372_v18 = vpop.permute.xlu0 %5371 }
0x4110   :  { %v12150_v35 = vmul.f32 %v7948_v0, %v5372_v18 }
0x4112   :  { %v5379_v16 = vsel %vm535_vm1, %v12150_v35, %v5377_v17 }
0x4113   :  { %5445 = vmatmul.mubr.f32.vlgmr.msra.gmra.mxu1 %v5379_v16 }
0x4114   :  { %7501 = vmatpush3.msra.mxu1 %v11362_v29  ;;  %7516 = vmatprep.mubr.msk.f32.mxu1 %vm8470_vm0, %v12794_v23  ;;  %v13229_v29 = vld [vmem:[#allocation73_spill] sm:$0xff] }
0x4115   :  { %7502 = vmatprep.subr.mxu1 %v12794_v23 }
0x4116   :  { %7503 = vmatpush3.msra.mxu1 %v11368_v40  ;;  %v13231_v40 = vld [vmem:[#allocation75_spill] sm:$0xff] }
0x4117   :  { %7504 = vmatprep.subr.mxu1 %v12794_v23 }
0x4118   :  { %7505 = vmatpush3.msra.mxu1 %v13163_v34 }
0x4119   :  { %7506 = vmatprep.subr.mxu1 %v12794_v23 }
0x411a   :  { %7507 = vmatpush3.msra.mxu1 %v13164_v1 }
0x411b   :  { %7508 = vmatprep.subr.mxu1 %v12794_v23 }
0x411c   :  { %7509 = vmatpush3.msra.mxu1 %v13228_v30 }
0x411d   :  { %7510 = vmatprep.subr.mxu1 %v12794_v23 }
0x411e   :  { %7511 = vmatpush3.msra.mxu1 %v13229_v29 }
0x411f   :  { %7512 = vmatprep.subr.mxu1 %v12794_v23 }
0x4120   :  { %7513 = vmatpush3.msra.mxu1 %v13230_v5 }
0x4121   :  { %7514 = vmatprep.subr.mxu1 %v12794_v23 }
0x4122   :  { %7515 = vmatpush3.msra.mxu1 %v13231_v40 }
0x4123   :  { %7538 = vmatprep.subr.mxu1 %v12794_v23 }
0x41d3   :  { %v5446_v34 = vpop.f32.mrf.mxu1 }
0x41d4   :  { %v5447_v52 = vadd.f32 %v5446_v34, %v12864_v36 }
0x41d5   :  { %v5448_v1 = vpop.f32.mrf.mxu1 }
0x41d6   :  { %v5449_v33 = vadd.f32 %v5448_v1, %v13232_v2  ;;  %v6592_v9 = vmul.f32 -1.442695, %v5447_v52  ;;  %v13233_v52 = vld [vmem:[#allocation76_spill] sm:$0xff] }
0x41d8   :  { %7949 = vtanh.f32 %v5449_v33  ;;  %v6593_v29 = vmul.f32 -1.442695, %v5449_v33  ;;  %v13234_v33 = vld [vmem:[#allocation77_spill] sm:$0xff] }
0x41d9   :  { %7951 = vpow2.f32 %v6592_v9  ;;  %v13235_v9 = vld [vmem:[#allocation43_spill] sm:$0xff] }
0x41e5   :  { %v7950_v46 = vpop.eup %7949 }
0x41e6   :  { %5466 = vrot.lane.b32.xlu0 %v7950_v46, %s8471_s5  ;;  %v7952_v6 = vpop.eup %7951 }
0x41e7   :  { %v5457_v41 = vadd.f32 1.0, %v7952_v6  ;;  %v13236_v6 = vld [vmem:[#allocation44_spill] sm:$0xff] }
0x41e9   :  { %7953 = vrcp.f32 %v5457_v41  ;;  %v13237_v41 = vld [vmem:[#allocation45_spill] sm:$0xff] }
0x41f6   :  { %v7954_v62 = vpop.eup %7953 }
0x41f7   :  { %v5464_v18 = vmul.f32 %v7954_v62, %v11807_v8 }
0x4258   :  { %v5467_v45 = vpop.permute.xlu0 %5466 }
0x4259   :  { %v5469_v0 = vmul.f32 %v7954_v62, %v5467_v45  ;;  %v13238_v62 = vld [vmem:[#allocation46_spill] sm:$0xff]  ;;  %v13239_v45 = vld [vmem:[#allocation47_spill] sm:$0xff] }
0x425b   :  { %5471 = vrot.lane.b32.xlu1 %v5469_v0, %s8471_s5  ;;  %v13240_v0 = vld [vmem:[#allocation48_spill] sm:$0xff] }
0x425f   :  { %5481 = vrot.lane.b32.xlu1 %v11842_v12, %s8471_s5 }
0x42cd   :  { %v5472_v17 = vpop.permute.xlu1 %5471 }
0x42ce   :  { %v12179_v16 = vadd.f32 %v5472_v17, %v5464_v18  ;;  %v13241_v18 = vld [vmem:[#allocation49_spill] sm:$0xff] }
0x42d0   :  { %7955 = vtanh.f32 %v12179_v16 }
0x42d1   :  { %7957 = vpow2.f32 %v6593_v29  ;;  %v5482_v12 = vpop.permute.xlu1 %5481 }
0x42dd   :  { %v7956_v30 = vpop.eup %7955 }
0x42de   :  { %5477 = vrot.lane.b32.xlu0 %v7956_v30, %s8471_s5  ;;  %v7958_v5 = vpop.eup %7957 }
0x42df   :  { %v5458_v40 = vadd.f32 1.0, %v7958_v5 }
0x42e1   :  { %7959 = vrcp.f32 %v5458_v40 }
0x42ee   :  { %v7960_v34 = vpop.eup %7959 }
0x4350   :  { %v5478_v1 = vpop.permute.xlu0 %5477 }
0x4351   :  { %v12183_v46 = vmul.f32 %v7960_v34, %v5478_v1 }
0x4353   :  { %v5484_v8 = vsel %vm535_vm1, %v12183_v46, %v5482_v12 }
0x4354   :  { %5550 = vmatmul.mubr.f32.vlgmr.msra.gmra.mxu0 %v5484_v8 }
0x4355   :  { %7520 = vmatpush3.msra.mxu0 %v13233_v52  ;;  %7535 = vmatprep.mubr.msk.f32.mxu0 %vm8470_vm0, %v12794_v23 }
0x4356   :  { %7521 = vmatprep.subr.mxu0 %v12794_v23 }
0x4357   :  { %7522 = vmatpush3.msra.mxu0 %v13234_v33 }
0x4358   :  { %7523 = vmatprep.subr.mxu0 %v12794_v23 }
0x4359   :  { %7524 = vmatpush3.msra.mxu0 %v13235_v9 }
0x435a   :  { %7525 = vmatprep.subr.mxu0 %v12794_v23 }
0x435b   :  { %7526 = vmatpush3.msra.mxu0 %v13236_v6 }
0x435c   :  { %7527 = vmatprep.subr.mxu0 %v12794_v23 }
0x435d   :  { %7528 = vmatpush3.msra.mxu0 %v13237_v41 }
0x435e   :  { %7529 = vmatprep.subr.mxu0 %v12794_v23 }
0x435f   :  { %7530 = vmatpush3.msra.mxu0 %v13238_v62 }
0x4360   :  { %7531 = vmatprep.subr.mxu0 %v12794_v23 }
0x4361   :  { %7532 = vmatpush3.msra.mxu0 %v13239_v45 }
0x4362   :  { %7533 = vmatprep.subr.mxu0 %v12794_v23 }
0x4363   :  { %7534 = vmatpush3.msra.mxu0 %v13240_v0 }
0x4364   :  { %5828 = vmatprep.subr.mxu0 %v13241_v18 }
0x4414   :  { %v5551_v17 = vpop.f32.mrf.mxu0 }
0x4415   :  { %v5552_v40 = vadd.f32 %v5551_v17, %v12875_v50 }
0x4416   :  { %v5553_v30 = vpop.f32.mrf.mxu0 }
0x4417   :  { %v5554_v29 = vadd.f32 %v5553_v30, %v12874_v55  ;;  %v6594_v34 = vmul.f32 -1.442695, %v5552_v40 }
0x4419   :  { %7961 = vtanh.f32 %v5554_v29  ;;  %v6595_v45 = vmul.f32 -1.442695, %v5554_v29 }
0x441a   :  { %7963 = vpow2.f32 %v6594_v34 }
0x4426   :  { %v7962_v5 = vpop.eup %7961 }
0x4427   :  { %5571 = vrot.lane.b32.xlu0 %v7962_v5, %s8471_s5  ;;  %v7964_v1 = vpop.eup %7963 }
0x4428   :  { %v5562_v12 = vadd.f32 1.0, %v7964_v1  ;;  %v13260_v1 = vld [vmem:[#allocation84_spill] sm:$0xff] }
0x442a   :  { %7965 = vrcp.f32 %v5562_v12  ;;  %v13261_v12 = vld [vmem:[#allocation85_spill] sm:$0xff] }
0x4437   :  { %v7966_v8 = vpop.eup %7965 }
0x4438   :  { %v5569_v9 = vmul.f32 %v7966_v8, %v11838_v25 }
0x4499   :  { %v5572_v52 = vpop.permute.xlu0 %5571 }
0x449a   :  { %v5574_v33 = vmul.f32 %v7966_v8, %v5572_v52  ;;  %v13262_v8 = vld [vmem:[#allocation86_spill] sm:$0xff]  ;;  %v13263_v52 = vld [vmem:[#allocation87_spill] sm:$0xff] }
0x449c   :  { %5576 = vrot.lane.b32.xlu1 %v5574_v33, %s8471_s5  ;;  %v13264_v33 = vld [vmem:[#allocation88_spill] sm:$0xff] }
0x450e   :  { %v5577_v6 = vpop.permute.xlu1 %5576 }
0x450f   :  { %v12210_v41 = vadd.f32 %v5577_v6, %v5569_v9  ;;  %v13265_v9 = vld [vmem:[#allocation89_spill] sm:$0xff]  ;;  %v13266_v6 = vld [vmem:[#allocation90_spill] sm:$0xff] }
0x4511   :  { %7967 = vtanh.f32 %v12210_v41 }
0x4512   :  { %7969 = vpow2.f32 %v6595_v45  ;;  %v13268_v45 = vld [vmem:[#allocation92_spill] sm:$0xff] }
0x451e   :  { %v7968_v62 = vpop.eup %7967 }
0x451f   :  { %5582 = vrot.lane.b32.xlu0 %v7968_v62, %s8471_s5  ;;  %v7970_v0 = vpop.eup %7969  ;;  %v13267_v62 = vld [vmem:[#allocation91_spill] sm:$0xff] }
0x4520   :  { %v5563_v18 = vadd.f32 1.0, %v7970_v0  ;;  %v13269_v0 = vld [vmem:[#allocation93_spill] sm:$0xff] }
0x4522   :  { %7971 = vrcp.f32 %v5563_v18  ;;  %v13270_v18 = vld [vmem:[#allocation62_spill] sm:$0xff] }
0x452f   :  { %v7972_v17 = vpop.eup %7971 }
0x4591   :  { %v5583_v30 = vpop.permute.xlu0 %5582 }
0x4592   :  { %v12214_v5 = vmul.f32 %v7972_v17, %v5583_v30  ;;  %v13271_v17 = vld [vmem:[#allocation81_spill] sm:$0xff]  ;;  %v13272_v30 = vld [vmem:[#allocation82_spill] sm:$0xff] }
0x4594   :  { %7517 = vmatmul.mubr.msk.f32.vlgmr.msra.gmra.mxu1 %vm535_vm1, %v12214_v5 }
0x4595   :  { %7539 = vmatpush3.msra.mxu1 %v11846_v7  ;;  %7554 = vmatprep.mubr.msk.f32.mxu1 %vm8470_vm0, %v12794_v23 }
0x4596   :  { %7540 = vmatprep.subr.mxu1 %v12794_v23 }
0x4597   :  { %7541 = vmatpush3.msra.mxu1 %v11852_v20 }
0x4598   :  { %7542 = vmatprep.subr.mxu1 %v12794_v23 }
0x4599   :  { %7543 = vmatpush3.msra.mxu1 %v11856_v54 }
0x459a   :  { %7544 = vmatprep.subr.mxu1 %v12794_v23 }
0x459b   :  { %7545 = vmatpush3.msra.mxu1 %v11860_v39 }
0x459c   :  { %7546 = vmatprep.subr.mxu1 %v12794_v23 }
0x459d   :  { %7547 = vmatpush3.msra.mxu1 %v11864_v42 }
0x459e   :  { %7548 = vmatprep.subr.mxu1 %v12794_v23 }
0x459f   :  { %7549 = vmatpush3.msra.mxu1 %v11472_v49  ;;  %v13242_v49 = vld [vmem:[#allocation52_spill] sm:$0xff] }
0x45a0   :  { %7550 = vmatprep.subr.mxu1 %v12794_v23 }
0x45a1   :  { %7551 = vmatpush3.msra.mxu1 %v11476_v3  ;;  %v13243_v3 = vld [vmem:[#allocation53_spill] sm:$0xff] }
0x45a2   :  { %7552 = vmatprep.subr.mxu1 %v12794_v23 }
0x45a3   :  { %7553 = vmatpush3.msra.mxu1 %v11480_v61  ;;  %v13244_v61 = vld [vmem:[#allocation67_spill] sm:$0xff] }
0x45a4   :  { %5933 = vmatprep.subr.mxu1 %v11486_v44  ;;  %v13245_v44 = vld [vmem:[#allocation68_spill] sm:$0xff] }
0x4654   :  { %v5655_v25 = vpop.f32.mrf.mxu1 }
0x4655   :  { %v5656_v29 = vadd.f32 %v11874_v32, %v5655_v25  ;;  %v13273_v25 = vld [vmem:[#allocation35_spill] sm:$0xff] }
0x4656   :  { %v7518_v40 = vpop.f32.mrf.mxu1 }
0x4657   :  { %v5659_v34 = vmax.f32 %v5656_v29, 0.0 }
0x4659   :  { %7536 = vmatmul.mubr.msk.f32.vlgmr.msra.gmra.mxu0 %vm535_vm1, %v5659_v34 }
0x465a   :  { %5829 = vmatpush1.msra.mxu0 %v11491_v10  ;;  %5876 = vmatprep.mubr.f32.mxu0 %v12794_v23  ;;  %v13246_v10 = vld [vmem:[#allocation69_spill] sm:$0xff] }
0x465b   :  { %5830 = vmatprep.subr.mxu0 %v11495_v28  ;;  %v13247_v28 = vld [vmem:[#allocation32_spill] sm:$0xff] }
0x465c   :  { %5831 = vmatpush1.msra.mxu0 %v11498_v56  ;;  %v13248_v56 = vld [vmem:[#allocation33_spill] sm:$0xff] }
0x465d   :  { %5832 = vmatprep.subr.mxu0 %v11501_v27  ;;  %v13249_v27 = vld [vmem:[#allocation34_spill] sm:$0xff] }
0x465e   :  { %5833 = vmatpush1.msra.mxu0 %v11504_v4  ;;  %v13250_v4 = vld [vmem:[#allocation36_spill] sm:$0xff] }
0x465f   :  { %5834 = vmatprep.subr.mxu0 %v11507_v37  ;;  %v13251_v37 = vld [vmem:[#allocation37_spill] sm:$0xff] }
0x4660   :  { %5835 = vmatpush1.msra.mxu0 %v11510_v11  ;;  %v13252_v11 = vld [vmem:[#allocation38_spill] sm:$0xff] }
0x4661   :  { %5836 = vmatprep.subr.mxu0 %v13179_v31  ;;  %v13257_v31 = vld [vmem:[#allocation24_spill] sm:$0xff] }
0x4662   :  { %5837 = vmatpush1.msra.mxu0 %v13180_v57  ;;  %v13258_v57 = vld [vmem:[#allocation63_spill] sm:$0xff] }
0x4663   :  { %5838 = vmatprep.subr.mxu0 %v11519_v47  ;;  %v13253_v47 = vld [vmem:[#allocation39_spill] sm:$0xff] }
0x4664   :  { %5839 = vmatpush1.msra.mxu0 %v11522_v19  ;;  %v13254_v19 = vld [vmem:[#allocation40_spill] sm:$0xff] }
0x4665   :  { %5840 = vmatprep.subr.mxu0 %v11525_v15  ;;  %v13255_v15 = vld [vmem:[#allocation41_spill] sm:$0xff] }
0x4666   :  { %5841 = vmatpush1.msra.mxu0 %v11528_v26  ;;  %v13256_v26 = vld [vmem:[#allocation42_spill] sm:$0xff] }
0x4667   :  { %5842 = vmatprep.subr.mxu0 %v13242_v49 }
0x4668   :  { %5843 = vmatpush1.msra.mxu0 %v13243_v3  ;;  %v13276_v3 = vld [vmem:[#allocation57_spill] sm:$0xff] }
0x4669   :  { %6599 = vmatmul.mubr.msk.f32.vlgmr.msra.gmra.mxu0 %vm535_vm1, %v12150_v35  ;;  %6038 = vmatprep.subr.mxu0 %v13244_v61  ;;  %v13259_v35 = vld [vmem:[#allocation83_spill] sm:$0xff] }
0x466a   :  { %6039 = vmatpush1.msra.mxu0 %v13245_v44  ;;  %6102 = vmatprep.mubr.f32.mxu0 %v12794_v23  ;;  %v13278_v61 = vld [vmem:[#allocation19_spill] sm:$0xff] }
0x466b   :  { %6040 = vmatprep.subr.mxu0 %v13246_v10  ;;  %v13279_v44 = vld [vmem:[#allocation55_spill] sm:$0xff] }
0x466c   :  { %6041 = vmatpush1.msra.mxu0 %v13247_v28  ;;  %v13281_v10 = vld [vmem:[#allocation71_spill] sm:$0xff] }
0x466d   :  { %6042 = vmatprep.subr.mxu0 %v13248_v56  ;;  %v13285_v56 = vld [vmem:[#allocation70_spill] sm:$0xff] }
0x466e   :  { %6043 = vmatpush1.msra.mxu0 %v13249_v27  ;;  %v13286_v27 = vld [vmem:[#allocation78_spill] sm:$0xff] }
0x466f   :  { %6044 = vmatprep.subr.mxu0 %v13250_v4  ;;  %v13287_v4 = vld [vmem:[#allocation79_spill] sm:$0xff] }
0x4670   :  { %6045 = vmatpush1.msra.mxu0 %v13251_v37  ;;  %v13288_v37 = vld [vmem:[#allocation80_spill] sm:$0xff] }
0x4671   :  { %6046 = vmatprep.subr.mxu0 %v13252_v11  ;;  %v13289_v11 = vld [vmem:[#allocation27_spill] sm:$0xff] }
0x4672   :  { %6047 = vmatpush1.msra.mxu0 %v13253_v47  ;;  %v13290_v47 = vld [vmem:[#allocation28_spill] sm:$0xff] }
0x4673   :  { %6048 = vmatprep.subr.mxu0 %v13254_v19  ;;  %v13291_v19 = vld [vmem:[#allocation29_spill] sm:$0xff] }
0x4674   :  { %6049 = vmatpush1.msra.mxu0 %v13255_v15  ;;  %v13292_v15 = vld [vmem:[#allocation30_spill] sm:$0xff] }
0x4675   :  { %6050 = vmatprep.subr.mxu0 %v13256_v26  ;;  %v13293_v26 = vld [vmem:[#allocation31_spill] sm:$0xff] }
0x4676   :  { %6051 = vmatpush1.msra.mxu0 %v13257_v31  ;;  %v13294_v31 = vld [vmem:[#allocation20_spill] sm:$0xff] }
0x4677   :  { %6052 = vmatprep.subr.mxu0 %v13258_v57  ;;  %v13295_v57 = vld [vmem:[#allocation60_spill] sm:$0xff] }
0x4678   :  { %6053 = vmatpush1.msra.mxu0 %v13259_v35  ;;  %v13296_v35 = vld [vmem:[#allocation23_spill] sm:$0xff] }
0x4679   :  { %6054 = vmatprep.subr.mxu0 %v13260_v1  ;;  %v13297_v1 = vld [vmem:[#allocation25_spill] sm:$0xff] }
0x467a   :  { %6055 = vmatpush1.msra.mxu0 %v13261_v12 }
0x467b   :  { %6056 = vmatprep.subr.mxu0 %v13262_v8 }
0x467c   :  { %6057 = vmatpush1.msra.mxu0 %v13263_v52 }
0x467d   :  { %6058 = vmatprep.subr.mxu0 %v13264_v33 }
0x467e   :  { %6059 = vmatpush1.msra.mxu0 %v13265_v9 }
0x467f   :  { %6060 = vmatprep.subr.mxu0 %v13266_v6 }
0x4680   :  { %6061 = vmatpush1.msra.mxu0 %v13267_v62 }
0x4681   :  { %6062 = vmatprep.subr.mxu0 %v13268_v45 }
0x4682   :  { %6063 = vmatpush1.msra.mxu0 %v13269_v0 }
0x4683   :  { %6064 = vmatprep.subr.mxu0 %v13270_v18  ;;  %v5925_v18 = vrot.slane %v12183_v46, 6 }
0x4684   :  { %6065 = vmatpush1.msra.mxu0 %v13271_v17  ;;  %v8309_v17 = vld [vmem:[#allocation10 + $0x4] ss:$0 sm:$0xff] }
0x4685   :  { %6066 = vmatprep.subr.mxu0 %v13272_v30  ;;  %v13298_v30 = vld [vmem:[#allocation21_spill] sm:$0xff] }
0x4686   :  { %6067 = vmatpush1.msra.mxu0 %v13273_v25  ;;  %v12332_v25 = vadd.f32 %v8309_v17, %v13298_v30 }
0x4687   :  { %6068 = vmatprep.subr.mxu0 %v12080_v63  ;;  %v13274_v63 = vld [vmem:[#allocation54_spill] sm:$0xff] }
0x4688   :  { %6069 = vmatpush1.msra.mxu0 %v12086_v51  ;;  %v13275_v51 = vld [vmem:[#allocation56_spill] sm:$0xff] }
0x4689   :  { %7576 = vmatprep.subr.mxu0 %v12794_v23 }
0x4719   :  { %v5729_v29 = vpop.f32.mrf.mxu0 }
0x471a   :  { %v5730_v40 = vadd.f32 %v12090_v60, %v5729_v29 }
0x471b   :  { %v7537_v34 = vpop.f32.mrf.mxu0 }
0x471c   :  { %v5733_v49 = vmax.f32 %v5730_v40, 0.0 }
0x471e   :  { %7555 = vmatmul.mubr.msk.f32.vlgmr.msra.gmra.mxu1 %vm535_vm1, %v5733_v49 }
0x471f   :  { %5934 = vmatpush1.msra.mxu1 %v11578_v59  ;;  %5997 = vmatprep.mubr.f32.mxu1 %v12794_v23 }
0x4720   :  { %5935 = vmatprep.subr.mxu1 %v11585_v21  ;;  %v13277_v21 = vld [vmem:[#allocation61_spill] sm:$0xff] }
0x4721   :  { %5936 = vmatpush1.msra.mxu1 %v11591_v14 }
0x4722   :  { %5937 = vmatprep.subr.mxu1 %v11597_v43 }
0x4723   :  { %5938 = vmatpush1.msra.mxu1 %v13274_v63  ;;  %v5905_v63 = vrot.slane %v12146_v22, 6  ;;  %v8310_v22 = vld [vmem:[#allocation8 + $0x38] sm:$0xff] }
0x4724   :  { %5939 = vmatprep.subr.mxu1 %v11609_v58  ;;  %v13280_v58 = vld [vmem:[#allocation16_spill] sm:$0xff] }
0x4725   :  { %5940 = vmatpush1.msra.mxu1 %v13275_v51 }
0x4726   :  { %5941 = vmatprep.subr.mxu1 %v11621_v53  ;;  %v13282_v53 = vld [vmem:[#allocation59_spill] sm:$0xff] }
0x4727   :  { %5942 = vmatpush1.msra.mxu1 %v11627_v38  ;;  %v13283_v38 = vld [vmem:[#allocation66_spill] sm:$0xff] }
0x4728   :  { %5943 = vmatprep.subr.mxu1 %v11633_v24  ;;  %v13284_v24 = vld [vmem:[#allocation17_spill] sm:$0xff] }
0x4729   :  { %v5878_v59 = vpop.f32.mrf.mxu0  ;;  %5944 = vmatpush1.msra.mxu1 %v13276_v3 }
0x472a   :  { %5945 = vmatprep.subr.mxu1 %v13277_v21  ;;  %v5885_v8 = vrot.slane %v5878_v59, 6 }
0x472b   :  { %v5880_v14 = vpop.f32.mrf.mxu0  ;;  %5946 = vmatpush1.msra.mxu1 %v13278_v61 }
0x472c   :  { %v5886_v43 = vrot.slane %v5880_v14, 6  ;;  %5947 = vmatprep.subr.mxu1 %v13279_v44  ;;  %v5889_v52 = vadd.f32 %v5885_v8, %v12135_v48 }
0x472d   :  { %5948 = vmatpush1.msra.mxu1 %v13280_v58 }
0x472e   :  { %v5890_v28 = vadd.f32 %v5886_v43, %v13281_v10  ;;  %5949 = vmatprep.subr.mxu1 %v13282_v53  ;;  %v6600_v33 = vmul.f32 -1.442695, %v5889_v52 }
0x472f   :  { %5950 = vmatpush1.msra.mxu1 %v13283_v38  ;;  %v8312_v38 = vld [vmem:[#allocation8 + $0x28] sm:$0xff] }
0x4730   :  { %5951 = vmatprep.subr.mxu1 %v13284_v24  ;;  %7973 = vtanh.f32 %v5890_v28  ;;  %v6601_v21 = vmul.f32 -1.442695, %v5890_v28  ;;  %v8311_v28 = vld [vmem:[#allocation8 + $0x30] sm:$0xff]  ;;  %v8313_v24 = vld [vmem:[#allocation8 + $0x20] sm:$0xff] }
0x4731   :  { %5952 = vmatpush1.msra.mxu1 %v13285_v56  ;;  %7975 = vpow2.f32 %v6600_v33  ;;  %v8314_v56 = vld [vmem:[#allocation8 + $0x18] sm:$0xff] }
0x4732   :  { %5953 = vmatprep.subr.mxu1 %v13286_v27  ;;  %v8315_v27 = vld [vmem:[#allocation8 + $0x10] sm:$0xff] }
0x4733   :  { %5954 = vmatpush1.msra.mxu1 %v13287_v4  ;;  %v8316_v4 = vld [vmem:[#allocation8 + $0x8] sm:$0xff] }
0x4734   :  { %5955 = vmatprep.subr.mxu1 %v13288_v37  ;;  %v8317_v37 = vld [vmem:[#allocation8] sm:$0xff] }
0x4735   :  { %5956 = vmatpush1.msra.mxu1 %v13289_v11 }
0x4736   :  { %5957 = vmatprep.subr.mxu1 %v13290_v47 }
0x4737   :  { %5958 = vmatpush1.msra.mxu1 %v13291_v19 }
0x4738   :  { %5959 = vmatprep.subr.mxu1 %v13292_v15 }
0x4739   :  { %5960 = vmatpush1.msra.mxu1 %v13293_v26 }
0x473a   :  { %5961 = vmatprep.subr.mxu1 %v13294_v31 }
0x473b   :  { %5962 = vmatpush1.msra.mxu1 %v13295_v57 }
0x473c   :  { %5963 = vmatprep.subr.mxu1 %v13296_v35 }
0x473d   :  { %5964 = vmatpush1.msra.mxu1 %v13297_v1  ;;  %v7974_v12 = vpop.eup %7973 }
0x473e   :  { %7557 = vmatprep.subr.mxu1 %v12794_v23  ;;  %5909 = vrot.lane.b32.xlu1 %v7974_v12, %s8471_s5  ;;  %v7976_v9 = vpop.eup %7975 }
0x473f   :  { %v5897_v6 = vadd.f32 1.0, %v7976_v9 }
0x4741   :  { %7977 = vrcp.f32 %v5897_v6 }
0x474e   :  { %v7978_v62 = vpop.eup %7977 }
0x474f   :  { %v5907_v51 = vmul.f32 %v7978_v62, %v5905_v63  ;;  %v8324_v63 = vld [vmem:[#allocation8 + $0x48] sm:$0xff] }
0x47b0   :  { %v5910_v45 = vpop.permute.xlu1 %5909 }
0x47b1   :  { %v5912_v0 = vmul.f32 %v7978_v62, %v5910_v45 }
0x47b3   :  { %5914 = vrot.lane.b32.xlu0 %v5912_v0, %s8471_s5 }
0x47b7   :  { %5926 = vrot.lane.b32.xlu0 %v5925_v18, %s8471_s5 }
0x47de   :  { %v5803_v29 = vpop.f32.mrf.mxu1 }
0x47df   :  { %v5804_v48 = vadd.f32 %v5803_v29, %v12332_v25  ;;  %v8320_v29 = vld [vmem:[#allocation8 + $0x68] sm:$0xff] }
0x47e0   :  { %v7556_v40 = vpop.f32.mrf.mxu1 }
0x47e1   :  { %v5807_v34 = vmax.f32 %v5804_v48, 0.0  ;;  %v8321_v48 = vld [vmem:[#allocation8 + $0x60] sm:$0xff]  ;;  %v8322_v40 = vld [vmem:[#allocation8 + $0x58] sm:$0xff] }
0x47e3   :  { %v12336_v49 = vadd.f32 %v5807_v34, %v12143_v13  ;;  %v8323_v34 = vld [vmem:[#allocation8 + $0x50] sm:$0xff] }
0x4825   :  { %v5915_v59 = vpop.permute.xlu0 %5914 }
0x4826   :  { %v5917_v3 = vadd.f32 %v5915_v59, %v5907_v51  ;;  %v8325_v51 = vld [vmem:[#allocation8 + $0x40] sm:$0xff] }
0x4828   :  { %7979 = vtanh.f32 %v5917_v3 }
0x4829   :  { %7981 = vpow2.f32 %v6601_v21  ;;  %v5927_v10 = vpop.permute.xlu0 %5926 }
0x4835   :  { %v7980_v46 = vpop.eup %7979 }
0x4836   :  { %5920 = vrot.lane.b32.xlu1 %v7980_v46, %s8471_s5  ;;  %v7982_v14 = vpop.eup %7981 }
0x4837   :  { %v5898_v61 = vadd.f32 1.0, %v7982_v14 }
0x4839   :  { %7983 = vrcp.f32 %v5898_v61 }
0x4846   :  { %v7984_v43 = vpop.eup %7983 }
0x48a8   :  { %v5921_v44 = vpop.permute.xlu1 %5920 }
0x48a9   :  { %v5923_v58 = vmul.f32 %v7984_v43, %v5921_v44 }
0x48ab   :  { %v5929_v13 = vsel %vm535_vm1, %v5923_v58, %v5927_v10 }
0x48ac   :  { %v5931_v53 = vrot.slane %v5929_v13, 2 }
0x48ae   :  { %5998 = vmatmul.mubr.f32.vlgmr.msra.gmra.mxu1 %v5931_v53 }
0x48af   :  { %7558 = vmatpush3.msra.mxu1 %v8310_v22  ;;  %7573 = vmatprep.mubr.msk.f32.mxu1 %vm8470_vm0, %v12794_v23 }
0x48b0   :  { %7559 = vmatprep.subr.mxu1 %v12794_v23 }
0x48b1   :  { %7560 = vmatpush3.msra.mxu1 %v8311_v28 }
0x48b2   :  { %7561 = vmatprep.subr.mxu1 %v12794_v23 }
0x48b3   :  { %7562 = vmatpush3.msra.mxu1 %v8312_v38 }
0x48b4   :  { %7563 = vmatprep.subr.mxu1 %v12794_v23 }
0x48b5   :  { %7564 = vmatpush3.msra.mxu1 %v8313_v24 }
0x48b6   :  { %7565 = vmatprep.subr.mxu1 %v12794_v23 }
0x48b7   :  { %7566 = vmatpush3.msra.mxu1 %v8314_v56 }
0x48b8   :  { %7567 = vmatprep.subr.mxu1 %v12794_v23 }
0x48b9   :  { %7568 = vmatpush3.msra.mxu1 %v8315_v27 }
0x48ba   :  { %7569 = vmatprep.subr.mxu1 %v12794_v23 }
0x48bb   :  { %7570 = vmatpush3.msra.mxu1 %v8316_v4 }
0x48bc   :  { %7571 = vmatprep.subr.mxu1 %v12794_v23 }
0x48bd   :  { %7572 = vmatpush3.msra.mxu1 %v8317_v37 }
0x48be   :  { %7595 = vmatprep.subr.mxu1 %v12794_v23 }
0x496e   :  { %v5999_v11 = vpop.f32.mrf.mxu1 }
0x496f   :  { %v6000_v26 = vadd.f32 %v5999_v11, %v12864_v36 }
0x4970   :  { %v6001_v47 = vpop.f32.mrf.mxu1 }
0x4971   :  { %v6002_v19 = vadd.f32 %v6001_v47, %v13232_v2  ;;  %v6602_v31 = vmul.f32 -1.442695, %v6000_v26  ;;  %v152_v47 = vld [vmem:[#allocation8 + $0x170] sm:$0xff] }
0x4973   :  { %7985 = vtanh.f32 %v6002_v19  ;;  %v6603_v36 = vmul.f32 -1.442695, %v6002_v19  ;;  %v151_v19 = vld [vmem:[#allocation8 + $0x168] sm:$0xff] }
0x4974   :  { %7987 = vpow2.f32 %v6602_v31 }
0x4980   :  { %v7986_v15 = vpop.eup %7985 }
0x4981   :  { %6019 = vrot.lane.b32.xlu1 %v7986_v15, %s8471_s5  ;;  %v7988_v57 = vpop.eup %7987  ;;  %v150_v15 = vld [vmem:[#allocation8 + $0x160] sm:$0xff] }
0x4982   :  { %v6010_v35 = vadd.f32 1.0, %v7988_v57 }
0x4984   :  { %7989 = vrcp.f32 %v6010_v35  ;;  %v149_v35 = vld [vmem:[#allocation8 + $0x158] sm:$0xff] }
0x4991   :  { %v7990_v1 = vpop.eup %7989 }
0x4992   :  { %v6017_v2 = vmul.f32 %v7990_v1, %v12179_v16  ;;  %v8319_v16 = vld [vmem:[#allocation8 + $0x70] sm:$0xff] }
0x49f3   :  { %v6020_v12 = vpop.permute.xlu1 %6019 }
0x49f4   :  { %v6022_v8 = vmul.f32 %v7990_v1, %v6020_v12  ;;  %v148_v1 = vld [vmem:[#allocation8 + $0x150] sm:$0xff]  ;;  %v147_v12 = vld [vmem:[#allocation8 + $0x148] sm:$0xff] }
0x49f6   :  { %6024 = vrot.lane.b32.xlu0 %v6022_v8, %s8471_s5  ;;  %v146_v8 = vld [vmem:[#allocation8 + $0x140] sm:$0xff] }
0x49fa   :  { %6034 = vrot.lane.b32.xlu0 %v12214_v5, %s8471_s5  ;;  %v8318_v5 = vld [vmem:[#allocation8 + $0x78] sm:$0xff] }
0x4a68   :  { %v6025_v52 = vpop.permute.xlu0 %6024 }
0x4a69   :  { %v6027_v33 = vadd.f32 %v6025_v52, %v6017_v2 }
0x4a6b   :  { %7991 = vtanh.f32 %v6027_v33 }
0x4a6c   :  { %7993 = vpow2.f32 %v6603_v36  ;;  %v6035_v17 = vpop.permute.xlu0 %6034 }
0x4a78   :  { %v7992_v9 = vpop.eup %7991 }
0x4a79   :  { %6030 = vrot.lane.b32.xlu1 %v7992_v9, %s8471_s5  ;;  %v7994_v6 = vpop.eup %7993 }
0x4a7a   :  { %v6011_v62 = vadd.f32 1.0, %v7994_v6  ;;  %v6609_v6 = vld [vmem:[#allocation10 + $0x5] ss:$0 sm:$0xff] }
0x4a7c   :  { %7995 = vrcp.f32 %v6011_v62 }
0x4a89   :  { %v7996_v45 = vpop.eup %7995 }
0x4aeb   :  { %v6031_v0 = vpop.permute.xlu1 %6030 }
0x4aec   :  { %v6033_v18 = vmul.f32 %v7996_v45, %v6031_v0 }
0x4aee   :  { %v6037_v30 = vsel %vm535_vm1, %v6033_v18, %v6035_v17 }
0x4aef   :  { %6103 = vmatmul.mubr.f32.vlgmr.msra.gmra.mxu0 %v6037_v30 }
0x4af0   :  { %7577 = vmatpush3.msra.mxu0 %v8318_v5  ;;  %7592 = vmatprep.mubr.msk.f32.mxu0 %vm8470_vm0, %v12794_v23 }
0x4af1   :  { %7578 = vmatprep.subr.mxu0 %v12794_v23 }
0x4af2   :  { %7579 = vmatpush3.msra.mxu0 %v8319_v16 }
0x4af3   :  { %7580 = vmatprep.subr.mxu0 %v12794_v23 }
0x4af4   :  { %7581 = vmatpush3.msra.mxu0 %v8320_v29 }
0x4af5   :  { %7582 = vmatprep.subr.mxu0 %v12794_v23 }
0x4af6   :  { %7583 = vmatpush3.msra.mxu0 %v8321_v48 }
0x4af7   :  { %7584 = vmatprep.subr.mxu0 %v12794_v23 }
0x4af8   :  { %7585 = vmatpush3.msra.mxu0 %v8322_v40 }
0x4af9   :  { %7586 = vmatprep.subr.mxu0 %v12794_v23 }
0x4afa   :  { %7587 = vmatpush3.msra.mxu0 %v8323_v34 }
0x4afb   :  { %7588 = vmatprep.subr.mxu0 %v12794_v23 }
0x4afc   :  { %7589 = vmatpush3.msra.mxu0 %v8324_v63 }
0x4afd   :  { %7590 = vmatprep.subr.mxu0 %v12794_v23 }
0x4afe   :  { %7591 = vmatpush3.msra.mxu0 %v8325_v51 }
0x4aff   :  { %7614 = vmatprep.subr.mxu0 %v12794_v23 }
0x4baf   :  { %v6104_v59 = vpop.f32.mrf.mxu0 }
0x4bb0   :  { %v6105_v14 = vadd.f32 %v6104_v59, %v12875_v50 }
0x4bb1   :  { %v6106_v3 = vpop.f32.mrf.mxu0 }
0x4bb2   :  { %v6107_v46 = vadd.f32 %v6106_v3, %v12874_v55  ;;  %v6604_v61 = vmul.f32 -1.442695, %v6105_v14 }
0x4bb4   :  { %7997 = vtanh.f32 %v6107_v46  ;;  %v6605_v38 = vmul.f32 -1.442695, %v6107_v46 }
0x4bb5   :  { %7999 = vpow2.f32 %v6604_v61 }
0x4bc1   :  { %v7998_v21 = vpop.eup %7997 }
0x4bc2   :  { %6124 = vrot.lane.b32.xlu1 %v7998_v21, %s8471_s5  ;;  %v8000_v43 = vpop.eup %7999 }
0x4bc3   :  { %v6115_v44 = vadd.f32 1.0, %v8000_v43 }
0x4bc5   :  { %8001 = vrcp.f32 %v6115_v44 }
0x4bd2   :  { %v8002_v58 = vpop.eup %8001 }
0x4bd3   :  { %v6122_v53 = vmul.f32 %v8002_v58, %v12210_v41  ;;  %v8327_v41 = vld [vmem:[#allocation8 + $0xc8] sm:$0xff] }
0x4c34   :  { %v6125_v10 = vpop.permute.xlu1 %6124 }
0x4c35   :  { %v6127_v13 = vmul.f32 %v8002_v58, %v6125_v10 }
0x4c37   :  { %6129 = vrot.lane.b32.xlu0 %v6127_v13, %s8471_s5 }
0x4ca9   :  { %v6130_v22 = vpop.permute.xlu0 %6129 }
0x4caa   :  { %v6132_v55 = vadd.f32 %v6130_v22, %v6122_v53 }
0x4cac   :  { %8003 = vtanh.f32 %v6132_v55 }
0x4cad   :  { %8005 = vpow2.f32 %v6605_v38 }
0x4cb9   :  { %v8004_v28 = vpop.eup %8003 }
0x4cba   :  { %6135 = vrot.lane.b32.xlu1 %v8004_v28, %s8471_s5  ;;  %v8006_v50 = vpop.eup %8005  ;;  %s6452_s5 = sshll.u32 %s8472_s4, 4  ;;  %s6453_s5 = int_to_ptr.vmem [resolvable:$true] %s6452_s5 }
0x4cbb   :  { %v6116_v24 = vadd.f32 1.0, %v8006_v50  ;;  %s8429_s12 = scalar_lea.vmem %s6453_s5, 32  ;;  %p8434_p12 = scmp.lt.s32.totalorder %s6453_s5, %s6453_s5 }
0x4cbc   :  { %p8430_p11 = scmp.ne.s32.totalorder %s6453_s5, %s8429_s12  ;;  %p8435_p13 = scmp.lt.s32.totalorder %s8429_s12, %s8429_s12 }
0x4cbd   :  { %8007 = vrcp.f32 %v6116_v24 }
0x4cbe   :  { %p8436_p0 = por %p8435_p13, %p8434_p12 }
0x4cc0   :  { %p8437_p1 = pnand %p8436_p0, %p8430_p11 }
0x4cca   :  { %v8008_v56 = vpop.eup %8007 }
0x4d2c   :  { %v6136_v27 = vpop.permute.xlu1 %6135 }
0x4d2d   :  { %v6138_v4 = vmul.f32 %v8008_v56, %v6136_v27 }
0x4d2f   :  { %7574 = vmatmul.mubr.msk.f32.vlgmr.msra.gmra.mxu1 %vm535_vm1, %v6138_v4 }
0x4d30   :  { %7596 = vmatpush3.msra.mxu1 %v11846_v7  ;;  %7611 = vmatprep.mubr.msk.f32.mxu1 %vm8470_vm0, %v12794_v23  ;;  %v8326_v7 = vld [vmem:[#allocation8 + $0xd0] sm:$0xff] }
0x4d31   :  { %7597 = vmatprep.subr.mxu1 %v12794_v23 }
0x4d32   :  { %7598 = vmatpush3.msra.mxu1 %v11852_v20  ;;  %v8328_v20 = vld [vmem:[#allocation8 + $0xc0] sm:$0xff] }
0x4d33   :  { %7599 = vmatprep.subr.mxu1 %v12794_v23 }
0x4d34   :  { %7600 = vmatpush3.msra.mxu1 %v11856_v54 }
0x4d35   :  { %7601 = vmatprep.subr.mxu1 %v12794_v23 }
0x4d36   :  { %7602 = vmatpush3.msra.mxu1 %v11860_v39 }
0x4d37   :  { %7603 = vmatprep.subr.mxu1 %v12794_v23 }
0x4d38   :  { %7604 = vmatpush3.msra.mxu1 %v11864_v42  ;;  %v153_v42 = vld [vmem:[#allocation8 + $0x178] sm:$0xff] }
0x4d39   :  { %7605 = vmatprep.subr.mxu1 %v12794_v23 }
0x4d3a   :  { %7606 = vmatpush3.msra.mxu1 %v8326_v7 }
0x4d3b   :  { %7607 = vmatprep.subr.mxu1 %v12794_v23 }
0x4d3c   :  { %7608 = vmatpush3.msra.mxu1 %v8327_v41 }
0x4d3d   :  { %7609 = vmatprep.subr.mxu1 %v12794_v23 }
0x4d3e   :  { %7610 = vmatpush3.msra.mxu1 %v8328_v20 }
0x4def   :  { %v6208_v54 = vpop.f32.mrf.mxu1 }
0x4df0   :  { %v6209_v37 = vadd.f32 %v11874_v32, %v6208_v54 }
0x4df1   :  { %v7575_v39 = vpop.f32.mrf.mxu1 }
0x4df2   :  { %v6212_v11 = vmax.f32 %v6209_v37, 0.0 }
0x4df4   :  { %7593 = vmatmul.mubr.msk.f32.vlgmr.msra.gmra.mxu0 %vm535_vm1, %v6212_v11 }
0x4df5   :  { %7630 = vmatprep.mubr.msk.f32.mxu0 %vm8470_vm0, %v12794_v23  ;;  %7615 = vmatpush3.msra.mxu0 %v153_v42 }
0x4df6   :  { %7616 = vmatprep.subr.mxu0 %v12794_v23 }
0x4df7   :  { %7617 = vmatpush3.msra.mxu0 %v152_v47 }
0x4df8   :  { %7618 = vmatprep.subr.mxu0 %v12794_v23 }
0x4df9   :  { %7619 = vmatpush3.msra.mxu0 %v151_v19 }
0x4dfa   :  { %7620 = vmatprep.subr.mxu0 %v12794_v23 }
0x4dfb   :  { %7621 = vmatpush3.msra.mxu0 %v150_v15 }
0x4dfc   :  { %7622 = vmatprep.subr.mxu0 %v12794_v23 }
0x4dfd   :  { %7623 = vmatpush3.msra.mxu0 %v149_v35 }
0x4dfe   :  { %7624 = vmatprep.subr.mxu0 %v12794_v23 }
0x4dff   :  { %7625 = vmatpush3.msra.mxu0 %v148_v1 }
0x4e00   :  { %7626 = vmatprep.subr.mxu0 %v12794_v23 }
0x4e01   :  { %7627 = vmatpush3.msra.mxu0 %v147_v12 }
0x4e02   :  { %7628 = vmatprep.subr.mxu0 %v12794_v23 }
0x4e03   :  { %7629 = vmatpush3.msra.mxu0 %v146_v8 }
0x4eb4   :  { %v6282_v32 = vpop.f32.mrf.mxu0 }
0x4eb5   :  { %v6283_v26 = vadd.f32 %v12090_v60, %v6282_v32  ;;  %v6288_v60 = vrot.slane %v12332_v25, 2 }
0x4eb6   :  { %v7594_v31 = vpop.f32.mrf.mxu0 }
0x4eb7   :  { %v6286_v57 = vmax.f32 %v6283_v26, 0.0 }
0x4eb9   :  { %7612 = vmatmul.mubr.msk.f32.vlgmr.msra.gmra.mxu1 %vm535_vm1, %v6286_v57 }
0x4f79   :  { %v6359_v2 = vpop.f32.mrf.mxu1 }
0x4f7a   :  { %v6360_v52 = vadd.f32 %v6359_v2, %v6288_v60 }
0x4f7b   :  { %v7613_v33 = vpop.f32.mrf.mxu1 }
0x4f7c   :  { %v6363_v9 = vmax.f32 %v6360_v52, 0.0 }
0x4f7e   :  { %v6364_v36 = vadd.f32 %v6363_v9, %v12336_v49 }
0x4f80   :  { %7631 = vmatmul.mubr.msk.f32.vlgmr.msra.gmra.mxu0 %vm535_vm1, %v6364_v36 }
0x5040   :  { %v6440_v62 = vpop.f32.mrf.mxu0 }
0x5041   :  { %v6441_v45 = vadd.f32 %v6609_v6, %v6440_v62 }
0x5042   :  { %v7632_v23 = vpop.f32.mrf.mxu0 }
0x5043   :  { %6445 = vst.msk [vmem:[#allocation11] sm:$0x3] %vm6444_vm2, %v6441_v45 }
0x5044   :  { %8440 = shalt.err (!%p8437_p1)
}
0x5045   :  { %6455 = dma.vmem_to_hbm [thread:$0]  %s6453_s5, 32, %s12419_s9, [#allocation4]  }
0x5046   :  { %8455 = dma.done.wait [#allocation4], 32  }
0x5047   :  { %8456 = vsyncadd [#allocation4], 4294967264 }
0x5048   :  { %6459 = vsyncpa [#allocation3], 1 }
0x5049   :  { %6460 = vsyncpa [#allocation6], 1 }
0x504a   :  { %6461 = vsyncpa [#allocation9], 1 }
0x504b   :  { %6462 = vsyncpa [#allocation4], 1 }

</bundles_post_ra>
